<compile_context>
chip_gen: v7x
topology: tpu7x:2x2x1
jax: 0.10.0
libtpu: 0.0.40
codegen_flags: <defaults>
</compile_context>

<pallas_src>
import functools

import jax
import jax.numpy as jnp
from jax import lax
from jax.experimental import pallas as pl
from jax.experimental.pallas import tpu as pltpu

ROW_TILE = 128                    # row tile for node/edge MLP grids (can grow to 512+ at scale)
EDGE_TILE = 128                   # edge tile for the fused edge-block kernel
VMEM_LIMIT = 32 * 1024 * 1024     # explicit scoped-VMEM budget (safe on v5e/v6e/v7x)


# ---------------------------------------------------------------------------
# Small helpers
# ---------------------------------------------------------------------------

def _round_up(n, m):
    return ((n + m - 1) // m) * m


def _pad_rows(x, rows_p):
    pad = rows_p - x.shape[0]
    return jnp.pad(x, ((0, pad), (0, 0))) if pad else x


def _mlp_cost(rows, dims, extra_bytes=0):
    flops = sum(2 * rows * din * dout for din, dout in dims)
    w_bytes = sum(2 * din * dout + 4 * dout for din, dout in dims)      # bf16 W + f32 b
    act_bytes = 4 * rows * (dims[0][0] + dims[-1][1])                    # f32 in/out activations
    return pl.CostEstimate(flops=flops, transcendentals=0,
                           bytes_accessed=w_bytes + act_bytes + extra_bytes)


def _dot_bf16(x, w_ref):
    # bf16 MXU operands, f32 accumulation.
    return jnp.dot(x.astype(jnp.bfloat16), w_ref[...],
                   preferred_element_type=jnp.float32)


def _mlp_tail(h, w2_ref, b2_ref, w3_ref, b3_ref, w4_ref, b4_ref):
    h = jnp.maximum(h, 0.0)
    h = _dot_bf16(h, w2_ref) + b2_ref[...]
    h = jnp.maximum(h, 0.0)
    h = _dot_bf16(h, w3_ref) + b3_ref[...]
    h = jnp.maximum(h, 0.0)
    h = _dot_bf16(h, w4_ref) + b4_ref[...]
    return h


# ---------------------------------------------------------------------------
# Kernel 1: plain 4-layer MLP, row-tiled (encoder node / encoder edge / decoder)
# ---------------------------------------------------------------------------

def _mlp4_kernel(x_ref, w1_ref, b1_ref, w2_ref, b2_ref, w3_ref, b3_ref,
                 w4_ref, b4_ref, o_ref):
    h = _dot_bf16(x_ref[...], w1_ref) + b1_ref[...]
    h = _mlp_tail(h, w2_ref, b2_ref, w3_ref, b3_ref, w4_ref, b4_ref)
    o_ref[...] = h.astype(o_ref.dtype)


def mlp4(x, params):
    """Row-tiled 4-layer MLP; x rows must be a multiple of ROW_TILE (inputs pre-padded)."""
    (w1, b1), (w2, b2), (w3, b3), (w4, b4) = params
    rows, in_dim = x.shape
    hidden = w1.shape[1]
    out_dim = w4.shape[1]
    assert rows % ROW_TILE == 0
    grid = (rows // ROW_TILE,)

    row_spec = lambda d: pl.BlockSpec((ROW_TILE, d), lambda i: (i, 0))
    full_spec = lambda a: pl.BlockSpec(a.shape, lambda i: (0, 0))
    args = (x, w1, b1, w2, b2, w3, b3, w4, b4)

    return pl.pallas_call(
        _mlp4_kernel,
        out_shape=jax.ShapeDtypeStruct((rows, out_dim), jnp.float32),
        grid=grid,
        in_specs=[row_spec(in_dim)] + [full_spec(a) for a in args[1:]],
        out_specs=row_spec(out_dim),
        compiler_params=pltpu.CompilerParams(
            dimension_semantics=("parallel",),
            vmem_limit_bytes=VMEM_LIMIT),
        cost_estimate=_mlp_cost(rows, [(in_dim, hidden), (hidden, hidden),
                                       (hidden, hidden), (hidden, out_dim)]),
    )(*args)


# ---------------------------------------------------------------------------
# Kernel 2: fused EdgeBlock (gather + concat-free MLP + residual) + NodeBlock scatter_add
# ---------------------------------------------------------------------------

def _edge_block_kernel(s_idx_ref, r_idx_ref,                         # SMEM scalar prefetch
                       e_ref, node_ref,                              # VMEM inputs
                       w1s_ref, w1r_ref, w1e_ref, b1_ref,
                       w2_ref, b2_ref, w3_ref, b3_ref, w4_ref, b4_ref,
                       eo_ref, agg_ref,                              # outputs
                       s_buf, r_buf, h_buf,                          # VMEM scratch
                       *, num_edges, edge_tile):
    t = pl.program_id(0)
    base = t * edge_tile

    # Zero the resident node-aggregate accumulator on the first edge tile.
    @pl.when(t == 0)
    def _():
        agg_ref[...] = jnp.zeros_like(agg_ref)

    # In-kernel gather: copy sender / receiver node rows into VMEM scratch.
    def gather_body(i, carry):
        s_buf[pl.ds(i, 1), :] = node_ref[pl.ds(s_idx_ref[base + i], 1), :]
        r_buf[pl.ds(i, 1), :] = node_ref[pl.ds(r_idx_ref[base + i], 1), :]
        return carry
    lax.fori_loop(0, edge_tile, gather_body, 0)

    # EdgeBlock MLP on [senders | receivers | edge] without materializing the concat
    # (W1 pre-split into three [H, H] blocks).
    e = e_ref[...]
    h = (_dot_bf16(s_buf[...], w1s_ref) + _dot_bf16(r_buf[...], w1r_ref)
         + _dot_bf16(e, w1e_ref) + b1_ref[...])
    h = _mlp_tail(h, w2_ref, b2_ref, w3_ref, b3_ref, w4_ref, b4_ref)
    h_buf[...] = h

    # Carried edge features (GnBlock residual): e_last + e_new.
    eo_ref[...] = (e + h).astype(eo_ref.dtype)

    # NodeBlock scatter_add: accumulate e_new rows onto their receiver node.
    def scatter_body(i, carry):
        eidx = base + i
        valid = (eidx < num_edges).astype(jnp.float32)   # mask padded edge rows
        r = r_idx_ref[eidx]
        agg_ref[pl.ds(r, 1), :] = agg_ref[pl.ds(r, 1), :] + h_buf[pl.ds(i, 1), :] * valid
        return carry
    lax.fori_loop(0, edge_tile, scatter_body, 0)


def gn_edge_block(senders, receivers, edge_h, node_h, p, num_edges):
    e_rows, hidden = edge_h.shape
    n_rows = node_h.shape[0]
    (w1s, w1r, w1e, b1), (w2, b2), (w3, b3), (w4, b4) = p
    assert e_rows % EDGE_TILE == 0
    grid = (e_rows // EDGE_TILE,)

    kernel = functools.partial(_edge_block_kernel, num_edges=num_edges,
                               edge_tile=EDGE_TILE)
    full = lambda a: pl.BlockSpec(a.shape, lambda t, s, r: (0, 0))
    edge_spec = pl.BlockSpec((EDGE_TILE, hidden), lambda t, s, r: (t, 0))

    cost = _mlp_cost(e_rows, [(3 * hidden, hidden), (hidden, hidden),
                              (hidden, hidden), (hidden, hidden)],
                     extra_bytes=4 * (2 * e_rows + 2 * n_rows) * hidden)

    return pl.pallas_call(
        kernel,
        out_shape=(jax.ShapeDtypeStruct((e_rows, hidden), jnp.float32),   # e_last + e_new
                   jax.ShapeDtypeStruct((n_rows, hidden), jnp.float32)),  # scatter_add aggregate
        grid_spec=pltpu.PrefetchScalarGridSpec(
            num_scalar_prefetch=2,
            grid=grid,
            in_specs=[edge_spec, full(node_h),
                      full(w1s), full(w1r), full(w1e), full(b1),
                      full(w2), full(b2), full(w3), full(b3),
                      full(w4), full(b4)],
            out_specs=[edge_spec,
                       pl.BlockSpec((n_rows, hidden), lambda t, s, r: (0, 0))],
            scratch_shapes=[pltpu.VMEM((EDGE_TILE, hidden), jnp.float32),
                            pltpu.VMEM((EDGE_TILE, hidden), jnp.float32),
                            pltpu.VMEM((EDGE_TILE, hidden), jnp.float32)]),
        compiler_params=pltpu.CompilerParams(
            # Edge axis carries the resident scatter accumulator -> sequential reduction.
            dimension_semantics=("arbitrary",),
            vmem_limit_bytes=VMEM_LIMIT),
        cost_estimate=cost,
    )(senders, receivers, edge_h, node_h, w1s, w1r, w1e, b1,
      w2, b2, w3, b3, w4, b4)


# ---------------------------------------------------------------------------
# Kernel 3: fused NodeBlock MLP (+residual), row-tiled over nodes
# ---------------------------------------------------------------------------

def _node_block_kernel(x_ref, agg_ref, w1n_ref, w1a_ref, b1_ref,
                       w2_ref, b2_ref, w3_ref, b3_ref, w4_ref, b4_ref, o_ref):
    x = x_ref[...]
    h = _dot_bf16(x, w1n_ref) + _dot_bf16(agg_ref[...], w1a_ref) + b1_ref[...]
    h = _mlp_tail(h, w2_ref, b2_ref, w3_ref, b3_ref, w4_ref, b4_ref)
    o_ref[...] = (x + h).astype(o_ref.dtype)          # GnBlock residual: x_last + x_new


def gn_node_block(node_h, agg, p):
    n_rows, hidden = node_h.shape
    (w1n, w1a, b1), (w2, b2), (w3, b3), (w4, b4) = p
    assert n_rows % ROW_TILE == 0
    grid = (n_rows // ROW_TILE,)
    row = pl.BlockSpec((ROW_TILE, hidden), lambda i: (i, 0))
    full = lambda a: pl.BlockSpec(a.shape, lambda i: (0, 0))

    cost = _mlp_cost(n_rows, [(2 * hidden, hidden), (hidden, hidden),
                              (hidden, hidden), (hidden, hidden)],
                     extra_bytes=4 * n_rows * hidden)

    return pl.pallas_call(
        _node_block_kernel,
        out_shape=jax.ShapeDtypeStruct((n_rows, hidden), jnp.float32),
        grid=grid,
        in_specs=[row, row, full(w1n), full(w1a), full(b1),
                  full(w2), full(b2), full(w3), full(b3), full(w4), full(b4)],
        out_specs=row,
        compiler_params=pltpu.CompilerParams(
            dimension_semantics=("parallel",),
            vmem_limit_bytes=VMEM_LIMIT),
        cost_estimate=cost,
    )(node_h, agg, w1n, w1a, b1, w2, b2, w3, b3, w4, b4)


# ---------------------------------------------------------------------------
# Parameter construction (deterministic, synthetic). W stored as [in, out] bf16, b as [1, out] f32.
# ---------------------------------------------------------------------------

def _init_linear(key, din, dout):
    kw, kb = jax.random.split(key)
    w = (jax.random.normal(kw, (din, dout), jnp.float32) / jnp.sqrt(din)).astype(jnp.bfloat16)
    b = jax.random.normal(kb, (1, dout), jnp.float32) * 0.01
    return w, b


def init_mlp4(key, in_size, hidden, out_size):
    dims = [(in_size, hidden), (hidden, hidden), (hidden, hidden), (hidden, out_size)]
    keys = jax.random.split(key, 4)
    return [_init_linear(k, din, dout) for k, (din, dout) in zip(keys, dims)]


def init_model(key, message_passing_num, node_input_size, edge_input_size,
               hidden_size, output_size=2):
    keys = jax.random.split(key, 3 + 2 * message_passing_num)
    params = {
        "enc_node": init_mlp4(keys[0], node_input_size, hidden_size, hidden_size),
        "enc_edge": init_mlp4(keys[1], edge_input_size, hidden_size, hidden_size),
        "dec": init_mlp4(keys[2], hidden_size, hidden_size, output_size),
        "blocks": [],
    }
    H = hidden_size
    for m in range(message_passing_num):
        eb = init_mlp4(keys[3 + 2 * m], 3 * H, H, H)
        (w1, b1), e2, e3, e4 = eb
        eb = ((w1[:H], w1[H:2 * H], w1[2 * H:], b1), e2, e3, e4)   # split W1 -> [s | r | e]
        nb = init_mlp4(keys[4 + 2 * m], 2 * H, H, H)
        (v1, c1), n2, n3, n4 = nb
        nb = ((v1[:H], v1[H:], c1), n2, n3, n4)                    # split W1 -> [x | agg]
        params["blocks"].append({"eb": eb, "nb": nb})
    return params


# ---------------------------------------------------------------------------
# Forward pass: Encoder -> [GnBlock] * M -> Decoder
# ---------------------------------------------------------------------------

@jax.jit
def encoder_processor_decoder(node_attr, edge_attr, edge_index, params):
    num_nodes = node_attr.shape[0]
    num_edges = edge_attr.shape[0]
    n_p = _round_up(num_nodes, ROW_TILE)
    e_p = _round_up(num_edges, EDGE_TILE)

    # Pad rows once up front; padded rows are zero / masked and sliced off at the end.
    node_attr = _pad_rows(node_attr, n_p)
    edge_attr = _pad_rows(edge_attr, e_p)
    senders = jnp.pad(edge_index[0].astype(jnp.int32), (0, e_p - num_edges))
    receivers = jnp.pad(edge_index[1].astype(jnp.int32), (0, e_p - num_edges))

    # Encoder.
    node_h = mlp4(node_attr, params["enc_node"])
    edge_h = mlp4(edge_attr, params["enc_edge"])

    # Processor: message-passing GnBlocks — 2 fused pallas_calls per block.
    for blk in params["blocks"]:
        edge_h, agg = gn_edge_block(senders, receivers, edge_h, node_h,
                                    blk["eb"], num_edges)
        node_h = gn_node_block(node_h, agg, blk["nb"])

    # Decoder.
    decoded = mlp4(node_h, params["dec"])
    return decoded[:num_nodes]


# ---------------------------------------------------------------------------
# Main
# ---------------------------------------------------------------------------

if __name__ == "__main__":
    num_nodes = 256
    num_edges = 512
    node_input_size = 16
    edge_input_size = 16
    hidden_size = 128          # lane-dense hidden (module default), multiple of 128
    message_passing_num = 2

    key = jax.random.PRNGKey(0)
    k_node, k_edge, k_idx, k_params = jax.random.split(key, 4)

    node_attr = jax.random.normal(k_node, (num_nodes, node_input_size), jnp.float32)
    edge_attr = jax.random.normal(k_edge, (num_edges, edge_input_size), jnp.float32)
    edge_index = jax.random.randint(k_idx, (2, num_edges), 0, num_nodes, jnp.int32)

    params = init_model(k_params, message_passing_num, node_input_size,
                        edge_input_size, hidden_size, output_size=2)

    out = encoder_processor_decoder(node_attr, edge_attr, edge_index, params)
    out = jax.block_until_ready(out)

    assert out.shape == (num_nodes, 2), out.shape
    assert out.dtype == jnp.float32
    assert bool(jnp.all(jnp.isfinite(out)))
    print("KERNEL_OK")
</pallas_src>

<mosaic_0001>
module attributes {stable_mosaic.version = 11 : i64} {
  func.func @_mlp4_kernel(%arg0: i32, %arg1: memref<128x16xf32, #tpu.memory_space<vmem>>, %arg2: memref<16x128xbf16, #tpu.memory_space<vmem>>, %arg3: memref<1x128xf32, #tpu.memory_space<vmem>>, %arg4: memref<128x128xbf16, #tpu.memory_space<vmem>>, %arg5: memref<1x128xf32, #tpu.memory_space<vmem>>, %arg6: memref<128x128xbf16, #tpu.memory_space<vmem>>, %arg7: memref<1x128xf32, #tpu.memory_space<vmem>>, %arg8: memref<128x128xbf16, #tpu.memory_space<vmem>>, %arg9: memref<1x128xf32, #tpu.memory_space<vmem>>, %arg10: memref<128x128xf32, #tpu.memory_space<vmem>>) attributes {dimension_semantics = [#tpu.dimension_semantics<parallel>], iteration_bounds = array<i64: 2>, scalar_prefetch = 0 : i64, scratch_operands = 0 : i64, tpu.core_type = #tpu.core_type<tc>, window_params = [{transform_indices = @transform_0, window_bounds = array<i64: 128, 16>}, {pipeline_mode = #tpu.pipeline_mode<synchronous>, transform_indices = @transform_1, window_bounds = array<i64: 16, 128>}, {pipeline_mode = #tpu.pipeline_mode<synchronous>, transform_indices = @transform_2, window_bounds = array<i64: 1, 128>}, {pipeline_mode = #tpu.pipeline_mode<synchronous>, transform_indices = @transform_3, window_bounds = array<i64: 128, 128>}, {pipeline_mode = #tpu.pipeline_mode<synchronous>, transform_indices = @transform_4, window_bounds = array<i64: 1, 128>}, {pipeline_mode = #tpu.pipeline_mode<synchronous>, transform_indices = @transform_5, window_bounds = array<i64: 128, 128>}, {pipeline_mode = #tpu.pipeline_mode<synchronous>, transform_indices = @transform_6, window_bounds = array<i64: 1, 128>}, {pipeline_mode = #tpu.pipeline_mode<synchronous>, transform_indices = @transform_7, window_bounds = array<i64: 128, 128>}, {pipeline_mode = #tpu.pipeline_mode<synchronous>, transform_indices = @transform_8, window_bounds = array<i64: 1, 128>}, {transform_indices = @transform_9, window_bounds = array<i64: 128, 128>}]} {
    %c0 = arith.constant 0 : index
    %c0_0 = arith.constant 0 : index
    %0 = vector.load %arg1[%c0, %c0_0] : memref<128x16xf32, #tpu.memory_space<vmem>>, vector<128x16xf32>
    %1 = arith.truncf %0 : vector<128x16xf32> to vector<128x16xbf16>
    %c0_1 = arith.constant 0 : index
    %c0_2 = arith.constant 0 : index
    %2 = vector.load %arg2[%c0_1, %c0_2] : memref<16x128xbf16, #tpu.memory_space<vmem>>, vector<16x128xbf16>
    %cst = arith.constant dense<0.000000e+00> : vector<128x128xf32>
    %3 = tpu.matmul %1, %2, %cst {dimension_numbers = #tpu.dot_dimension_numbers<[1], [0], [0], [1], [0, 0, 1, 1], [], []>} : vector<128x16xbf16>, vector<16x128xbf16>, vector<128x128xf32> -> vector<128x128xf32>
    %c0_3 = arith.constant 0 : index
    %c0_4 = arith.constant 0 : index
    %4 = vector.load %arg3[%c0_3, %c0_4] : memref<1x128xf32, #tpu.memory_space<vmem>>, vector<1x128xf32>
    %5 = vector.broadcast %4 : vector<1x128xf32> to vector<128x128xf32>
    %6 = arith.addf %3, %5 : vector<128x128xf32>
    %cst_5 = arith.constant 0.000000e+00 : f32
    %7 = vector.broadcast %cst_5 : f32 to vector<128x128xf32>
    %8 = arith.maximumf %6, %7 : vector<128x128xf32>
    %9 = arith.truncf %8 : vector<128x128xf32> to vector<128x128xbf16>
    %c0_6 = arith.constant 0 : index
    %c0_7 = arith.constant 0 : index
    %10 = vector.load %arg4[%c0_6, %c0_7] : memref<128x128xbf16, #tpu.memory_space<vmem>>, vector<128x128xbf16>
    %cst_8 = arith.constant dense<0.000000e+00> : vector<128x128xf32>
    %11 = tpu.matmul %9, %10, %cst_8 {dimension_numbers = #tpu.dot_dimension_numbers<[1], [0], [0], [1], [0, 0, 1, 1], [], []>} : vector<128x128xbf16>, vector<128x128xbf16>, vector<128x128xf32> -> vector<128x128xf32>
    %c0_9 = arith.constant 0 : index
    %c0_10 = arith.constant 0 : index
    %12 = vector.load %arg5[%c0_9, %c0_10] : memref<1x128xf32, #tpu.memory_space<vmem>>, vector<1x128xf32>
    %13 = vector.broadcast %12 : vector<1x128xf32> to vector<128x128xf32>
    %14 = arith.addf %11, %13 : vector<128x128xf32>
    %cst_11 = arith.constant 0.000000e+00 : f32
    %15 = vector.broadcast %cst_11 : f32 to vector<128x128xf32>
    %16 = arith.maximumf %14, %15 : vector<128x128xf32>
    %17 = arith.truncf %16 : vector<128x128xf32> to vector<128x128xbf16>
    %c0_12 = arith.constant 0 : index
    %c0_13 = arith.constant 0 : index
    %18 = vector.load %arg6[%c0_12, %c0_13] : memref<128x128xbf16, #tpu.memory_space<vmem>>, vector<128x128xbf16>
    %cst_14 = arith.constant dense<0.000000e+00> : vector<128x128xf32>
    %19 = tpu.matmul %17, %18, %cst_14 {dimension_numbers = #tpu.dot_dimension_numbers<[1], [0], [0], [1], [0, 0, 1, 1], [], []>} : vector<128x128xbf16>, vector<128x128xbf16>, vector<128x128xf32> -> vector<128x128xf32>
    %c0_15 = arith.constant 0 : index
    %c0_16 = arith.constant 0 : index
    %20 = vector.load %arg7[%c0_15, %c0_16] : memref<1x128xf32, #tpu.memory_space<vmem>>, vector<1x128xf32>
    %21 = vector.broadcast %20 : vector<1x128xf32> to vector<128x128xf32>
    %22 = arith.addf %19, %21 : vector<128x128xf32>
    %cst_17 = arith.constant 0.000000e+00 : f32
    %23 = vector.broadcast %cst_17 : f32 to vector<128x128xf32>
    %24 = arith.maximumf %22, %23 : vector<128x128xf32>
    %25 = arith.truncf %24 : vector<128x128xf32> to vector<128x128xbf16>
    %c0_18 = arith.constant 0 : index
    %c0_19 = arith.constant 0 : index
    %26 = vector.load %arg8[%c0_18, %c0_19] : memref<128x128xbf16, #tpu.memory_space<vmem>>, vector<128x128xbf16>
    %cst_20 = arith.constant dense<0.000000e+00> : vector<128x128xf32>
    %27 = tpu.matmul %25, %26, %cst_20 {dimension_numbers = #tpu.dot_dimension_numbers<[1], [0], [0], [1], [0, 0, 1, 1], [], []>} : vector<128x128xbf16>, vector<128x128xbf16>, vector<128x128xf32> -> vector<128x128xf32>
    %c0_21 = arith.constant 0 : index
    %c0_22 = arith.constant 0 : index
    %28 = vector.load %arg9[%c0_21, %c0_22] : memref<1x128xf32, #tpu.memory_space<vmem>>, vector<1x128xf32>
    %29 = vector.broadcast %28 : vector<1x128xf32> to vector<128x128xf32>
    %30 = arith.addf %27, %29 : vector<128x128xf32>
    %c0_23 = arith.constant 0 : index
    %c0_24 = arith.constant 0 : index
    %31 = vector.load %arg10[%c0_23, %c0_24] : memref<128x128xf32, #tpu.memory_space<vmem>>, vector<128x128xf32>
    tpu.vector_store %arg10[%c0_23, %c0_24], %30 {strides = array<i32>} : memref<128x128xf32, #tpu.memory_space<vmem>>, vector<128x128xf32>,
    return
  }
  func.func @transform_0(%arg0: i32) -> (i32, i32) {
    %c0_i32 = arith.constant 0 : i32
    %c0_i32_0 = arith.constant 0 : i32
    return %arg0, %c0_i32 : i32, i32
  }
  func.func @transform_1(%arg0: i32) -> (i32, i32) {
    %c0_i32 = arith.constant 0 : i32
    %c0_i32_0 = arith.constant 0 : i32
    %c0_i32_1 = arith.constant 0 : i32
    return %c0_i32, %c0_i32_0 : i32, i32
  }
  func.func @transform_2(%arg0: i32) -> (i32, i32) {
    %c0_i32 = arith.constant 0 : i32
    %c0_i32_0 = arith.constant 0 : i32
    %c0_i32_1 = arith.constant 0 : i32
    return %c0_i32, %c0_i32_0 : i32, i32
  }
  func.func @transform_3(%arg0: i32) -> (i32, i32) {
    %c0_i32 = arith.constant 0 : i32
    %c0_i32_0 = arith.constant 0 : i32
    %c0_i32_1 = arith.constant 0 : i32
    return %c0_i32, %c0_i32_0 : i32, i32
  }
  func.func @transform_4(%arg0: i32) -> (i32, i32) {
    %c0_i32 = arith.constant 0 : i32
    %c0_i32_0 = arith.constant 0 : i32
    %c0_i32_1 = arith.constant 0 : i32
    return %c0_i32, %c0_i32_0 : i32, i32
  }
  func.func @transform_5(%arg0: i32) -> (i32, i32) {
    %c0_i32 = arith.constant 0 : i32
    %c0_i32_0 = arith.constant 0 : i32
    %c0_i32_1 = arith.constant 0 : i32
    return %c0_i32, %c0_i32_0 : i32, i32
  }
  func.func @transform_6(%arg0: i32) -> (i32, i32) {
    %c0_i32 = arith.constant 0 : i32
    %c0_i32_0 = arith.constant 0 : i32
    %c0_i32_1 = arith.constant 0 : i32
    return %c0_i32, %c0_i32_0 : i32, i32
  }
  func.func @transform_7(%arg0: i32) -> (i32, i32) {
    %c0_i32 = arith.constant 0 : i32
    %c0_i32_0 = arith.constant 0 : i32
    %c0_i32_1 = arith.constant 0 : i32
    return %c0_i32, %c0_i32_0 : i32, i32
  }
  func.func @transform_8(%arg0: i32) -> (i32, i32) {
    %c0_i32 = arith.constant 0 : i32
    %c0_i32_0 = arith.constant 0 : i32
    %c0_i32_1 = arith.constant 0 : i32
    return %c0_i32, %c0_i32_0 : i32, i32
  }
  func.func @transform_9(%arg0: i32) -> (i32, i32) {
    %c0_i32 = arith.constant 0 : i32
    %c0_i32_0 = arith.constant 0 : i32
    return %arg0, %c0_i32 : i32, i32
  }
}

module attributes {stable_mosaic.version = 11 : i64} {
  func.func @_node_block_kernel(%arg0: i32, %arg1: memref<128x128xf32, #tpu.memory_space<vmem>>, %arg2: memref<128x128xf32, #tpu.memory_space<vmem>>, %arg3: memref<128x128xbf16, #tpu.memory_space<vmem>>, %arg4: memref<128x128xbf16, #tpu.memory_space<vmem>>, %arg5: memref<1x128xf32, #tpu.memory_space<vmem>>, %arg6: memref<128x128xbf16, #tpu.memory_space<vmem>>, %arg7: memref<1x128xf32, #tpu.memory_space<vmem>>, %arg8: memref<128x128xbf16, #tpu.memory_space<vmem>>, %arg9: memref<1x128xf32, #tpu.memory_space<vmem>>, %arg10: memref<128x128xbf16, #tpu.memory_space<vmem>>, %arg11: memref<1x128xf32, #tpu.memory_space<vmem>>, %arg12: memref<128x128xf32, #tpu.memory_space<vmem>>) attributes {dimension_semantics = [#tpu.dimension_semantics<parallel>], iteration_bounds = array<i64: 2>, scalar_prefetch = 0 : i64, scratch_operands = 0 : i64, tpu.core_type = #tpu.core_type<tc>, window_params = [{transform_indices = @transform_0, window_bounds = array<i64: 128, 128>}, {transform_indices = @transform_1, window_bounds = array<i64: 128, 128>}, {pipeline_mode = #tpu.pipeline_mode<synchronous>, transform_indices = @transform_2, window_bounds = array<i64: 128, 128>}, {pipeline_mode = #tpu.pipeline_mode<synchronous>, transform_indices = @transform_3, window_bounds = array<i64: 128, 128>}, {pipeline_mode = #tpu.pipeline_mode<synchronous>, transform_indices = @transform_4, window_bounds = array<i64: 1, 128>}, {pipeline_mode = #tpu.pipeline_mode<synchronous>, transform_indices = @transform_5, window_bounds = array<i64: 128, 128>}, {pipeline_mode = #tpu.pipeline_mode<synchronous>, transform_indices = @transform_6, window_bounds = array<i64: 1, 128>}, {pipeline_mode = #tpu.pipeline_mode<synchronous>, transform_indices = @transform_7, window_bounds = array<i64: 128, 128>}, {pipeline_mode = #tpu.pipeline_mode<synchronous>, transform_indices = @transform_8, window_bounds = array<i64: 1, 128>}, {pipeline_mode = #tpu.pipeline_mode<synchronous>, transform_indices = @transform_9, window_bounds = array<i64: 128, 128>}, {pipeline_mode = #tpu.pipeline_mode<synchronous>, transform_indices = @transform_10, window_bounds = array<i64: 1, 128>}, {transform_indices = @transform_11, window_bounds = array<i64: 128, 128>}]} {
    %c0 = arith.constant 0 : index
    %c0_0 = arith.constant 0 : index
    %0 = vector.load %arg1[%c0, %c0_0] : memref<128x128xf32, #tpu.memory_space<vmem>>, vector<128x128xf32>
    %1 = arith.truncf %0 : vector<128x128xf32> to vector<128x128xbf16>
    %c0_1 = arith.constant 0 : index
    %c0_2 = arith.constant 0 : index
    %2 = vector.load %arg3[%c0_1, %c0_2] : memref<128x128xbf16, #tpu.memory_space<vmem>>, vector<128x128xbf16>
    %cst = arith.constant dense<0.000000e+00> : vector<128x128xf32>
    %3 = tpu.matmul %1, %2, %cst {dimension_numbers = #tpu.dot_dimension_numbers<[1], [0], [0], [1], [0, 0, 1, 1], [], []>} : vector<128x128xbf16>, vector<128x128xbf16>, vector<128x128xf32> -> vector<128x128xf32>
    %c0_3 = arith.constant 0 : index
    %c0_4 = arith.constant 0 : index
    %4 = vector.load %arg2[%c0_3, %c0_4] : memref<128x128xf32, #tpu.memory_space<vmem>>, vector<128x128xf32>
    %5 = arith.truncf %4 : vector<128x128xf32> to vector<128x128xbf16>
    %c0_5 = arith.constant 0 : index
    %c0_6 = arith.constant 0 : index
    %6 = vector.load %arg4[%c0_5, %c0_6] : memref<128x128xbf16, #tpu.memory_space<vmem>>, vector<128x128xbf16>
    %cst_7 = arith.constant dense<0.000000e+00> : vector<128x128xf32>
    %7 = tpu.matmul %5, %6, %cst_7 {dimension_numbers = #tpu.dot_dimension_numbers<[1], [0], [0], [1], [0, 0, 1, 1], [], []>} : vector<128x128xbf16>, vector<128x128xbf16>, vector<128x128xf32> -> vector<128x128xf32>
    %8 = arith.addf %3, %7 : vector<128x128xf32>
    %c0_8 = arith.constant 0 : index
    %c0_9 = arith.constant 0 : index
    %9 = vector.load %arg5[%c0_8, %c0_9] : memref<1x128xf32, #tpu.memory_space<vmem>>, vector<1x128xf32>
    %10 = vector.broadcast %9 : vector<1x128xf32> to vector<128x128xf32>
    %11 = arith.addf %8, %10 : vector<128x128xf32>
    %cst_10 = arith.constant 0.000000e+00 : f32
    %12 = vector.broadcast %cst_10 : f32 to vector<128x128xf32>
    %13 = arith.maximumf %11, %12 : vector<128x128xf32>
    %14 = arith.truncf %13 : vector<128x128xf32> to vector<128x128xbf16>
    %c0_11 = arith.constant 0 : index
    %c0_12 = arith.constant 0 : index
    %15 = vector.load %arg6[%c0_11, %c0_12] : memref<128x128xbf16, #tpu.memory_space<vmem>>, vector<128x128xbf16>
    %cst_13 = arith.constant dense<0.000000e+00> : vector<128x128xf32>
    %16 = tpu.matmul %14, %15, %cst_13 {dimension_numbers = #tpu.dot_dimension_numbers<[1], [0], [0], [1], [0, 0, 1, 1], [], []>} : vector<128x128xbf16>, vector<128x128xbf16>, vector<128x128xf32> -> vector<128x128xf32>
    %c0_14 = arith.constant 0 : index
    %c0_15 = arith.constant 0 : index
    %17 = vector.load %arg7[%c0_14, %c0_15] : memref<1x128xf32, #tpu.memory_space<vmem>>, vector<1x128xf32>
    %18 = vector.broadcast %17 : vector<1x128xf32> to vector<128x128xf32>
    %19 = arith.addf %16, %18 : vector<128x128xf32>
    %cst_16 = arith.constant 0.000000e+00 : f32
    %20 = vector.broadcast %cst_16 : f32 to vector<128x128xf32>
    %21 = arith.maximumf %19, %20 : vector<128x128xf32>
    %22 = arith.truncf %21 : vector<128x128xf32> to vector<128x128xbf16>
    %c0_17 = arith.constant 0 : index
    %c0_18 = arith.constant 0 : index
    %23 = vector.load %arg8[%c0_17, %c0_18] : memref<128x128xbf16, #tpu.memory_space<vmem>>, vector<128x128xbf16>
    %cst_19 = arith.constant dense<0.000000e+00> : vector<128x128xf32>
    %24 = tpu.matmul %22, %23, %cst_19 {dimension_numbers = #tpu.dot_dimension_numbers<[1], [0], [0], [1], [0, 0, 1, 1], [], []>} : vector<128x128xbf16>, vector<128x128xbf16>, vector<128x128xf32> -> vector<128x128xf32>
    %c0_20 = arith.constant 0 : index
    %c0_21 = arith.constant 0 : index
    %25 = vector.load %arg9[%c0_20, %c0_21] : memref<1x128xf32, #tpu.memory_space<vmem>>, vector<1x128xf32>
    %26 = vector.broadcast %25 : vector<1x128xf32> to vector<128x128xf32>
    %27 = arith.addf %24, %26 : vector<128x128xf32>
    %cst_22 = arith.constant 0.000000e+00 : f32
    %28 = vector.broadcast %cst_22 : f32 to vector<128x128xf32>
    %29 = arith.maximumf %27, %28 : vector<128x128xf32>
    %30 = arith.truncf %29 : vector<128x128xf32> to vector<128x128xbf16>
    %c0_23 = arith.constant 0 : index
    %c0_24 = arith.constant 0 : index
    %31 = vector.load %arg10[%c0_23, %c0_24] : memref<128x128xbf16, #tpu.memory_space<vmem>>, vector<128x128xbf16>
    %cst_25 = arith.constant dense<0.000000e+00> : vector<128x128xf32>
    %32 = tpu.matmul %30, %31, %cst_25 {dimension_numbers = #tpu.dot_dimension_numbers<[1], [0], [0], [1], [0, 0, 1, 1], [], []>} : vector<128x128xbf16>, vector<128x128xbf16>, vector<128x128xf32> -> vector<128x128xf32>
    %c0_26 = arith.constant 0 : index
    %c0_27 = arith.constant 0 : index
    %33 = vector.load %arg11[%c0_26, %c0_27] : memref<1x128xf32, #tpu.memory_space<vmem>>, vector<1x128xf32>
    %34 = vector.broadcast %33 : vector<1x128xf32> to vector<128x128xf32>
    %35 = arith.addf %32, %34 : vector<128x128xf32>
    %36 = arith.addf %0, %35 : vector<128x128xf32>
    %c0_28 = arith.constant 0 : index
    %c0_29 = arith.constant 0 : index
    %37 = vector.load %arg12[%c0_28, %c0_29] : memref<128x128xf32, #tpu.memory_space<vmem>>, vector<128x128xf32>
    tpu.vector_store %arg12[%c0_28, %c0_29], %36 {strides = array<i32>} : memref<128x128xf32, #tpu.memory_space<vmem>>, vector<128x128xf32>,
    return
  }
  func.func @transform_0(%arg0: i32) -> (i32, i32) {
    %c0_i32 = arith.constant 0 : i32
    %c0_i32_0 = arith.constant 0 : i32
    return %arg0, %c0_i32 : i32, i32
  }
  func.func @transform_1(%arg0: i32) -> (i32, i32) {
    %c0_i32 = arith.constant 0 : i32
    %c0_i32_0 = arith.constant 0 : i32
    return %arg0, %c0_i32 : i32, i32
  }
  func.func @transform_2(%arg0: i32) -> (i32, i32) {
    %c0_i32 = arith.constant 0 : i32
    %c0_i32_0 = arith.constant 0 : i32
    %c0_i32_1 = arith.constant 0 : i32
    return %c0_i32, %c0_i32_0 : i32, i32
  }
  func.func @transform_3(%arg0: i32) -> (i32, i32) {
    %c0_i32 = arith.constant 0 : i32
    %c0_i32_0 = arith.constant 0 : i32
    %c0_i32_1 = arith.constant 0 : i32
    return %c0_i32, %c0_i32_0 : i32, i32
  }
  func.func @transform_4(%arg0: i32) -> (i32, i32) {
    %c0_i32 = arith.constant 0 : i32
    %c0_i32_0 = arith.constant 0 : i32
    %c0_i32_1 = arith.constant 0 : i32
    return %c0_i32, %c0_i32_0 : i32, i32
  }
  func.func @transform_5(%arg0: i32) -> (i32, i32) {
    %c0_i32 = arith.constant 0 : i32
    %c0_i32_0 = arith.constant 0 : i32
    %c0_i32_1 = arith.constant 0 : i32
    return %c0_i32, %c0_i32_0 : i32, i32
  }
  func.func @transform_6(%arg0: i32) -> (i32, i32) {
    %c0_i32 = arith.constant 0 : i32
    %c0_i32_0 = arith.constant 0 : i32
    %c0_i32_1 = arith.constant 0 : i32
    return %c0_i32, %c0_i32_0 : i32, i32
  }
  func.func @transform_7(%arg0: i32) -> (i32, i32) {
    %c0_i32 = arith.constant 0 : i32
    %c0_i32_0 = arith.constant 0 : i32
    %c0_i32_1 = arith.constant 0 : i32
    return %c0_i32, %c0_i32_0 : i32, i32
  }
  func.func @transform_8(%arg0: i32) -> (i32, i32) {
    %c0_i32 = arith.constant 0 : i32
    %c0_i32_0 = arith.constant 0 : i32
    %c0_i32_1 = arith.constant 0 : i32
    return %c0_i32, %c0_i32_0 : i32, i32
  }
  func.func @transform_9(%arg0: i32) -> (i32, i32) {
    %c0_i32 = arith.constant 0 : i32
    %c0_i32_0 = arith.constant 0 : i32
    %c0_i32_1 = arith.constant 0 : i32
    return %c0_i32, %c0_i32_0 : i32, i32
  }
  func.func @transform_10(%arg0: i32) -> (i32, i32) {
    %c0_i32 = arith.constant 0 : i32
    %c0_i32_0 = arith.constant 0 : i32
    %c0_i32_1 = arith.constant 0 : i32
    return %c0_i32, %c0_i32_0 : i32, i32
  }
  func.func @transform_11(%arg0: i32) -> (i32, i32) {
    %c0_i32 = arith.constant 0 : i32
    %c0_i32_0 = arith.constant 0 : i32
    return %arg0, %c0_i32 : i32, i32
  }
}

module attributes {stable_mosaic.version = 11 : i64} {
  func.func @_mlp4_kernel(%arg0: i32, %arg1: memref<128x16xf32, #tpu.memory_space<vmem>>, %arg2: memref<16x128xbf16, #tpu.memory_space<vmem>>, %arg3: memref<1x128xf32, #tpu.memory_space<vmem>>, %arg4: memref<128x128xbf16, #tpu.memory_space<vmem>>, %arg5: memref<1x128xf32, #tpu.memory_space<vmem>>, %arg6: memref<128x128xbf16, #tpu.memory_space<vmem>>, %arg7: memref<1x128xf32, #tpu.memory_space<vmem>>, %arg8: memref<128x128xbf16, #tpu.memory_space<vmem>>, %arg9: memref<1x128xf32, #tpu.memory_space<vmem>>, %arg10: memref<128x128xf32, #tpu.memory_space<vmem>>) attributes {dimension_semantics = [#tpu.dimension_semantics<parallel>], iteration_bounds = array<i64: 4>, scalar_prefetch = 0 : i64, scratch_operands = 0 : i64, tpu.core_type = #tpu.core_type<tc>, window_params = [{transform_indices = @transform_0, window_bounds = array<i64: 128, 16>}, {pipeline_mode = #tpu.pipeline_mode<synchronous>, transform_indices = @transform_1, window_bounds = array<i64: 16, 128>}, {pipeline_mode = #tpu.pipeline_mode<synchronous>, transform_indices = @transform_2, window_bounds = array<i64: 1, 128>}, {pipeline_mode = #tpu.pipeline_mode<synchronous>, transform_indices = @transform_3, window_bounds = array<i64: 128, 128>}, {pipeline_mode = #tpu.pipeline_mode<synchronous>, transform_indices = @transform_4, window_bounds = array<i64: 1, 128>}, {pipeline_mode = #tpu.pipeline_mode<synchronous>, transform_indices = @transform_5, window_bounds = array<i64: 128, 128>}, {pipeline_mode = #tpu.pipeline_mode<synchronous>, transform_indices = @transform_6, window_bounds = array<i64: 1, 128>}, {pipeline_mode = #tpu.pipeline_mode<synchronous>, transform_indices = @transform_7, window_bounds = array<i64: 128, 128>}, {pipeline_mode = #tpu.pipeline_mode<synchronous>, transform_indices = @transform_8, window_bounds = array<i64: 1, 128>}, {transform_indices = @transform_9, window_bounds = array<i64: 128, 128>}]} {
    %c0 = arith.constant 0 : index
    %c0_0 = arith.constant 0 : index
    %0 = vector.load %arg1[%c0, %c0_0] : memref<128x16xf32, #tpu.memory_space<vmem>>, vector<128x16xf32>
    %1 = arith.truncf %0 : vector<128x16xf32> to vector<128x16xbf16>
    %c0_1 = arith.constant 0 : index
    %c0_2 = arith.constant 0 : index
    %2 = vector.load %arg2[%c0_1, %c0_2] : memref<16x128xbf16, #tpu.memory_space<vmem>>, vector<16x128xbf16>
    %cst = arith.constant dense<0.000000e+00> : vector<128x128xf32>
    %3 = tpu.matmul %1, %2, %cst {dimension_numbers = #tpu.dot_dimension_numbers<[1], [0], [0], [1], [0, 0, 1, 1], [], []>} : vector<128x16xbf16>, vector<16x128xbf16>, vector<128x128xf32> -> vector<128x128xf32>
    %c0_3 = arith.constant 0 : index
    %c0_4 = arith.constant 0 : index
    %4 = vector.load %arg3[%c0_3, %c0_4] : memref<1x128xf32, #tpu.memory_space<vmem>>, vector<1x128xf32>
    %5 = vector.broadcast %4 : vector<1x128xf32> to vector<128x128xf32>
    %6 = arith.addf %3, %5 : vector<128x128xf32>
    %cst_5 = arith.constant 0.000000e+00 : f32
    %7 = vector.broadcast %cst_5 : f32 to vector<128x128xf32>
    %8 = arith.maximumf %6, %7 : vector<128x128xf32>
    %9 = arith.truncf %8 : vector<128x128xf32> to vector<128x128xbf16>
    %c0_6 = arith.constant 0 : index
    %c0_7 = arith.constant 0 : index
    %10 = vector.load %arg4[%c0_6, %c0_7] : memref<128x128xbf16, #tpu.memory_space<vmem>>, vector<128x128xbf16>
    %cst_8 = arith.constant dense<0.000000e+00> : vector<128x128xf32>
    %11 = tpu.matmul %9, %10, %cst_8 {dimension_numbers = #tpu.dot_dimension_numbers<[1], [0], [0], [1], [0, 0, 1, 1], [], []>} : vector<128x128xbf16>, vector<128x128xbf16>, vector<128x128xf32> -> vector<128x128xf32>
    %c0_9 = arith.constant 0 : index
    %c0_10 = arith.constant 0 : index
    %12 = vector.load %arg5[%c0_9, %c0_10] : memref<1x128xf32, #tpu.memory_space<vmem>>, vector<1x128xf32>
    %13 = vector.broadcast %12 : vector<1x128xf32> to vector<128x128xf32>
    %14 = arith.addf %11, %13 : vector<128x128xf32>
    %cst_11 = arith.constant 0.000000e+00 : f32
    %15 = vector.broadcast %cst_11 : f32 to vector<128x128xf32>
    %16 = arith.maximumf %14, %15 : vector<128x128xf32>
    %17 = arith.truncf %16 : vector<128x128xf32> to vector<128x128xbf16>
    %c0_12 = arith.constant 0 : index
    %c0_13 = arith.constant 0 : index
    %18 = vector.load %arg6[%c0_12, %c0_13] : memref<128x128xbf16, #tpu.memory_space<vmem>>, vector<128x128xbf16>
    %cst_14 = arith.constant dense<0.000000e+00> : vector<128x128xf32>
    %19 = tpu.matmul %17, %18, %cst_14 {dimension_numbers = #tpu.dot_dimension_numbers<[1], [0], [0], [1], [0, 0, 1, 1], [], []>} : vector<128x128xbf16>, vector<128x128xbf16>, vector<128x128xf32> -> vector<128x128xf32>
    %c0_15 = arith.constant 0 : index
    %c0_16 = arith.constant 0 : index
    %20 = vector.load %arg7[%c0_15, %c0_16] : memref<1x128xf32, #tpu.memory_space<vmem>>, vector<1x128xf32>
    %21 = vector.broadcast %20 : vector<1x128xf32> to vector<128x128xf32>
    %22 = arith.addf %19, %21 : vector<128x128xf32>
    %cst_17 = arith.constant 0.000000e+00 : f32
    %23 = vector.broadcast %cst_17 : f32 to vector<128x128xf32>
    %24 = arith.maximumf %22, %23 : vector<128x128xf32>
    %25 = arith.truncf %24 : vector<128x128xf32> to vector<128x128xbf16>
    %c0_18 = arith.constant 0 : index
    %c0_19 = arith.constant 0 : index
    %26 = vector.load %arg8[%c0_18, %c0_19] : memref<128x128xbf16, #tpu.memory_space<vmem>>, vector<128x128xbf16>
    %cst_20 = arith.constant dense<0.000000e+00> : vector<128x128xf32>
    %27 = tpu.matmul %25, %26, %cst_20 {dimension_numbers = #tpu.dot_dimension_numbers<[1], [0], [0], [1], [0, 0, 1, 1], [], []>} : vector<128x128xbf16>, vector<128x128xbf16>, vector<128x128xf32> -> vector<128x128xf32>
    %c0_21 = arith.constant 0 : index
    %c0_22 = arith.constant 0 : index
    %28 = vector.load %arg9[%c0_21, %c0_22] : memref<1x128xf32, #tpu.memory_space<vmem>>, vector<1x128xf32>
    %29 = vector.broadcast %28 : vector<1x128xf32> to vector<128x128xf32>
    %30 = arith.addf %27, %29 : vector<128x128xf32>
    %c0_23 = arith.constant 0 : index
    %c0_24 = arith.constant 0 : index
    %31 = vector.load %arg10[%c0_23, %c0_24] : memref<128x128xf32, #tpu.memory_space<vmem>>, vector<128x128xf32>
    tpu.vector_store %arg10[%c0_23, %c0_24], %30 {strides = array<i32>} : memref<128x128xf32, #tpu.memory_space<vmem>>, vector<128x128xf32>,
    return
  }
  func.func @transform_0(%arg0: i32) -> (i32, i32) {
    %c0_i32 = arith.constant 0 : i32
    %c0_i32_0 = arith.constant 0 : i32
    return %arg0, %c0_i32 : i32, i32
  }
  func.func @transform_1(%arg0: i32) -> (i32, i32) {
    %c0_i32 = arith.constant 0 : i32
    %c0_i32_0 = arith.constant 0 : i32
    %c0_i32_1 = arith.constant 0 : i32
    return %c0_i32, %c0_i32_0 : i32, i32
  }
  func.func @transform_2(%arg0: i32) -> (i32, i32) {
    %c0_i32 = arith.constant 0 : i32
    %c0_i32_0 = arith.constant 0 : i32
    %c0_i32_1 = arith.constant 0 : i32
    return %c0_i32, %c0_i32_0 : i32, i32
  }
  func.func @transform_3(%arg0: i32) -> (i32, i32) {
    %c0_i32 = arith.constant 0 : i32
    %c0_i32_0 = arith.constant 0 : i32
    %c0_i32_1 = arith.constant 0 : i32
    return %c0_i32, %c0_i32_0 : i32, i32
  }
  func.func @transform_4(%arg0: i32) -> (i32, i32) {
    %c0_i32 = arith.constant 0 : i32
    %c0_i32_0 = arith.constant 0 : i32
    %c0_i32_1 = arith.constant 0 : i32
    return %c0_i32, %c0_i32_0 : i32, i32
  }
  func.func @transform_5(%arg0: i32) -> (i32, i32) {
    %c0_i32 = arith.constant 0 : i32
    %c0_i32_0 = arith.constant 0 : i32
    %c0_i32_1 = arith.constant 0 : i32
    return %c0_i32, %c0_i32_0 : i32, i32
  }
  func.func @transform_6(%arg0: i32) -> (i32, i32) {
    %c0_i32 = arith.constant 0 : i32
    %c0_i32_0 = arith.constant 0 : i32
    %c0_i32_1 = arith.constant 0 : i32
    return %c0_i32, %c0_i32_0 : i32, i32
  }
  func.func @transform_7(%arg0: i32) -> (i32, i32) {
    %c0_i32 = arith.constant 0 : i32
    %c0_i32_0 = arith.constant 0 : i32
    %c0_i32_1 = arith.constant 0 : i32
    return %c0_i32, %c0_i32_0 : i32, i32
  }
  func.func @transform_8(%arg0: i32) -> (i32, i32) {
    %c0_i32 = arith.constant 0 : i32
    %c0_i32_0 = arith.constant 0 : i32
    %c0_i32_1 = arith.constant 0 : i32
    return %c0_i32, %c0_i32_0 : i32, i32
  }
  func.func @transform_9(%arg0: i32) -> (i32, i32) {
    %c0_i32 = arith.constant 0 : i32
    %c0_i32_0 = arith.constant 0 : i32
    return %arg0, %c0_i32 : i32, i32
  }
}

module attributes {stable_mosaic.version = 11 : i64} {
  func.func @_edge_block_kernel(%arg0: i32, %arg1: memref<512xi32, #tpu.memory_space<smem>>, %arg2: memref<512xi32, #tpu.memory_space<smem>>, %arg3: memref<128x128xf32, #tpu.memory_space<vmem>>, %arg4: memref<256x128xf32, #tpu.memory_space<vmem>>, %arg5: memref<128x128xbf16, #tpu.memory_space<vmem>>, %arg6: memref<128x128xbf16, #tpu.memory_space<vmem>>, %arg7: memref<128x128xbf16, #tpu.memory_space<vmem>>, %arg8: memref<1x128xf32, #tpu.memory_space<vmem>>, %arg9: memref<128x128xbf16, #tpu.memory_space<vmem>>, %arg10: memref<1x128xf32, #tpu.memory_space<vmem>>, %arg11: memref<128x128xbf16, #tpu.memory_space<vmem>>, %arg12: memref<1x128xf32, #tpu.memory_space<vmem>>, %arg13: memref<128x128xbf16, #tpu.memory_space<vmem>>, %arg14: memref<1x128xf32, #tpu.memory_space<vmem>>, %arg15: memref<128x128xf32, #tpu.memory_space<vmem>>, %arg16: memref<256x128xf32, #tpu.memory_space<vmem>>, %arg17: memref<128x128xf32, #tpu.memory_space<vmem>>, %arg18: memref<128x128xf32, #tpu.memory_space<vmem>>, %arg19: memref<128x128xf32, #tpu.memory_space<vmem>>) attributes {dimension_semantics = [#tpu.dimension_semantics<arbitrary>], iteration_bounds = array<i64: 4>, scalar_prefetch = 2 : i64, scratch_operands = 3 : i64, tpu.core_type = #tpu.core_type<tc>, window_params = [{transform_indices = @transform_0, window_bounds = array<i64: 128, 128>}, {pipeline_mode = #tpu.pipeline_mode<synchronous>, transform_indices = @transform_1, window_bounds = array<i64: 256, 128>}, {pipeline_mode = #tpu.pipeline_mode<synchronous>, transform_indices = @transform_2, window_bounds = array<i64: 128, 128>}, {pipeline_mode = #tpu.pipeline_mode<synchronous>, transform_indices = @transform_3, window_bounds = array<i64: 128, 128>}, {pipeline_mode = #tpu.pipeline_mode<synchronous>, transform_indices = @transform_4, window_bounds = array<i64: 128, 128>}, {pipeline_mode = #tpu.pipeline_mode<synchronous>, transform_indices = @transform_5, window_bounds = array<i64: 1, 128>}, {pipeline_mode = #tpu.pipeline_mode<synchronous>, transform_indices = @transform_6, window_bounds = array<i64: 128, 128>}, {pipeline_mode = #tpu.pipeline_mode<synchronous>, transform_indices = @transform_7, window_bounds = array<i64: 1, 128>}, {pipeline_mode = #tpu.pipeline_mode<synchronous>, transform_indices = @transform_8, window_bounds = array<i64: 128, 128>}, {pipeline_mode = #tpu.pipeline_mode<synchronous>, transform_indices = @transform_9, window_bounds = array<i64: 1, 128>}, {pipeline_mode = #tpu.pipeline_mode<synchronous>, transform_indices = @transform_10, window_bounds = array<i64: 128, 128>}, {pipeline_mode = #tpu.pipeline_mode<synchronous>, transform_indices = @transform_11, window_bounds = array<i64: 1, 128>}, {transform_indices = @transform_12, window_bounds = array<i64: 128, 128>}, {pipeline_mode = #tpu.pipeline_mode<synchronous>, transform_indices = @transform_13, window_bounds = array<i64: 256, 128>}]} {
    %c128_i32 = arith.constant 128 : i32
    %0 = arith.muli %arg0, %c128_i32 : i32
    %c0_i32 = arith.constant 0 : i32
    %1 = arith.cmpi eq, %arg0, %c0_i32 : i32
    %2 = arith.extui %1 : i1 to i32
    %c0_i32_0 = arith.constant 0 : i32
    %3 = arith.cmpi ne, %2, %c0_i32_0 : i32
    scf.if %3 {
      %cst_45 = arith.constant 0.000000e+00 : f32
      %50 = vector.broadcast %cst_45 : f32 to vector<256x128xf32>
      %c0_46 = arith.constant 0 : index
      %c0_47 = arith.constant 0 : index
      %51 = vector.load %arg16[%c0_46, %c0_47] : memref<256x128xf32, #tpu.memory_space<vmem>>, vector<256x128xf32>
      tpu.vector_store %arg16[%c0_46, %c0_47], %50 {strides = array<i32>} : memref<256x128xf32, #tpu.memory_space<vmem>>, vector<256x128xf32>,
    } else {
    }
    %c0_i32_1 = arith.constant 0 : i32
    %c128_i32_2 = arith.constant 128 : i32
    %4 = arith.addi %c0_i32_1, %c128_i32_2 : i32
    %c1_i32 = arith.constant 1 : i32
    scf.for %arg20 = %c0_i32_1 to %4 step %c1_i32  : i32 {
      %50 = arith.addi %0, %arg20 : i32
      %51 = arith.index_cast %50 : i32 to index
      %52 = memref.load %arg1[%51] : memref<512xi32, #tpu.memory_space<smem>>
      %53 = arith.index_cast %52 : i32 to index
      %c0_45 = arith.constant 0 : index
      %54 = vector.load %arg4[%53, %c0_45] : memref<256x128xf32, #tpu.memory_space<vmem>>, vector<1x128xf32>
      %55 = arith.index_cast %arg20 : i32 to index
      %c0_46 = arith.constant 0 : index
      %56 = vector.load %arg17[%55, %c0_46] : memref<128x128xf32, #tpu.memory_space<vmem>>, vector<1x128xf32>
      tpu.vector_store %arg17[%55, %c0_46], %54 {strides = array<i32>} : memref<128x128xf32, #tpu.memory_space<vmem>>, vector<1x128xf32>,
      %57 = arith.addi %0, %arg20 : i32
      %58 = arith.index_cast %57 : i32 to index
      %59 = memref.load %arg2[%58] : memref<512xi32, #tpu.memory_space<smem>>
      %60 = arith.index_cast %59 : i32 to index
      %c0_47 = arith.constant 0 : index
      %61 = vector.load %arg4[%60, %c0_47] : memref<256x128xf32, #tpu.memory_space<vmem>>, vector<1x128xf32>
      %62 = arith.index_cast %arg20 : i32 to index
      %c0_48 = arith.constant 0 : index
      %63 = vector.load %arg18[%62, %c0_48] : memref<128x128xf32, #tpu.memory_space<vmem>>, vector<1x128xf32>
      tpu.vector_store %arg18[%62, %c0_48], %61 {strides = array<i32>} : memref<128x128xf32, #tpu.memory_space<vmem>>, vector<1x128xf32>,
    }
    %c128_i32_3 = arith.constant 128 : i32
    %c0 = arith.constant 0 : index
    %c0_4 = arith.constant 0 : index
    %5 = vector.load %arg3[%c0, %c0_4] : memref<128x128xf32, #tpu.memory_space<vmem>>, vector<128x128xf32>
    %c0_5 = arith.constant 0 : index
    %c0_6 = arith.constant 0 : index
    %6 = vector.load %arg17[%c0_5, %c0_6] : memref<128x128xf32, #tpu.memory_space<vmem>>, vector<128x128xf32>
    %7 = arith.truncf %6 : vector<128x128xf32> to vector<128x128xbf16>
    %c0_7 = arith.constant 0 : index
    %c0_8 = arith.constant 0 : index
    %8 = vector.load %arg5[%c0_7, %c0_8] : memref<128x128xbf16, #tpu.memory_space<vmem>>, vector<128x128xbf16>
    %cst = arith.constant dense<0.000000e+00> : vector<128x128xf32>
    %9 = tpu.matmul %7, %8, %cst {dimension_numbers = #tpu.dot_dimension_numbers<[1], [0], [0], [1], [0, 0, 1, 1], [], []>} : vector<128x128xbf16>, vector<128x128xbf16>, vector<128x128xf32> -> vector<128x128xf32>
    %c0_9 = arith.constant 0 : index
    %c0_10 = arith.constant 0 : index
    %10 = vector.load %arg18[%c0_9, %c0_10] : memref<128x128xf32, #tpu.memory_space<vmem>>, vector<128x128xf32>
    %11 = arith.truncf %10 : vector<128x128xf32> to vector<128x128xbf16>
    %c0_11 = arith.constant 0 : index
    %c0_12 = arith.constant 0 : index
    %12 = vector.load %arg6[%c0_11, %c0_12] : memref<128x128xbf16, #tpu.memory_space<vmem>>, vector<128x128xbf16>
    %cst_13 = arith.constant dense<0.000000e+00> : vector<128x128xf32>
    %13 = tpu.matmul %11, %12, %cst_13 {dimension_numbers = #tpu.dot_dimension_numbers<[1], [0], [0], [1], [0, 0, 1, 1], [], []>} : vector<128x128xbf16>, vector<128x128xbf16>, vector<128x128xf32> -> vector<128x128xf32>
    %14 = arith.addf %9, %13 : vector<128x128xf32>
    %15 = arith.truncf %5 : vector<128x128xf32> to vector<128x128xbf16>
    %c0_14 = arith.constant 0 : index
    %c0_15 = arith.constant 0 : index
    %16 = vector.load %arg7[%c0_14, %c0_15] : memref<128x128xbf16, #tpu.memory_space<vmem>>, vector<128x128xbf16>
    %cst_16 = arith.constant dense<0.000000e+00> : vector<128x128xf32>
    %17 = tpu.matmul %15, %16, %cst_16 {dimension_numbers = #tpu.dot_dimension_numbers<[1], [0], [0], [1], [0, 0, 1, 1], [], []>} : vector<128x128xbf16>, vector<128x128xbf16>, vector<128x128xf32> -> vector<128x128xf32>
    %18 = arith.addf %14, %17 : vector<128x128xf32>
    %c0_17 = arith.constant 0 : index
    %c0_18 = arith.constant 0 : index
    %19 = vector.load %arg8[%c0_17, %c0_18] : memref<1x128xf32, #tpu.memory_space<vmem>>, vector<1x128xf32>
    %20 = vector.broadcast %19 : vector<1x128xf32> to vector<128x128xf32>
    %21 = arith.addf %18, %20 : vector<128x128xf32>
    %cst_19 = arith.constant 0.000000e+00 : f32
    %22 = vector.broadcast %cst_19 : f32 to vector<128x128xf32>
    %23 = arith.maximumf %21, %22 : vector<128x128xf32>
    %24 = arith.truncf %23 : vector<128x128xf32> to vector<128x128xbf16>
    %c0_20 = arith.constant 0 : index
    %c0_21 = arith.constant 0 : index
    %25 = vector.load %arg9[%c0_20, %c0_21] : memref<128x128xbf16, #tpu.memory_space<vmem>>, vector<128x128xbf16>
    %cst_22 = arith.constant dense<0.000000e+00> : vector<128x128xf32>
    %26 = tpu.matmul %24, %25, %cst_22 {dimension_numbers = #tpu.dot_dimension_numbers<[1], [0], [0], [1], [0, 0, 1, 1], [], []>} : vector<128x128xbf16>, vector<128x128xbf16>, vector<128x128xf32> -> vector<128x128xf32>
    %c0_23 = arith.constant 0 : index
    %c0_24 = arith.constant 0 : index
    %27 = vector.load %arg10[%c0_23, %c0_24] : memref<1x128xf32, #tpu.memory_space<vmem>>, vector<1x128xf32>
    %28 = vector.broadcast %27 : vector<1x128xf32> to vector<128x128xf32>
    %29 = arith.addf %26, %28 : vector<128x128xf32>
    %cst_25 = arith.constant 0.000000e+00 : f32
    %30 = vector.broadcast %cst_25 : f32 to vector<128x128xf32>
    %31 = arith.maximumf %29, %30 : vector<128x128xf32>
    %32 = arith.truncf %31 : vector<128x128xf32> to vector<128x128xbf16>
    %c0_26 = arith.constant 0 : index
    %c0_27 = arith.constant 0 : index
    %33 = vector.load %arg11[%c0_26, %c0_27] : memref<128x128xbf16, #tpu.memory_space<vmem>>, vector<128x128xbf16>
    %cst_28 = arith.constant dense<0.000000e+00> : vector<128x128xf32>
    %34 = tpu.matmul %32, %33, %cst_28 {dimension_numbers = #tpu.dot_dimension_numbers<[1], [0], [0], [1], [0, 0, 1, 1], [], []>} : vector<128x128xbf16>, vector<128x128xbf16>, vector<128x128xf32> -> vector<128x128xf32>
    %c0_29 = arith.constant 0 : index
    %c0_30 = arith.constant 0 : index
    %35 = vector.load %arg12[%c0_29, %c0_30] : memref<1x128xf32, #tpu.memory_space<vmem>>, vector<1x128xf32>
    %36 = vector.broadcast %35 : vector<1x128xf32> to vector<128x128xf32>
    %37 = arith.addf %34, %36 : vector<128x128xf32>
    %cst_31 = arith.constant 0.000000e+00 : f32
    %38 = vector.broadcast %cst_31 : f32 to vector<128x128xf32>
    %39 = arith.maximumf %37, %38 : vector<128x128xf32>
    %40 = arith.truncf %39 : vector<128x128xf32> to vector<128x128xbf16>
    %c0_32 = arith.constant 0 : index
    %c0_33 = arith.constant 0 : index
    %41 = vector.load %arg13[%c0_32, %c0_33] : memref<128x128xbf16, #tpu.memory_space<vmem>>, vector<128x128xbf16>
    %cst_34 = arith.constant dense<0.000000e+00> : vector<128x128xf32>
    %42 = tpu.matmul %40, %41, %cst_34 {dimension_numbers = #tpu.dot_dimension_numbers<[1], [0], [0], [1], [0, 0, 1, 1], [], []>} : vector<128x128xbf16>, vector<128x128xbf16>, vector<128x128xf32> -> vector<128x128xf32>
    %c0_35 = arith.constant 0 : index
    %c0_36 = arith.constant 0 : index
    %43 = vector.load %arg14[%c0_35, %c0_36] : memref<1x128xf32, #tpu.memory_space<vmem>>, vector<1x128xf32>
    %44 = vector.broadcast %43 : vector<1x128xf32> to vector<128x128xf32>
    %45 = arith.addf %42, %44 : vector<128x128xf32>
    %c0_37 = arith.constant 0 : index
    %c0_38 = arith.constant 0 : index
    %46 = vector.load %arg19[%c0_37, %c0_38] : memref<128x128xf32, #tpu.memory_space<vmem>>, vector<128x128xf32>
    tpu.vector_store %arg19[%c0_37, %c0_38], %45 {strides = array<i32>} : memref<128x128xf32, #tpu.memory_space<vmem>>, vector<128x128xf32>,
    %47 = arith.addf %5, %45 : vector<128x128xf32>
    %c0_39 = arith.constant 0 : index
    %c0_40 = arith.constant 0 : index
    %48 = vector.load %arg15[%c0_39, %c0_40] : memref<128x128xf32, #tpu.memory_space<vmem>>, vector<128x128xf32>
    tpu.vector_store %arg15[%c0_39, %c0_40], %47 {strides = array<i32>} : memref<128x128xf32, #tpu.memory_space<vmem>>, vector<128x128xf32>,
    %c0_i32_41 = arith.constant 0 : i32
    %c128_i32_42 = arith.constant 128 : i32
    %49 = arith.addi %c0_i32_41, %c128_i32_42 : i32
    %c1_i32_43 = arith.constant 1 : i32
    scf.for %arg20 = %c0_i32_41 to %49 step %c1_i32_43  : i32 {
      %50 = arith.addi %0, %arg20 : i32
      %c512_i32 = arith.constant 512 : i32
      %51 = arith.cmpi slt, %50, %c512_i32 : i32
      %52 = arith.extui %51 : i1 to i32
      %53 = arith.sitofp %52 : i32 to f32
      %54 = arith.index_cast %50 : i32 to index
      %55 = memref.load %arg2[%54] : memref<512xi32, #tpu.memory_space<smem>>
      %56 = arith.index_cast %55 : i32 to index
      %c0_45 = arith.constant 0 : index
      %57 = vector.load %arg16[%56, %c0_45] : memref<256x128xf32, #tpu.memory_space<vmem>>, vector<1x128xf32>
      %58 = arith.index_cast %arg20 : i32 to index
      %c0_46 = arith.constant 0 : index
      %59 = vector.load %arg19[%58, %c0_46] : memref<128x128xf32, #tpu.memory_space<vmem>>, vector<1x128xf32>
      %60 = vector.broadcast %53 : f32 to vector<1x128xf32>
      %61 = arith.mulf %59, %60 : vector<1x128xf32>
      %62 = arith.addf %57, %61 : vector<1x128xf32>
      %63 = arith.index_cast %55 : i32 to index
      %c0_47 = arith.constant 0 : index
      %64 = vector.load %arg16[%63, %c0_47] : memref<256x128xf32, #tpu.memory_space<vmem>>, vector<1x128xf32>
      tpu.vector_store %arg16[%63, %c0_47], %62 {strides = array<i32>} : memref<256x128xf32, #tpu.memory_space<vmem>>, vector<1x128xf32>,
    }
    %c128_i32_44 = arith.constant 128 : i32
    return
  }
  func.func @transform_0(%arg0: i32, %arg1: memref<512xi32, #tpu.memory_space<smem>>, %arg2: memref<512xi32, #tpu.memory_space<smem>>) -> (i32, i32) {
    %c0_i32 = arith.constant 0 : i32
    %c0_i32_0 = arith.constant 0 : i32
    return %arg0, %c0_i32 : i32, i32
  }
  func.func @transform_1(%arg0: i32, %arg1: memref<512xi32, #tpu.memory_space<smem>>, %arg2: memref<512xi32, #tpu.memory_space<smem>>) -> (i32, i32) {
    %c0_i32 = arith.constant 0 : i32
    %c0_i32_0 = arith.constant 0 : i32
    %c0_i32_1 = arith.constant 0 : i32
    return %c0_i32, %c0_i32_0 : i32, i32
  }
  func.func @transform_2(%arg0: i32, %arg1: memref<512xi32, #tpu.memory_space<smem>>, %arg2: memref<512xi32, #tpu.memory_space<smem>>) -> (i32, i32) {
    %c0_i32 = arith.constant 0 : i32
    %c0_i32_0 = arith.constant 0 : i32
    %c0_i32_1 = arith.constant 0 : i32
    return %c0_i32, %c0_i32_0 : i32, i32
  }
  func.func @transform_3(%arg0: i32, %arg1: memref<512xi32, #tpu.memory_space<smem>>, %arg2: memref<512xi32, #tpu.memory_space<smem>>) -> (i32, i32) {
    %c0_i32 = arith.constant 0 : i32
    %c0_i32_0 = arith.constant 0 : i32
    %c0_i32_1 = arith.constant 0 : i32
    return %c0_i32, %c0_i32_0 : i32, i32
  }
  func.func @transform_4(%arg0: i32, %arg1: memref<512xi32, #tpu.memory_space<smem>>, %arg2: memref<512xi32, #tpu.memory_space<smem>>) -> (i32, i32) {
    %c0_i32 = arith.constant 0 : i32
    %c0_i32_0 = arith.constant 0 : i32
    %c0_i32_1 = arith.constant 0 : i32
    return %c0_i32, %c0_i32_0 : i32, i32
  }
  func.func @transform_5(%arg0: i32, %arg1: memref<512xi32, #tpu.memory_space<smem>>, %arg2: memref<512xi32, #tpu.memory_space<smem>>) -> (i32, i32) {
    %c0_i32 = arith.constant 0 : i32
    %c0_i32_0 = arith.constant 0 : i32
    %c0_i32_1 = arith.constant 0 : i32
    return %c0_i32, %c0_i32_0 : i32, i32
  }
  func.func @transform_6(%arg0: i32, %arg1: memref<512xi32, #tpu.memory_space<smem>>, %arg2: memref<512xi32, #tpu.memory_space<smem>>) -> (i32, i32) {
    %c0_i32 = arith.constant 0 : i32
    %c0_i32_0 = arith.constant 0 : i32
    %c0_i32_1 = arith.constant 0 : i32
    return %c0_i32, %c0_i32_0 : i32, i32
  }
  func.func @transform_7(%arg0: i32, %arg1: memref<512xi32, #tpu.memory_space<smem>>, %arg2: memref<512xi32, #tpu.memory_space<smem>>) -> (i32, i32) {
    %c0_i32 = arith.constant 0 : i32
    %c0_i32_0 = arith.constant 0 : i32
    %c0_i32_1 = arith.constant 0 : i32
    return %c0_i32, %c0_i32_0 : i32, i32
  }
  func.func @transform_8(%arg0: i32, %arg1: memref<512xi32, #tpu.memory_space<smem>>, %arg2: memref<512xi32, #tpu.memory_space<smem>>) -> (i32, i32) {
    %c0_i32 = arith.constant 0 : i32
    %c0_i32_0 = arith.constant 0 : i32
    %c0_i32_1 = arith.constant 0 : i32
    return %c0_i32, %c0_i32_0 : i32, i32
  }
  func.func @transform_9(%arg0: i32, %arg1: memref<512xi32, #tpu.memory_space<smem>>, %arg2: memref<512xi32, #tpu.memory_space<smem>>) -> (i32, i32) {
    %c0_i32 = arith.constant 0 : i32
    %c0_i32_0 = arith.constant 0 : i32
    %c0_i32_1 = arith.constant 0 : i32
    return %c0_i32, %c0_i32_0 : i32, i32
  }
  func.func @transform_10(%arg0: i32, %arg1: memref<512xi32, #tpu.memory_space<smem>>, %arg2: memref<512xi32, #tpu.memory_space<smem>>) -> (i32, i32) {
    %c0_i32 = arith.constant 0 : i32
    %c0_i32_0 = arith.constant 0 : i32
    %c0_i32_1 = arith.constant 0 : i32
    return %c0_i32, %c0_i32_0 : i32, i32
  }
  func.func @transform_11(%arg0: i32, %arg1: memref<512xi32, #tpu.memory_space<smem>>, %arg2: memref<512xi32, #tpu.memory_space<smem>>) -> (i32, i32) {
    %c0_i32 = arith.constant 0 : i32
    %c0_i32_0 = arith.constant 0 : i32
    %c0_i32_1 = arith.constant 0 : i32
    return %c0_i32, %c0_i32_0 : i32, i32
  }
  func.func @transform_12(%arg0: i32, %arg1: memref<512xi32, #tpu.memory_space<smem>>, %arg2: memref<512xi32, #tpu.memory_space<smem>>) -> (i32, i32) {
    %c0_i32 = arith.constant 0 : i32
    %c0_i32_0 = arith.constant 0 : i32
    return %arg0, %c0_i32 : i32, i32
  }
  func.func @transform_13(%arg0: i32, %arg1: memref<512xi32, #tpu.memory_space<smem>>, %arg2: memref<512xi32, #tpu.memory_space<smem>>) -> (i32, i32) {
    %c0_i32 = arith.constant 0 : i32
    %c0_i32_0 = arith.constant 0 : i32
    %c0_i32_1 = arith.constant 0 : i32
    return %c0_i32, %c0_i32_0 : i32, i32
  }
}

module attributes {stable_mosaic.version = 11 : i64} {
  func.func @_edge_block_kernel(%arg0: i32, %arg1: memref<512xi32, #tpu.memory_space<smem>>, %arg2: memref<512xi32, #tpu.memory_space<smem>>, %arg3: memref<128x128xf32, #tpu.memory_space<vmem>>, %arg4: memref<256x128xf32, #tpu.memory_space<vmem>>, %arg5: memref<128x128xbf16, #tpu.memory_space<vmem>>, %arg6: memref<128x128xbf16, #tpu.memory_space<vmem>>, %arg7: memref<128x128xbf16, #tpu.memory_space<vmem>>, %arg8: memref<1x128xf32, #tpu.memory_space<vmem>>, %arg9: memref<128x128xbf16, #tpu.memory_space<vmem>>, %arg10: memref<1x128xf32, #tpu.memory_space<vmem>>, %arg11: memref<128x128xbf16, #tpu.memory_space<vmem>>, %arg12: memref<1x128xf32, #tpu.memory_space<vmem>>, %arg13: memref<128x128xbf16, #tpu.memory_space<vmem>>, %arg14: memref<1x128xf32, #tpu.memory_space<vmem>>, %arg15: memref<128x128xf32, #tpu.memory_space<vmem>>, %arg16: memref<256x128xf32, #tpu.memory_space<vmem>>, %arg17: memref<128x128xf32, #tpu.memory_space<vmem>>, %arg18: memref<128x128xf32, #tpu.memory_space<vmem>>, %arg19: memref<128x128xf32, #tpu.memory_space<vmem>>) attributes {dimension_semantics = [#tpu.dimension_semantics<arbitrary>], iteration_bounds = array<i64: 4>, scalar_prefetch = 2 : i64, scratch_operands = 3 : i64, tpu.core_type = #tpu.core_type<tc>, window_params = [{transform_indices = @transform_0, window_bounds = array<i64: 128, 128>}, {pipeline_mode = #tpu.pipeline_mode<synchronous>, transform_indices = @transform_1, window_bounds = array<i64: 256, 128>}, {pipeline_mode = #tpu.pipeline_mode<synchronous>, transform_indices = @transform_2, window_bounds = array<i64: 128, 128>}, {pipeline_mode = #tpu.pipeline_mode<synchronous>, transform_indices = @transform_3, window_bounds = array<i64: 128, 128>}, {pipeline_mode = #tpu.pipeline_mode<synchronous>, transform_indices = @transform_4, window_bounds = array<i64: 128, 128>}, {pipeline_mode = #tpu.pipeline_mode<synchronous>, transform_indices = @transform_5, window_bounds = array<i64: 1, 128>}, {pipeline_mode = #tpu.pipeline_mode<synchronous>, transform_indices = @transform_6, window_bounds = array<i64: 128, 128>}, {pipeline_mode = #tpu.pipeline_mode<synchronous>, transform_indices = @transform_7, window_bounds = array<i64: 1, 128>}, {pipeline_mode = #tpu.pipeline_mode<synchronous>, transform_indices = @transform_8, window_bounds = array<i64: 128, 128>}, {pipeline_mode = #tpu.pipeline_mode<synchronous>, transform_indices = @transform_9, window_bounds = array<i64: 1, 128>}, {pipeline_mode = #tpu.pipeline_mode<synchronous>, transform_indices = @transform_10, window_bounds = array<i64: 128, 128>}, {pipeline_mode = #tpu.pipeline_mode<synchronous>, transform_indices = @transform_11, window_bounds = array<i64: 1, 128>}, {transform_indices = @transform_12, window_bounds = array<i64: 128, 128>}, {pipeline_mode = #tpu.pipeline_mode<synchronous>, transform_indices = @transform_13, window_bounds = array<i64: 256, 128>}]} {
    %c128_i32 = arith.constant 128 : i32
    %0 = arith.muli %arg0, %c128_i32 : i32
    %c0_i32 = arith.constant 0 : i32
    %1 = arith.cmpi eq, %arg0, %c0_i32 : i32
    %2 = arith.extui %1 : i1 to i32
    %c0_i32_0 = arith.constant 0 : i32
    %3 = arith.cmpi ne, %2, %c0_i32_0 : i32
    scf.if %3 {
      %cst_45 = arith.constant 0.000000e+00 : f32
      %50 = vector.broadcast %cst_45 : f32 to vector<256x128xf32>
      %c0_46 = arith.constant 0 : index
      %c0_47 = arith.constant 0 : index
      %51 = vector.load %arg16[%c0_46, %c0_47] : memref<256x128xf32, #tpu.memory_space<vmem>>, vector<256x128xf32>
      tpu.vector_store %arg16[%c0_46, %c0_47], %50 {strides = array<i32>} : memref<256x128xf32, #tpu.memory_space<vmem>>, vector<256x128xf32>,
    } else {
    }
    %c0_i32_1 = arith.constant 0 : i32
    %c128_i32_2 = arith.constant 128 : i32
    %4 = arith.addi %c0_i32_1, %c128_i32_2 : i32
    %c1_i32 = arith.constant 1 : i32
    scf.for %arg20 = %c0_i32_1 to %4 step %c1_i32  : i32 {
      %50 = arith.addi %0, %arg20 : i32
      %51 = arith.index_cast %50 : i32 to index
      %52 = memref.load %arg1[%51] : memref<512xi32, #tpu.memory_space<smem>>
      %53 = arith.index_cast %52 : i32 to index
      %c0_45 = arith.constant 0 : index
      %54 = vector.load %arg4[%53, %c0_45] : memref<256x128xf32, #tpu.memory_space<vmem>>, vector<1x128xf32>
      %55 = arith.index_cast %arg20 : i32 to index
      %c0_46 = arith.constant 0 : index
      %56 = vector.load %arg17[%55, %c0_46] : memref<128x128xf32, #tpu.memory_space<vmem>>, vector<1x128xf32>
      tpu.vector_store %arg17[%55, %c0_46], %54 {strides = array<i32>} : memref<128x128xf32, #tpu.memory_space<vmem>>, vector<1x128xf32>,
      %57 = arith.addi %0, %arg20 : i32
      %58 = arith.index_cast %57 : i32 to index
      %59 = memref.load %arg2[%58] : memref<512xi32, #tpu.memory_space<smem>>
      %60 = arith.index_cast %59 : i32 to index
      %c0_47 = arith.constant 0 : index
      %61 = vector.load %arg4[%60, %c0_47] : memref<256x128xf32, #tpu.memory_space<vmem>>, vector<1x128xf32>
      %62 = arith.index_cast %arg20 : i32 to index
      %c0_48 = arith.constant 0 : index
      %63 = vector.load %arg18[%62, %c0_48] : memref<128x128xf32, #tpu.memory_space<vmem>>, vector<1x128xf32>
      tpu.vector_store %arg18[%62, %c0_48], %61 {strides = array<i32>} : memref<128x128xf32, #tpu.memory_space<vmem>>, vector<1x128xf32>,
    }
    %c128_i32_3 = arith.constant 128 : i32
    %c0 = arith.constant 0 : index
    %c0_4 = arith.constant 0 : index
    %5 = vector.load %arg3[%c0, %c0_4] : memref<128x128xf32, #tpu.memory_space<vmem>>, vector<128x128xf32>
    %c0_5 = arith.constant 0 : index
    %c0_6 = arith.constant 0 : index
    %6 = vector.load %arg17[%c0_5, %c0_6] : memref<128x128xf32, #tpu.memory_space<vmem>>, vector<128x128xf32>
    %7 = arith.truncf %6 : vector<128x128xf32> to vector<128x128xbf16>
    %c0_7 = arith.constant 0 : index
    %c0_8 = arith.constant 0 : index
    %8 = vector.load %arg5[%c0_7, %c0_8] : memref<128x128xbf16, #tpu.memory_space<vmem>>, vector<128x128xbf16>
    %cst = arith.constant dense<0.000000e+00> : vector<128x128xf32>
    %9 = tpu.matmul %7, %8, %cst {dimension_numbers = #tpu.dot_dimension_numbers<[1], [0], [0], [1], [0, 0, 1, 1], [], []>} : vector<128x128xbf16>, vector<128x128xbf16>, vector<128x128xf32> -> vector<128x128xf32>
    %c0_9 = arith.constant 0 : index
    %c0_10 = arith.constant 0 : index
    %10 = vector.load %arg18[%c0_9, %c0_10] : memref<128x128xf32, #tpu.memory_space<vmem>>, vector<128x128xf32>
    %11 = arith.truncf %10 : vector<128x128xf32> to vector<128x128xbf16>
    %c0_11 = arith.constant 0 : index
    %c0_12 = arith.constant 0 : index
    %12 = vector.load %arg6[%c0_11, %c0_12] : memref<128x128xbf16, #tpu.memory_space<vmem>>, vector<128x128xbf16>
    %cst_13 = arith.constant dense<0.000000e+00> : vector<128x128xf32>
    %13 = tpu.matmul %11, %12, %cst_13 {dimension_numbers = #tpu.dot_dimension_numbers<[1], [0], [0], [1], [0, 0, 1, 1], [], []>} : vector<128x128xbf16>, vector<128x128xbf16>, vector<128x128xf32> -> vector<128x128xf32>
    %14 = arith.addf %9, %13 : vector<128x128xf32>
    %15 = arith.truncf %5 : vector<128x128xf32> to vector<128x128xbf16>
    %c0_14 = arith.constant 0 : index
    %c0_15 = arith.constant 0 : index
    %16 = vector.load %arg7[%c0_14, %c0_15] : memref<128x128xbf16, #tpu.memory_space<vmem>>, vector<128x128xbf16>
    %cst_16 = arith.constant dense<0.000000e+00> : vector<128x128xf32>
    %17 = tpu.matmul %15, %16, %cst_16 {dimension_numbers = #tpu.dot_dimension_numbers<[1], [0], [0], [1], [0, 0, 1, 1], [], []>} : vector<128x128xbf16>, vector<128x128xbf16>, vector<128x128xf32> -> vector<128x128xf32>
    %18 = arith.addf %14, %17 : vector<128x128xf32>
    %c0_17 = arith.constant 0 : index
    %c0_18 = arith.constant 0 : index
    %19 = vector.load %arg8[%c0_17, %c0_18] : memref<1x128xf32, #tpu.memory_space<vmem>>, vector<1x128xf32>
    %20 = vector.broadcast %19 : vector<1x128xf32> to vector<128x128xf32>
    %21 = arith.addf %18, %20 : vector<128x128xf32>
    %cst_19 = arith.constant 0.000000e+00 : f32
    %22 = vector.broadcast %cst_19 : f32 to vector<128x128xf32>
    %23 = arith.maximumf %21, %22 : vector<128x128xf32>
    %24 = arith.truncf %23 : vector<128x128xf32> to vector<128x128xbf16>
    %c0_20 = arith.constant 0 : index
    %c0_21 = arith.constant 0 : index
    %25 = vector.load %arg9[%c0_20, %c0_21] : memref<128x128xbf16, #tpu.memory_space<vmem>>, vector<128x128xbf16>
    %cst_22 = arith.constant dense<0.000000e+00> : vector<128x128xf32>
    %26 = tpu.matmul %24, %25, %cst_22 {dimension_numbers = #tpu.dot_dimension_numbers<[1], [0], [0], [1], [0, 0, 1, 1], [], []>} : vector<128x128xbf16>, vector<128x128xbf16>, vector<128x128xf32> -> vector<128x128xf32>
    %c0_23 = arith.constant 0 : index
    %c0_24 = arith.constant 0 : index
    %27 = vector.load %arg10[%c0_23, %c0_24] : memref<1x128xf32, #tpu.memory_space<vmem>>, vector<1x128xf32>
    %28 = vector.broadcast %27 : vector<1x128xf32> to vector<128x128xf32>
    %29 = arith.addf %26, %28 : vector<128x128xf32>
    %cst_25 = arith.constant 0.000000e+00 : f32
    %30 = vector.broadcast %cst_25 : f32 to vector<128x128xf32>
    %31 = arith.maximumf %29, %30 : vector<128x128xf32>
    %32 = arith.truncf %31 : vector<128x128xf32> to vector<128x128xbf16>
    %c0_26 = arith.constant 0 : index
    %c0_27 = arith.constant 0 : index
    %33 = vector.load %arg11[%c0_26, %c0_27] : memref<128x128xbf16, #tpu.memory_space<vmem>>, vector<128x128xbf16>
    %cst_28 = arith.constant dense<0.000000e+00> : vector<128x128xf32>
    %34 = tpu.matmul %32, %33, %cst_28 {dimension_numbers = #tpu.dot_dimension_numbers<[1], [0], [0], [1], [0, 0, 1, 1], [], []>} : vector<128x128xbf16>, vector<128x128xbf16>, vector<128x128xf32> -> vector<128x128xf32>
    %c0_29 = arith.constant 0 : index
    %c0_30 = arith.constant 0 : index
    %35 = vector.load %arg12[%c0_29, %c0_30] : memref<1x128xf32, #tpu.memory_space<vmem>>, vector<1x128xf32>
    %36 = vector.broadcast %35 : vector<1x128xf32> to vector<128x128xf32>
    %37 = arith.addf %34, %36 : vector<128x128xf32>
    %cst_31 = arith.constant 0.000000e+00 : f32
    %38 = vector.broadcast %cst_31 : f32 to vector<128x128xf32>
    %39 = arith.maximumf %37, %38 : vector<128x128xf32>
    %40 = arith.truncf %39 : vector<128x128xf32> to vector<128x128xbf16>
    %c0_32 = arith.constant 0 : index
    %c0_33 = arith.constant 0 : index
    %41 = vector.load %arg13[%c0_32, %c0_33] : memref<128x128xbf16, #tpu.memory_space<vmem>>, vector<128x128xbf16>
    %cst_34 = arith.constant dense<0.000000e+00> : vector<128x128xf32>
    %42 = tpu.matmul %40, %41, %cst_34 {dimension_numbers = #tpu.dot_dimension_numbers<[1], [0], [0], [1], [0, 0, 1, 1], [], []>} : vector<128x128xbf16>, vector<128x128xbf16>, vector<128x128xf32> -> vector<128x128xf32>
    %c0_35 = arith.constant 0 : index
    %c0_36 = arith.constant 0 : index
    %43 = vector.load %arg14[%c0_35, %c0_36] : memref<1x128xf32, #tpu.memory_space<vmem>>, vector<1x128xf32>
    %44 = vector.broadcast %43 : vector<1x128xf32> to vector<128x128xf32>
    %45 = arith.addf %42, %44 : vector<128x128xf32>
    %c0_37 = arith.constant 0 : index
    %c0_38 = arith.constant 0 : index
    %46 = vector.load %arg19[%c0_37, %c0_38] : memref<128x128xf32, #tpu.memory_space<vmem>>, vector<128x128xf32>
    tpu.vector_store %arg19[%c0_37, %c0_38], %45 {strides = array<i32>} : memref<128x128xf32, #tpu.memory_space<vmem>>, vector<128x128xf32>,
    %47 = arith.addf %5, %45 : vector<128x128xf32>
    %c0_39 = arith.constant 0 : index
    %c0_40 = arith.constant 0 : index
    %48 = vector.load %arg15[%c0_39, %c0_40] : memref<128x128xf32, #tpu.memory_space<vmem>>, vector<128x128xf32>
    tpu.vector_store %arg15[%c0_39, %c0_40], %47 {strides = array<i32>} : memref<128x128xf32, #tpu.memory_space<vmem>>, vector<128x128xf32>,
    %c0_i32_41 = arith.constant 0 : i32
    %c128_i32_42 = arith.constant 128 : i32
    %49 = arith.addi %c0_i32_41, %c128_i32_42 : i32
    %c1_i32_43 = arith.constant 1 : i32
    scf.for %arg20 = %c0_i32_41 to %49 step %c1_i32_43  : i32 {
      %50 = arith.addi %0, %arg20 : i32
      %c512_i32 = arith.constant 512 : i32
      %51 = arith.cmpi slt, %50, %c512_i32 : i32
      %52 = arith.extui %51 : i1 to i32
      %53 = arith.sitofp %52 : i32 to f32
      %54 = arith.index_cast %50 : i32 to index
      %55 = memref.load %arg2[%54] : memref<512xi32, #tpu.memory_space<smem>>
      %56 = arith.index_cast %55 : i32 to index
      %c0_45 = arith.constant 0 : index
      %57 = vector.load %arg16[%56, %c0_45] : memref<256x128xf32, #tpu.memory_space<vmem>>, vector<1x128xf32>
      %58 = arith.index_cast %arg20 : i32 to index
      %c0_46 = arith.constant 0 : index
      %59 = vector.load %arg19[%58, %c0_46] : memref<128x128xf32, #tpu.memory_space<vmem>>, vector<1x128xf32>
      %60 = vector.broadcast %53 : f32 to vector<1x128xf32>
      %61 = arith.mulf %59, %60 : vector<1x128xf32>
      %62 = arith.addf %57, %61 : vector<1x128xf32>
      %63 = arith.index_cast %55 : i32 to index
      %c0_47 = arith.constant 0 : index
      %64 = vector.load %arg16[%63, %c0_47] : memref<256x128xf32, #tpu.memory_space<vmem>>, vector<1x128xf32>
      tpu.vector_store %arg16[%63, %c0_47], %62 {strides = array<i32>} : memref<256x128xf32, #tpu.memory_space<vmem>>, vector<1x128xf32>,
    }
    %c128_i32_44 = arith.constant 128 : i32
    return
  }
  func.func @transform_0(%arg0: i32, %arg1: memref<512xi32, #tpu.memory_space<smem>>, %arg2: memref<512xi32, #tpu.memory_space<smem>>) -> (i32, i32) {
    %c0_i32 = arith.constant 0 : i32
    %c0_i32_0 = arith.constant 0 : i32
    return %arg0, %c0_i32 : i32, i32
  }
  func.func @transform_1(%arg0: i32, %arg1: memref<512xi32, #tpu.memory_space<smem>>, %arg2: memref<512xi32, #tpu.memory_space<smem>>) -> (i32, i32) {
    %c0_i32 = arith.constant 0 : i32
    %c0_i32_0 = arith.constant 0 : i32
    %c0_i32_1 = arith.constant 0 : i32
    return %c0_i32, %c0_i32_0 : i32, i32
  }
  func.func @transform_2(%arg0: i32, %arg1: memref<512xi32, #tpu.memory_space<smem>>, %arg2: memref<512xi32, #tpu.memory_space<smem>>) -> (i32, i32) {
    %c0_i32 = arith.constant 0 : i32
    %c0_i32_0 = arith.constant 0 : i32
    %c0_i32_1 = arith.constant 0 : i32
    return %c0_i32, %c0_i32_0 : i32, i32
  }
  func.func @transform_3(%arg0: i32, %arg1: memref<512xi32, #tpu.memory_space<smem>>, %arg2: memref<512xi32, #tpu.memory_space<smem>>) -> (i32, i32) {
    %c0_i32 = arith.constant 0 : i32
    %c0_i32_0 = arith.constant 0 : i32
    %c0_i32_1 = arith.constant 0 : i32
    return %c0_i32, %c0_i32_0 : i32, i32
  }
  func.func @transform_4(%arg0: i32, %arg1: memref<512xi32, #tpu.memory_space<smem>>, %arg2: memref<512xi32, #tpu.memory_space<smem>>) -> (i32, i32) {
    %c0_i32 = arith.constant 0 : i32
    %c0_i32_0 = arith.constant 0 : i32
    %c0_i32_1 = arith.constant 0 : i32
    return %c0_i32, %c0_i32_0 : i32, i32
  }
  func.func @transform_5(%arg0: i32, %arg1: memref<512xi32, #tpu.memory_space<smem>>, %arg2: memref<512xi32, #tpu.memory_space<smem>>) -> (i32, i32) {
    %c0_i32 = arith.constant 0 : i32
    %c0_i32_0 = arith.constant 0 : i32
    %c0_i32_1 = arith.constant 0 : i32
    return %c0_i32, %c0_i32_0 : i32, i32
  }
  func.func @transform_6(%arg0: i32, %arg1: memref<512xi32, #tpu.memory_space<smem>>, %arg2: memref<512xi32, #tpu.memory_space<smem>>) -> (i32, i32) {
    %c0_i32 = arith.constant 0 : i32
    %c0_i32_0 = arith.constant 0 : i32
    %c0_i32_1 = arith.constant 0 : i32
    return %c0_i32, %c0_i32_0 : i32, i32
  }
  func.func @transform_7(%arg0: i32, %arg1: memref<512xi32, #tpu.memory_space<smem>>, %arg2: memref<512xi32, #tpu.memory_space<smem>>) -> (i32, i32) {
    %c0_i32 = arith.constant 0 : i32
    %c0_i32_0 = arith.constant 0 : i32
    %c0_i32_1 = arith.constant 0 : i32
    return %c0_i32, %c0_i32_0 : i32, i32
  }
  func.func @transform_8(%arg0: i32, %arg1: memref<512xi32, #tpu.memory_space<smem>>, %arg2: memref<512xi32, #tpu.memory_space<smem>>) -> (i32, i32) {
    %c0_i32 = arith.constant 0 : i32
    %c0_i32_0 = arith.constant 0 : i32
    %c0_i32_1 = arith.constant 0 : i32
    return %c0_i32, %c0_i32_0 : i32, i32
  }
  func.func @transform_9(%arg0: i32, %arg1: memref<512xi32, #tpu.memory_space<smem>>, %arg2: memref<512xi32, #tpu.memory_space<smem>>) -> (i32, i32) {
    %c0_i32 = arith.constant 0 : i32
    %c0_i32_0 = arith.constant 0 : i32
    %c0_i32_1 = arith.constant 0 : i32
    return %c0_i32, %c0_i32_0 : i32, i32
  }
  func.func @transform_10(%arg0: i32, %arg1: memref<512xi32, #tpu.memory_space<smem>>, %arg2: memref<512xi32, #tpu.memory_space<smem>>) -> (i32, i32) {
    %c0_i32 = arith.constant 0 : i32
    %c0_i32_0 = arith.constant 0 : i32
    %c0_i32_1 = arith.constant 0 : i32
    return %c0_i32, %c0_i32_0 : i32, i32
  }
  func.func @transform_11(%arg0: i32, %arg1: memref<512xi32, #tpu.memory_space<smem>>, %arg2: memref<512xi32, #tpu.memory_space<smem>>) -> (i32, i32) {
    %c0_i32 = arith.constant 0 : i32
    %c0_i32_0 = arith.constant 0 : i32
    %c0_i32_1 = arith.constant 0 : i32
    return %c0_i32, %c0_i32_0 : i32, i32
  }
  func.func @transform_12(%arg0: i32, %arg1: memref<512xi32, #tpu.memory_space<smem>>, %arg2: memref<512xi32, #tpu.memory_space<smem>>) -> (i32, i32) {
    %c0_i32 = arith.constant 0 : i32
    %c0_i32_0 = arith.constant 0 : i32
    return %arg0, %c0_i32 : i32, i32
  }
  func.func @transform_13(%arg0: i32, %arg1: memref<512xi32, #tpu.memory_space<smem>>, %arg2: memref<512xi32, #tpu.memory_space<smem>>) -> (i32, i32) {
    %c0_i32 = arith.constant 0 : i32
    %c0_i32_0 = arith.constant 0 : i32
    %c0_i32_1 = arith.constant 0 : i32
    return %c0_i32, %c0_i32_0 : i32, i32
  }
}

module attributes {stable_mosaic.version = 11 : i64} {
  func.func @_mlp4_kernel(%arg0: i32, %arg1: memref<128x128xf32, #tpu.memory_space<vmem>>, %arg2: memref<128x128xbf16, #tpu.memory_space<vmem>>, %arg3: memref<1x128xf32, #tpu.memory_space<vmem>>, %arg4: memref<128x128xbf16, #tpu.memory_space<vmem>>, %arg5: memref<1x128xf32, #tpu.memory_space<vmem>>, %arg6: memref<128x128xbf16, #tpu.memory_space<vmem>>, %arg7: memref<1x128xf32, #tpu.memory_space<vmem>>, %arg8: memref<128x2xbf16, #tpu.memory_space<vmem>>, %arg9: memref<1x2xf32, #tpu.memory_space<vmem>>, %arg10: memref<128x2xf32, #tpu.memory_space<vmem>>) attributes {dimension_semantics = [#tpu.dimension_semantics<parallel>], iteration_bounds = array<i64: 2>, scalar_prefetch = 0 : i64, scratch_operands = 0 : i64, tpu.core_type = #tpu.core_type<tc>, window_params = [{transform_indices = @transform_0, window_bounds = array<i64: 128, 128>}, {pipeline_mode = #tpu.pipeline_mode<synchronous>, transform_indices = @transform_1, window_bounds = array<i64: 128, 128>}, {pipeline_mode = #tpu.pipeline_mode<synchronous>, transform_indices = @transform_2, window_bounds = array<i64: 1, 128>}, {pipeline_mode = #tpu.pipeline_mode<synchronous>, transform_indices = @transform_3, window_bounds = array<i64: 128, 128>}, {pipeline_mode = #tpu.pipeline_mode<synchronous>, transform_indices = @transform_4, window_bounds = array<i64: 1, 128>}, {pipeline_mode = #tpu.pipeline_mode<synchronous>, transform_indices = @transform_5, window_bounds = array<i64: 128, 128>}, {pipeline_mode = #tpu.pipeline_mode<synchronous>, transform_indices = @transform_6, window_bounds = array<i64: 1, 128>}, {pipeline_mode = #tpu.pipeline_mode<synchronous>, transform_indices = @transform_7, window_bounds = array<i64: 128, 2>}, {pipeline_mode = #tpu.pipeline_mode<synchronous>, transform_indices = @transform_8, window_bounds = array<i64: 1, 2>}, {transform_indices = @transform_9, window_bounds = array<i64: 128, 2>}]} {
    %c0 = arith.constant 0 : index
    %c0_0 = arith.constant 0 : index
    %0 = vector.load %arg1[%c0, %c0_0] : memref<128x128xf32, #tpu.memory_space<vmem>>, vector<128x128xf32>
    %1 = arith.truncf %0 : vector<128x128xf32> to vector<128x128xbf16>
    %c0_1 = arith.constant 0 : index
    %c0_2 = arith.constant 0 : index
    %2 = vector.load %arg2[%c0_1, %c0_2] : memref<128x128xbf16, #tpu.memory_space<vmem>>, vector<128x128xbf16>
    %cst = arith.constant dense<0.000000e+00> : vector<128x128xf32>
    %3 = tpu.matmul %1, %2, %cst {dimension_numbers = #tpu.dot_dimension_numbers<[1], [0], [0], [1], [0, 0, 1, 1], [], []>} : vector<128x128xbf16>, vector<128x128xbf16>, vector<128x128xf32> -> vector<128x128xf32>
    %c0_3 = arith.constant 0 : index
    %c0_4 = arith.constant 0 : index
    %4 = vector.load %arg3[%c0_3, %c0_4] : memref<1x128xf32, #tpu.memory_space<vmem>>, vector<1x128xf32>
    %5 = vector.broadcast %4 : vector<1x128xf32> to vector<128x128xf32>
    %6 = arith.addf %3, %5 : vector<128x128xf32>
    %cst_5 = arith.constant 0.000000e+00 : f32
    %7 = vector.broadcast %cst_5 : f32 to vector<128x128xf32>
    %8 = arith.maximumf %6, %7 : vector<128x128xf32>
    %9 = arith.truncf %8 : vector<128x128xf32> to vector<128x128xbf16>
    %c0_6 = arith.constant 0 : index
    %c0_7 = arith.constant 0 : index
    %10 = vector.load %arg4[%c0_6, %c0_7] : memref<128x128xbf16, #tpu.memory_space<vmem>>, vector<128x128xbf16>
    %cst_8 = arith.constant dense<0.000000e+00> : vector<128x128xf32>
    %11 = tpu.matmul %9, %10, %cst_8 {dimension_numbers = #tpu.dot_dimension_numbers<[1], [0], [0], [1], [0, 0, 1, 1], [], []>} : vector<128x128xbf16>, vector<128x128xbf16>, vector<128x128xf32> -> vector<128x128xf32>
    %c0_9 = arith.constant 0 : index
    %c0_10 = arith.constant 0 : index
    %12 = vector.load %arg5[%c0_9, %c0_10] : memref<1x128xf32, #tpu.memory_space<vmem>>, vector<1x128xf32>
    %13 = vector.broadcast %12 : vector<1x128xf32> to vector<128x128xf32>
    %14 = arith.addf %11, %13 : vector<128x128xf32>
    %cst_11 = arith.constant 0.000000e+00 : f32
    %15 = vector.broadcast %cst_11 : f32 to vector<128x128xf32>
    %16 = arith.maximumf %14, %15 : vector<128x128xf32>
    %17 = arith.truncf %16 : vector<128x128xf32> to vector<128x128xbf16>
    %c0_12 = arith.constant 0 : index
    %c0_13 = arith.constant 0 : index
    %18 = vector.load %arg6[%c0_12, %c0_13] : memref<128x128xbf16, #tpu.memory_space<vmem>>, vector<128x128xbf16>
    %cst_14 = arith.constant dense<0.000000e+00> : vector<128x128xf32>
    %19 = tpu.matmul %17, %18, %cst_14 {dimension_numbers = #tpu.dot_dimension_numbers<[1], [0], [0], [1], [0, 0, 1, 1], [], []>} : vector<128x128xbf16>, vector<128x128xbf16>, vector<128x128xf32> -> vector<128x128xf32>
    %c0_15 = arith.constant 0 : index
    %c0_16 = arith.constant 0 : index
    %20 = vector.load %arg7[%c0_15, %c0_16] : memref<1x128xf32, #tpu.memory_space<vmem>>, vector<1x128xf32>
    %21 = vector.broadcast %20 : vector<1x128xf32> to vector<128x128xf32>
    %22 = arith.addf %19, %21 : vector<128x128xf32>
    %cst_17 = arith.constant 0.000000e+00 : f32
    %23 = vector.broadcast %cst_17 : f32 to vector<128x128xf32>
    %24 = arith.maximumf %22, %23 : vector<128x128xf32>
    %25 = arith.truncf %24 : vector<128x128xf32> to vector<128x128xbf16>
    %c0_18 = arith.constant 0 : index
    %c0_19 = arith.constant 0 : index
    %26 = vector.load %arg8[%c0_18, %c0_19] : memref<128x2xbf16, #tpu.memory_space<vmem>>, vector<128x2xbf16>
    %cst_20 = arith.constant dense<0.000000e+00> : vector<128x2xf32>
    %27 = tpu.matmul %25, %26, %cst_20 {dimension_numbers = #tpu.dot_dimension_numbers<[1], [0], [0], [1], [0, 0, 1, 1], [], []>} : vector<128x128xbf16>, vector<128x2xbf16>, vector<128x2xf32> -> vector<128x2xf32>
    %c0_21 = arith.constant 0 : index
    %c0_22 = arith.constant 0 : index
    %28 = vector.load %arg9[%c0_21, %c0_22] : memref<1x2xf32, #tpu.memory_space<vmem>>, vector<1x2xf32>
    %29 = vector.broadcast %28 : vector<1x2xf32> to vector<128x2xf32>
    %30 = arith.addf %27, %29 : vector<128x2xf32>
    %c0_23 = arith.constant 0 : index
    %c0_24 = arith.constant 0 : index
    %31 = vector.load %arg10[%c0_23, %c0_24] : memref<128x2xf32, #tpu.memory_space<vmem>>, vector<128x2xf32>
    tpu.vector_store %arg10[%c0_23, %c0_24], %30 {strides = array<i32>} : memref<128x2xf32, #tpu.memory_space<vmem>>, vector<128x2xf32>,
    return
  }
  func.func @transform_0(%arg0: i32) -> (i32, i32) {
    %c0_i32 = arith.constant 0 : i32
    %c0_i32_0 = arith.constant 0 : i32
    return %arg0, %c0_i32 : i32, i32
  }
  func.func @transform_1(%arg0: i32) -> (i32, i32) {
    %c0_i32 = arith.constant 0 : i32
    %c0_i32_0 = arith.constant 0 : i32
    %c0_i32_1 = arith.constant 0 : i32
    return %c0_i32, %c0_i32_0 : i32, i32
  }
  func.func @transform_2(%arg0: i32) -> (i32, i32) {
    %c0_i32 = arith.constant 0 : i32
    %c0_i32_0 = arith.constant 0 : i32
    %c0_i32_1 = arith.constant 0 : i32
    return %c0_i32, %c0_i32_0 : i32, i32
  }
  func.func @transform_3(%arg0: i32) -> (i32, i32) {
    %c0_i32 = arith.constant 0 : i32
    %c0_i32_0 = arith.constant 0 : i32
    %c0_i32_1 = arith.constant 0 : i32
    return %c0_i32, %c0_i32_0 : i32, i32
  }
  func.func @transform_4(%arg0: i32) -> (i32, i32) {
    %c0_i32 = arith.constant 0 : i32
    %c0_i32_0 = arith.constant 0 : i32
    %c0_i32_1 = arith.constant 0 : i32
    return %c0_i32, %c0_i32_0 : i32, i32
  }
  func.func @transform_5(%arg0: i32) -> (i32, i32) {
    %c0_i32 = arith.constant 0 : i32
    %c0_i32_0 = arith.constant 0 : i32
    %c0_i32_1 = arith.constant 0 : i32
    return %c0_i32, %c0_i32_0 : i32, i32
  }
  func.func @transform_6(%arg0: i32) -> (i32, i32) {
    %c0_i32 = arith.constant 0 : i32
    %c0_i32_0 = arith.constant 0 : i32
    %c0_i32_1 = arith.constant 0 : i32
    return %c0_i32, %c0_i32_0 : i32, i32
  }
  func.func @transform_7(%arg0: i32) -> (i32, i32) {
    %c0_i32 = arith.constant 0 : i32
    %c0_i32_0 = arith.constant 0 : i32
    %c0_i32_1 = arith.constant 0 : i32
    return %c0_i32, %c0_i32_0 : i32, i32
  }
  func.func @transform_8(%arg0: i32) -> (i32, i32) {
    %c0_i32 = arith.constant 0 : i32
    %c0_i32_0 = arith.constant 0 : i32
    %c0_i32_1 = arith.constant 0 : i32
    return %c0_i32, %c0_i32_0 : i32, i32
  }
  func.func @transform_9(%arg0: i32) -> (i32, i32) {
    %c0_i32 = arith.constant 0 : i32
    %c0_i32_0 = arith.constant 0 : i32
    return %arg0, %c0_i32 : i32, i32
  }
}

</mosaic_0001>

<bundles_post_ra>
// kernel: encoder_processor_decoder.7
= control target key start
LH: loop header
LB: loop body
LE: loop exit
PB: predicated region body
PF: predicated region fallthrough
CT: control target
= control target key end

     0   :  { %s1472_s30 = smov 0   ;;  %s1663_s0 = inlined_call_operand.vmem [shape: f32[256,16], index: 0, kind: input, shape index: {}]   ;;  %s1664_s1 = inlined_call_operand.vmem [shape: bf16[16,128], index: 1, kind: input, shape index: {}]   ;;  %s1665_s2 = inlined_call_operand.vmem [shape: f32[1,128], index: 2, kind: input, shape index: {}]   ;;  %s1666_s3 = inlined_call_operand.vmem [shape: bf16[128,128], index: 3, kind: input, shape index: {}]   ;;  %s1667_s4 = inlined_call_operand.vmem [shape: f32[1,128], index: 4, kind: input, shape index: {}]   ;;  %s1668_s5 = inlined_call_operand.vmem [shape: bf16[128,128], index: 5, kind: input, shape index: {}]   ;;  %s1669_s6 = inlined_call_operand.vmem [shape: f32[1,128], index: 6, kind: input, shape index: {}]   ;;  %s1670_s7 = inlined_call_operand.vmem [shape: bf16[128,128], index: 7, kind: input, shape index: {}]   ;;  %s1671_s8 = inlined_call_operand.vmem [shape: f32[1,128], index: 8, kind: input, shape index: {}]   ;;  %s1672_s9 = inlined_call_operand.vmem [shape: f32[256,128], index: 9, kind: output, shape index: {}]  }
   0x1 LB: > { %s1146_s10 = sadd.s32 4294967295, %s1420_s30   ;;  %p1150_p0 = scmp.ge.s32.totalorder %s1420_s30, 1  ;;  %s1420_s30 = sphi %s1472_s30, %s19_s30  }
   0x2   : > { %p288_p1 = scmp.lt.s32.totalorder %s1420_s30, 3 }
   0x4   : > { %p289_p2 = pnand %p1150_p0, %p288_p1 }
   0x5   : > { %v1389_v0 = vld [vmem:[%s1664_s1] sm:$0xff] (!%p289_p2)   ;;  %s1151_s13 = sshll.u32 (!%p289_p2), %s1146_s10, 4  ;;  %v1391_v2 = vld [vmem:[%s1666_s3 + $0x8] sm:$0xff] (!%p289_p2)   ;;  %v1392_v3 = vld [vmem:[%s1666_s3 + $0x10] sm:$0xff] (!%p289_p2)   ;;  %vm376_vm0 = vcmask (!%p289_p2), 130048  }
   0x6   : > { %292 = sbr.rel (%p289_p2) target bundleno = 928 (0x3a0), region = 56  ;;  %p325_p3 = scmp.lt.s32.totalorder (!%p289_p2), %s1151_s13, 31  ;;  %1251 = vmatprep.subr.bf16.mxu0 (!%p289_p2), %v1389_v0  ;;  %v1390_v1 = vld [vmem:[%s1666_s3] sm:$0xff] (!%p289_p2)   ;;  %v1393_v13 = vld [vmem:[%s1666_s3 + $0x18] sm:$0xff] (!%p289_p2)   ;;  %v1395_v21 = vld [vmem:[%s1666_s3 + $0x28] sm:$0xff] (!%p289_p2)  }
   0x7   : > { %1252 = vmatpush3.bf16.msra.mxu0 (!%p289_p2), %v1389_v0  ;;  %1269 = vmatprep.subr.bf16.mxu1 (!%p289_p2), %v1390_v1  ;;  %v1394_v18 = vld [vmem:[%s1666_s3 + $0x20] sm:$0xff] (!%p289_p2)   ;;  %v1396_v31 = vld [vmem:[%s1666_s3 + $0x30] sm:$0xff] (!%p289_p2)   ;;  %v1397_v32 = vld [vmem:[%s1666_s3 + $0x38] sm:$0xff] (!%p289_p2)  }
   0x8   : > { %1270 = vmatpush3.bf16.msra.mxu1 (!%p289_p2), %v1390_v1  ;;  %v1398_v33 = vld [vmem:[%s1668_s5] sm:$0xff] (!%p289_p2)   ;;  %v1399_v34 = vld [vmem:[%s1668_s5 + $0x8] sm:$0xff] (!%p289_p2)   ;;  %v1400_v35 = vld [vmem:[%s1668_s5 + $0x10] sm:$0xff] (!%p289_p2)  }
   0x9   : > { %1271 = vmatprep.subr.bf16.mxu1 (!%p289_p2), %v1391_v2  ;;  %1301 = vmatprep.subr.bf16.mxu0 (!%p289_p2), %v1398_v33  ;;  %v1401_v36 = vld [vmem:[%s1668_s5 + $0x18] sm:$0xff] (!%p289_p2)   ;;  %v1402_v37 = vld [vmem:[%s1668_s5 + $0x20] sm:$0xff] (!%p289_p2)   ;;  %v1403_v38 = vld [vmem:[%s1668_s5 + $0x28] sm:$0xff] (!%p289_p2)  }
   0xa   : > { %v1155_v39 = vld [vmem:[%s1665_s2] ss:$0 sm:$0xff] (!%p289_p2) }
   0xc   : > { %1272 = vmatpush3.bf16.msra.mxu1 (!%p289_p2), %v1391_v2 }
   0xd   : > { %s1674_s13 = smov (!%p325_p3, %s1151_s13), 31  ;;  %1273 = vmatprep.subr.bf16.mxu1 %v1392_v3 }
   0xe   : > { %s1152_s18 = sshll.u32 %s1674_s13, 3 }
   0xf   : > { %s1497_s21 = scalar_lea.vmem %s1663_s0, %s1152_s18  ;;  %s1642_s22 = scalar_lea.vmem %s1672_s9, %s1152_s18 }
  0x10   : > { %v337_v4 = vld [vmem:[%s1497_s21] sm:$0xff]  ;;  %v338_v5 = vld [vmem:[%s1497_s21 + $0x8] sm:$0xff]  ;;  %v339_v6 = vld [vmem:[%s1497_s21 + $0x10] sm:$0xff]  ;;  %1274 = vmatpush3.bf16.msra.mxu1 %v1392_v3 }
  0x11   : > { %v353_v7 = vpack.c.bf16 %v338_v5, %v337_v4  ;;  %v340_v8 = vld [vmem:[%s1497_s21 + $0x18] sm:$0xff]  ;;  %v341_v9 = vld [vmem:[%s1497_s21 + $0x20] sm:$0xff]  ;;  %v342_v10 = vld [vmem:[%s1497_s21 + $0x28] sm:$0xff]  ;;  %1275 = vmatprep.subr.bf16.mxu1 %v1393_v13 }
  0x12   : > { %v354_v11 = vpack.c.bf16 %v340_v8, %v339_v6  ;;  %v355_v12 = vpack.c.bf16 %v342_v10, %v341_v9  ;;  %v343_v14 = vld [vmem:[%s1497_s21 + $0x30] sm:$0xff]  ;;  %v344_v15 = vld [vmem:[%s1497_s21 + $0x38] sm:$0xff]  ;;  %v345_v16 = vld [vmem:[%s1497_s21 + $0x40] sm:$0xff] }
  0x13   : > { %1253 = vmatprep.mubr.msk.bf16.mxu0 %vm376_vm0, %v353_v7  ;;  %v346_v17 = vld [vmem:[%s1497_s21 + $0x48] sm:$0xff]  ;;  %v356_v19 = vpack.c.bf16 %v344_v15, %v343_v14  ;;  %v347_v22 = vld [vmem:[%s1497_s21 + $0x50] sm:$0xff]  ;;  %v348_v23 = vld [vmem:[%s1497_s21 + $0x58] sm:$0xff] }
  0x14   : > { %1254 = vmatmul.mubr.msk.bf16.vlgmr.msra.gmra.mrb[0].mxu0 %vm376_vm0, %v354_v11  ;;  %v357_v20 = vpack.c.bf16 %v346_v17, %v345_v16  ;;  %1276 = vmatpush3.bf16.msra.mxu1 %v1393_v13  ;;  %v349_v24 = vld [vmem:[%s1497_s21 + $0x60] sm:$0xff]  ;;  %v350_v25 = vld [vmem:[%s1497_s21 + $0x68] sm:$0xff]  ;;  %v358_v26 = vpack.c.bf16 %v348_v23, %v347_v22  ;;  %v351_v28 = vld [vmem:[%s1497_s21 + $0x70] sm:$0xff] }
  0x15   : > { %1257 = vmatprep.mubr.msk.bf16.mxu0 %vm376_vm0, %v355_v12  ;;  %1277 = vmatprep.subr.bf16.mxu1 %v1394_v18  ;;  %v359_v27 = vpack.c.bf16 %v350_v25, %v349_v24  ;;  %v352_v29 = vld [vmem:[%s1497_s21 + $0x78] sm:$0xff] }
  0x16   : > { %v360_v30 = vpack.c.bf16 %v352_v29, %v351_v28  ;;  %1302 = vmatpush3.bf16.msra.mxu0 %v1398_v33  ;;  %v1405_v33 = vld [vmem:[%s1668_s5 + $0x38] sm:$0xff]  }
  0x17   : > { %1303 = vmatprep.subr.bf16.mxu0 %v1399_v34 }
  0x18   : > { %1278 = vmatpush3.bf16.msra.mxu1 %v1394_v18 }
  0x19   : > { %1279 = vmatprep.subr.bf16.mxu1 %v1395_v21 }
  0x1a   : > { %1304 = vmatpush3.bf16.msra.mxu0 %v1399_v34  ;;  %v1406_v34 = vld [vmem:[%s1670_s7] sm:$0xff]  }
  0x1b   : > { %1305 = vmatprep.subr.bf16.mxu0 %v1400_v35 }
  0x1c   : > { %1258 = vmatmul.mubr.msk.bf16.gmra.mrb[4].mxu0 %vm376_vm0, %v356_v19  ;;  %1280 = vmatpush3.bf16.msra.mxu1 %v1395_v21 }
  0x1d   : > { %1261 = vmatprep.mubr.msk.bf16.mxu0 %vm376_vm0, %v357_v20  ;;  %1281 = vmatprep.subr.bf16.mxu1 %v1396_v31 }
  0x1e   : > { %1306 = vmatpush3.bf16.msra.mxu0 %v1400_v35  ;;  %v1407_v35 = vld [vmem:[%s1670_s7 + $0x8] sm:$0xff]  }
  0x1f   : > { %1307 = vmatprep.subr.bf16.mxu0 %v1401_v36 }
  0x20   : > { %1282 = vmatpush3.bf16.msra.mxu1 %v1396_v31 }
  0x21   : > { %1283 = vmatprep.subr.bf16.mxu1 %v1397_v32 }
  0x22   : > { %1308 = vmatpush3.bf16.msra.mxu0 %v1401_v36  ;;  %v1408_v36 = vld [vmem:[%s1670_s7 + $0x10] sm:$0xff]  }
  0x23   : > { %1309 = vmatprep.subr.bf16.mxu0 %v1402_v37 }
  0x24   : > { %1262 = vmatmul.mubr.msk.bf16.gmra.mrb[8].mxu0 %vm376_vm0, %v358_v26  ;;  %1284 = vmatpush3.bf16.msra.mxu1 %v1397_v32  ;;  %v1404_v32 = vld [vmem:[%s1668_s5 + $0x30] sm:$0xff]  }
  0x25   : > { %1265 = vmatprep.mubr.msk.bf16.mxu0 %vm376_vm0, %v359_v27  ;;  %1365 = vmatprep.subr.bf16.mxu1 %v1406_v34 }
  0x26   : > { %1310 = vmatpush3.bf16.msra.mxu0 %v1402_v37  ;;  %v1580_v37 = vld [vmem:[%s1670_s7 + $0x18] sm:$0xff]  }
  0x27   : > { %1311 = vmatprep.subr.bf16.mxu0 %v1403_v38 }
  0x2a   : > { %1312 = vmatpush3.bf16.msra.mxu0 %v1403_v38  ;;  %v1586_v38 = vld [vmem:[%s1670_s7 + $0x20] sm:$0xff]  }
  0x2b   : > { %1313 = vmatprep.subr.bf16.mxu0 %v1404_v32 }
  0x2c   : > { %1266 = vmatmul.mubr.msk.bf16.gmra.mrb[12].mxu0 %vm376_vm0, %v360_v30 }
  0x2e   : > { %1314 = vmatpush3.bf16.msra.mxu0 %v1404_v32 }
  0x2f   : > { %1315 = vmatprep.subr.bf16.mxu0 %v1405_v33 }
  0x32   : > { %1316 = vmatpush3.bf16.msra.mxu0 %v1405_v33  ;;  %v1412_v33 = vld [vmem:[%s1670_s7 + $0x30] sm:$0xff]  }
  0x33   : > { %1333 = vmatprep.subr.bf16.mxu0 %v1406_v34 }
  0xe7   : > { %v1255_v40 = vpop.f32.mrb[0].mxu0 }
  0xe8   : > { %v444_v41 = vadd.f32 %v1255_v40, %v1155_v39  ;;  %v435_v42 = vpop.f32.mrb[1].mxu0  ;;  %v1601_v40 = vld [vmem:[%s1667_s4] ss:$0 sm:$0xff] }
  0xe9   : > { %v436_v43 = vadd.f32 %v1155_v39, %v435_v42  ;;  %v1256_v44 = vpop.f32.mrb[2].mxu0 }
  0xea   : > { %v447_v45 = vadd.f32 %v1256_v44, %v1155_v39  ;;  %v438_v46 = vpop.f32.mrb[3].mxu0  ;;  %v500_v48 = vmax.f32 %v444_v41, 0.0 }
  0xeb   : > { %v439_v47 = vadd.f32 %v1155_v39, %v438_v46  ;;  %v498_v50 = vmax.f32 %v436_v43, 0.0 }
  0xec   : > { %v501_v49 = vmax.f32 %v447_v45, 0.0 }
  0xed   : > { %v499_v51 = vmax.f32 %v439_v47, 0.0 }
  0xee   : > { %v515_v52 = vpack.c.bf16 %v501_v49, %v500_v48 }
  0xef   : > { %v1259_v53 = vpop.f32.mrb[4].mxu0  ;;  %v514_v54 = vpack.c.bf16 %v499_v51, %v498_v50 }
  0xf0   : > { %v460_v55 = vadd.f32 %v1259_v53, %v1155_v39  ;;  %v451_v56 = vpop.f32.mrb[5].mxu0 }
  0xf1   : > { %v452_v57 = vadd.f32 %v1155_v39, %v451_v56  ;;  %v1260_v58 = vpop.f32.mrb[6].mxu0  ;;  %1285 = vmatprep.mubr.bf16.mxu1 %v514_v54 }
  0xf2   : > { %v463_v59 = vadd.f32 %v1260_v58, %v1155_v39  ;;  %v454_v60 = vpop.f32.mrb[7].mxu0  ;;  %1286 = vmatmul.mubr.bf16.vlgmr.msra.gmra.mrb[0].mxu1 %v515_v52  ;;  %v504_v62 = vmax.f32 %v460_v55, 0.0 }
  0xf3   : > { %v455_v61 = vadd.f32 %v1155_v39, %v454_v60  ;;  %v502_v0 = vmax.f32 %v452_v57, 0.0  ;;  %1373 = vmatpush3.bf16.msra.mxu1 %v1406_v34 }
  0xf4   : > { %v505_v63 = vmax.f32 %v463_v59, 0.0  ;;  %1366 = vmatprep.subr.bf16.mxu1 %v1407_v35 }
  0xf5   : > { %v503_v1 = vmax.f32 %v455_v61, 0.0 }
  0xf6   : > { %v517_v2 = vpack.c.bf16 %v505_v63, %v504_v62 }
  0xf7   : > { %v516_v3 = vpack.c.bf16 %v503_v1, %v502_v0  ;;  %v1263_v4 = vpop.f32.mrb[8].mxu0  ;;  %1374 = vmatpush3.bf16.msra.mxu1 %v1407_v35 }
  0xf8   : > { %v476_v5 = vadd.f32 %v1263_v4, %v1155_v39  ;;  %v467_v6 = vpop.f32.mrb[9].mxu0  ;;  %1367 = vmatprep.subr.bf16.mxu1 %v1408_v36 }
  0xf9   : > { %v468_v7 = vadd.f32 %v1155_v39, %v467_v6  ;;  %v1264_v8 = vpop.f32.mrb[10].mxu0  ;;  %1289 = vmatprep.mubr.bf16.mxu1 %v516_v3 }
  0xfa   : > { %v479_v9 = vadd.f32 %v1264_v8, %v1155_v39  ;;  %v470_v10 = vpop.f32.mrb[11].mxu0  ;;  %1290 = vmatmul.mubr.bf16.gmra.mrb[4].mxu1 %v517_v2  ;;  %v508_v12 = vmax.f32 %v476_v5, 0.0 }
  0xfb   : > { %v471_v11 = vadd.f32 %v1155_v39, %v470_v10  ;;  %v506_v14 = vmax.f32 %v468_v7, 0.0  ;;  %1375 = vmatpush3.bf16.msra.mxu1 %v1408_v36 }
  0xfc   : > { %v509_v13 = vmax.f32 %v479_v9, 0.0  ;;  %1368 = vmatprep.subr.bf16.mxu1 %v1580_v37 }
  0xfd   : > { %v507_v15 = vmax.f32 %v471_v11, 0.0 }
  0xfe   : > { %v519_v16 = vpack.c.bf16 %v509_v13, %v508_v12 }
  0xff   : > { %v518_v17 = vpack.c.bf16 %v507_v15, %v506_v14  ;;  %v1267_v18 = vpop.f32.mrb[12].mxu0  ;;  %1376 = vmatpush3.bf16.msra.mxu1 %v1580_v37 }
 0x100   : > { %v492_v19 = vadd.f32 %v1267_v18, %v1155_v39  ;;  %v483_v20 = vpop.f32.mrb[13].mxu0  ;;  %1369 = vmatprep.subr.bf16.mxu1 %v1586_v38 }
 0x101   : > { %v484_v21 = vadd.f32 %v1155_v39, %v483_v20  ;;  %v1268_v22 = vpop.f32.mrb[14].mxu0  ;;  %1293 = vmatprep.mubr.bf16.mxu1 %v518_v17 }
 0x102   : > { %v495_v23 = vadd.f32 %v1268_v22, %v1155_v39  ;;  %v486_v24 = vpop.f32.mrb[15].mxu0  ;;  %1294 = vmatmul.mubr.bf16.gmra.mrb[8].mxu1 %v519_v16  ;;  %v512_v26 = vmax.f32 %v492_v19, 0.0 }
 0x103   : > { %v487_v25 = vadd.f32 %v1155_v39, %v486_v24  ;;  %v510_v28 = vmax.f32 %v484_v21, 0.0  ;;  %v1593_v39 = vld [vmem:[%s1670_s7 + $0x28] sm:$0xff]   ;;  %1377 = vmatpush3.bf16.msra.mxu1 %v1586_v38 }
 0x104   : > { %v513_v27 = vmax.f32 %v495_v23, 0.0  ;;  %1370 = vmatprep.subr.bf16.mxu1 %v1593_v39 }
 0x105   : > { %v511_v29 = vmax.f32 %v487_v25, 0.0 }
 0x106   : > { %v521_v30 = vpack.c.bf16 %v513_v27, %v512_v26 }
 0x107   : > { %v520_v31 = vpack.c.bf16 %v511_v29, %v510_v28  ;;  %1378 = vmatpush3.bf16.msra.mxu1 %v1593_v39 }
 0x108   : > { %1371 = vmatprep.subr.bf16.mxu1 %v1412_v33 }
 0x109   : > { %1297 = vmatprep.mubr.bf16.mxu1 %v520_v31 }
 0x10a   : > { %1298 = vmatmul.mubr.bf16.gmra.mrb[12].mxu1 %v521_v30 }
 0x10b   : > { %1379 = vmatpush3.bf16.msra.mxu1 %v1412_v33 }
 0x1c5   : > { %v1287_v41 = vpop.f32.mrb[0].mxu1 }
 0x1c6   : > { %v636_v42 = vadd.f32 %v1287_v41, %v1601_v40  ;;  %v627_v43 = vpop.f32.mrb[1].mxu1 }
 0x1c7   : > { %v628_v44 = vadd.f32 %v1601_v40, %v627_v43  ;;  %v1288_v45 = vpop.f32.mrb[2].mxu1 }
 0x1c8   : > { %v639_v46 = vadd.f32 %v1288_v45, %v1601_v40  ;;  %v630_v47 = vpop.f32.mrb[3].mxu1  ;;  %v692_v49 = vmax.f32 %v636_v42, 0.0 }
 0x1c9   : > { %v631_v48 = vadd.f32 %v1601_v40, %v630_v47  ;;  %v690_v51 = vmax.f32 %v628_v44, 0.0 }
 0x1ca   : > { %v693_v50 = vmax.f32 %v639_v46, 0.0 }
 0x1cb   : > { %v691_v52 = vmax.f32 %v631_v48, 0.0 }
 0x1cc   : > { %v707_v53 = vpack.c.bf16 %v693_v50, %v692_v49 }
 0x1cd   : > { %v706_v54 = vpack.c.bf16 %v691_v52, %v690_v51  ;;  %v1291_v55 = vpop.f32.mrb[4].mxu1 }
 0x1ce   : > { %v652_v56 = vadd.f32 %v1291_v55, %v1601_v40  ;;  %v643_v57 = vpop.f32.mrb[5].mxu1 }
 0x1cf   : > { %v644_v58 = vadd.f32 %v1601_v40, %v643_v57  ;;  %v1292_v59 = vpop.f32.mrb[6].mxu1  ;;  %1317 = vmatprep.mubr.bf16.mxu0 %v706_v54 }
 0x1d0   : > { %v655_v60 = vadd.f32 %v1292_v59, %v1601_v40  ;;  %v646_v61 = vpop.f32.mrb[7].mxu1  ;;  %1318 = vmatmul.mubr.bf16.vlgmr.msra.gmra.mrb[16].mxu0 %v707_v53  ;;  %v696_v63 = vmax.f32 %v652_v56, 0.0 }
 0x1d1   : > { %v647_v62 = vadd.f32 %v1601_v40, %v646_v61  ;;  %1334 = vmatpush3.bf16.msra.mxu0 %v1406_v34  ;;  %v694_v1 = vmax.f32 %v644_v58, 0.0  ;;  %v1413_v34 = vld [vmem:[%s1670_s7 + $0x38] sm:$0xff]  }
 0x1d2   : > { %v697_v0 = vmax.f32 %v655_v60, 0.0  ;;  %1335 = vmatprep.subr.bf16.mxu0 %v1407_v35  ;;  %1372 = vmatprep.subr.bf16.mxu1 %v1413_v34 }
 0x1d3   : > { %v695_v2 = vmax.f32 %v647_v62, 0.0  ;;  %1380 = vmatpush3.bf16.msra.mxu1 %v1413_v34 }
 0x1d4   : > { %v709_v3 = vpack.c.bf16 %v697_v0, %v696_v63 }
 0x1d5   : > { %v708_v4 = vpack.c.bf16 %v695_v2, %v694_v1  ;;  %v1295_v5 = vpop.f32.mrb[8].mxu1  ;;  %1336 = vmatpush3.bf16.msra.mxu0 %v1407_v35  ;;  %v1174_v35 = vld [vmem:[%s1669_s6] ss:$0 sm:$0xff] }
 0x1d6   : > { %v668_v6 = vadd.f32 %v1295_v5, %v1601_v40  ;;  %v659_v7 = vpop.f32.mrb[9].mxu1  ;;  %1337 = vmatprep.subr.bf16.mxu0 %v1408_v36 }
 0x1d7   : > { %v660_v8 = vadd.f32 %v1601_v40, %v659_v7  ;;  %v1296_v9 = vpop.f32.mrb[10].mxu1  ;;  %1321 = vmatprep.mubr.bf16.mxu0 %v708_v4 }
 0x1d8   : > { %v671_v10 = vadd.f32 %v1296_v9, %v1601_v40  ;;  %v662_v11 = vpop.f32.mrb[11].mxu1  ;;  %1322 = vmatmul.mubr.bf16.gmra.mrb[20].mxu0 %v709_v3  ;;  %v700_v13 = vmax.f32 %v668_v6, 0.0 }
 0x1d9   : > { %v663_v12 = vadd.f32 %v1601_v40, %v662_v11  ;;  %1338 = vmatpush3.bf16.msra.mxu0 %v1408_v36  ;;  %v698_v15 = vmax.f32 %v660_v8, 0.0 }
 0x1da   : > { %v701_v14 = vmax.f32 %v671_v10, 0.0  ;;  %1339 = vmatprep.subr.bf16.mxu0 %v1580_v37 }
 0x1db   : > { %v699_v16 = vmax.f32 %v663_v12, 0.0 }
 0x1dc   : > { %v711_v17 = vpack.c.bf16 %v701_v14, %v700_v13 }
 0x1dd   : > { %v710_v18 = vpack.c.bf16 %v699_v16, %v698_v15  ;;  %v1299_v19 = vpop.f32.mrb[12].mxu1  ;;  %1340 = vmatpush3.bf16.msra.mxu0 %v1580_v37 }
 0x1de   : > { %v684_v20 = vadd.f32 %v1299_v19, %v1601_v40  ;;  %v675_v21 = vpop.f32.mrb[13].mxu1  ;;  %1341 = vmatprep.subr.bf16.mxu0 %v1586_v38 }
 0x1df   : > { %v676_v22 = vadd.f32 %v1601_v40, %v675_v21  ;;  %v1300_v23 = vpop.f32.mrb[14].mxu1  ;;  %1325 = vmatprep.mubr.bf16.mxu0 %v710_v18 }
 0x1e0   : > { %v687_v24 = vadd.f32 %v1300_v23, %v1601_v40  ;;  %v678_v25 = vpop.f32.mrb[15].mxu1  ;;  %1326 = vmatmul.mubr.bf16.gmra.mrb[24].mxu0 %v711_v17  ;;  %v704_v27 = vmax.f32 %v684_v20, 0.0 }
 0x1e1   : > { %v679_v26 = vadd.f32 %v1601_v40, %v678_v25  ;;  %1342 = vmatpush3.bf16.msra.mxu0 %v1586_v38  ;;  %v702_v29 = vmax.f32 %v676_v22, 0.0 }
 0x1e2   : > { %v705_v28 = vmax.f32 %v687_v24, 0.0  ;;  %1343 = vmatprep.subr.bf16.mxu0 %v1593_v39 }
 0x1e3   : > { %v703_v30 = vmax.f32 %v679_v26, 0.0 }
 0x1e4   : > { %v713_v31 = vpack.c.bf16 %v705_v28, %v704_v27  ;;  %v1183_v28 = vld [vmem:[%s1671_s8] ss:$0 sm:$0xff] }
 0x1e5   : > { %v712_v32 = vpack.c.bf16 %v703_v30, %v702_v29  ;;  %1344 = vmatpush3.bf16.msra.mxu0 %v1593_v39 }
 0x1e6   : > { %1345 = vmatprep.subr.bf16.mxu0 %v1412_v33 }
 0x1e7   : > { %1329 = vmatprep.mubr.bf16.mxu0 %v712_v32 }
 0x1e8   : > { %1330 = vmatmul.mubr.bf16.gmra.mrb[28].mxu0 %v713_v31 }
 0x1e9   : > { %1346 = vmatpush3.bf16.msra.mxu0 %v1412_v33 }
 0x1ea   : > { %1347 = vmatprep.subr.bf16.mxu0 %v1413_v34 }
 0x1ed   : > { %1348 = vmatpush3.bf16.msra.mxu0 %v1413_v34 }
 0x2a3   : > { %v1319_v36 = vpop.f32.mrb[16].mxu0 }
 0x2a4   : > { %v828_v37 = vadd.f32 %v1319_v36, %v1174_v35  ;;  %v819_v38 = vpop.f32.mrb[17].mxu0 }
 0x2a5   : > { %v820_v39 = vadd.f32 %v1174_v35, %v819_v38  ;;  %v1320_v40 = vpop.f32.mrb[18].mxu0 }
 0x2a6   : > { %v831_v41 = vadd.f32 %v1320_v40, %v1174_v35  ;;  %v822_v42 = vpop.f32.mrb[19].mxu0  ;;  %v884_v44 = vmax.f32 %v828_v37, 0.0 }
 0x2a7   : > { %v823_v43 = vadd.f32 %v1174_v35, %v822_v42  ;;  %v882_v46 = vmax.f32 %v820_v39, 0.0 }
 0x2a8   : > { %v885_v45 = vmax.f32 %v831_v41, 0.0 }
 0x2a9   : > { %v883_v47 = vmax.f32 %v823_v43, 0.0 }
 0x2aa   : > { %v899_v48 = vpack.c.bf16 %v885_v45, %v884_v44 }
 0x2ab   : > { %v898_v49 = vpack.c.bf16 %v883_v47, %v882_v46  ;;  %v1323_v50 = vpop.f32.mrb[20].mxu0 }
 0x2ac   : > { %v844_v51 = vadd.f32 %v1323_v50, %v1174_v35  ;;  %v835_v52 = vpop.f32.mrb[21].mxu0 }
 0x2ad   : > { %v836_v53 = vadd.f32 %v1174_v35, %v835_v52  ;;  %v1324_v54 = vpop.f32.mrb[22].mxu0  ;;  %1349 = vmatprep.mubr.bf16.mxu0 %v898_v49 }
 0x2ae   : > { %v847_v55 = vadd.f32 %v1324_v54, %v1174_v35  ;;  %v838_v56 = vpop.f32.mrb[23].mxu0  ;;  %1350 = vmatmul.mubr.bf16.vlgmr.msra.gmra.mrb[32].mxu0 %v899_v48  ;;  %v888_v58 = vmax.f32 %v844_v51, 0.0 }
 0x2af   : > { %v839_v57 = vadd.f32 %v1174_v35, %v838_v56  ;;  %v886_v60 = vmax.f32 %v836_v53, 0.0 }
 0x2b0   : > { %v889_v59 = vmax.f32 %v847_v55, 0.0 }
 0x2b1   : > { %v887_v61 = vmax.f32 %v839_v57, 0.0 }
 0x2b2   : > { %v901_v62 = vpack.c.bf16 %v889_v59, %v888_v58 }
 0x2b3   : > { %v900_v63 = vpack.c.bf16 %v887_v61, %v886_v60  ;;  %v1327_v0 = vpop.f32.mrb[24].mxu0 }
 0x2b4   : > { %v860_v1 = vadd.f32 %v1327_v0, %v1174_v35  ;;  %v851_v2 = vpop.f32.mrb[25].mxu0 }
 0x2b5   : > { %v852_v3 = vadd.f32 %v1174_v35, %v851_v2  ;;  %v1328_v4 = vpop.f32.mrb[26].mxu0  ;;  %1353 = vmatprep.mubr.bf16.mxu1 %v900_v63 }
 0x2b6   : > { %v863_v5 = vadd.f32 %v1328_v4, %v1174_v35  ;;  %v854_v6 = vpop.f32.mrb[27].mxu0  ;;  %1354 = vmatmul.mubr.bf16.vlgmr.msra.gmra.mrb[16].mxu1 %v901_v62  ;;  %v892_v8 = vmax.f32 %v860_v1, 0.0 }
 0x2b7   : > { %v855_v7 = vadd.f32 %v1174_v35, %v854_v6  ;;  %v890_v10 = vmax.f32 %v852_v3, 0.0 }
 0x2b8   : > { %v893_v9 = vmax.f32 %v863_v5, 0.0 }
 0x2b9   : > { %v891_v11 = vmax.f32 %v855_v7, 0.0 }
 0x2ba   : > { %v903_v12 = vpack.c.bf16 %v893_v9, %v892_v8 }
 0x2bb   : > { %v902_v13 = vpack.c.bf16 %v891_v11, %v890_v10  ;;  %v1331_v14 = vpop.f32.mrb[28].mxu0 }
 0x2bc   : > { %v876_v15 = vadd.f32 %v1331_v14, %v1174_v35  ;;  %v867_v16 = vpop.f32.mrb[29].mxu0 }
 0x2bd   : > { %v868_v17 = vadd.f32 %v1174_v35, %v867_v16  ;;  %v1332_v18 = vpop.f32.mrb[30].mxu0  ;;  %1357 = vmatprep.mubr.bf16.mxu1 %v902_v13 }
 0x2be   : > { %v879_v19 = vadd.f32 %v1332_v18, %v1174_v35  ;;  %v870_v20 = vpop.f32.mrb[31].mxu0  ;;  %1358 = vmatmul.mubr.bf16.gmra.mrb[20].mxu1 %v903_v12  ;;  %v896_v22 = vmax.f32 %v876_v15, 0.0 }
 0x2bf   : > { %v871_v21 = vadd.f32 %v1174_v35, %v870_v20  ;;  %v894_v24 = vmax.f32 %v868_v17, 0.0 }
 0x2c0   : > { %v897_v23 = vmax.f32 %v879_v19, 0.0 }
 0x2c1   : > { %v895_v25 = vmax.f32 %v871_v21, 0.0 }
 0x2c2   : > { %v905_v26 = vpack.c.bf16 %v897_v23, %v896_v22 }
 0x2c3   : > { %v904_v27 = vpack.c.bf16 %v895_v25, %v894_v24 }
 0x2c5   : > { %1361 = vmatprep.mubr.bf16.mxu1 %v904_v27 }
 0x2c6   : > { %1362 = vmatmul.mubr.bf16.gmra.mrb[24].mxu1 %v905_v26 }
 0x381   : > { %v1351_v29 = vpop.f32.mrb[32].mxu0 }
 0x382   : > { %v1020_v30 = vadd.f32 %v1351_v29, %v1183_v28  ;;  %v1011_v31 = vpop.f32.mrb[33].mxu0 }
 0x383   : > { %v1012_v32 = vadd.f32 %v1183_v28, %v1011_v31  ;;  %v1352_v33 = vpop.f32.mrb[34].mxu0 }
 0x384   : > { %1076 = vst [vmem:[%s1642_s22 + $0x10] sm:$0xff] %v1020_v30  ;;  %v1023_v34 = vadd.f32 %v1352_v33, %v1183_v28  ;;  %v1014_v35 = vpop.f32.mrb[35].mxu0 }
 0x385   : > { %1074 = vst [vmem:[%s1642_s22] sm:$0xff] %v1012_v32  ;;  %v1015_v36 = vadd.f32 %v1183_v28, %v1014_v35 }
 0x386   : > { %1077 = vst [vmem:[%s1642_s22 + $0x18] sm:$0xff] %v1023_v34 }
 0x387   : > { %1075 = vst [vmem:[%s1642_s22 + $0x8] sm:$0xff] %v1015_v36 }
 0x389   : > { %v1355_v37 = vpop.f32.mrb[16].mxu1 }
 0x38a   : > { %v1036_v38 = vadd.f32 %v1355_v37, %v1183_v28  ;;  %v1027_v39 = vpop.f32.mrb[17].mxu1 }
 0x38b   : > { %v1028_v40 = vadd.f32 %v1183_v28, %v1027_v39  ;;  %v1356_v41 = vpop.f32.mrb[18].mxu1 }
 0x38c   : > { %1080 = vst [vmem:[%s1642_s22 + $0x30] sm:$0xff] %v1036_v38  ;;  %v1039_v42 = vadd.f32 %v1356_v41, %v1183_v28  ;;  %v1030_v43 = vpop.f32.mrb[19].mxu1 }
 0x38d   : > { %1078 = vst [vmem:[%s1642_s22 + $0x20] sm:$0xff] %v1028_v40  ;;  %v1031_v44 = vadd.f32 %v1183_v28, %v1030_v43 }
 0x38e   : > { %1081 = vst [vmem:[%s1642_s22 + $0x38] sm:$0xff] %v1039_v42 }
 0x38f   : > { %1079 = vst [vmem:[%s1642_s22 + $0x28] sm:$0xff] %v1031_v44 }
 0x391   : > { %v1359_v45 = vpop.f32.mrb[20].mxu1 }
 0x392   : > { %v1052_v46 = vadd.f32 %v1359_v45, %v1183_v28  ;;  %v1043_v47 = vpop.f32.mrb[21].mxu1 }
 0x393   : > { %v1044_v48 = vadd.f32 %v1183_v28, %v1043_v47  ;;  %v1360_v49 = vpop.f32.mrb[22].mxu1 }
 0x394   : > { %1084 = vst [vmem:[%s1642_s22 + $0x50] sm:$0xff] %v1052_v46  ;;  %v1055_v50 = vadd.f32 %v1360_v49, %v1183_v28  ;;  %v1046_v51 = vpop.f32.mrb[23].mxu1 }
 0x395   : > { %1082 = vst [vmem:[%s1642_s22 + $0x40] sm:$0xff] %v1044_v48  ;;  %v1047_v52 = vadd.f32 %v1183_v28, %v1046_v51 }
 0x396   : > { %1085 = vst [vmem:[%s1642_s22 + $0x58] sm:$0xff] %v1055_v50 }
 0x397   : > { %1083 = vst [vmem:[%s1642_s22 + $0x48] sm:$0xff] %v1047_v52 }
 0x399   : > { %v1363_v53 = vpop.f32.mrb[24].mxu1 }
 0x39a   : > { %v1068_v54 = vadd.f32 %v1363_v53, %v1183_v28  ;;  %v1059_v55 = vpop.f32.mrb[25].mxu1 }
 0x39b   : > { %v1060_v56 = vadd.f32 %v1183_v28, %v1059_v55  ;;  %v1364_v57 = vpop.f32.mrb[26].mxu1 }
 0x39c   : > { %1088 = vst [vmem:[%s1642_s22 + $0x70] sm:$0xff] %v1068_v54  ;;  %v1071_v58 = vadd.f32 %v1364_v57, %v1183_v28  ;;  %v1062_v59 = vpop.f32.mrb[27].mxu1 }
 0x39d   : > { %1086 = vst [vmem:[%s1642_s22 + $0x60] sm:$0xff] %v1060_v56  ;;  %v1063_v60 = vadd.f32 %v1183_v28, %v1062_v59 }
 0x39e   : > { %1089 = vst [vmem:[%s1642_s22 + $0x78] sm:$0xff] %v1071_v58 }
 0x39f   : > { %1087 = vst [vmem:[%s1642_s22 + $0x68] sm:$0xff] %v1063_v60 }
 0x3a0 PF: > { %s19_s30 = sadd.s32 1, %s1420_s30  }
 0x3a1   : > { %p16_p4 = scmp.ge.s32.totalorder %s19_s30, 4  }
 0x3a3   :  { %18 = sbr.rel (!%p16_p4) target bundleno = 1 (0x1), region = 86 }

// kernel: encoder_processor_decoder.10
= control target key start
LH: loop header
LB: loop body
LE: loop exit
PB: predicated region body
PF: predicated region fallthrough
CT: control target
= control target key end

     0   :  { %s1927_s17 = smov 0   ;;  %s2256_s0 = inlined_call_operand.vmem [shape: f32[256,128], index: 0, kind: input, shape index: {}]   ;;  %s2257_s1 = inlined_call_operand.vmem [shape: f32[256,128], index: 1, kind: input, shape index: {}]   ;;  %s2258_s2 = inlined_call_operand.vmem [shape: bf16[128,128], index: 2, kind: input, shape index: {}]   ;;  %s2259_s3 = inlined_call_operand.vmem [shape: bf16[128,128], index: 3, kind: input, shape index: {}]   ;;  %s2260_s4 = inlined_call_operand.vmem [shape: f32[1,128], index: 4, kind: input, shape index: {}]   ;;  %s2261_s5 = inlined_call_operand.vmem [shape: bf16[128,128], index: 5, kind: input, shape index: {}]   ;;  %s2262_s6 = inlined_call_operand.vmem [shape: f32[1,128], index: 6, kind: input, shape index: {}]   ;;  %s2263_s7 = inlined_call_operand.vmem [shape: bf16[128,128], index: 7, kind: input, shape index: {}]   ;;  %s2264_s8 = inlined_call_operand.vmem [shape: f32[1,128], index: 8, kind: input, shape index: {}]   ;;  %s2265_s9 = inlined_call_operand.vmem [shape: bf16[128,128], index: 9, kind: input, shape index: {}]   ;;  %s2266_s10 = inlined_call_operand.vmem [shape: f32[1,128], index: 10, kind: input, shape index: {}]   ;;  %s2267_s11 = inlined_call_operand.vmem [shape: f32[256,128], index: 11, kind: output, shape index: {}]  }
   0x1 LB: > { %s1482_s18 = sadd.s32 4294967295, %s1865_s17   ;;  %p1486_p0 = scmp.ge.s32.totalorder %s1865_s17, 1  ;;  %s1865_s17 = sphi %s1927_s17, %s21_s17  }
   0x2   : > { %p349_p1 = scmp.lt.s32.totalorder %s1865_s17, 3 }
   0x4   : > { %p350_p2 = pnand %p1486_p0, %p349_p1 }
   0x5   : > { %v1819_v0 = vld [vmem:[%s2259_s3] sm:$0xff] (!%p350_p2)   ;;  %s1487_s21 = sshll.u32 (!%p350_p2), %s1482_s18, 4  ;;  %v1820_v1 = vld [vmem:[%s2259_s3 + $0x8] sm:$0xff] (!%p350_p2)   ;;  %v1821_v2 = vld [vmem:[%s2259_s3 + $0x10] sm:$0xff] (!%p350_p2)  }
   0x6   : > { %353 = sbr.rel (%p350_p2) target bundleno = 980 (0x3d4), region = 64  ;;  %p395_p3 = scmp.lt.s32.totalorder (!%p350_p2), %s1487_s21, 31  ;;  %1619 = vmatprep.subr.bf16.mxu0 (!%p350_p2), %v1819_v0  ;;  %v1822_v3 = vld [vmem:[%s2259_s3 + $0x18] sm:$0xff] (!%p350_p2)   ;;  %v1823_v7 = vld [vmem:[%s2259_s3 + $0x20] sm:$0xff] (!%p350_p2)   ;;  %v1824_v8 = vld [vmem:[%s2259_s3 + $0x28] sm:$0xff] (!%p350_p2)  }
   0x7   : > { %1620 = vmatpush3.bf16.msra.mxu0 (!%p350_p2), %v1819_v0  ;;  %v1825_v9 = vld [vmem:[%s2259_s3 + $0x30] sm:$0xff] (!%p350_p2)   ;;  %v1826_v10 = vld [vmem:[%s2259_s3 + $0x38] sm:$0xff] (!%p350_p2)   ;;  %v1827_v13 = vld [vmem:[%s2258_s2] sm:$0xff] (!%p350_p2)  }
   0x8   : > { %1621 = vmatprep.subr.bf16.mxu0 (!%p350_p2), %v1820_v1  ;;  %v1835_v16 = vld [vmem:[%s2261_s5] sm:$0xff] (!%p350_p2)   ;;  %v1836_v17 = vld [vmem:[%s2261_s5 + $0x8] sm:$0xff] (!%p350_p2)   ;;  %v1837_v21 = vld [vmem:[%s2261_s5 + $0x10] sm:$0xff] (!%p350_p2)  }
   0x9   : > { %1683 = vmatprep.subr.bf16.mxu1 (!%p350_p2), %v1835_v16  ;;  %v1828_v19 = vld [vmem:[%s2258_s2 + $0x8] sm:$0xff] (!%p350_p2)   ;;  %v1838_v24 = vld [vmem:[%s2261_s5 + $0x18] sm:$0xff] (!%p350_p2)   ;;  %v1829_v25 = vld [vmem:[%s2258_s2 + $0x10] sm:$0xff] (!%p350_p2)  }
   0xa   : > { %1684 = vmatpush3.bf16.msra.mxu1 (!%p350_p2), %v1835_v16  ;;  %v1830_v29 = vld [vmem:[%s2258_s2 + $0x18] sm:$0xff] (!%p350_p2)   ;;  %v1839_v30 = vld [vmem:[%s2261_s5 + $0x20] sm:$0xff] (!%p350_p2)   ;;  %v1840_v34 = vld [vmem:[%s2261_s5 + $0x28] sm:$0xff] (!%p350_p2)  }
   0xb   : > { %1622 = vmatpush3.bf16.msra.mxu0 (!%p350_p2), %v1820_v1  ;;  %1685 = vmatprep.subr.bf16.mxu1 (!%p350_p2), %v1836_v17  ;;  %v1831_v35 = vld [vmem:[%s2258_s2 + $0x20] sm:$0xff] (!%p350_p2)   ;;  %v1832_v40 = vld [vmem:[%s2258_s2 + $0x28] sm:$0xff] (!%p350_p2)   ;;  %v1833_v43 = vld [vmem:[%s2258_s2 + $0x30] sm:$0xff] (!%p350_p2)  }
   0xc   : > { %1623 = vmatprep.subr.bf16.mxu0 (!%p350_p2), %v1821_v2  ;;  %v1834_v48 = vld [vmem:[%s2258_s2 + $0x38] sm:$0xff] (!%p350_p2)  }
   0xd   : > { %s2269_s21 = smov (!%p395_p3, %s1487_s21), 31 }
   0xe   : > { %s1944_s26 = sshll.u32 %s2269_s21, 3  ;;  %1686 = vmatpush3.bf16.msra.mxu1 %v1836_v17 }
   0xf   : > { %s1950_s29 = scalar_lea.vmem %s2257_s1, %s1944_s26  ;;  %1624 = vmatpush3.bf16.msra.mxu0 %v1821_v2  ;;  %1687 = vmatprep.subr.bf16.mxu1 %v1837_v21  ;;  %s2021_s15 = scalar_lea.vmem %s2256_s0, %s1944_s26 }
  0x10   : > { %v453_v4 = vld [vmem:[%s1950_s29] sm:$0xff]  ;;  %v454_v5 = vld [vmem:[%s1950_s29 + $0x8] sm:$0xff]  ;;  %1625 = vmatprep.subr.bf16.mxu0 %v1822_v3  ;;  %v455_v11 = vld [vmem:[%s1950_s29 + $0x10] sm:$0xff] }
  0x11   : > { %v469_v6 = vpack.c.bf16 %v454_v5, %v453_v4  ;;  %v456_v12 = vld [vmem:[%s1950_s29 + $0x18] sm:$0xff]  ;;  %v457_v14 = vld [vmem:[%s1950_s29 + $0x20] sm:$0xff]  ;;  %v458_v15 = vld [vmem:[%s1950_s29 + $0x28] sm:$0xff] }
  0x12   : > { %v470_v18 = vpack.c.bf16 %v456_v12, %v455_v11  ;;  %v471_v20 = vpack.c.bf16 %v458_v15, %v457_v14  ;;  %v459_v22 = vld [vmem:[%s1950_s29 + $0x30] sm:$0xff]  ;;  %v460_v23 = vld [vmem:[%s1950_s29 + $0x38] sm:$0xff]  ;;  %v461_v26 = vld [vmem:[%s1950_s29 + $0x40] sm:$0xff]  ;;  %1688 = vmatpush3.bf16.msra.mxu1 %v1837_v21 }
  0x13   : > { %1635 = vmatprep.mubr.bf16.mxu0 %v469_v6  ;;  %1626 = vmatpush3.bf16.msra.mxu0 %v1822_v3  ;;  %v462_v27 = vld [vmem:[%s1950_s29 + $0x48] sm:$0xff]  ;;  %v472_v28 = vpack.c.bf16 %v460_v23, %v459_v22  ;;  %v463_v32 = vld [vmem:[%s1950_s29 + $0x50] sm:$0xff]  ;;  %v464_v33 = vld [vmem:[%s1950_s29 + $0x58] sm:$0xff] }
  0x14   : > { %1627 = vmatprep.subr.bf16.mxu0 %v1823_v7  ;;  %v473_v31 = vpack.c.bf16 %v462_v27, %v461_v26  ;;  %1689 = vmatprep.subr.bf16.mxu1 %v1838_v24  ;;  %v465_v36 = vld [vmem:[%s1950_s29 + $0x60] sm:$0xff]  ;;  %v466_v37 = vld [vmem:[%s1950_s29 + $0x68] sm:$0xff]  ;;  %v474_v38 = vpack.c.bf16 %v464_v33, %v463_v32  ;;  %v467_v41 = vld [vmem:[%s1950_s29 + $0x70] sm:$0xff] }
  0x15   : > { %v475_v39 = vpack.c.bf16 %v466_v37, %v465_v36  ;;  %v468_v42 = vld [vmem:[%s1950_s29 + $0x78] sm:$0xff]  ;;  %v2029_v44 = vld [vmem:[%s2021_s15] sm:$0xff]  ;;  %v2032_v45 = vld [vmem:[%s2021_s15 + $0x8] sm:$0xff] }
  0x16   : > { %1690 = vmatpush3.bf16.msra.mxu1 %v1838_v24  ;;  %v476_v46 = vpack.c.bf16 %v468_v42, %v467_v41  ;;  %v429_v47 = vpack.c.bf16 %v2032_v45, %v2029_v44  ;;  %v2040_v49 = vld [vmem:[%s2021_s15 + $0x10] sm:$0xff]  ;;  %v2043_v50 = vld [vmem:[%s2021_s15 + $0x18] sm:$0xff]  ;;  %v2046_v51 = vld [vmem:[%s2021_s15 + $0x20] sm:$0xff] }
  0x17   : > { %1628 = vmatpush3.bf16.msra.mxu0 %v1823_v7  ;;  %1691 = vmatprep.subr.bf16.mxu1 %v1839_v30  ;;  %v2049_v52 = vld [vmem:[%s2021_s15 + $0x28] sm:$0xff]  ;;  %v430_v53 = vpack.c.bf16 %v2043_v50, %v2040_v49  ;;  %v2056_v55 = vld [vmem:[%s2021_s15 + $0x30] sm:$0xff]  ;;  %v2059_v56 = vld [vmem:[%s2021_s15 + $0x38] sm:$0xff] }
  0x18   : > { %1629 = vmatprep.subr.bf16.mxu0 %v1824_v8  ;;  %v431_v54 = vpack.c.bf16 %v2049_v52, %v2046_v51  ;;  %v2062_v57 = vld [vmem:[%s2021_s15 + $0x40] sm:$0xff]  ;;  %v2065_v58 = vld [vmem:[%s2021_s15 + $0x48] sm:$0xff]  ;;  %v432_v59 = vpack.c.bf16 %v2059_v56, %v2056_v55  ;;  %v2072_v61 = vld [vmem:[%s2021_s15 + $0x50] sm:$0xff] }
  0x19   : > { %v433_v60 = vpack.c.bf16 %v2065_v58, %v2062_v57  ;;  %v2075_v62 = vld [vmem:[%s2021_s15 + $0x58] sm:$0xff]  ;;  %v2078_v63 = vld [vmem:[%s2021_s15 + $0x60] sm:$0xff]  ;;  %v2081_v0 = vld [vmem:[%s2021_s15 + $0x68] sm:$0xff] }
  0x1a   : > { %1692 = vmatpush3.bf16.msra.mxu1 %v1839_v30  ;;  %v434_v1 = vpack.c.bf16 %v2075_v62, %v2072_v61  ;;  %v435_v2 = vpack.c.bf16 %v2081_v0, %v2078_v63  ;;  %v2088_v3 = vld [vmem:[%s2021_s15 + $0x70] sm:$0xff]  ;;  %v2091_v4 = vld [vmem:[%s2021_s15 + $0x78] sm:$0xff]  ;;  %v1844_v27 = vld [vmem:[%s2263_s7 + $0x8] sm:$0xff]   ;;  %s2219_s15 = scalar_lea.vmem %s2267_s11, %s1944_s26 }
  0x1b   : > { %1630 = vmatpush3.bf16.msra.mxu0 %v1824_v8  ;;  %1693 = vmatprep.subr.bf16.mxu1 %v1840_v34  ;;  %v436_v5 = vpack.c.bf16 %v2091_v4, %v2088_v3  ;;  %v1841_v6 = vld [vmem:[%s2261_s5 + $0x30] sm:$0xff]   ;;  %v1842_v7 = vld [vmem:[%s2261_s5 + $0x38] sm:$0xff]   ;;  %v1843_v8 = vld [vmem:[%s2263_s7] sm:$0xff]  }
  0x1c   : > { %1631 = vmatprep.subr.bf16.mxu0 %v1825_v9 }
  0x1e   : > { %1694 = vmatpush3.bf16.msra.mxu1 %v1840_v34 }
  0x1f   : > { %1632 = vmatpush3.bf16.msra.mxu0 %v1825_v9  ;;  %1695 = vmatprep.subr.bf16.mxu1 %v1841_v6  ;;  %v2107_v9 = vld [vmem:[%s2260_s4] ss:$0 sm:$0xff] }
  0x20   : > { %1633 = vmatprep.subr.bf16.mxu0 %v1826_v10 }
  0x22   : > { %1696 = vmatpush3.bf16.msra.mxu1 %v1841_v6 }
  0x23   : > { %1634 = vmatpush3.bf16.msra.mxu0 %v1826_v10  ;;  %1697 = vmatprep.subr.bf16.mxu1 %v1842_v7 }
  0x24   : > { %1651 = vmatprep.subr.bf16.mxu0 %v1827_v13 }
  0x26   : > { %1636 = vmatmul.mubr.bf16.vlgmr.msra.gmra.mrb[0].mxu0 %v470_v18  ;;  %1698 = vmatpush3.bf16.msra.mxu1 %v1842_v7 }
  0x27   : > { %1652 = vmatpush3.bf16.msra.mxu0 %v1827_v13  ;;  %1639 = vmatprep.mubr.bf16.mxu0 %v471_v20 }
  0x28   : > { %1653 = vmatprep.subr.bf16.mxu0 %v1828_v19  ;;  %1715 = vmatprep.subr.bf16.mxu1 %v1843_v8 }
  0x2b   : > { %1654 = vmatpush3.bf16.msra.mxu0 %v1828_v19 }
  0x2c   : > { %1655 = vmatprep.subr.bf16.mxu0 %v1829_v25 }
  0x2e   : > { %1640 = vmatmul.mubr.bf16.gmra.mrb[4].mxu0 %v472_v28 }
  0x2f   : > { %1656 = vmatpush3.bf16.msra.mxu0 %v1829_v25  ;;  %1643 = vmatprep.mubr.bf16.mxu0 %v473_v31 }
  0x30   : > { %1657 = vmatprep.subr.bf16.mxu0 %v1830_v29 }
  0x33   : > { %1658 = vmatpush3.bf16.msra.mxu0 %v1830_v29 }
  0x34   : > { %1659 = vmatprep.subr.bf16.mxu0 %v1831_v35 }
  0x36   : > { %1644 = vmatmul.mubr.bf16.gmra.mrb[8].mxu0 %v474_v38 }
  0x37   : > { %1660 = vmatpush3.bf16.msra.mxu0 %v1831_v35  ;;  %1647 = vmatprep.mubr.bf16.mxu0 %v475_v39  ;;  %v1845_v35 = vld [vmem:[%s2263_s7 + $0x10] sm:$0xff]  }
  0x38   : > { %1661 = vmatprep.subr.bf16.mxu0 %v1832_v40 }
  0x3b   : > { %1662 = vmatpush3.bf16.msra.mxu0 %v1832_v40 }
  0x3c   : > { %1663 = vmatprep.subr.bf16.mxu0 %v1833_v43 }
  0x3e   : > { %1648 = vmatmul.mubr.bf16.gmra.mrb[12].mxu0 %v476_v46 }
  0x3f   : > { %1664 = vmatpush3.bf16.msra.mxu0 %v1833_v43  ;;  %1667 = vmatprep.mubr.bf16.mxu0 %v429_v47  ;;  %v1846_v43 = vld [vmem:[%s2263_s7 + $0x18] sm:$0xff]  }
  0x40   : > { %1665 = vmatprep.subr.bf16.mxu0 %v1834_v48 }
  0x43   : > { %1666 = vmatpush3.bf16.msra.mxu0 %v1834_v48 }
  0x46   : > { %1668 = vmatmul.mubr.bf16.vlgmr.msra.gmra.mrb[0].mxu0 %v430_v53 }
  0x47   : > { %1671 = vmatprep.mubr.bf16.mxu0 %v431_v54 }
  0x4e   : > { %1672 = vmatmul.mubr.bf16.gmra.mrb[4].mxu0 %v432_v59 }
  0x4f   : > { %1675 = vmatprep.mubr.bf16.mxu0 %v433_v60 }
  0x56   : > { %1676 = vmatmul.mubr.bf16.gmra.mrb[8].mxu0 %v434_v1  ;;  %v1847_v1 = vld [vmem:[%s2263_s7 + $0x20] sm:$0xff]  }
  0x57   : > { %1679 = vmatprep.mubr.bf16.mxu0 %v435_v2 }
  0x5e   : > { %1680 = vmatmul.mubr.bf16.gmra.mrb[12].mxu0 %v436_v5 }
 0x119   : > { %v1669_v10 = vpop.f32.mrb[0].mxu0 }
 0x11a   : > { %v792_v11 = vadd.f32 %v1669_v10, %v2107_v9  ;;  %v720_v12 = vpop.f32.mrb[1].mxu0 }
 0x11b   : > { %v790_v13 = vadd.f32 %v2107_v9, %v720_v12  ;;  %v1670_v14 = vpop.f32.mrb[2].mxu0  ;;  %v1848_v12 = vld [vmem:[%s2263_s7 + $0x28] sm:$0xff]  }
 0x11c   : > { %v793_v15 = vadd.f32 %v1670_v14, %v2107_v9  ;;  %v723_v16 = vpop.f32.mrb[3].mxu0  ;;  %v808_v18 = vmax.f32 %v792_v11, 0.0 }
 0x11d   : > { %v791_v17 = vadd.f32 %v2107_v9, %v723_v16  ;;  %v806_v20 = vmax.f32 %v790_v13, 0.0 }
 0x11e   : > { %v809_v19 = vmax.f32 %v793_v15, 0.0 }
 0x11f   : > { %v807_v21 = vmax.f32 %v791_v17, 0.0 }
 0x120   : > { %v823_v22 = vpack.c.bf16 %v809_v19, %v808_v18 }
 0x121   : > { %v1673_v23 = vpop.f32.mrb[4].mxu0  ;;  %v822_v24 = vpack.c.bf16 %v807_v21, %v806_v20 }
 0x122   : > { %v796_v25 = vadd.f32 %v1673_v23, %v2107_v9  ;;  %v736_v26 = vpop.f32.mrb[5].mxu0 }
 0x123   : > { %v794_v28 = vadd.f32 %v2107_v9, %v736_v26  ;;  %v1674_v29 = vpop.f32.mrb[6].mxu0  ;;  %1699 = vmatprep.mubr.bf16.mxu1 %v822_v24  ;;  %v1849_v24 = vld [vmem:[%s2263_s7 + $0x30] sm:$0xff]   ;;  %v1852_v26 = vld [vmem:[%s2265_s9 + $0x8] sm:$0xff]  }
 0x124   : > { %v797_v30 = vadd.f32 %v1674_v29, %v2107_v9  ;;  %v739_v31 = vpop.f32.mrb[7].mxu0  ;;  %1700 = vmatmul.mubr.bf16.vlgmr.msra.gmra.mrb[0].mxu1 %v823_v22  ;;  %v812_v33 = vmax.f32 %v796_v25, 0.0  ;;  %v1851_v25 = vld [vmem:[%s2265_s9] sm:$0xff]  }
 0x125   : > { %v795_v32 = vadd.f32 %v2107_v9, %v739_v31  ;;  %1716 = vmatpush3.bf16.msra.mxu1 %v1843_v8  ;;  %v810_v36 = vmax.f32 %v794_v28, 0.0  ;;  %1747 = vmatprep.subr.bf16.mxu0 %v1851_v25  ;;  %v2158_v28 = vld [vmem:[%s2265_s9 + $0x18] sm:$0xff]   ;;  %v2164_v29 = vld [vmem:[%s2265_s9 + $0x20] sm:$0xff]  }
 0x126   : > { %v813_v34 = vmax.f32 %v797_v30, 0.0  ;;  %1717 = vmatprep.subr.bf16.mxu1 %v1844_v27  ;;  %1748 = vmatpush3.bf16.msra.mxu0 %v1851_v25  ;;  %v2171_v30 = vld [vmem:[%s2265_s9 + $0x28] sm:$0xff]   ;;  %v2179_v31 = vld [vmem:[%s2262_s6] ss:$0 sm:$0xff] }
 0x127   : > { %v811_v37 = vmax.f32 %v795_v32, 0.0  ;;  %1749 = vmatprep.subr.bf16.mxu0 %v1852_v26 }
 0x128   : > { %v825_v38 = vpack.c.bf16 %v813_v34, %v812_v33 }
 0x129   : > { %v824_v39 = vpack.c.bf16 %v811_v37, %v810_v36  ;;  %v1677_v40 = vpop.f32.mrb[8].mxu0  ;;  %1718 = vmatpush3.bf16.msra.mxu1 %v1844_v27  ;;  %v1853_v27 = vld [vmem:[%s2265_s9 + $0x10] sm:$0xff]  }
 0x12a   : > { %v800_v41 = vadd.f32 %v1677_v40, %v2107_v9  ;;  %v752_v42 = vpop.f32.mrb[9].mxu0  ;;  %1719 = vmatprep.subr.bf16.mxu1 %v1845_v35  ;;  %1750 = vmatpush3.bf16.msra.mxu0 %v1852_v26 }
 0x12b   : > { %v798_v46 = vadd.f32 %v2107_v9, %v752_v42  ;;  %v1678_v47 = vpop.f32.mrb[10].mxu0  ;;  %1703 = vmatprep.mubr.bf16.mxu1 %v824_v39  ;;  %1751 = vmatprep.subr.bf16.mxu0 %v1853_v27 }
 0x12c   : > { %v801_v48 = vadd.f32 %v1678_v47, %v2107_v9  ;;  %v755_v53 = vpop.f32.mrb[11].mxu0  ;;  %1704 = vmatmul.mubr.bf16.gmra.mrb[4].mxu1 %v825_v38  ;;  %v816_v59 = vmax.f32 %v800_v41, 0.0 }
 0x12d   : > { %v799_v54 = vadd.f32 %v2107_v9, %v755_v53  ;;  %1720 = vmatpush3.bf16.msra.mxu1 %v1845_v35  ;;  %v814_v2 = vmax.f32 %v798_v46, 0.0 }
 0x12e   : > { %v817_v60 = vmax.f32 %v801_v48, 0.0  ;;  %1721 = vmatprep.subr.bf16.mxu1 %v1846_v43  ;;  %1752 = vmatpush3.bf16.msra.mxu0 %v1853_v27 }
 0x12f   : > { %v815_v5 = vmax.f32 %v799_v54, 0.0  ;;  %1753 = vmatprep.subr.bf16.mxu0 %v2158_v28 }
 0x130   : > { %v827_v6 = vpack.c.bf16 %v817_v60, %v816_v59 }
 0x131   : > { %v826_v7 = vpack.c.bf16 %v815_v5, %v814_v2  ;;  %v1681_v8 = vpop.f32.mrb[12].mxu0  ;;  %1722 = vmatpush3.bf16.msra.mxu1 %v1846_v43 }
 0x132   : > { %v804_v10 = vadd.f32 %v1681_v8, %v2107_v9  ;;  %v768_v11 = vpop.f32.mrb[13].mxu0  ;;  %1723 = vmatprep.subr.bf16.mxu1 %v1847_v1  ;;  %1754 = vmatpush3.bf16.msra.mxu0 %v2158_v28 }
 0x133   : > { %v802_v13 = vadd.f32 %v2107_v9, %v768_v11  ;;  %v1682_v14 = vpop.f32.mrb[14].mxu0  ;;  %1707 = vmatprep.mubr.bf16.mxu1 %v826_v7  ;;  %1755 = vmatprep.subr.bf16.mxu0 %v2164_v29 }
 0x134   : > { %v805_v15 = vadd.f32 %v1682_v14, %v2107_v9  ;;  %v771_v16 = vpop.f32.mrb[15].mxu0  ;;  %1708 = vmatmul.mubr.bf16.gmra.mrb[8].mxu1 %v827_v6  ;;  %v820_v18 = vmax.f32 %v804_v10, 0.0 }
 0x135   : > { %v803_v17 = vadd.f32 %v2107_v9, %v771_v16  ;;  %1724 = vmatpush3.bf16.msra.mxu1 %v1847_v1  ;;  %v818_v20 = vmax.f32 %v802_v13, 0.0  ;;  %v1850_v9 = vld [vmem:[%s2263_s7 + $0x38] sm:$0xff]  }
 0x136   : > { %v821_v19 = vmax.f32 %v805_v15, 0.0  ;;  %1725 = vmatprep.subr.bf16.mxu1 %v1848_v12  ;;  %1756 = vmatpush3.bf16.msra.mxu0 %v2164_v29 }
 0x137   : > { %v819_v21 = vmax.f32 %v803_v17, 0.0  ;;  %1757 = vmatprep.subr.bf16.mxu0 %v2171_v30 }
 0x138   : > { %v829_v22 = vpack.c.bf16 %v821_v19, %v820_v18 }
 0x139   : > { %v828_v23 = vpack.c.bf16 %v819_v21, %v818_v20  ;;  %1726 = vmatpush3.bf16.msra.mxu1 %v1848_v12 }
 0x13a   : > { %1727 = vmatprep.subr.bf16.mxu1 %v1849_v24  ;;  %1758 = vmatpush3.bf16.msra.mxu0 %v2171_v30 }
 0x13b   : > { %1711 = vmatprep.mubr.bf16.mxu1 %v828_v23 }
 0x13c   : > { %1712 = vmatmul.mubr.bf16.gmra.mrb[12].mxu1 %v829_v22 }
 0x13d   : > { %1728 = vmatpush3.bf16.msra.mxu1 %v1849_v24 }
 0x13e   : > { %1729 = vmatprep.subr.bf16.mxu1 %v1850_v9 }
 0x141   : > { %1730 = vmatpush3.bf16.msra.mxu1 %v1850_v9 }
 0x142   : > { %1779 = vmatprep.subr.bf16.mxu1 %v1851_v25 }
 0x1f7   : > { %v1701_v32 = vpop.f32.mrb[0].mxu1 }
 0x1f8   : > { %v944_v33 = vadd.f32 %v1701_v32, %v2179_v31  ;;  %v935_v34 = vpop.f32.mrb[1].mxu1 }
 0x1f9   : > { %v936_v35 = vadd.f32 %v2179_v31, %v935_v34  ;;  %v1702_v36 = vpop.f32.mrb[2].mxu1 }
 0x1fa   : > { %v947_v37 = vadd.f32 %v1702_v36, %v2179_v31  ;;  %v938_v38 = vpop.f32.mrb[3].mxu1  ;;  %v1000_v40 = vmax.f32 %v944_v33, 0.0 }
 0x1fb   : > { %v939_v39 = vadd.f32 %v2179_v31, %v938_v38  ;;  %v998_v42 = vmax.f32 %v936_v35, 0.0 }
 0x1fc   : > { %v1001_v41 = vmax.f32 %v947_v37, 0.0 }
 0x1fd   : > { %v999_v43 = vmax.f32 %v939_v39, 0.0 }
 0x1fe   : > { %v1015_v46 = vpack.c.bf16 %v1001_v41, %v1000_v40 }
 0x1ff   : > { %v1014_v47 = vpack.c.bf16 %v999_v43, %v998_v42  ;;  %v1705_v48 = vpop.f32.mrb[4].mxu1  ;;  %v1857_v43 = vld [vmem:[%s2265_s9 + $0x30] sm:$0xff]  }
 0x200   : > { %v960_v53 = vadd.f32 %v1705_v48, %v2179_v31  ;;  %v951_v54 = vpop.f32.mrb[5].mxu1  ;;  %1759 = vmatprep.subr.bf16.mxu0 %v1857_v43 }
 0x201   : > { %v952_v59 = vadd.f32 %v2179_v31, %v951_v54  ;;  %v1706_v60 = vpop.f32.mrb[6].mxu1  ;;  %1731 = vmatprep.mubr.bf16.mxu1 %v1014_v47  ;;  %1760 = vmatpush3.bf16.msra.mxu0 %v1857_v43 }
 0x202   : > { %v963_v1 = vadd.f32 %v1706_v60, %v2179_v31  ;;  %v954_v2 = vpop.f32.mrb[7].mxu1  ;;  %1732 = vmatmul.mubr.bf16.vlgmr.msra.gmra.mrb[16].mxu1 %v1015_v46  ;;  %v1004_v6 = vmax.f32 %v960_v53, 0.0 }
 0x203   : > { %v955_v5 = vadd.f32 %v2179_v31, %v954_v2  ;;  %1787 = vmatpush3.bf16.msra.mxu1 %v1851_v25  ;;  %v1002_v8 = vmax.f32 %v952_v59, 0.0 }
 0x204   : > { %v1005_v7 = vmax.f32 %v963_v1, 0.0  ;;  %1780 = vmatprep.subr.bf16.mxu1 %v1852_v26 }
 0x205   : > { %v1003_v10 = vmax.f32 %v955_v5, 0.0 }
 0x206   : > { %v1017_v11 = vpack.c.bf16 %v1005_v7, %v1004_v6 }
 0x207   : > { %v1016_v12 = vpack.c.bf16 %v1003_v10, %v1002_v8  ;;  %v1709_v13 = vpop.f32.mrb[8].mxu1  ;;  %1788 = vmatpush3.bf16.msra.mxu1 %v1852_v26 }
 0x208   : > { %v976_v14 = vadd.f32 %v1709_v13, %v2179_v31  ;;  %v967_v15 = vpop.f32.mrb[9].mxu1  ;;  %1781 = vmatprep.subr.bf16.mxu1 %v1853_v27 }
 0x209   : > { %v968_v16 = vadd.f32 %v2179_v31, %v967_v15  ;;  %v1710_v17 = vpop.f32.mrb[10].mxu1  ;;  %1735 = vmatprep.mubr.bf16.mxu1 %v1016_v12 }
 0x20a   : > { %v979_v18 = vadd.f32 %v1710_v17, %v2179_v31  ;;  %v970_v19 = vpop.f32.mrb[11].mxu1  ;;  %1736 = vmatmul.mubr.bf16.gmra.mrb[20].mxu1 %v1017_v11  ;;  %v1008_v21 = vmax.f32 %v976_v14, 0.0 }
 0x20b   : > { %v971_v20 = vadd.f32 %v2179_v31, %v970_v19  ;;  %1789 = vmatpush3.bf16.msra.mxu1 %v1853_v27  ;;  %v1006_v23 = vmax.f32 %v968_v16, 0.0 }
 0x20c   : > { %v1009_v22 = vmax.f32 %v979_v18, 0.0  ;;  %1782 = vmatprep.subr.bf16.mxu1 %v2158_v28 }
 0x20d   : > { %v1007_v24 = vmax.f32 %v971_v20, 0.0 }
 0x20e   : > { %v1019_v9 = vpack.c.bf16 %v1009_v22, %v1008_v21 }
 0x20f   : > { %v1018_v25 = vpack.c.bf16 %v1007_v24, %v1006_v23  ;;  %v1713_v26 = vpop.f32.mrb[12].mxu1  ;;  %1790 = vmatpush3.bf16.msra.mxu1 %v2158_v28 }
 0x210   : > { %v992_v32 = vadd.f32 %v1713_v26, %v2179_v31  ;;  %v983_v33 = vpop.f32.mrb[13].mxu1  ;;  %1783 = vmatprep.subr.bf16.mxu1 %v2164_v29 }
 0x211   : > { %v984_v34 = vadd.f32 %v2179_v31, %v983_v33  ;;  %v1714_v35 = vpop.f32.mrb[14].mxu1  ;;  %1739 = vmatprep.mubr.bf16.mxu1 %v1018_v25 }
 0x212   : > { %v995_v27 = vadd.f32 %v1714_v35, %v2179_v31  ;;  %v986_v36 = vpop.f32.mrb[15].mxu1  ;;  %1740 = vmatmul.mubr.bf16.gmra.mrb[24].mxu1 %v1019_v9  ;;  %v1012_v38 = vmax.f32 %v992_v32, 0.0 }
 0x213   : > { %v987_v37 = vadd.f32 %v2179_v31, %v986_v36  ;;  %1791 = vmatpush3.bf16.msra.mxu1 %v2164_v29  ;;  %v1010_v28 = vmax.f32 %v984_v34, 0.0  ;;  %v1858_v29 = vld [vmem:[%s2265_s9 + $0x38] sm:$0xff]  }
 0x214   : > { %v1013_v39 = vmax.f32 %v995_v27, 0.0  ;;  %1784 = vmatprep.subr.bf16.mxu1 %v2171_v30  ;;  %1761 = vmatprep.subr.bf16.mxu0 %v1858_v29 }
 0x215   : > { %v1011_v40 = vmax.f32 %v987_v37, 0.0  ;;  %1762 = vmatpush3.bf16.msra.mxu0 %v1858_v29 }
 0x216   : > { %v1021_v41 = vpack.c.bf16 %v1013_v39, %v1012_v38 }
 0x217   : > { %v1020_v42 = vpack.c.bf16 %v1011_v40, %v1010_v28  ;;  %1792 = vmatpush3.bf16.msra.mxu1 %v2171_v30  ;;  %v1519_v30 = vld [vmem:[%s2264_s8] ss:$0 sm:$0xff] }
 0x218   : > { %1785 = vmatprep.subr.bf16.mxu1 %v1857_v43 }
 0x219   : > { %1743 = vmatprep.mubr.bf16.mxu1 %v1020_v42 }
 0x21a   : > { %1744 = vmatmul.mubr.bf16.gmra.mrb[28].mxu1 %v1021_v41 }
 0x21b   : > { %1793 = vmatpush3.bf16.msra.mxu1 %v1857_v43 }
 0x21c   : > { %1786 = vmatprep.subr.bf16.mxu1 %v1858_v29 }
 0x21f   : > { %1794 = vmatpush3.bf16.msra.mxu1 %v1858_v29 }
 0x2d5   : > { %v1733_v31 = vpop.f32.mrb[16].mxu1 }
 0x2d6   : > { %v1136_v46 = vadd.f32 %v1733_v31, %v1519_v30  ;;  %v1127_v47 = vpop.f32.mrb[17].mxu1 }
 0x2d7   : > { %v1128_v48 = vadd.f32 %v1519_v30, %v1127_v47  ;;  %v1734_v53 = vpop.f32.mrb[18].mxu1 }
 0x2d8   : > { %v1139_v54 = vadd.f32 %v1734_v53, %v1519_v30  ;;  %v1130_v59 = vpop.f32.mrb[19].mxu1  ;;  %v1192_v1 = vmax.f32 %v1136_v46, 0.0 }
 0x2d9   : > { %v1131_v60 = vadd.f32 %v1519_v30, %v1130_v59  ;;  %v1190_v5 = vmax.f32 %v1128_v48, 0.0 }
 0x2da   : > { %v1193_v2 = vmax.f32 %v1139_v54, 0.0 }
 0x2db   : > { %v1191_v6 = vmax.f32 %v1131_v60, 0.0 }
 0x2dc   : > { %v1207_v7 = vpack.c.bf16 %v1193_v2, %v1192_v1  ;;  %v1528_v2 = vld [vmem:[%s2266_s10] ss:$0 sm:$0xff] }
 0x2dd   : > { %v1206_v8 = vpack.c.bf16 %v1191_v6, %v1190_v5  ;;  %v1737_v10 = vpop.f32.mrb[20].mxu1 }
 0x2de   : > { %v1152_v11 = vadd.f32 %v1737_v10, %v1519_v30  ;;  %v1143_v12 = vpop.f32.mrb[21].mxu1 }
 0x2df   : > { %v1144_v13 = vadd.f32 %v1519_v30, %v1143_v12  ;;  %v1738_v14 = vpop.f32.mrb[22].mxu1  ;;  %1763 = vmatprep.mubr.bf16.mxu0 %v1206_v8 }
 0x2e0   : > { %v1155_v15 = vadd.f32 %v1738_v14, %v1519_v30  ;;  %v1146_v16 = vpop.f32.mrb[23].mxu1  ;;  %1764 = vmatmul.mubr.bf16.vlgmr.msra.gmra.mrb[16].mxu0 %v1207_v7  ;;  %v1196_v18 = vmax.f32 %v1152_v11, 0.0 }
 0x2e1   : > { %v1147_v17 = vadd.f32 %v1519_v30, %v1146_v16  ;;  %v1194_v20 = vmax.f32 %v1144_v13, 0.0 }
 0x2e2   : > { %v1197_v19 = vmax.f32 %v1155_v15, 0.0 }
 0x2e3   : > { %v1195_v21 = vmax.f32 %v1147_v17, 0.0 }
 0x2e4   : > { %v1209_v22 = vpack.c.bf16 %v1197_v19, %v1196_v18 }
 0x2e5   : > { %v1208_v23 = vpack.c.bf16 %v1195_v21, %v1194_v20  ;;  %v1741_v24 = vpop.f32.mrb[24].mxu1 }
 0x2e6   : > { %v1168_v9 = vadd.f32 %v1741_v24, %v1519_v30  ;;  %v1159_v25 = vpop.f32.mrb[25].mxu1 }
 0x2e7   : > { %v1160_v26 = vadd.f32 %v1519_v30, %v1159_v25  ;;  %v1742_v32 = vpop.f32.mrb[26].mxu1  ;;  %1767 = vmatprep.mubr.bf16.mxu0 %v1208_v23 }
 0x2e8   : > { %v1171_v33 = vadd.f32 %v1742_v32, %v1519_v30  ;;  %v1162_v34 = vpop.f32.mrb[27].mxu1  ;;  %1768 = vmatmul.mubr.bf16.gmra.mrb[20].mxu0 %v1209_v22  ;;  %v1200_v27 = vmax.f32 %v1168_v9, 0.0 }
 0x2e9   : > { %v1163_v35 = vadd.f32 %v1519_v30, %v1162_v34  ;;  %v1198_v37 = vmax.f32 %v1160_v26, 0.0 }
 0x2ea   : > { %v1201_v36 = vmax.f32 %v1171_v33, 0.0 }
 0x2eb   : > { %v1199_v38 = vmax.f32 %v1163_v35, 0.0 }
 0x2ec   : > { %v1211_v39 = vpack.c.bf16 %v1201_v36, %v1200_v27 }
 0x2ed   : > { %v1210_v28 = vpack.c.bf16 %v1199_v38, %v1198_v37  ;;  %v1745_v40 = vpop.f32.mrb[28].mxu1 }
 0x2ee   : > { %v1184_v41 = vadd.f32 %v1745_v40, %v1519_v30  ;;  %v1175_v42 = vpop.f32.mrb[29].mxu1 }
 0x2ef   : > { %v1176_v43 = vadd.f32 %v1519_v30, %v1175_v42  ;;  %v1746_v29 = vpop.f32.mrb[30].mxu1  ;;  %1771 = vmatprep.mubr.bf16.mxu1 %v1210_v28 }
 0x2f0   : > { %v1187_v31 = vadd.f32 %v1746_v29, %v1519_v30  ;;  %v1178_v46 = vpop.f32.mrb[31].mxu1  ;;  %1772 = vmatmul.mubr.bf16.vlgmr.msra.gmra.mrb[32].mxu1 %v1211_v39  ;;  %v1204_v48 = vmax.f32 %v1184_v41, 0.0 }
 0x2f1   : > { %v1179_v47 = vadd.f32 %v1519_v30, %v1178_v46  ;;  %v1202_v54 = vmax.f32 %v1176_v43, 0.0 }
 0x2f2   : > { %v1205_v53 = vmax.f32 %v1187_v31, 0.0 }
 0x2f3   : > { %v1203_v59 = vmax.f32 %v1179_v47, 0.0 }
 0x2f4   : > { %v1213_v60 = vpack.c.bf16 %v1205_v53, %v1204_v48 }
 0x2f5   : > { %v1212_v1 = vpack.c.bf16 %v1203_v59, %v1202_v54 }
 0x2f7   : > { %1775 = vmatprep.mubr.bf16.mxu1 %v1212_v1 }
 0x2f8   : > { %1776 = vmatmul.mubr.bf16.gmra.mrb[36].mxu1 %v1213_v60 }
 0x3b3   : > { %v1765_v5 = vpop.f32.mrb[16].mxu0 }
 0x3b4   : > { %v1328_v6 = vadd.f32 %v1765_v5, %v1528_v2  ;;  %v1319_v7 = vpop.f32.mrb[17].mxu0 }
 0x3b5   : > { %v1320_v30 = vadd.f32 %v1528_v2, %v1319_v7  ;;  %v1766_v8 = vpop.f32.mrb[18].mxu0 }
 0x3b6   : > { %v1384_v10 = vadd.f32 %v1328_v6, %v2040_v49  ;;  %v1331_v11 = vadd.f32 %v1766_v8, %v1528_v2  ;;  %v1322_v12 = vpop.f32.mrb[19].mxu0 }
 0x3b7   : > { %v1382_v13 = vadd.f32 %v1320_v30, %v2029_v44  ;;  %v1323_v14 = vadd.f32 %v1528_v2, %v1322_v12 }
 0x3b8   : > { %1400 = vst [vmem:[%s2219_s15 + $0x10] sm:$0xff] %v1384_v10  ;;  %v1385_v15 = vadd.f32 %v1331_v11, %v2043_v50 }
 0x3b9   : > { %1398 = vst [vmem:[%s2219_s15] sm:$0xff] %v1382_v13  ;;  %v1383_v16 = vadd.f32 %v1323_v14, %v2032_v45 }
 0x3ba   : > { %1401 = vst [vmem:[%s2219_s15 + $0x18] sm:$0xff] %v1385_v15 }
 0x3bb   : > { %1399 = vst [vmem:[%s2219_s15 + $0x8] sm:$0xff] %v1383_v16  ;;  %v1769_v17 = vpop.f32.mrb[20].mxu0 }
 0x3bc   : > { %v1344_v18 = vadd.f32 %v1769_v17, %v1528_v2  ;;  %v1335_v49 = vpop.f32.mrb[21].mxu0 }
 0x3bd   : > { %v1336_v19 = vadd.f32 %v1528_v2, %v1335_v49  ;;  %v1770_v20 = vpop.f32.mrb[22].mxu0 }
 0x3be   : > { %v1388_v44 = vadd.f32 %v1344_v18, %v2056_v55  ;;  %v1347_v21 = vadd.f32 %v1770_v20, %v1528_v2  ;;  %v1338_v22 = vpop.f32.mrb[23].mxu0 }
 0x3bf   : > { %v1386_v23 = vadd.f32 %v1336_v19, %v2046_v51  ;;  %v1339_v50 = vadd.f32 %v1528_v2, %v1338_v22 }
 0x3c0   : > { %1404 = vst [vmem:[%s2219_s15 + $0x30] sm:$0xff] %v1388_v44  ;;  %v1389_v45 = vadd.f32 %v1347_v21, %v2059_v56 }
 0x3c1   : > { %1402 = vst [vmem:[%s2219_s15 + $0x20] sm:$0xff] %v1386_v23  ;;  %v1387_v24 = vadd.f32 %v1339_v50, %v2049_v52 }
 0x3c2   : > { %1405 = vst [vmem:[%s2219_s15 + $0x38] sm:$0xff] %v1389_v45 }
 0x3c3   : > { %1403 = vst [vmem:[%s2219_s15 + $0x28] sm:$0xff] %v1387_v24  ;;  %v1773_v9 = vpop.f32.mrb[32].mxu1 }
 0x3c4   : > { %v1360_v25 = vadd.f32 %v1773_v9, %v1528_v2  ;;  %v1351_v55 = vpop.f32.mrb[33].mxu1 }
 0x3c5   : > { %v1352_v26 = vadd.f32 %v1528_v2, %v1351_v55  ;;  %v1774_v32 = vpop.f32.mrb[34].mxu1 }
 0x3c6   : > { %v1392_v51 = vadd.f32 %v1360_v25, %v2072_v61  ;;  %v1363_v33 = vadd.f32 %v1774_v32, %v1528_v2  ;;  %v1354_v34 = vpop.f32.mrb[35].mxu1 }
 0x3c7   : > { %v1390_v35 = vadd.f32 %v1352_v26, %v2062_v57  ;;  %v1355_v56 = vadd.f32 %v1528_v2, %v1354_v34 }
 0x3c8   : > { %1408 = vst [vmem:[%s2219_s15 + $0x50] sm:$0xff] %v1392_v51  ;;  %v1393_v52 = vadd.f32 %v1363_v33, %v2075_v62 }
 0x3c9   : > { %1406 = vst [vmem:[%s2219_s15 + $0x40] sm:$0xff] %v1390_v35  ;;  %v1391_v27 = vadd.f32 %v1355_v56, %v2065_v58 }
 0x3ca   : > { %1409 = vst [vmem:[%s2219_s15 + $0x58] sm:$0xff] %v1393_v52 }
 0x3cb   : > { %1407 = vst [vmem:[%s2219_s15 + $0x48] sm:$0xff] %v1391_v27  ;;  %v1777_v36 = vpop.f32.mrb[36].mxu1 }
 0x3cc   : > { %v1376_v37 = vadd.f32 %v1777_v36, %v1528_v2  ;;  %v1367_v61 = vpop.f32.mrb[37].mxu1 }
 0x3cd   : > { %v1368_v38 = vadd.f32 %v1528_v2, %v1367_v61  ;;  %v1778_v39 = vpop.f32.mrb[38].mxu1 }
 0x3ce   : > { %v1396_v57 = vadd.f32 %v1376_v37, %v2088_v3  ;;  %v1379_v28 = vadd.f32 %v1778_v39, %v1528_v2  ;;  %v1370_v40 = vpop.f32.mrb[39].mxu1 }
 0x3cf   : > { %v1394_v41 = vadd.f32 %v1368_v38, %v2078_v63  ;;  %v1371_v62 = vadd.f32 %v1528_v2, %v1370_v40 }
 0x3d0   : > { %1412 = vst [vmem:[%s2219_s15 + $0x70] sm:$0xff] %v1396_v57  ;;  %v1397_v42 = vadd.f32 %v1379_v28, %v2091_v4 }
 0x3d1   : > { %1410 = vst [vmem:[%s2219_s15 + $0x60] sm:$0xff] %v1394_v41  ;;  %v1395_v58 = vadd.f32 %v1371_v62, %v2081_v0 }
 0x3d2   : > { %1413 = vst [vmem:[%s2219_s15 + $0x78] sm:$0xff] %v1397_v42 }
 0x3d3   : > { %1411 = vst [vmem:[%s2219_s15 + $0x68] sm:$0xff] %v1395_v58 }
 0x3d4 PF: > { %s21_s17 = sadd.s32 1, %s1865_s17  }
 0x3d5   : > { %p18_p4 = scmp.ge.s32.totalorder %s21_s17, 4  }
 0x3d7   :  { %20 = sbr.rel (!%p18_p4) target bundleno = 1 (0x1), region = 97 }

// kernel: encoder_processor_decoder.8
= control target key start
LH: loop header
LB: loop body
LE: loop exit
PB: predicated region body
PF: predicated region fallthrough
CT: control target
= control target key end

     0   :  { %s1472_s30 = smov 0   ;;  %s1663_s0 = inlined_call_operand.vmem [shape: f32[512,16], index: 0, kind: input, shape index: {}]   ;;  %s1664_s1 = inlined_call_operand.vmem [shape: bf16[16,128], index: 1, kind: input, shape index: {}]   ;;  %s1665_s2 = inlined_call_operand.vmem [shape: f32[1,128], index: 2, kind: input, shape index: {}]   ;;  %s1666_s3 = inlined_call_operand.vmem [shape: bf16[128,128], index: 3, kind: input, shape index: {}]   ;;  %s1667_s4 = inlined_call_operand.vmem [shape: f32[1,128], index: 4, kind: input, shape index: {}]   ;;  %s1668_s5 = inlined_call_operand.vmem [shape: bf16[128,128], index: 5, kind: input, shape index: {}]   ;;  %s1669_s6 = inlined_call_operand.vmem [shape: f32[1,128], index: 6, kind: input, shape index: {}]   ;;  %s1670_s7 = inlined_call_operand.vmem [shape: bf16[128,128], index: 7, kind: input, shape index: {}]   ;;  %s1671_s8 = inlined_call_operand.vmem [shape: f32[1,128], index: 8, kind: input, shape index: {}]   ;;  %s1672_s9 = inlined_call_operand.vmem [shape: f32[512,128], index: 9, kind: output, shape index: {}]  }
   0x1 LB: > { %s1146_s10 = sadd.s32 4294967295, %s1420_s30   ;;  %p1150_p0 = scmp.ge.s32.totalorder %s1420_s30, 1  ;;  %s1420_s30 = sphi %s1472_s30, %s19_s30  }
   0x2   : > { %p288_p1 = scmp.lt.s32.totalorder %s1420_s30, 5 }
   0x4   : > { %p289_p2 = pnand %p1150_p0, %p288_p1 }
   0x5   : > { %v1389_v0 = vld [vmem:[%s1664_s1] sm:$0xff] (!%p289_p2)   ;;  %s1151_s13 = sshll.u32 (!%p289_p2), %s1146_s10, 4  ;;  %v1391_v2 = vld [vmem:[%s1666_s3 + $0x8] sm:$0xff] (!%p289_p2)   ;;  %v1392_v3 = vld [vmem:[%s1666_s3 + $0x10] sm:$0xff] (!%p289_p2)   ;;  %vm376_vm0 = vcmask (!%p289_p2), 130048  }
   0x6   : > { %292 = sbr.rel (%p289_p2) target bundleno = 928 (0x3a0), region = 56  ;;  %p325_p3 = scmp.lt.s32.totalorder (!%p289_p2), %s1151_s13, 63  ;;  %1251 = vmatprep.subr.bf16.mxu0 (!%p289_p2), %v1389_v0  ;;  %v1390_v1 = vld [vmem:[%s1666_s3] sm:$0xff] (!%p289_p2)   ;;  %v1393_v13 = vld [vmem:[%s1666_s3 + $0x18] sm:$0xff] (!%p289_p2)   ;;  %v1395_v21 = vld [vmem:[%s1666_s3 + $0x28] sm:$0xff] (!%p289_p2)  }
   0x7   : > { %1252 = vmatpush3.bf16.msra.mxu0 (!%p289_p2), %v1389_v0  ;;  %1269 = vmatprep.subr.bf16.mxu1 (!%p289_p2), %v1390_v1  ;;  %v1394_v18 = vld [vmem:[%s1666_s3 + $0x20] sm:$0xff] (!%p289_p2)   ;;  %v1396_v31 = vld [vmem:[%s1666_s3 + $0x30] sm:$0xff] (!%p289_p2)   ;;  %v1397_v32 = vld [vmem:[%s1666_s3 + $0x38] sm:$0xff] (!%p289_p2)  }
   0x8   : > { %1270 = vmatpush3.bf16.msra.mxu1 (!%p289_p2), %v1390_v1  ;;  %v1398_v33 = vld [vmem:[%s1668_s5] sm:$0xff] (!%p289_p2)   ;;  %v1399_v34 = vld [vmem:[%s1668_s5 + $0x8] sm:$0xff] (!%p289_p2)   ;;  %v1400_v35 = vld [vmem:[%s1668_s5 + $0x10] sm:$0xff] (!%p289_p2)  }
   0x9   : > { %1271 = vmatprep.subr.bf16.mxu1 (!%p289_p2), %v1391_v2  ;;  %1301 = vmatprep.subr.bf16.mxu0 (!%p289_p2), %v1398_v33  ;;  %v1401_v36 = vld [vmem:[%s1668_s5 + $0x18] sm:$0xff] (!%p289_p2)   ;;  %v1402_v37 = vld [vmem:[%s1668_s5 + $0x20] sm:$0xff] (!%p289_p2)   ;;  %v1403_v38 = vld [vmem:[%s1668_s5 + $0x28] sm:$0xff] (!%p289_p2)  }
   0xa   : > { %v1155_v39 = vld [vmem:[%s1665_s2] ss:$0 sm:$0xff] (!%p289_p2) }
   0xc   : > { %1272 = vmatpush3.bf16.msra.mxu1 (!%p289_p2), %v1391_v2 }
   0xd   : > { %s1674_s13 = smov (!%p325_p3, %s1151_s13), 63  ;;  %1273 = vmatprep.subr.bf16.mxu1 %v1392_v3 }
   0xe   : > { %s1152_s18 = sshll.u32 %s1674_s13, 3 }
   0xf   : > { %s1497_s21 = scalar_lea.vmem %s1663_s0, %s1152_s18  ;;  %s1642_s22 = scalar_lea.vmem %s1672_s9, %s1152_s18 }
  0x10   : > { %v337_v4 = vld [vmem:[%s1497_s21] sm:$0xff]  ;;  %v338_v5 = vld [vmem:[%s1497_s21 + $0x8] sm:$0xff]  ;;  %v339_v6 = vld [vmem:[%s1497_s21 + $0x10] sm:$0xff]  ;;  %1274 = vmatpush3.bf16.msra.mxu1 %v1392_v3 }
  0x11   : > { %v353_v7 = vpack.c.bf16 %v338_v5, %v337_v4  ;;  %v340_v8 = vld [vmem:[%s1497_s21 + $0x18] sm:$0xff]  ;;  %v341_v9 = vld [vmem:[%s1497_s21 + $0x20] sm:$0xff]  ;;  %v342_v10 = vld [vmem:[%s1497_s21 + $0x28] sm:$0xff]  ;;  %1275 = vmatprep.subr.bf16.mxu1 %v1393_v13 }
  0x12   : > { %v354_v11 = vpack.c.bf16 %v340_v8, %v339_v6  ;;  %v355_v12 = vpack.c.bf16 %v342_v10, %v341_v9  ;;  %v343_v14 = vld [vmem:[%s1497_s21 + $0x30] sm:$0xff]  ;;  %v344_v15 = vld [vmem:[%s1497_s21 + $0x38] sm:$0xff]  ;;  %v345_v16 = vld [vmem:[%s1497_s21 + $0x40] sm:$0xff] }
  0x13   : > { %1253 = vmatprep.mubr.msk.bf16.mxu0 %vm376_vm0, %v353_v7  ;;  %v346_v17 = vld [vmem:[%s1497_s21 + $0x48] sm:$0xff]  ;;  %v356_v19 = vpack.c.bf16 %v344_v15, %v343_v14  ;;  %v347_v22 = vld [vmem:[%s1497_s21 + $0x50] sm:$0xff]  ;;  %v348_v23 = vld [vmem:[%s1497_s21 + $0x58] sm:$0xff] }
  0x14   : > { %1254 = vmatmul.mubr.msk.bf16.vlgmr.msra.gmra.mrb[0].mxu0 %vm376_vm0, %v354_v11  ;;  %v357_v20 = vpack.c.bf16 %v346_v17, %v345_v16  ;;  %1276 = vmatpush3.bf16.msra.mxu1 %v1393_v13  ;;  %v349_v24 = vld [vmem:[%s1497_s21 + $0x60] sm:$0xff]  ;;  %v350_v25 = vld [vmem:[%s1497_s21 + $0x68] sm:$0xff]  ;;  %v358_v26 = vpack.c.bf16 %v348_v23, %v347_v22  ;;  %v351_v28 = vld [vmem:[%s1497_s21 + $0x70] sm:$0xff] }
  0x15   : > { %1257 = vmatprep.mubr.msk.bf16.mxu0 %vm376_vm0, %v355_v12  ;;  %1277 = vmatprep.subr.bf16.mxu1 %v1394_v18  ;;  %v359_v27 = vpack.c.bf16 %v350_v25, %v349_v24  ;;  %v352_v29 = vld [vmem:[%s1497_s21 + $0x78] sm:$0xff] }
  0x16   : > { %v360_v30 = vpack.c.bf16 %v352_v29, %v351_v28  ;;  %1302 = vmatpush3.bf16.msra.mxu0 %v1398_v33  ;;  %v1405_v33 = vld [vmem:[%s1668_s5 + $0x38] sm:$0xff]  }
  0x17   : > { %1303 = vmatprep.subr.bf16.mxu0 %v1399_v34 }
  0x18   : > { %1278 = vmatpush3.bf16.msra.mxu1 %v1394_v18 }
  0x19   : > { %1279 = vmatprep.subr.bf16.mxu1 %v1395_v21 }
  0x1a   : > { %1304 = vmatpush3.bf16.msra.mxu0 %v1399_v34  ;;  %v1406_v34 = vld [vmem:[%s1670_s7] sm:$0xff]  }
  0x1b   : > { %1305 = vmatprep.subr.bf16.mxu0 %v1400_v35 }
  0x1c   : > { %1258 = vmatmul.mubr.msk.bf16.gmra.mrb[4].mxu0 %vm376_vm0, %v356_v19  ;;  %1280 = vmatpush3.bf16.msra.mxu1 %v1395_v21 }
  0x1d   : > { %1261 = vmatprep.mubr.msk.bf16.mxu0 %vm376_vm0, %v357_v20  ;;  %1281 = vmatprep.subr.bf16.mxu1 %v1396_v31 }
  0x1e   : > { %1306 = vmatpush3.bf16.msra.mxu0 %v1400_v35  ;;  %v1407_v35 = vld [vmem:[%s1670_s7 + $0x8] sm:$0xff]  }
  0x1f   : > { %1307 = vmatprep.subr.bf16.mxu0 %v1401_v36 }
  0x20   : > { %1282 = vmatpush3.bf16.msra.mxu1 %v1396_v31 }
  0x21   : > { %1283 = vmatprep.subr.bf16.mxu1 %v1397_v32 }
  0x22   : > { %1308 = vmatpush3.bf16.msra.mxu0 %v1401_v36  ;;  %v1408_v36 = vld [vmem:[%s1670_s7 + $0x10] sm:$0xff]  }
  0x23   : > { %1309 = vmatprep.subr.bf16.mxu0 %v1402_v37 }
  0x24   : > { %1262 = vmatmul.mubr.msk.bf16.gmra.mrb[8].mxu0 %vm376_vm0, %v358_v26  ;;  %1284 = vmatpush3.bf16.msra.mxu1 %v1397_v32  ;;  %v1404_v32 = vld [vmem:[%s1668_s5 + $0x30] sm:$0xff]  }
  0x25   : > { %1265 = vmatprep.mubr.msk.bf16.mxu0 %vm376_vm0, %v359_v27  ;;  %1365 = vmatprep.subr.bf16.mxu1 %v1406_v34 }
  0x26   : > { %1310 = vmatpush3.bf16.msra.mxu0 %v1402_v37  ;;  %v1580_v37 = vld [vmem:[%s1670_s7 + $0x18] sm:$0xff]  }
  0x27   : > { %1311 = vmatprep.subr.bf16.mxu0 %v1403_v38 }
  0x2a   : > { %1312 = vmatpush3.bf16.msra.mxu0 %v1403_v38  ;;  %v1586_v38 = vld [vmem:[%s1670_s7 + $0x20] sm:$0xff]  }
  0x2b   : > { %1313 = vmatprep.subr.bf16.mxu0 %v1404_v32 }
  0x2c   : > { %1266 = vmatmul.mubr.msk.bf16.gmra.mrb[12].mxu0 %vm376_vm0, %v360_v30 }
  0x2e   : > { %1314 = vmatpush3.bf16.msra.mxu0 %v1404_v32 }
  0x2f   : > { %1315 = vmatprep.subr.bf16.mxu0 %v1405_v33 }
  0x32   : > { %1316 = vmatpush3.bf16.msra.mxu0 %v1405_v33  ;;  %v1412_v33 = vld [vmem:[%s1670_s7 + $0x30] sm:$0xff]  }
  0x33   : > { %1333 = vmatprep.subr.bf16.mxu0 %v1406_v34 }
  0xe7   : > { %v1255_v40 = vpop.f32.mrb[0].mxu0 }
  0xe8   : > { %v444_v41 = vadd.f32 %v1255_v40, %v1155_v39  ;;  %v435_v42 = vpop.f32.mrb[1].mxu0  ;;  %v1601_v40 = vld [vmem:[%s1667_s4] ss:$0 sm:$0xff] }
  0xe9   : > { %v436_v43 = vadd.f32 %v1155_v39, %v435_v42  ;;  %v1256_v44 = vpop.f32.mrb[2].mxu0 }
  0xea   : > { %v447_v45 = vadd.f32 %v1256_v44, %v1155_v39  ;;  %v438_v46 = vpop.f32.mrb[3].mxu0  ;;  %v500_v48 = vmax.f32 %v444_v41, 0.0 }
  0xeb   : > { %v439_v47 = vadd.f32 %v1155_v39, %v438_v46  ;;  %v498_v50 = vmax.f32 %v436_v43, 0.0 }
  0xec   : > { %v501_v49 = vmax.f32 %v447_v45, 0.0 }
  0xed   : > { %v499_v51 = vmax.f32 %v439_v47, 0.0 }
  0xee   : > { %v515_v52 = vpack.c.bf16 %v501_v49, %v500_v48 }
  0xef   : > { %v1259_v53 = vpop.f32.mrb[4].mxu0  ;;  %v514_v54 = vpack.c.bf16 %v499_v51, %v498_v50 }
  0xf0   : > { %v460_v55 = vadd.f32 %v1259_v53, %v1155_v39  ;;  %v451_v56 = vpop.f32.mrb[5].mxu0 }
  0xf1   : > { %v452_v57 = vadd.f32 %v1155_v39, %v451_v56  ;;  %v1260_v58 = vpop.f32.mrb[6].mxu0  ;;  %1285 = vmatprep.mubr.bf16.mxu1 %v514_v54 }
  0xf2   : > { %v463_v59 = vadd.f32 %v1260_v58, %v1155_v39  ;;  %v454_v60 = vpop.f32.mrb[7].mxu0  ;;  %1286 = vmatmul.mubr.bf16.vlgmr.msra.gmra.mrb[0].mxu1 %v515_v52  ;;  %v504_v62 = vmax.f32 %v460_v55, 0.0 }
  0xf3   : > { %v455_v61 = vadd.f32 %v1155_v39, %v454_v60  ;;  %v502_v0 = vmax.f32 %v452_v57, 0.0  ;;  %1373 = vmatpush3.bf16.msra.mxu1 %v1406_v34 }
  0xf4   : > { %v505_v63 = vmax.f32 %v463_v59, 0.0  ;;  %1366 = vmatprep.subr.bf16.mxu1 %v1407_v35 }
  0xf5   : > { %v503_v1 = vmax.f32 %v455_v61, 0.0 }
  0xf6   : > { %v517_v2 = vpack.c.bf16 %v505_v63, %v504_v62 }
  0xf7   : > { %v516_v3 = vpack.c.bf16 %v503_v1, %v502_v0  ;;  %v1263_v4 = vpop.f32.mrb[8].mxu0  ;;  %1374 = vmatpush3.bf16.msra.mxu1 %v1407_v35 }
  0xf8   : > { %v476_v5 = vadd.f32 %v1263_v4, %v1155_v39  ;;  %v467_v6 = vpop.f32.mrb[9].mxu0  ;;  %1367 = vmatprep.subr.bf16.mxu1 %v1408_v36 }
  0xf9   : > { %v468_v7 = vadd.f32 %v1155_v39, %v467_v6  ;;  %v1264_v8 = vpop.f32.mrb[10].mxu0  ;;  %1289 = vmatprep.mubr.bf16.mxu1 %v516_v3 }
  0xfa   : > { %v479_v9 = vadd.f32 %v1264_v8, %v1155_v39  ;;  %v470_v10 = vpop.f32.mrb[11].mxu0  ;;  %1290 = vmatmul.mubr.bf16.gmra.mrb[4].mxu1 %v517_v2  ;;  %v508_v12 = vmax.f32 %v476_v5, 0.0 }
  0xfb   : > { %v471_v11 = vadd.f32 %v1155_v39, %v470_v10  ;;  %v506_v14 = vmax.f32 %v468_v7, 0.0  ;;  %1375 = vmatpush3.bf16.msra.mxu1 %v1408_v36 }
  0xfc   : > { %v509_v13 = vmax.f32 %v479_v9, 0.0  ;;  %1368 = vmatprep.subr.bf16.mxu1 %v1580_v37 }
  0xfd   : > { %v507_v15 = vmax.f32 %v471_v11, 0.0 }
  0xfe   : > { %v519_v16 = vpack.c.bf16 %v509_v13, %v508_v12 }
  0xff   : > { %v518_v17 = vpack.c.bf16 %v507_v15, %v506_v14  ;;  %v1267_v18 = vpop.f32.mrb[12].mxu0  ;;  %1376 = vmatpush3.bf16.msra.mxu1 %v1580_v37 }
 0x100   : > { %v492_v19 = vadd.f32 %v1267_v18, %v1155_v39  ;;  %v483_v20 = vpop.f32.mrb[13].mxu0  ;;  %1369 = vmatprep.subr.bf16.mxu1 %v1586_v38 }
 0x101   : > { %v484_v21 = vadd.f32 %v1155_v39, %v483_v20  ;;  %v1268_v22 = vpop.f32.mrb[14].mxu0  ;;  %1293 = vmatprep.mubr.bf16.mxu1 %v518_v17 }
 0x102   : > { %v495_v23 = vadd.f32 %v1268_v22, %v1155_v39  ;;  %v486_v24 = vpop.f32.mrb[15].mxu0  ;;  %1294 = vmatmul.mubr.bf16.gmra.mrb[8].mxu1 %v519_v16  ;;  %v512_v26 = vmax.f32 %v492_v19, 0.0 }
 0x103   : > { %v487_v25 = vadd.f32 %v1155_v39, %v486_v24  ;;  %v510_v28 = vmax.f32 %v484_v21, 0.0  ;;  %v1593_v39 = vld [vmem:[%s1670_s7 + $0x28] sm:$0xff]   ;;  %1377 = vmatpush3.bf16.msra.mxu1 %v1586_v38 }
 0x104   : > { %v513_v27 = vmax.f32 %v495_v23, 0.0  ;;  %1370 = vmatprep.subr.bf16.mxu1 %v1593_v39 }
 0x105   : > { %v511_v29 = vmax.f32 %v487_v25, 0.0 }
 0x106   : > { %v521_v30 = vpack.c.bf16 %v513_v27, %v512_v26 }
 0x107   : > { %v520_v31 = vpack.c.bf16 %v511_v29, %v510_v28  ;;  %1378 = vmatpush3.bf16.msra.mxu1 %v1593_v39 }
 0x108   : > { %1371 = vmatprep.subr.bf16.mxu1 %v1412_v33 }
 0x109   : > { %1297 = vmatprep.mubr.bf16.mxu1 %v520_v31 }
 0x10a   : > { %1298 = vmatmul.mubr.bf16.gmra.mrb[12].mxu1 %v521_v30 }
 0x10b   : > { %1379 = vmatpush3.bf16.msra.mxu1 %v1412_v33 }
 0x1c5   : > { %v1287_v41 = vpop.f32.mrb[0].mxu1 }
 0x1c6   : > { %v636_v42 = vadd.f32 %v1287_v41, %v1601_v40  ;;  %v627_v43 = vpop.f32.mrb[1].mxu1 }
 0x1c7   : > { %v628_v44 = vadd.f32 %v1601_v40, %v627_v43  ;;  %v1288_v45 = vpop.f32.mrb[2].mxu1 }
 0x1c8   : > { %v639_v46 = vadd.f32 %v1288_v45, %v1601_v40  ;;  %v630_v47 = vpop.f32.mrb[3].mxu1  ;;  %v692_v49 = vmax.f32 %v636_v42, 0.0 }
 0x1c9   : > { %v631_v48 = vadd.f32 %v1601_v40, %v630_v47  ;;  %v690_v51 = vmax.f32 %v628_v44, 0.0 }
 0x1ca   : > { %v693_v50 = vmax.f32 %v639_v46, 0.0 }
 0x1cb   : > { %v691_v52 = vmax.f32 %v631_v48, 0.0 }
 0x1cc   : > { %v707_v53 = vpack.c.bf16 %v693_v50, %v692_v49 }
 0x1cd   : > { %v706_v54 = vpack.c.bf16 %v691_v52, %v690_v51  ;;  %v1291_v55 = vpop.f32.mrb[4].mxu1 }
 0x1ce   : > { %v652_v56 = vadd.f32 %v1291_v55, %v1601_v40  ;;  %v643_v57 = vpop.f32.mrb[5].mxu1 }
 0x1cf   : > { %v644_v58 = vadd.f32 %v1601_v40, %v643_v57  ;;  %v1292_v59 = vpop.f32.mrb[6].mxu1  ;;  %1317 = vmatprep.mubr.bf16.mxu0 %v706_v54 }
 0x1d0   : > { %v655_v60 = vadd.f32 %v1292_v59, %v1601_v40  ;;  %v646_v61 = vpop.f32.mrb[7].mxu1  ;;  %1318 = vmatmul.mubr.bf16.vlgmr.msra.gmra.mrb[16].mxu0 %v707_v53  ;;  %v696_v63 = vmax.f32 %v652_v56, 0.0 }
 0x1d1   : > { %v647_v62 = vadd.f32 %v1601_v40, %v646_v61  ;;  %1334 = vmatpush3.bf16.msra.mxu0 %v1406_v34  ;;  %v694_v1 = vmax.f32 %v644_v58, 0.0  ;;  %v1413_v34 = vld [vmem:[%s1670_s7 + $0x38] sm:$0xff]  }
 0x1d2   : > { %v697_v0 = vmax.f32 %v655_v60, 0.0  ;;  %1335 = vmatprep.subr.bf16.mxu0 %v1407_v35  ;;  %1372 = vmatprep.subr.bf16.mxu1 %v1413_v34 }
 0x1d3   : > { %v695_v2 = vmax.f32 %v647_v62, 0.0  ;;  %1380 = vmatpush3.bf16.msra.mxu1 %v1413_v34 }
 0x1d4   : > { %v709_v3 = vpack.c.bf16 %v697_v0, %v696_v63 }
 0x1d5   : > { %v708_v4 = vpack.c.bf16 %v695_v2, %v694_v1  ;;  %v1295_v5 = vpop.f32.mrb[8].mxu1  ;;  %1336 = vmatpush3.bf16.msra.mxu0 %v1407_v35  ;;  %v1174_v35 = vld [vmem:[%s1669_s6] ss:$0 sm:$0xff] }
 0x1d6   : > { %v668_v6 = vadd.f32 %v1295_v5, %v1601_v40  ;;  %v659_v7 = vpop.f32.mrb[9].mxu1  ;;  %1337 = vmatprep.subr.bf16.mxu0 %v1408_v36 }
 0x1d7   : > { %v660_v8 = vadd.f32 %v1601_v40, %v659_v7  ;;  %v1296_v9 = vpop.f32.mrb[10].mxu1  ;;  %1321 = vmatprep.mubr.bf16.mxu0 %v708_v4 }
 0x1d8   : > { %v671_v10 = vadd.f32 %v1296_v9, %v1601_v40  ;;  %v662_v11 = vpop.f32.mrb[11].mxu1  ;;  %1322 = vmatmul.mubr.bf16.gmra.mrb[20].mxu0 %v709_v3  ;;  %v700_v13 = vmax.f32 %v668_v6, 0.0 }
 0x1d9   : > { %v663_v12 = vadd.f32 %v1601_v40, %v662_v11  ;;  %1338 = vmatpush3.bf16.msra.mxu0 %v1408_v36  ;;  %v698_v15 = vmax.f32 %v660_v8, 0.0 }
 0x1da   : > { %v701_v14 = vmax.f32 %v671_v10, 0.0  ;;  %1339 = vmatprep.subr.bf16.mxu0 %v1580_v37 }
 0x1db   : > { %v699_v16 = vmax.f32 %v663_v12, 0.0 }
 0x1dc   : > { %v711_v17 = vpack.c.bf16 %v701_v14, %v700_v13 }
 0x1dd   : > { %v710_v18 = vpack.c.bf16 %v699_v16, %v698_v15  ;;  %v1299_v19 = vpop.f32.mrb[12].mxu1  ;;  %1340 = vmatpush3.bf16.msra.mxu0 %v1580_v37 }
 0x1de   : > { %v684_v20 = vadd.f32 %v1299_v19, %v1601_v40  ;;  %v675_v21 = vpop.f32.mrb[13].mxu1  ;;  %1341 = vmatprep.subr.bf16.mxu0 %v1586_v38 }
 0x1df   : > { %v676_v22 = vadd.f32 %v1601_v40, %v675_v21  ;;  %v1300_v23 = vpop.f32.mrb[14].mxu1  ;;  %1325 = vmatprep.mubr.bf16.mxu0 %v710_v18 }
 0x1e0   : > { %v687_v24 = vadd.f32 %v1300_v23, %v1601_v40  ;;  %v678_v25 = vpop.f32.mrb[15].mxu1  ;;  %1326 = vmatmul.mubr.bf16.gmra.mrb[24].mxu0 %v711_v17  ;;  %v704_v27 = vmax.f32 %v684_v20, 0.0 }
 0x1e1   : > { %v679_v26 = vadd.f32 %v1601_v40, %v678_v25  ;;  %1342 = vmatpush3.bf16.msra.mxu0 %v1586_v38  ;;  %v702_v29 = vmax.f32 %v676_v22, 0.0 }
 0x1e2   : > { %v705_v28 = vmax.f32 %v687_v24, 0.0  ;;  %1343 = vmatprep.subr.bf16.mxu0 %v1593_v39 }
 0x1e3   : > { %v703_v30 = vmax.f32 %v679_v26, 0.0 }
 0x1e4   : > { %v713_v31 = vpack.c.bf16 %v705_v28, %v704_v27  ;;  %v1183_v28 = vld [vmem:[%s1671_s8] ss:$0 sm:$0xff] }
 0x1e5   : > { %v712_v32 = vpack.c.bf16 %v703_v30, %v702_v29  ;;  %1344 = vmatpush3.bf16.msra.mxu0 %v1593_v39 }
 0x1e6   : > { %1345 = vmatprep.subr.bf16.mxu0 %v1412_v33 }
 0x1e7   : > { %1329 = vmatprep.mubr.bf16.mxu0 %v712_v32 }
 0x1e8   : > { %1330 = vmatmul.mubr.bf16.gmra.mrb[28].mxu0 %v713_v31 }
 0x1e9   : > { %1346 = vmatpush3.bf16.msra.mxu0 %v1412_v33 }
 0x1ea   : > { %1347 = vmatprep.subr.bf16.mxu0 %v1413_v34 }
 0x1ed   : > { %1348 = vmatpush3.bf16.msra.mxu0 %v1413_v34 }
 0x2a3   : > { %v1319_v36 = vpop.f32.mrb[16].mxu0 }
 0x2a4   : > { %v828_v37 = vadd.f32 %v1319_v36, %v1174_v35  ;;  %v819_v38 = vpop.f32.mrb[17].mxu0 }
 0x2a5   : > { %v820_v39 = vadd.f32 %v1174_v35, %v819_v38  ;;  %v1320_v40 = vpop.f32.mrb[18].mxu0 }
 0x2a6   : > { %v831_v41 = vadd.f32 %v1320_v40, %v1174_v35  ;;  %v822_v42 = vpop.f32.mrb[19].mxu0  ;;  %v884_v44 = vmax.f32 %v828_v37, 0.0 }
 0x2a7   : > { %v823_v43 = vadd.f32 %v1174_v35, %v822_v42  ;;  %v882_v46 = vmax.f32 %v820_v39, 0.0 }
 0x2a8   : > { %v885_v45 = vmax.f32 %v831_v41, 0.0 }
 0x2a9   : > { %v883_v47 = vmax.f32 %v823_v43, 0.0 }
 0x2aa   : > { %v899_v48 = vpack.c.bf16 %v885_v45, %v884_v44 }
 0x2ab   : > { %v898_v49 = vpack.c.bf16 %v883_v47, %v882_v46  ;;  %v1323_v50 = vpop.f32.mrb[20].mxu0 }
 0x2ac   : > { %v844_v51 = vadd.f32 %v1323_v50, %v1174_v35  ;;  %v835_v52 = vpop.f32.mrb[21].mxu0 }
 0x2ad   : > { %v836_v53 = vadd.f32 %v1174_v35, %v835_v52  ;;  %v1324_v54 = vpop.f32.mrb[22].mxu0  ;;  %1349 = vmatprep.mubr.bf16.mxu0 %v898_v49 }
 0x2ae   : > { %v847_v55 = vadd.f32 %v1324_v54, %v1174_v35  ;;  %v838_v56 = vpop.f32.mrb[23].mxu0  ;;  %1350 = vmatmul.mubr.bf16.vlgmr.msra.gmra.mrb[32].mxu0 %v899_v48  ;;  %v888_v58 = vmax.f32 %v844_v51, 0.0 }
 0x2af   : > { %v839_v57 = vadd.f32 %v1174_v35, %v838_v56  ;;  %v886_v60 = vmax.f32 %v836_v53, 0.0 }
 0x2b0   : > { %v889_v59 = vmax.f32 %v847_v55, 0.0 }
 0x2b1   : > { %v887_v61 = vmax.f32 %v839_v57, 0.0 }
 0x2b2   : > { %v901_v62 = vpack.c.bf16 %v889_v59, %v888_v58 }
 0x2b3   : > { %v900_v63 = vpack.c.bf16 %v887_v61, %v886_v60  ;;  %v1327_v0 = vpop.f32.mrb[24].mxu0 }
 0x2b4   : > { %v860_v1 = vadd.f32 %v1327_v0, %v1174_v35  ;;  %v851_v2 = vpop.f32.mrb[25].mxu0 }
 0x2b5   : > { %v852_v3 = vadd.f32 %v1174_v35, %v851_v2  ;;  %v1328_v4 = vpop.f32.mrb[26].mxu0  ;;  %1353 = vmatprep.mubr.bf16.mxu1 %v900_v63 }
 0x2b6   : > { %v863_v5 = vadd.f32 %v1328_v4, %v1174_v35  ;;  %v854_v6 = vpop.f32.mrb[27].mxu0  ;;  %1354 = vmatmul.mubr.bf16.vlgmr.msra.gmra.mrb[16].mxu1 %v901_v62  ;;  %v892_v8 = vmax.f32 %v860_v1, 0.0 }
 0x2b7   : > { %v855_v7 = vadd.f32 %v1174_v35, %v854_v6  ;;  %v890_v10 = vmax.f32 %v852_v3, 0.0 }
 0x2b8   : > { %v893_v9 = vmax.f32 %v863_v5, 0.0 }
 0x2b9   : > { %v891_v11 = vmax.f32 %v855_v7, 0.0 }
 0x2ba   : > { %v903_v12 = vpack.c.bf16 %v893_v9, %v892_v8 }
 0x2bb   : > { %v902_v13 = vpack.c.bf16 %v891_v11, %v890_v10  ;;  %v1331_v14 = vpop.f32.mrb[28].mxu0 }
 0x2bc   : > { %v876_v15 = vadd.f32 %v1331_v14, %v1174_v35  ;;  %v867_v16 = vpop.f32.mrb[29].mxu0 }
 0x2bd   : > { %v868_v17 = vadd.f32 %v1174_v35, %v867_v16  ;;  %v1332_v18 = vpop.f32.mrb[30].mxu0  ;;  %1357 = vmatprep.mubr.bf16.mxu1 %v902_v13 }
 0x2be   : > { %v879_v19 = vadd.f32 %v1332_v18, %v1174_v35  ;;  %v870_v20 = vpop.f32.mrb[31].mxu0  ;;  %1358 = vmatmul.mubr.bf16.gmra.mrb[20].mxu1 %v903_v12  ;;  %v896_v22 = vmax.f32 %v876_v15, 0.0 }
 0x2bf   : > { %v871_v21 = vadd.f32 %v1174_v35, %v870_v20  ;;  %v894_v24 = vmax.f32 %v868_v17, 0.0 }
 0x2c0   : > { %v897_v23 = vmax.f32 %v879_v19, 0.0 }
 0x2c1   : > { %v895_v25 = vmax.f32 %v871_v21, 0.0 }
 0x2c2   : > { %v905_v26 = vpack.c.bf16 %v897_v23, %v896_v22 }
 0x2c3   : > { %v904_v27 = vpack.c.bf16 %v895_v25, %v894_v24 }
 0x2c5   : > { %1361 = vmatprep.mubr.bf16.mxu1 %v904_v27 }
 0x2c6   : > { %1362 = vmatmul.mubr.bf16.gmra.mrb[24].mxu1 %v905_v26 }
 0x381   : > { %v1351_v29 = vpop.f32.mrb[32].mxu0 }
 0x382   : > { %v1020_v30 = vadd.f32 %v1351_v29, %v1183_v28  ;;  %v1011_v31 = vpop.f32.mrb[33].mxu0 }
 0x383   : > { %v1012_v32 = vadd.f32 %v1183_v28, %v1011_v31  ;;  %v1352_v33 = vpop.f32.mrb[34].mxu0 }
 0x384   : > { %1076 = vst [vmem:[%s1642_s22 + $0x10] sm:$0xff] %v1020_v30  ;;  %v1023_v34 = vadd.f32 %v1352_v33, %v1183_v28  ;;  %v1014_v35 = vpop.f32.mrb[35].mxu0 }
 0x385   : > { %1074 = vst [vmem:[%s1642_s22] sm:$0xff] %v1012_v32  ;;  %v1015_v36 = vadd.f32 %v1183_v28, %v1014_v35 }
 0x386   : > { %1077 = vst [vmem:[%s1642_s22 + $0x18] sm:$0xff] %v1023_v34 }
 0x387   : > { %1075 = vst [vmem:[%s1642_s22 + $0x8] sm:$0xff] %v1015_v36 }
 0x389   : > { %v1355_v37 = vpop.f32.mrb[16].mxu1 }
 0x38a   : > { %v1036_v38 = vadd.f32 %v1355_v37, %v1183_v28  ;;  %v1027_v39 = vpop.f32.mrb[17].mxu1 }
 0x38b   : > { %v1028_v40 = vadd.f32 %v1183_v28, %v1027_v39  ;;  %v1356_v41 = vpop.f32.mrb[18].mxu1 }
 0x38c   : > { %1080 = vst [vmem:[%s1642_s22 + $0x30] sm:$0xff] %v1036_v38  ;;  %v1039_v42 = vadd.f32 %v1356_v41, %v1183_v28  ;;  %v1030_v43 = vpop.f32.mrb[19].mxu1 }
 0x38d   : > { %1078 = vst [vmem:[%s1642_s22 + $0x20] sm:$0xff] %v1028_v40  ;;  %v1031_v44 = vadd.f32 %v1183_v28, %v1030_v43 }
 0x38e   : > { %1081 = vst [vmem:[%s1642_s22 + $0x38] sm:$0xff] %v1039_v42 }
 0x38f   : > { %1079 = vst [vmem:[%s1642_s22 + $0x28] sm:$0xff] %v1031_v44 }
 0x391   : > { %v1359_v45 = vpop.f32.mrb[20].mxu1 }
 0x392   : > { %v1052_v46 = vadd.f32 %v1359_v45, %v1183_v28  ;;  %v1043_v47 = vpop.f32.mrb[21].mxu1 }
 0x393   : > { %v1044_v48 = vadd.f32 %v1183_v28, %v1043_v47  ;;  %v1360_v49 = vpop.f32.mrb[22].mxu1 }
 0x394   : > { %1084 = vst [vmem:[%s1642_s22 + $0x50] sm:$0xff] %v1052_v46  ;;  %v1055_v50 = vadd.f32 %v1360_v49, %v1183_v28  ;;  %v1046_v51 = vpop.f32.mrb[23].mxu1 }
 0x395   : > { %1082 = vst [vmem:[%s1642_s22 + $0x40] sm:$0xff] %v1044_v48  ;;  %v1047_v52 = vadd.f32 %v1183_v28, %v1046_v51 }
 0x396   : > { %1085 = vst [vmem:[%s1642_s22 + $0x58] sm:$0xff] %v1055_v50 }
 0x397   : > { %1083 = vst [vmem:[%s1642_s22 + $0x48] sm:$0xff] %v1047_v52 }
 0x399   : > { %v1363_v53 = vpop.f32.mrb[24].mxu1 }
 0x39a   : > { %v1068_v54 = vadd.f32 %v1363_v53, %v1183_v28  ;;  %v1059_v55 = vpop.f32.mrb[25].mxu1 }
 0x39b   : > { %v1060_v56 = vadd.f32 %v1183_v28, %v1059_v55  ;;  %v1364_v57 = vpop.f32.mrb[26].mxu1 }
 0x39c   : > { %1088 = vst [vmem:[%s1642_s22 + $0x70] sm:$0xff] %v1068_v54  ;;  %v1071_v58 = vadd.f32 %v1364_v57, %v1183_v28  ;;  %v1062_v59 = vpop.f32.mrb[27].mxu1 }
 0x39d   : > { %1086 = vst [vmem:[%s1642_s22 + $0x60] sm:$0xff] %v1060_v56  ;;  %v1063_v60 = vadd.f32 %v1183_v28, %v1062_v59 }
 0x39e   : > { %1089 = vst [vmem:[%s1642_s22 + $0x78] sm:$0xff] %v1071_v58 }
 0x39f   : > { %1087 = vst [vmem:[%s1642_s22 + $0x68] sm:$0xff] %v1063_v60 }
 0x3a0 PF: > { %s19_s30 = sadd.s32 1, %s1420_s30  }
 0x3a1   : > { %p16_p4 = scmp.ge.s32.totalorder %s19_s30, 6  }
 0x3a3   :  { %18 = sbr.rel (!%p16_p4) target bundleno = 1 (0x1), region = 86 }

// kernel: encoder_processor_decoder.9
= control target key start
LH: loop header
LB: loop body
LE: loop exit
PB: predicated region body
PF: predicated region fallthrough
CT: control target
= control target key end

     0   :  { %s2864_s0 = inlined_call_operand.vmem [shape: s32[512], index: 0, kind: input, shape index: {}]   ;;  %s2865_s2 = inlined_call_operand.vmem [shape: f32[512,128], index: 2, kind: input, shape index: {}]   ;;  %s2866_s3 = inlined_call_operand.vmem [shape: f32[256,128], index: 3, kind: input, shape index: {}]   ;;  %s2867_s4 = inlined_call_operand.vmem [shape: bf16[128,128], index: 4, kind: input, shape index: {}]   ;;  %s2868_s5 = inlined_call_operand.vmem [shape: bf16[128,128], index: 5, kind: input, shape index: {}]   ;;  %s2869_s6 = inlined_call_operand.vmem [shape: bf16[128,128], index: 6, kind: input, shape index: {}]   ;;  %s2870_s7 = inlined_call_operand.vmem [shape: f32[1,128], index: 7, kind: input, shape index: {}]   ;;  %s2871_s8 = inlined_call_operand.vmem [shape: bf16[128,128], index: 8, kind: input, shape index: {}]   ;;  %s2872_s9 = inlined_call_operand.vmem [shape: f32[1,128], index: 9, kind: input, shape index: {}]   ;;  %s2873_s10 = inlined_call_operand.vmem [shape: bf16[128,128], index: 10, kind: input, shape index: {}]   ;;  %s2874_s11 = inlined_call_operand.vmem [shape: f32[1,128], index: 11, kind: input, shape index: {}]   ;;  %s2875_s12 = inlined_call_operand.vmem [shape: bf16[128,128], index: 12, kind: input, shape index: {}]   ;;  %s2876_s13 = inlined_call_operand.vmem [shape: f32[1,128], index: 13, kind: input, shape index: {}]   ;;  %s2877_s14 = inlined_call_operand.vmem [shape: f32[512,128], index: 14, kind: output, shape index: {0}]   ;;  %s2878_s15 = inlined_call_operand.vmem [shape: f32[256,128], index: 15, kind: output, shape index: {1}]   ;;  %s2879_s1 = inlined_call_operand.vmem [shape: s32[512], index: 1, kind: input, shape index: {}]  }
   0x1   :  { %s21_s20 = sshll.u32 %s2864_s0, 4  ;;  %s25_s23 = sshll.u32 %s2879_s1, 4  ;;  %s22_s20 = int_to_ptr.vmem [resolvable:$true] %s21_s20  ;;  %s26_s23 = int_to_ptr.vmem [resolvable:$true] %s25_s23 }
   0x2   :  { %s2284_s24 = scalar_lea.vmem %s22_s20, 64  ;;  %p2289_p1 = scmp.lt.s32.totalorder %s22_s20, %s22_s20 }
   0x3   :  { %p2285_p0 = scmp.ne.s32.totalorder %s22_s20, %s2284_s24  ;;  %p2290_p2 = scmp.lt.s32.totalorder %s2284_s24, %s2284_s24 }
   0x5   :  { %p2291_p3 = por %p2290_p2, %p2289_p1 }
   0x7   :  { %p2292_p4 = pnand %p2291_p3, %p2285_p0 }
   0x9   :  { %2295 = shalt.err (!%p2292_p4)  }
   0xa   :  { %s2334_s25 = smov [#allocation6]   ;;  %s2296_s26 = scalar_lea.vmem %s26_s23, 64 }
   0xb   :  { %24 = dma.vmem_to_smem %s22_s20, 64, %s2334_s25, [#allocation5] }
   0xc   :  { %p2297_p5 = scmp.ne.s32.totalorder %s26_s23, %s2296_s26  ;;  %p2301_p6 = scmp.lt.s32.totalorder %s26_s23, %s26_s23 }
   0xd   :  { %p2302_p7 = scmp.lt.s32.totalorder %s2296_s26, %s2296_s26 }
   0xf   :  { %p2303_p8 = por %p2302_p7, %p2301_p6 }
  0x11   :  { %p2304_p9 = pnand %p2303_p8, %p2297_p5 }
  0x13   :  { %2307 = shalt.err (!%p2304_p9)  }
  0x14   :  { %s2335_s0 = smov [#allocation7]  }
  0x15   :  { %28 = dma.vmem_to_smem %s26_s23, 64, %s2335_s0, [#allocation5] }
  0x16   :  { %2320 = dma.done.wait [#allocation5], 128 }
  0x17   :  { %2321 = vsyncadd [#allocation5], 4294967168 }
  0x18   :  { %30 = sfence }
  0x19   :  { %s2423_s1 = smov 0  }
  0x1a LB: > { %s2429_s27 = sadd.s32 4294967295, %s2324_s1   ;;  %p1828_p10 = scmp.ge.s32.totalorder %s2324_s1, 1  ;;  %s2324_s1 = sphi %s2423_s1, %s36_s1  }
  0x1b   : > { %p398_p11 = scmp.lt.s32.totalorder %s2324_s1, 5 }
  0x1d   : > { %p399_p12 = pnand %p1828_p10, %p398_p11 }
  0x1e   : > { %s1829_s28 = sshll.u32 (!%p399_p12), %s2429_s27, 4  ;;  %s2880_s29 = sshll.u32 (!%p399_p12), %s2429_s27, 7 }
  0x1f   : > { %402 = sbr.rel (%p399_p12) target bundleno = 1082 (0x43a), region = 68  ;;  %p443_p13 = scmp.lt.s32.totalorder (!%p399_p12), %s1829_s28, 63 }
  0x20   : > { %p1834_p0 = scmp.ne.s32.totalorder (!%p399_p12), %s2429_s27, 0 }
  0x26   : > { %s2883_s28 = smov (!%p443_p13, %s1829_s28), 63  ;;  %459 = sbr.rel (%p1834_p0) target bundleno = 56 (0x38), region = 72 }
  0x27   : > { %s1830_s30 = sshll.u32 %s2883_s28, 3  ;;  %v2336_v0 = vmov (!%p1834_p0), 0.0  }
  0x28   : > { %s2438_s18 = scalar_lea.vmem %s2865_s2, %s1830_s30  ;;  %s2443_s21 = scalar_lea.vmem %s2877_s14, %s1830_s30  ;;  %460 = vst [vmem:[%s2878_s15] sm:$0xff] (!%p1834_p0), %v2336_v0  ;;  %461 = vst [vmem:[%s2878_s15 + $0x8] sm:$0xff] (!%p1834_p0), %v2336_v0 }
  0x29   : > { %462 = vst [vmem:[%s2878_s15 + $0x10] sm:$0xff] (!%p1834_p0), %v2336_v0  ;;  %463 = vst [vmem:[%s2878_s15 + $0x18] sm:$0xff] (!%p1834_p0), %v2336_v0 }
  0x2a   : > { %464 = vst [vmem:[%s2878_s15 + $0x20] sm:$0xff] (!%p1834_p0), %v2336_v0  ;;  %465 = vst [vmem:[%s2878_s15 + $0x28] sm:$0xff] (!%p1834_p0), %v2336_v0 }
  0x2b   : > { %466 = vst [vmem:[%s2878_s15 + $0x30] sm:$0xff] (!%p1834_p0), %v2336_v0  ;;  %467 = vst [vmem:[%s2878_s15 + $0x38] sm:$0xff] (!%p1834_p0), %v2336_v0 }
  0x2c   : > { %468 = vst [vmem:[%s2878_s15 + $0x40] sm:$0xff] (!%p1834_p0), %v2336_v0  ;;  %469 = vst [vmem:[%s2878_s15 + $0x48] sm:$0xff] (!%p1834_p0), %v2336_v0 }
  0x2d   : > { %470 = vst [vmem:[%s2878_s15 + $0x50] sm:$0xff] %v2336_v0  ;;  %471 = vst [vmem:[%s2878_s15 + $0x58] sm:$0xff] %v2336_v0 }
  0x2e   : > { %472 = vst [vmem:[%s2878_s15 + $0x60] sm:$0xff] %v2336_v0  ;;  %473 = vst [vmem:[%s2878_s15 + $0x68] sm:$0xff] %v2336_v0 }
  0x2f   : > { %474 = vst [vmem:[%s2878_s15 + $0x70] sm:$0xff] %v2336_v0  ;;  %475 = vst [vmem:[%s2878_s15 + $0x78] sm:$0xff] %v2336_v0 }
  0x30   : > { %476 = vst [vmem:[%s2878_s15 + $0x80] sm:$0xff] %v2336_v0  ;;  %477 = vst [vmem:[%s2878_s15 + $0x88] sm:$0xff] %v2336_v0 }
  0x31   : > { %478 = vst [vmem:[%s2878_s15 + $0x90] sm:$0xff] %v2336_v0  ;;  %479 = vst [vmem:[%s2878_s15 + $0x98] sm:$0xff] %v2336_v0 }
  0x32   : > { %480 = vst [vmem:[%s2878_s15 + $0xa0] sm:$0xff] %v2336_v0  ;;  %481 = vst [vmem:[%s2878_s15 + $0xa8] sm:$0xff] %v2336_v0 }
  0x33   : > { %482 = vst [vmem:[%s2878_s15 + $0xb0] sm:$0xff] %v2336_v0  ;;  %483 = vst [vmem:[%s2878_s15 + $0xb8] sm:$0xff] %v2336_v0 }
  0x34   : > { %484 = vst [vmem:[%s2878_s15 + $0xc0] sm:$0xff] %v2336_v0  ;;  %485 = vst [vmem:[%s2878_s15 + $0xc8] sm:$0xff] %v2336_v0 }
  0x35   : > { %486 = vst [vmem:[%s2878_s15 + $0xd0] sm:$0xff] %v2336_v0  ;;  %487 = vst [vmem:[%s2878_s15 + $0xd8] sm:$0xff] %v2336_v0 }
  0x36   : > { %488 = vst [vmem:[%s2878_s15 + $0xe0] sm:$0xff] %v2336_v0  ;;  %489 = vst [vmem:[%s2878_s15 + $0xe8] sm:$0xff] %v2336_v0 }
  0x37   : > { %490 = vst [vmem:[%s2878_s15 + $0xf0] sm:$0xff] %v2336_v0  ;;  %491 = vst [vmem:[%s2878_s15 + $0xf8] sm:$0xff] %v2336_v0 }
  0x38 PF: > { %s2326_s26 = smov 0  }
  0x39 LB: >> { %s498_s0 = sadd.s32 %s2328_s26, %s2880_s29  ;;  %s502_s24 = scalar_lea.vmem [#allocation2], %s2328_s26  ;;  %s2328_s26 = sphi %s2326_s26, %s497_s26  }
  0x3a   : >> { %s499_s28 = sld [smem:[#allocation6 + %s498_s0]]  ;;  %s507_s25 = scalar_lea.vmem [#allocation3], %s2328_s26 }
  0x3b   : >> { %s504_s16 = sld [smem:[#allocation7 + %s498_s0]]  ;;  %s497_s26 = sadd.s32 1, %s2328_s26  }
  0x3c   : >> { %p494_p1 = scmp.ge.s32.totalorder %s497_s26, 128  }
  0x3d   : > { %v2236_v3 = vld [vmem:[%s2868_s5] sm:$0xff] (%p494_p1)   ;;  %v2237_v4 = vld [vmem:[%s2868_s5 + $0x8] sm:$0xff] (%p494_p1)   ;;  %v2238_v5 = vld [vmem:[%s2868_s5 + $0x10] sm:$0xff] (%p494_p1)   ;;  %s2330_s22 = smov (%p494_p1), 0  }
  0x3e   : > { %496 = sbr.rel (!%p494_p1) target bundleno = 57 (0x39), region = 130  ;;  %1985 = vmatprep.subr.bf16.mxu0 (%p494_p1), %v2236_v3  ;;  %v2239_v6 = vld [vmem:[%s2868_s5 + $0x18] sm:$0xff] (%p494_p1)   ;;  %v2240_v10 = vld [vmem:[%s2868_s5 + $0x20] sm:$0xff] (%p494_p1)   ;;  %v2241_v11 = vld [vmem:[%s2868_s5 + $0x28] sm:$0xff] (%p494_p1)  }
  0x3f   : > { %1986 = vmatpush3.bf16.msra.mxu0 (%p494_p1), %v2236_v3  ;;  %v2242_v12 = vld [vmem:[%s2868_s5 + $0x30] sm:$0xff] (%p494_p1)   ;;  %v2243_v13 = vld [vmem:[%s2868_s5 + $0x38] sm:$0xff] (%p494_p1)   ;;  %v2244_v16 = vld [vmem:[%s2867_s4] sm:$0xff] (%p494_p1)  }
  0x40   : >> { %s500_s19 = scalar_lea.vmem %s2866_s3, %s499_s28  ;;  %1987 = vmatprep.subr.bf16.mxu0 (%p494_p1), %v2237_v4  ;;  %v2245_v21 = vld [vmem:[%s2867_s4 + $0x8] sm:$0xff] (%p494_p1)   ;;  %v2246_v24 = vld [vmem:[%s2867_s4 + $0x10] sm:$0xff] (%p494_p1)   ;;  %v2247_v28 = vld [vmem:[%s2867_s4 + $0x18] sm:$0xff] (%p494_p1)  }
  0x41   : >> { %s505_s23 = scalar_lea.vmem %s2866_s3, %s504_s16  ;;  %v501_v1 = vld [vmem:[%s500_s19] sm:$0x1]  ;;  %v2261_v33 = vld [vmem:[%s2871_s8 + $0x8] sm:$0xff] (%p494_p1)   ;;  %v2262_v37 = vld [vmem:[%s2871_s8 + $0x10] sm:$0xff] (%p494_p1)  }
  0x42   : >> { %v506_v2 = vld [vmem:[%s505_s23] sm:$0x1]  ;;  %503 = vst [vmem:[%s502_s24] sm:$0x1] %v501_v1  ;;  %v2249_v39 = vld [vmem:[%s2867_s4 + $0x28] sm:$0xff] (%p494_p1)   ;;  %v2263_v41 = vld [vmem:[%s2871_s8 + $0x18] sm:$0xff] (%p494_p1)  }
  0x43   : >> { %508 = vst [vmem:[%s507_s25] sm:$0x1] %v506_v2  ;;  %1988 = vmatpush3.bf16.msra.mxu0 (%p494_p1), %v2237_v4  ;;  %v2260_v30 = vld [vmem:[%s2871_s8] sm:$0xff] (%p494_p1)   ;;  %v2250_v44 = vld [vmem:[%s2867_s4 + $0x30] sm:$0xff] (%p494_p1)   ;;  %v2251_v49 = vld [vmem:[%s2867_s4 + $0x38] sm:$0xff] (%p494_p1)  }
  0x44   : > { %1989 = vmatprep.subr.bf16.mxu0 (%p494_p1), %v2238_v5  ;;  %v2248_v34 = vld [vmem:[%s2867_s4 + $0x20] sm:$0xff] (%p494_p1)   ;;  %2081 = vmatprep.subr.bf16.mxu1 (%p494_p1), %v2260_v30  ;;  %v2265_v51 = vld [vmem:[%s2871_s8 + $0x28] sm:$0xff] (%p494_p1)   ;;  %v2254_v62 = vld [vmem:[%s2869_s6 + $0x10] sm:$0xff] (%p494_p1)  }
  0x45   : > { %2082 = vmatpush3.bf16.msra.mxu1 %v2260_v30  ;;  %v2264_v47 = vld [vmem:[%s2871_s8 + $0x20] sm:$0xff]   ;;  %v2253_v59 = vld [vmem:[%s2869_s6 + $0x8] sm:$0xff]   ;;  %v2255_v3 = vld [vmem:[%s2869_s6 + $0x18] sm:$0xff]  }
  0x46   : > { %2083 = vmatprep.subr.bf16.mxu1 %v2261_v33  ;;  %v2252_v54 = vld [vmem:[%s2869_s6] sm:$0xff]  }
  0x47   : > { %1990 = vmatpush3.bf16.msra.mxu0 %v2238_v5 }
  0x48   : > { %1991 = vmatprep.subr.bf16.mxu0 %v2239_v6 }
  0x49   : > { %2084 = vmatpush3.bf16.msra.mxu1 %v2261_v33  ;;  %v525_v45 = vld [vmem:[#allocation2] sm:$0xff]  ;;  %v526_v46 = vld [vmem:[#allocation2 + $0x8] sm:$0xff]  ;;  %v527_v52 = vld [vmem:[#allocation2 + $0x10] sm:$0xff] }
  0x4a   : > { %v565_v7 = vld [vmem:[#allocation3] sm:$0xff]  ;;  %v566_v8 = vld [vmem:[#allocation3 + $0x8] sm:$0xff]  ;;  %v567_v14 = vld [vmem:[#allocation3 + $0x10] sm:$0xff]  ;;  %2085 = vmatprep.subr.bf16.mxu1 %v2262_v37  ;;  %v541_v50 = vpack.c.bf16 %v526_v46, %v525_v45 }
  0x4b   : > { %v581_v9 = vpack.c.bf16 %v566_v8, %v565_v7  ;;  %1992 = vmatpush3.bf16.msra.mxu0 %v2239_v6  ;;  %v568_v15 = vld [vmem:[#allocation3 + $0x18] sm:$0xff]  ;;  %v569_v17 = vld [vmem:[#allocation3 + $0x20] sm:$0xff]  ;;  %v570_v18 = vld [vmem:[#allocation3 + $0x28] sm:$0xff] }
  0x4c   : > { %1993 = vmatprep.subr.bf16.mxu0 %v2240_v10  ;;  %v582_v19 = vpack.c.bf16 %v568_v15, %v567_v14  ;;  %v583_v20 = vpack.c.bf16 %v570_v18, %v569_v17  ;;  %v571_v22 = vld [vmem:[#allocation3 + $0x30] sm:$0xff]  ;;  %v572_v23 = vld [vmem:[#allocation3 + $0x38] sm:$0xff]  ;;  %v573_v25 = vld [vmem:[#allocation3 + $0x40] sm:$0xff] }
  0x4d   : > { %2001 = vmatprep.mubr.bf16.mxu0 %v581_v9  ;;  %v574_v26 = vld [vmem:[#allocation3 + $0x48] sm:$0xff]  ;;  %v584_v27 = vpack.c.bf16 %v572_v23, %v571_v22  ;;  %v575_v31 = vld [vmem:[#allocation3 + $0x50] sm:$0xff]  ;;  %v576_v32 = vld [vmem:[#allocation3 + $0x58] sm:$0xff]  ;;  %2086 = vmatpush3.bf16.msra.mxu1 %v2262_v37 }
  0x4e   : > { %v585_v29 = vpack.c.bf16 %v574_v26, %v573_v25  ;;  %v577_v35 = vld [vmem:[#allocation3 + $0x60] sm:$0xff]  ;;  %v578_v36 = vld [vmem:[#allocation3 + $0x68] sm:$0xff]  ;;  %v586_v38 = vpack.c.bf16 %v576_v32, %v575_v31  ;;  %v579_v42 = vld [vmem:[#allocation3 + $0x70] sm:$0xff]  ;;  %2087 = vmatprep.subr.bf16.mxu1 %v2263_v41 }
  0x4f   : > { %1994 = vmatpush3.bf16.msra.mxu0 %v2240_v10  ;;  %v587_v40 = vpack.c.bf16 %v578_v36, %v577_v35  ;;  %v580_v43 = vld [vmem:[#allocation3 + $0x78] sm:$0xff]  ;;  %v529_v55 = vld [vmem:[#allocation2 + $0x20] sm:$0xff]  ;;  %v530_v56 = vld [vmem:[#allocation2 + $0x28] sm:$0xff] }
  0x50   : > { %1995 = vmatprep.subr.bf16.mxu0 %v2241_v11  ;;  %v588_v48 = vpack.c.bf16 %v580_v43, %v579_v42  ;;  %v528_v53 = vld [vmem:[#allocation2 + $0x18] sm:$0xff]  ;;  %v543_v58 = vpack.c.bf16 %v530_v56, %v529_v55  ;;  %v531_v60 = vld [vmem:[#allocation2 + $0x30] sm:$0xff]  ;;  %v533_v63 = vld [vmem:[#allocation2 + $0x40] sm:$0xff] }
  0x51   : > { %2088 = vmatpush3.bf16.msra.mxu1 %v2263_v41  ;;  %v542_v57 = vpack.c.bf16 %v528_v53, %v527_v52  ;;  %v532_v61 = vld [vmem:[#allocation2 + $0x38] sm:$0xff]  ;;  %v534_v0 = vld [vmem:[#allocation2 + $0x48] sm:$0xff]  ;;  %v535_v4 = vld [vmem:[#allocation2 + $0x50] sm:$0xff] }
  0x52   : > { %2089 = vmatprep.subr.bf16.mxu1 %v2264_v47  ;;  %v544_v1 = vpack.c.bf16 %v532_v61, %v531_v60  ;;  %v545_v2 = vpack.c.bf16 %v534_v0, %v533_v63  ;;  %v536_v5 = vld [vmem:[#allocation2 + $0x58] sm:$0xff]  ;;  %v2256_v6 = vld [vmem:[%s2869_s6 + $0x20] sm:$0xff]   ;;  %v538_v8 = vld [vmem:[#allocation2 + $0x68] sm:$0xff] }
  0x53   : > { %1996 = vmatpush3.bf16.msra.mxu0 %v2241_v11  ;;  %v537_v7 = vld [vmem:[#allocation2 + $0x60] sm:$0xff]  ;;  %v546_v9 = vpack.c.bf16 %v536_v5, %v535_v4  ;;  %v2257_v11 = vld [vmem:[%s2869_s6 + $0x28] sm:$0xff]   ;;  %v2258_v14 = vld [vmem:[%s2869_s6 + $0x30] sm:$0xff]  }
  0x54   : > { %1997 = vmatprep.subr.bf16.mxu0 %v2242_v12  ;;  %v547_v10 = vpack.c.bf16 %v538_v8, %v537_v7  ;;  %v2638_v15 = vld [vmem:[%s2438_s18] sm:$0xff]  ;;  %v2658_v23 = vld [vmem:[%s2438_s18 + $0x28] sm:$0xff]  ;;  %v2665_v26 = vld [vmem:[%s2438_s18 + $0x30] sm:$0xff] }
  0x55   : > { %2090 = vmatpush3.bf16.msra.mxu1 %v2264_v47  ;;  %v2655_v22 = vld [vmem:[%s2438_s18 + $0x20] sm:$0xff]  ;;  %v2681_v32 = vld [vmem:[%s2438_s18 + $0x50] sm:$0xff]  ;;  %v2684_v33 = vld [vmem:[%s2438_s18 + $0x58] sm:$0xff] }
  0x56   : > { %2091 = vmatprep.subr.bf16.mxu1 %v2265_v51  ;;  %v897_v25 = vpack.c.bf16 %v2658_v23, %v2655_v22  ;;  %v2690_v35 = vld [vmem:[%s2438_s18 + $0x68] sm:$0xff]  ;;  %v900_v36 = vpack.c.bf16 %v2684_v33, %v2681_v32  ;;  %v2266_v41 = vld [vmem:[%s2871_s8 + $0x30] sm:$0xff]   ;;  %v2267_v42 = vld [vmem:[%s2871_s8 + $0x38] sm:$0xff]  }
  0x57   : > { %1998 = vmatpush3.bf16.msra.mxu0 %v2242_v12  ;;  %v539_v12 = vld [vmem:[#allocation2 + $0x70] sm:$0xff]  ;;  %v2268_v43 = vld [vmem:[%s2873_s10] sm:$0xff]  }
  0x58   : > { %1999 = vmatprep.subr.bf16.mxu0 %v2243_v13 }
  0x59   : > { %2092 = vmatpush3.bf16.msra.mxu1 %v2265_v51 }
  0x5a   : > { %2093 = vmatprep.subr.bf16.mxu1 %v2266_v41 }
  0x5b   : > { %2000 = vmatpush3.bf16.msra.mxu0 %v2243_v13  ;;  %v540_v13 = vld [vmem:[#allocation2 + $0x78] sm:$0xff] }
  0x5c   : > { %2017 = vmatprep.subr.bf16.mxu0 %v2244_v16  ;;  %v548_v17 = vpack.c.bf16 %v540_v13, %v539_v12 }
  0x5d   : > { %2094 = vmatpush3.bf16.msra.mxu1 %v2266_v41 }
  0x5e   : > { %2002 = vmatmul.mubr.bf16.vlgmr.msra.gmra.mrb[0].mxu0 %v582_v19  ;;  %v2259_v19 = vld [vmem:[%s2869_s6 + $0x38] sm:$0xff]   ;;  %2095 = vmatprep.subr.bf16.mxu1 %v2267_v42 }
  0x5f   : > { %2018 = vmatpush3.bf16.msra.mxu0 %v2244_v16  ;;  %2005 = vmatprep.mubr.bf16.mxu0 %v583_v20  ;;  %v2641_v16 = vld [vmem:[%s2438_s18 + $0x8] sm:$0xff]  ;;  %v2649_v20 = vld [vmem:[%s2438_s18 + $0x10] sm:$0xff] }
  0x60   : > { %2019 = vmatprep.subr.bf16.mxu0 %v2245_v21  ;;  %v895_v18 = vpack.c.bf16 %v2641_v16, %v2638_v15 }
  0x61   : > { %2096 = vmatpush3.bf16.msra.mxu1 %v2267_v42 }
  0x62   : > { %2113 = vmatprep.subr.bf16.mxu1 %v2268_v43 }
  0x63   : > { %2020 = vmatpush3.bf16.msra.mxu0 %v2245_v21  ;;  %v2652_v21 = vld [vmem:[%s2438_s18 + $0x18] sm:$0xff] }
  0x64   : > { %2021 = vmatprep.subr.bf16.mxu0 %v2246_v24 }
  0x66   : > { %2006 = vmatmul.mubr.bf16.gmra.mrb[4].mxu0 %v584_v27  ;;  %v2668_v27 = vld [vmem:[%s2438_s18 + $0x38] sm:$0xff] }
  0x67   : > { %2022 = vmatpush3.bf16.msra.mxu0 %v2246_v24  ;;  %2009 = vmatprep.mubr.bf16.mxu0 %v585_v29  ;;  %v896_v24 = vpack.c.bf16 %v2652_v21, %v2649_v20  ;;  %v2674_v29 = vld [vmem:[%s2438_s18 + $0x48] sm:$0xff]  ;;  %v898_v30 = vpack.c.bf16 %v2668_v27, %v2665_v26 }
  0x68   : > { %2023 = vmatprep.subr.bf16.mxu0 %v2247_v28 }
  0x6b   : > { %2024 = vmatpush3.bf16.msra.mxu0 %v2247_v28  ;;  %v2671_v28 = vld [vmem:[%s2438_s18 + $0x40] sm:$0xff] }
  0x6c   : > { %2025 = vmatprep.subr.bf16.mxu0 %v2248_v34  ;;  %v899_v31 = vpack.c.bf16 %v2674_v29, %v2671_v28 }
  0x6e   : > { %2010 = vmatmul.mubr.bf16.gmra.mrb[8].mxu0 %v586_v38  ;;  %v2697_v38 = vld [vmem:[%s2438_s18 + $0x70] sm:$0xff] }
  0x6f   : > { %2026 = vmatpush3.bf16.msra.mxu0 %v2248_v34  ;;  %2013 = vmatprep.mubr.bf16.mxu0 %v587_v40  ;;  %v2687_v34 = vld [vmem:[%s2438_s18 + $0x60] sm:$0xff] }
  0x70   : > { %2027 = vmatprep.subr.bf16.mxu0 %v2249_v39  ;;  %v901_v37 = vpack.c.bf16 %v2690_v35, %v2687_v34 }
  0x73   : > { %2028 = vmatpush3.bf16.msra.mxu0 %v2249_v39  ;;  %v2700_v39 = vld [vmem:[%s2438_s18 + $0x78] sm:$0xff] }
  0x74   : > { %2029 = vmatprep.subr.bf16.mxu0 %v2250_v44  ;;  %v902_v40 = vpack.c.bf16 %v2700_v39, %v2697_v38 }
  0x76   : > { %2014 = vmatmul.mubr.bf16.gmra.mrb[12].mxu0 %v588_v48 }
  0x77   : > { %2030 = vmatpush3.bf16.msra.mxu0 %v2250_v44  ;;  %2033 = vmatprep.mubr.bf16.mxu0 %v541_v50  ;;  %v2716_v44 = vld [vmem:[%s2870_s7] ss:$0 sm:$0xff] }
  0x78   : > { %2031 = vmatprep.subr.bf16.mxu0 %v2251_v49 }
  0x7b   : > { %2032 = vmatpush3.bf16.msra.mxu0 %v2251_v49 }
  0x7c   : > { %2049 = vmatprep.subr.bf16.mxu0 %v2252_v54 }
  0x7e   : > { %2034 = vmatmul.mubr.bf16.vlgmr.msra.gmra.mrb[0].mxu0 %v542_v57 }
  0x7f   : > { %2050 = vmatpush3.bf16.msra.mxu0 %v2252_v54  ;;  %2037 = vmatprep.mubr.bf16.mxu0 %v543_v58 }
  0x80   : > { %2051 = vmatprep.subr.bf16.mxu0 %v2253_v59 }
  0x83   : > { %2052 = vmatpush3.bf16.msra.mxu0 %v2253_v59 }
  0x84   : > { %2053 = vmatprep.subr.bf16.mxu0 %v2254_v62 }
  0x86   : > { %2038 = vmatmul.mubr.bf16.gmra.mrb[4].mxu0 %v544_v1 }
  0x87   : > { %2054 = vmatpush3.bf16.msra.mxu0 %v2254_v62  ;;  %2041 = vmatprep.mubr.bf16.mxu0 %v545_v2  ;;  %v2269_v62 = vld [vmem:[%s2873_s10 + $0x8] sm:$0xff]  }
  0x88   : > { %2055 = vmatprep.subr.bf16.mxu0 %v2255_v3 }
  0x8b   : > { %2056 = vmatpush3.bf16.msra.mxu0 %v2255_v3 }
  0x8c   : > { %2057 = vmatprep.subr.bf16.mxu0 %v2256_v6 }
  0x8e   : > { %2042 = vmatmul.mubr.bf16.gmra.mrb[8].mxu0 %v546_v9 }
  0x8f   : > { %2058 = vmatpush3.bf16.msra.mxu0 %v2256_v6  ;;  %2045 = vmatprep.mubr.bf16.mxu0 %v547_v10  ;;  %v2270_v6 = vld [vmem:[%s2873_s10 + $0x10] sm:$0xff]  }
  0x90   : > { %2059 = vmatprep.subr.bf16.mxu0 %v2257_v11 }
  0x93   : > { %2060 = vmatpush3.bf16.msra.mxu0 %v2257_v11 }
  0x94   : > { %2061 = vmatprep.subr.bf16.mxu0 %v2258_v14 }
  0x96   : > { %2046 = vmatmul.mubr.bf16.gmra.mrb[12].mxu0 %v548_v17 }
  0x97   : > { %2062 = vmatpush3.bf16.msra.mxu0 %v2258_v14  ;;  %2065 = vmatprep.mubr.bf16.mxu0 %v895_v18  ;;  %v2271_v14 = vld [vmem:[%s2873_s10 + $0x18] sm:$0xff]  }
  0x98   : > { %2063 = vmatprep.subr.bf16.mxu0 %v2259_v19 }
  0x9b   : > { %2064 = vmatpush3.bf16.msra.mxu0 %v2259_v19 }
  0x9e   : > { %2066 = vmatmul.mubr.bf16.vlgmr.msra.gmra.mrb[0].mxu0 %v896_v24 }
  0x9f   : > { %2069 = vmatprep.mubr.bf16.mxu0 %v897_v25 }
  0xa6   : > { %2070 = vmatmul.mubr.bf16.gmra.mrb[4].mxu0 %v898_v30 }
  0xa7   : > { %2073 = vmatprep.mubr.bf16.mxu0 %v899_v31 }
  0xae   : > { %2074 = vmatmul.mubr.bf16.gmra.mrb[8].mxu0 %v900_v36  ;;  %v2272_v36 = vld [vmem:[%s2873_s10 + $0x20] sm:$0xff]  }
  0xaf   : > { %2077 = vmatprep.mubr.bf16.mxu0 %v901_v37 }
  0xb6   : > { %2078 = vmatmul.mubr.bf16.gmra.mrb[12].mxu0 %v902_v40 }
 0x171   : > { %v2067_v45 = vpop.f32.mrb[0].mxu0 }
 0x172   : > { %v1089_v46 = vadd.f32 %v2067_v45, %v2716_v44  ;;  %v1001_v47 = vpop.f32.mrb[1].mxu0 }
 0x173   : > { %v1087_v48 = vadd.f32 %v2716_v44, %v1001_v47  ;;  %v2068_v49 = vpop.f32.mrb[2].mxu0  ;;  %v2273_v47 = vld [vmem:[%s2873_s10 + $0x28] sm:$0xff]  }
 0x174   : > { %v1090_v50 = vadd.f32 %v2068_v49, %v2716_v44  ;;  %v1004_v51 = vpop.f32.mrb[3].mxu0  ;;  %v1105_v53 = vmax.f32 %v1089_v46, 0.0 }
 0x175   : > { %v1088_v52 = vadd.f32 %v2716_v44, %v1004_v51  ;;  %v1103_v55 = vmax.f32 %v1087_v48, 0.0 }
 0x176   : > { %v1106_v54 = vmax.f32 %v1090_v50, 0.0 }
 0x177   : > { %v1104_v56 = vmax.f32 %v1088_v52, 0.0 }
 0x178   : > { %v1120_v57 = vpack.c.bf16 %v1106_v54, %v1105_v53 }
 0x179   : > { %v2071_v58 = vpop.f32.mrb[4].mxu0  ;;  %v1119_v59 = vpack.c.bf16 %v1104_v56, %v1103_v55 }
 0x17a   : > { %v1093_v60 = vadd.f32 %v2071_v58, %v2716_v44  ;;  %v1017_v61 = vpop.f32.mrb[5].mxu0 }
 0x17b   : > { %v1091_v63 = vadd.f32 %v2716_v44, %v1017_v61  ;;  %v2072_v0 = vpop.f32.mrb[6].mxu0  ;;  %2097 = vmatprep.mubr.bf16.mxu1 %v1119_v59  ;;  %v2274_v59 = vld [vmem:[%s2873_s10 + $0x30] sm:$0xff]   ;;  %v2761_v61 = vld [vmem:[%s2872_s9] ss:$0 sm:$0xff] }
 0x17c   : > { %v1094_v1 = vadd.f32 %v2072_v0, %v2716_v44  ;;  %v1020_v2 = vpop.f32.mrb[7].mxu0  ;;  %2098 = vmatmul.mubr.bf16.vlgmr.msra.gmra.mrb[0].mxu1 %v1120_v57  ;;  %v1109_v4 = vmax.f32 %v1093_v60, 0.0  ;;  %v2276_v60 = vld [vmem:[%s2875_s12] sm:$0xff]  }
 0x17d   : > { %v1092_v3 = vadd.f32 %v2716_v44, %v1020_v2  ;;  %2114 = vmatpush3.bf16.msra.mxu1 %v2268_v43  ;;  %v1107_v7 = vmax.f32 %v1091_v63, 0.0 }
 0x17e   : > { %v1110_v5 = vmax.f32 %v1094_v1, 0.0  ;;  %2115 = vmatprep.subr.bf16.mxu1 %v2269_v62 }
 0x17f   : > { %v1108_v8 = vmax.f32 %v1092_v3, 0.0 }
 0x180   : > { %v1122_v9 = vpack.c.bf16 %v1110_v5, %v1109_v4 }
 0x181   : > { %v1121_v10 = vpack.c.bf16 %v1108_v8, %v1107_v7  ;;  %v2075_v11 = vpop.f32.mrb[8].mxu0  ;;  %2116 = vmatpush3.bf16.msra.mxu1 %v2269_v62 }
 0x182   : > { %v1097_v12 = vadd.f32 %v2075_v11, %v2716_v44  ;;  %v1033_v13 = vpop.f32.mrb[9].mxu0  ;;  %2117 = vmatprep.subr.bf16.mxu1 %v2270_v6 }
 0x183   : > { %v1095_v17 = vadd.f32 %v2716_v44, %v1033_v13  ;;  %v2076_v18 = vpop.f32.mrb[10].mxu0  ;;  %2101 = vmatprep.mubr.bf16.mxu1 %v1121_v10 }
 0x184   : > { %v1098_v19 = vadd.f32 %v2076_v18, %v2716_v44  ;;  %v1036_v24 = vpop.f32.mrb[11].mxu0  ;;  %2102 = vmatmul.mubr.bf16.gmra.mrb[4].mxu1 %v1122_v9  ;;  %v1113_v30 = vmax.f32 %v1097_v12, 0.0 }
 0x185   : > { %v1096_v25 = vadd.f32 %v2716_v44, %v1036_v24  ;;  %2118 = vmatpush3.bf16.msra.mxu1 %v2270_v6  ;;  %v1111_v37 = vmax.f32 %v1095_v17, 0.0  ;;  %v2277_v17 = vld [vmem:[%s2875_s12 + $0x8] sm:$0xff]  }
 0x186   : > { %v1114_v31 = vmax.f32 %v1098_v19, 0.0  ;;  %2119 = vmatprep.subr.bf16.mxu1 %v2271_v14 }
 0x187   : > { %v1112_v40 = vmax.f32 %v1096_v25, 0.0 }
 0x188   : > { %v1124_v41 = vpack.c.bf16 %v1114_v31, %v1113_v30 }
 0x189   : > { %v1123_v42 = vpack.c.bf16 %v1112_v40, %v1111_v37  ;;  %v2079_v43 = vpop.f32.mrb[12].mxu0  ;;  %2120 = vmatpush3.bf16.msra.mxu1 %v2271_v14  ;;  %v2278_v37 = vld [vmem:[%s2875_s12 + $0x10] sm:$0xff]  }
 0x18a   : > { %v1101_v45 = vadd.f32 %v2079_v43, %v2716_v44  ;;  %v1049_v46 = vpop.f32.mrb[13].mxu0  ;;  %2121 = vmatprep.subr.bf16.mxu1 %v2272_v36 }
 0x18b   : > { %v1099_v48 = vadd.f32 %v2716_v44, %v1049_v46  ;;  %v2080_v49 = vpop.f32.mrb[14].mxu0  ;;  %2105 = vmatprep.mubr.bf16.mxu1 %v1123_v42 }
 0x18c   : > { %v1102_v50 = vadd.f32 %v2080_v49, %v2716_v44  ;;  %v1052_v51 = vpop.f32.mrb[15].mxu0  ;;  %2106 = vmatmul.mubr.bf16.gmra.mrb[8].mxu1 %v1124_v41  ;;  %v1117_v53 = vmax.f32 %v1101_v45, 0.0 }
 0x18d   : > { %v1100_v52 = vadd.f32 %v2716_v44, %v1052_v51  ;;  %2122 = vmatpush3.bf16.msra.mxu1 %v2272_v36  ;;  %v1115_v55 = vmax.f32 %v1099_v48, 0.0  ;;  %v2275_v44 = vld [vmem:[%s2873_s10 + $0x38] sm:$0xff]  }
 0x18e   : > { %v1118_v54 = vmax.f32 %v1102_v50, 0.0  ;;  %2123 = vmatprep.subr.bf16.mxu1 %v2273_v47  ;;  %v2279_v48 = vld [vmem:[%s2875_s12 + $0x18] sm:$0xff]  }
 0x18f   : > { %v1116_v56 = vmax.f32 %v1100_v52, 0.0 }
 0x190   : > { %v1126_v57 = vpack.c.bf16 %v1118_v54, %v1117_v53 }
 0x191   : > { %v1125_v58 = vpack.c.bf16 %v1116_v56, %v1115_v55  ;;  %2124 = vmatpush3.bf16.msra.mxu1 %v2273_v47  ;;  %v2280_v56 = vld [vmem:[%s2875_s12 + $0x20] sm:$0xff]  }
 0x192   : > { %2125 = vmatprep.subr.bf16.mxu1 %v2274_v59 }
 0x193   : > { %2109 = vmatprep.mubr.bf16.mxu1 %v1125_v58 }
 0x194   : > { %2110 = vmatmul.mubr.bf16.gmra.mrb[12].mxu1 %v1126_v57 }
 0x195   : > { %2126 = vmatpush3.bf16.msra.mxu1 %v2274_v59 }
 0x196   : > { %2127 = vmatprep.subr.bf16.mxu1 %v2275_v44 }
 0x199   : > { %2128 = vmatpush3.bf16.msra.mxu1 %v2275_v44 }
 0x19a   : > { %2145 = vmatprep.subr.bf16.mxu1 %v2276_v60 }
 0x24f   : > { %v2099_v62 = vpop.f32.mrb[0].mxu1 }
 0x250   : > { %v1241_v63 = vadd.f32 %v2099_v62, %v2761_v61  ;;  %v1232_v0 = vpop.f32.mrb[1].mxu1 }
 0x251   : > { %v1233_v1 = vadd.f32 %v2761_v61, %v1232_v0  ;;  %v2100_v2 = vpop.f32.mrb[2].mxu1  ;;  %v2281_v0 = vld [vmem:[%s2875_s12 + $0x28] sm:$0xff]  }
 0x252   : > { %v1244_v3 = vadd.f32 %v2100_v2, %v2761_v61  ;;  %v1235_v4 = vpop.f32.mrb[3].mxu1  ;;  %v1297_v6 = vmax.f32 %v1241_v63, 0.0 }
 0x253   : > { %v1236_v5 = vadd.f32 %v2761_v61, %v1235_v4  ;;  %v1295_v8 = vmax.f32 %v1233_v1, 0.0 }
 0x254   : > { %v1298_v7 = vmax.f32 %v1244_v3, 0.0 }
 0x255   : > { %v1296_v9 = vmax.f32 %v1236_v5, 0.0 }
 0x256   : > { %v1312_v10 = vpack.c.bf16 %v1298_v7, %v1297_v6 }
 0x257   : > { %v1311_v11 = vpack.c.bf16 %v1296_v9, %v1295_v8  ;;  %v2103_v12 = vpop.f32.mrb[4].mxu1 }
 0x258   : > { %v1257_v13 = vadd.f32 %v2103_v12, %v2761_v61  ;;  %v1248_v14 = vpop.f32.mrb[5].mxu1  ;;  %v2282_v12 = vld [vmem:[%s2875_s12 + $0x30] sm:$0xff]  }
 0x259   : > { %v1249_v18 = vadd.f32 %v2761_v61, %v1248_v14  ;;  %v2104_v19 = vpop.f32.mrb[6].mxu1  ;;  %2129 = vmatprep.mubr.bf16.mxu1 %v1311_v11 }
 0x25a   : > { %v1260_v24 = vadd.f32 %v2104_v19, %v2761_v61  ;;  %v1251_v25 = vpop.f32.mrb[7].mxu1  ;;  %2130 = vmatmul.mubr.bf16.vlgmr.msra.gmra.mrb[16].mxu1 %v1312_v10  ;;  %v1301_v31 = vmax.f32 %v1257_v13, 0.0  ;;  %v1869_v13 = vld [vmem:[%s2874_s11] ss:$0 sm:$0xff] }
 0x25b   : > { %v1252_v30 = vadd.f32 %v2761_v61, %v1251_v25  ;;  %2146 = vmatpush3.bf16.msra.mxu1 %v2276_v60  ;;  %v1299_v40 = vmax.f32 %v1249_v18, 0.0 }
 0x25c   : > { %v1302_v36 = vmax.f32 %v1260_v24, 0.0  ;;  %2147 = vmatprep.subr.bf16.mxu1 %v2277_v17 }
 0x25d   : > { %v1300_v41 = vmax.f32 %v1252_v30, 0.0 }
 0x25e   : > { %v1314_v42 = vpack.c.bf16 %v1302_v36, %v1301_v31 }
 0x25f   : > { %v1313_v43 = vpack.c.bf16 %v1300_v41, %v1299_v40  ;;  %v2107_v45 = vpop.f32.mrb[8].mxu1  ;;  %2148 = vmatpush3.bf16.msra.mxu1 %v2277_v17 }
 0x260   : > { %v1273_v46 = vadd.f32 %v2107_v45, %v2761_v61  ;;  %v1264_v47 = vpop.f32.mrb[9].mxu1  ;;  %2149 = vmatprep.subr.bf16.mxu1 %v2278_v37 }
 0x261   : > { %v1265_v49 = vadd.f32 %v2761_v61, %v1264_v47  ;;  %v2108_v50 = vpop.f32.mrb[10].mxu1  ;;  %2133 = vmatprep.mubr.bf16.mxu1 %v1313_v43 }
 0x262   : > { %v1276_v51 = vadd.f32 %v2108_v50, %v2761_v61  ;;  %v1267_v52 = vpop.f32.mrb[11].mxu1  ;;  %2134 = vmatmul.mubr.bf16.gmra.mrb[20].mxu1 %v1314_v42  ;;  %v1305_v54 = vmax.f32 %v1273_v46, 0.0 }
 0x263   : > { %v1268_v53 = vadd.f32 %v2761_v61, %v1267_v52  ;;  %2150 = vmatpush3.bf16.msra.mxu1 %v2278_v37  ;;  %v1303_v57 = vmax.f32 %v1265_v49, 0.0 }
 0x264   : > { %v1306_v55 = vmax.f32 %v1276_v51, 0.0  ;;  %2151 = vmatprep.subr.bf16.mxu1 %v2279_v48 }
 0x265   : > { %v1304_v58 = vmax.f32 %v1268_v53, 0.0 }
 0x266   : > { %v1316_v59 = vpack.c.bf16 %v1306_v55, %v1305_v54 }
 0x267   : > { %v1315_v44 = vpack.c.bf16 %v1304_v58, %v1303_v57  ;;  %v2111_v60 = vpop.f32.mrb[12].mxu1  ;;  %2152 = vmatpush3.bf16.msra.mxu1 %v2279_v48 }
 0x268   : > { %v1289_v62 = vadd.f32 %v2111_v60, %v2761_v61  ;;  %v1280_v63 = vpop.f32.mrb[13].mxu1  ;;  %2153 = vmatprep.subr.bf16.mxu1 %v2280_v56 }
 0x269   : > { %v1281_v1 = vadd.f32 %v2761_v61, %v1280_v63  ;;  %v2112_v2 = vpop.f32.mrb[14].mxu1  ;;  %2137 = vmatprep.mubr.bf16.mxu1 %v1315_v44 }
 0x26a   : > { %v1292_v3 = vadd.f32 %v2112_v2, %v2761_v61  ;;  %v1283_v4 = vpop.f32.mrb[15].mxu1  ;;  %2138 = vmatmul.mubr.bf16.gmra.mrb[24].mxu1 %v1316_v59  ;;  %v1309_v6 = vmax.f32 %v1289_v62, 0.0 }
 0x26b   : > { %v1284_v5 = vadd.f32 %v2761_v61, %v1283_v4  ;;  %2154 = vmatpush3.bf16.msra.mxu1 %v2280_v56  ;;  %v1307_v8 = vmax.f32 %v1281_v1, 0.0  ;;  %v2283_v61 = vld [vmem:[%s2875_s12 + $0x38] sm:$0xff]  }
 0x26c   : > { %v1310_v7 = vmax.f32 %v1292_v3, 0.0  ;;  %2155 = vmatprep.subr.bf16.mxu1 %v2281_v0 }
 0x26d   : > { %v1308_v9 = vmax.f32 %v1284_v5, 0.0 }
 0x26e   : > { %v1318_v10 = vpack.c.bf16 %v1310_v7, %v1309_v6 }
 0x26f   : > { %v1317_v11 = vpack.c.bf16 %v1308_v9, %v1307_v8  ;;  %2156 = vmatpush3.bf16.msra.mxu1 %v2281_v0 }
 0x270   : > { %2157 = vmatprep.subr.bf16.mxu1 %v2282_v12 }
 0x271   : > { %2141 = vmatprep.mubr.bf16.mxu1 %v1317_v11 }
 0x272   : > { %2142 = vmatmul.mubr.bf16.gmra.mrb[28].mxu1 %v1318_v10 }
 0x273   : > { %2158 = vmatpush3.bf16.msra.mxu1 %v2282_v12 }
 0x274   : > { %2159 = vmatprep.subr.bf16.mxu1 %v2283_v61 }
 0x277   : > { %2160 = vmatpush3.bf16.msra.mxu1 %v2283_v61 }
 0x32d   : > { %v2131_v14 = vpop.f32.mrb[16].mxu1 }
 0x32e   : > { %v1433_v17 = vadd.f32 %v2131_v14, %v1869_v13  ;;  %v1424_v18 = vpop.f32.mrb[17].mxu1 }
 0x32f   : > { %v1425_v19 = vadd.f32 %v1869_v13, %v1424_v18  ;;  %v2132_v24 = vpop.f32.mrb[18].mxu1 }
 0x330   : > { %v1436_v25 = vadd.f32 %v2132_v24, %v1869_v13  ;;  %v1427_v30 = vpop.f32.mrb[19].mxu1  ;;  %v1489_v36 = vmax.f32 %v1433_v17, 0.0 }
 0x331   : > { %v1428_v31 = vadd.f32 %v1869_v13, %v1427_v30  ;;  %v1487_v40 = vmax.f32 %v1425_v19, 0.0 }
 0x332   : > { %v1490_v37 = vmax.f32 %v1436_v25, 0.0 }
 0x333   : > { %v1488_v41 = vmax.f32 %v1428_v31, 0.0 }
 0x334   : > { %v1504_v42 = vpack.c.bf16 %v1490_v37, %v1489_v36  ;;  %v2806_v37 = vld [vmem:[%s2876_s13] ss:$0 sm:$0xff] }
 0x335   : > { %v1503_v43 = vpack.c.bf16 %v1488_v41, %v1487_v40  ;;  %v2135_v45 = vpop.f32.mrb[20].mxu1 }
 0x336   : > { %v1449_v46 = vadd.f32 %v2135_v45, %v1869_v13  ;;  %v1440_v47 = vpop.f32.mrb[21].mxu1 }
 0x337   : > { %v1441_v48 = vadd.f32 %v1869_v13, %v1440_v47  ;;  %v2136_v49 = vpop.f32.mrb[22].mxu1  ;;  %2161 = vmatprep.mubr.bf16.mxu1 %v1503_v43 }
 0x338   : > { %v1452_v50 = vadd.f32 %v2136_v49, %v1869_v13  ;;  %v1443_v51 = vpop.f32.mrb[23].mxu1  ;;  %2162 = vmatmul.mubr.bf16.vlgmr.msra.gmra.mrb[32].mxu1 %v1504_v42  ;;  %v1493_v53 = vmax.f32 %v1449_v46, 0.0 }
 0x339   : > { %v1444_v52 = vadd.f32 %v1869_v13, %v1443_v51  ;;  %v1491_v55 = vmax.f32 %v1441_v48, 0.0 }
 0x33a   : > { %v1494_v54 = vmax.f32 %v1452_v50, 0.0 }
 0x33b   : > { %v1492_v56 = vmax.f32 %v1444_v52, 0.0 }
 0x33c   : > { %v1506_v57 = vpack.c.bf16 %v1494_v54, %v1493_v53 }
 0x33d   : > { %v1505_v58 = vpack.c.bf16 %v1492_v56, %v1491_v55  ;;  %v2139_v59 = vpop.f32.mrb[24].mxu1 }
 0x33e   : > { %v1465_v44 = vadd.f32 %v2139_v59, %v1869_v13  ;;  %v1456_v60 = vpop.f32.mrb[25].mxu1 }
 0x33f   : > { %v1457_v62 = vadd.f32 %v1869_v13, %v1456_v60  ;;  %v2140_v63 = vpop.f32.mrb[26].mxu1  ;;  %2165 = vmatprep.mubr.bf16.mxu1 %v1505_v58 }
 0x340   : > { %v1468_v0 = vadd.f32 %v2140_v63, %v1869_v13  ;;  %v1459_v1 = vpop.f32.mrb[27].mxu1  ;;  %2166 = vmatmul.mubr.bf16.gmra.mrb[36].mxu1 %v1506_v57  ;;  %v1497_v3 = vmax.f32 %v1465_v44, 0.0 }
 0x341   : > { %v1460_v2 = vadd.f32 %v1869_v13, %v1459_v1  ;;  %v1495_v5 = vmax.f32 %v1457_v62, 0.0 }
 0x342   : > { %v1498_v4 = vmax.f32 %v1468_v0, 0.0 }
 0x343   : > { %v1496_v6 = vmax.f32 %v1460_v2, 0.0 }
 0x344   : > { %v1508_v7 = vpack.c.bf16 %v1498_v4, %v1497_v3 }
 0x345   : > { %v1507_v8 = vpack.c.bf16 %v1496_v6, %v1495_v5  ;;  %v2143_v9 = vpop.f32.mrb[28].mxu1 }
 0x346   : > { %v1481_v10 = vadd.f32 %v2143_v9, %v1869_v13  ;;  %v1472_v11 = vpop.f32.mrb[29].mxu1 }
 0x347   : > { %v1473_v12 = vadd.f32 %v1869_v13, %v1472_v11  ;;  %v2144_v61 = vpop.f32.mrb[30].mxu1  ;;  %2169 = vmatprep.mubr.bf16.mxu1 %v1507_v8 }
 0x348   : > { %v1484_v14 = vadd.f32 %v2144_v61, %v1869_v13  ;;  %v1475_v17 = vpop.f32.mrb[31].mxu1  ;;  %2170 = vmatmul.mubr.bf16.gmra.mrb[40].mxu1 %v1508_v7  ;;  %v1501_v19 = vmax.f32 %v1481_v10, 0.0 }
 0x349   : > { %v1476_v18 = vadd.f32 %v1869_v13, %v1475_v17  ;;  %v1499_v25 = vmax.f32 %v1473_v12, 0.0 }
 0x34a   : > { %v1502_v24 = vmax.f32 %v1484_v14, 0.0 }
 0x34b   : > { %v1500_v30 = vmax.f32 %v1476_v18, 0.0 }
 0x34c   : > { %v1510_v31 = vpack.c.bf16 %v1502_v24, %v1501_v19 }
 0x34d   : > { %v1509_v36 = vpack.c.bf16 %v1500_v30, %v1499_v25 }
 0x34f   : > { %2173 = vmatprep.mubr.bf16.mxu1 %v1509_v36 }
 0x350   : > { %2174 = vmatmul.mubr.bf16.gmra.mrb[44].mxu1 %v1510_v31 }
 0x40b   : > { %v2163_v40 = vpop.f32.mrb[32].mxu1 }
 0x40c   : > { %v1625_v41 = vadd.f32 %v2163_v40, %v2806_v37  ;;  %v1616_v42 = vpop.f32.mrb[33].mxu1 }
 0x40d   : > { %v1617_v13 = vadd.f32 %v2806_v37, %v1616_v42  ;;  %v2164_v43 = vpop.f32.mrb[34].mxu1 }
 0x40e   : > { %1681 = vst [vmem:[#allocation4 + $0x10] sm:$0xff] %v1625_v41  ;;  %v1697_v45 = vadd.f32 %v1625_v41, %v2649_v20  ;;  %v1628_v46 = vadd.f32 %v2164_v43, %v2806_v37  ;;  %v1619_v47 = vpop.f32.mrb[35].mxu1 }
 0x40f   : > { %1679 = vst [vmem:[#allocation4] sm:$0xff] %v1617_v13  ;;  %v1695_v48 = vadd.f32 %v1617_v13, %v2638_v15  ;;  %v1620_v49 = vadd.f32 %v2806_v37, %v1619_v47 }
 0x410   : > { %1713 = vst [vmem:[%s2443_s21 + $0x10] sm:$0xff] %v1697_v45  ;;  %1682 = vst [vmem:[#allocation4 + $0x18] sm:$0xff] %v1628_v46  ;;  %v1698_v50 = vadd.f32 %v1628_v46, %v2652_v21 }
 0x411   : > { %1711 = vst [vmem:[%s2443_s21] sm:$0xff] %v1695_v48  ;;  %1680 = vst [vmem:[#allocation4 + $0x8] sm:$0xff] %v1620_v49  ;;  %v1696_v51 = vadd.f32 %v1620_v49, %v2641_v16 }
 0x412   : > { %1714 = vst [vmem:[%s2443_s21 + $0x18] sm:$0xff] %v1698_v50 }
 0x413   : > { %1712 = vst [vmem:[%s2443_s21 + $0x8] sm:$0xff] %v1696_v51  ;;  %v2167_v20 = vpop.f32.mrb[36].mxu1 }
 0x414   : > { %v1641_v52 = vadd.f32 %v2167_v20, %v2806_v37  ;;  %v1632_v53 = vpop.f32.mrb[37].mxu1 }
 0x415   : > { %v1633_v15 = vadd.f32 %v2806_v37, %v1632_v53  ;;  %v2168_v54 = vpop.f32.mrb[38].mxu1 }
 0x416   : > { %1685 = vst [vmem:[#allocation4 + $0x30] sm:$0xff] %v1641_v52  ;;  %v1701_v21 = vadd.f32 %v1641_v52, %v2665_v26  ;;  %v1644_v55 = vadd.f32 %v2168_v54, %v2806_v37  ;;  %v1635_v56 = vpop.f32.mrb[39].mxu1 }
 0x417   : > { %1683 = vst [vmem:[#allocation4 + $0x20] sm:$0xff] %v1633_v15  ;;  %v1699_v16 = vadd.f32 %v1633_v15, %v2655_v22  ;;  %v1636_v57 = vadd.f32 %v2806_v37, %v1635_v56 }
 0x418   : > { %1717 = vst [vmem:[%s2443_s21 + $0x30] sm:$0xff] %v1701_v21  ;;  %1686 = vst [vmem:[#allocation4 + $0x38] sm:$0xff] %v1644_v55  ;;  %v1702_v58 = vadd.f32 %v1644_v55, %v2668_v27 }
 0x419   : > { %1715 = vst [vmem:[%s2443_s21 + $0x20] sm:$0xff] %v1699_v16  ;;  %1684 = vst [vmem:[#allocation4 + $0x28] sm:$0xff] %v1636_v57  ;;  %v1700_v59 = vadd.f32 %v1636_v57, %v2658_v23 }
 0x41a   : > { %1718 = vst [vmem:[%s2443_s21 + $0x38] sm:$0xff] %v1702_v58 }
 0x41b   : > { %1716 = vst [vmem:[%s2443_s21 + $0x28] sm:$0xff] %v1700_v59  ;;  %v2171_v26 = vpop.f32.mrb[40].mxu1 }
 0x41c   : > { %v1657_v44 = vadd.f32 %v2171_v26, %v2806_v37  ;;  %v1648_v60 = vpop.f32.mrb[41].mxu1 }
 0x41d   : > { %v1649_v22 = vadd.f32 %v2806_v37, %v1648_v60  ;;  %v2172_v62 = vpop.f32.mrb[42].mxu1 }
 0x41e   : > { %1689 = vst [vmem:[#allocation4 + $0x50] sm:$0xff] %v1657_v44  ;;  %v1705_v27 = vadd.f32 %v1657_v44, %v2681_v32  ;;  %v1660_v63 = vadd.f32 %v2172_v62, %v2806_v37  ;;  %v1651_v0 = vpop.f32.mrb[43].mxu1 }
 0x41f   : > { %1687 = vst [vmem:[#allocation4 + $0x40] sm:$0xff] %v1649_v22  ;;  %v1703_v23 = vadd.f32 %v1649_v22, %v2671_v28  ;;  %v1652_v1 = vadd.f32 %v2806_v37, %v1651_v0 }
 0x420   : > { %1721 = vst [vmem:[%s2443_s21 + $0x50] sm:$0xff] %v1705_v27  ;;  %1690 = vst [vmem:[#allocation4 + $0x58] sm:$0xff] %v1660_v63  ;;  %v1706_v2 = vadd.f32 %v1660_v63, %v2684_v33 }
 0x421   : > { %1719 = vst [vmem:[%s2443_s21 + $0x40] sm:$0xff] %v1703_v23  ;;  %1688 = vst [vmem:[#allocation4 + $0x48] sm:$0xff] %v1652_v1  ;;  %v1704_v3 = vadd.f32 %v1652_v1, %v2674_v29 }
 0x422   : > { %1722 = vst [vmem:[%s2443_s21 + $0x58] sm:$0xff] %v1706_v2 }
 0x423   : > { %1720 = vst [vmem:[%s2443_s21 + $0x48] sm:$0xff] %v1704_v3  ;;  %v2175_v32 = vpop.f32.mrb[44].mxu1 }
 0x424   : > { %v1673_v4 = vadd.f32 %v2175_v32, %v2806_v37  ;;  %v1664_v5 = vpop.f32.mrb[45].mxu1 }
 0x425   : > { %v1665_v28 = vadd.f32 %v2806_v37, %v1664_v5  ;;  %v2176_v6 = vpop.f32.mrb[46].mxu1 }
 0x426   : > { %1693 = vst [vmem:[#allocation4 + $0x70] sm:$0xff] %v1673_v4  ;;  %v1709_v33 = vadd.f32 %v1673_v4, %v2697_v38  ;;  %v1676_v7 = vadd.f32 %v2176_v6, %v2806_v37  ;;  %v1667_v8 = vpop.f32.mrb[47].mxu1 }
 0x427   : > { %1691 = vst [vmem:[#allocation4 + $0x60] sm:$0xff] %v1665_v28  ;;  %v1707_v29 = vadd.f32 %v1665_v28, %v2687_v34  ;;  %v1668_v9 = vadd.f32 %v2806_v37, %v1667_v8 }
 0x428   : > { %1725 = vst [vmem:[%s2443_s21 + $0x70] sm:$0xff] %v1709_v33  ;;  %1694 = vst [vmem:[#allocation4 + $0x78] sm:$0xff] %v1676_v7  ;;  %v1710_v10 = vadd.f32 %v1676_v7, %v2700_v39 }
 0x429   : > { %1723 = vst [vmem:[%s2443_s21 + $0x60] sm:$0xff] %v1707_v29  ;;  %1692 = vst [vmem:[#allocation4 + $0x68] sm:$0xff] %v1668_v9  ;;  %v1708_v11 = vadd.f32 %v1668_v9, %v2690_v35 }
 0x42a   : > { %1726 = vst [vmem:[%s2443_s21 + $0x78] sm:$0xff] %v1710_v10 }
 0x42b   : > { %1724 = vst [vmem:[%s2443_s21 + $0x68] sm:$0xff] %v1708_v11 }
 0x42c LB: >> { %s2881_s23 = sshll.u32 %s2429_s27, 7  ;;  %s1740_s30 = scalar_lea.vmem [#allocation4], %s2332_s22  ;;  %s2332_s22 = sphi %s2330_s22, %s1732_s22  }
 0x42d   : >> { %s1733_s24 = sadd.s32 %s2332_s22, %s2881_s23  ;;  %s1732_s22 = sadd.s32 1, %s2332_s22  }
 0x42e   : >> { %p1734_p2 = scmp.lt.s32.totalorder %s1733_s24, 512  ;;  %s1737_s25 = sld [smem:[#allocation7 + %s1733_s24]] }
 0x42f   : >> { %p1729_p3 = scmp.ge.s32.totalorder %s1732_s22, 128  }
 0x430   : >> { %s1735_s18 = scalar_select %p1734_p2, 1, 0  ;;  %v1741_v34 = vld [vmem:[%s1740_s30] sm:$0x1] }
 0x432   : >> { %s1736_s0 = scvt.s32.f32 %s1735_s18 }
 0x433   : > { %1731 = sbr.rel (!%p1729_p3) target bundleno = 1068 (0x42c), region = 141 }
 0x434   : >> { %s1738_s17 = scalar_lea.vmem %s2878_s15, %s1737_s25  ;;  %v1742_v35 = vstv %s1736_s0 }
 0x435   : >> { %v1739_v38 = vld [vmem:[%s1738_s17] sm:$0x1]  ;;  %v1743_v39 = vmul.f32 %v1742_v35, %v1741_v34 }
 0x437   : >> { %v1744_v12 = vadd.f32 %v1743_v39, %v1739_v38 }
 0x439   : >> { %1745 = vst [vmem:[%s1738_s17] sm:$0x1] %v1744_v12 }
 0x43a PF: > { %s36_s1 = sadd.s32 1, %s2324_s1  }
 0x43b   : > { %p33_p4 = scmp.ge.s32.totalorder %s36_s1, 6  }
 0x43d   :  { %35 = sbr.rel (!%p33_p4) target bundleno = 26 (0x1a), region = 152 }

// kernel: encoder_processor_decoder.13
= control target key start
LH: loop header
LB: loop body
LE: loop exit
PB: predicated region body
PF: predicated region fallthrough
CT: control target
= control target key end

     0   :  { %s1515_s30 = smov 0   ;;  %s1699_s0 = inlined_call_operand.vmem [shape: f32[256,128], index: 0, kind: input, shape index: {}]   ;;  %s1700_s1 = inlined_call_operand.vmem [shape: bf16[128,128], index: 1, kind: input, shape index: {}]   ;;  %s1701_s2 = inlined_call_operand.vmem [shape: f32[1,128], index: 2, kind: input, shape index: {}]   ;;  %s1702_s3 = inlined_call_operand.vmem [shape: bf16[128,128], index: 3, kind: input, shape index: {}]   ;;  %s1703_s4 = inlined_call_operand.vmem [shape: f32[1,128], index: 4, kind: input, shape index: {}]   ;;  %s1704_s5 = inlined_call_operand.vmem [shape: bf16[128,128], index: 5, kind: input, shape index: {}]   ;;  %s1705_s6 = inlined_call_operand.vmem [shape: f32[1,128], index: 6, kind: input, shape index: {}]   ;;  %s1706_s7 = inlined_call_operand.vmem [shape: bf16[128,2], index: 7, kind: input, shape index: {}]   ;;  %s1707_s8 = inlined_call_operand.vmem [shape: f32[1,2], index: 8, kind: input, shape index: {}]   ;;  %s1708_s9 = inlined_call_operand.vmem [shape: f32[256,2], index: 9, kind: output, shape index: {}]  }
   0x1 LB: > { %s1178_s10 = sadd.s32 4294967295, %s1463_s30   ;;  %p1182_p0 = scmp.ge.s32.totalorder %s1463_s30, 1  ;;  %s1463_s30 = sphi %s1515_s30, %s19_s30  }
   0x2   : > { %p288_p1 = scmp.lt.s32.totalorder %s1463_s30, 3 }
   0x4   : > { %p289_p2 = pnand %p1182_p0, %p288_p1 }
   0x5   : > { %v1425_v0 = vld [vmem:[%s1700_s1] sm:$0xff] (!%p289_p2)   ;;  %s1183_s13 = sshll.u32 (!%p289_p2), %s1178_s10, 4  ;;  %v1426_v1 = vld [vmem:[%s1700_s1 + $0x8] sm:$0xff] (!%p289_p2)   ;;  %v1427_v2 = vld [vmem:[%s1700_s1 + $0x10] sm:$0xff] (!%p289_p2)   ;;  %vm1105_vm0 = vcmask (!%p289_p2), 15360  }
   0x6   : > { %292 = sbr.rel (%p289_p2) target bundleno = 946 (0x3b2), region = 56  ;;  %p325_p3 = scmp.lt.s32.totalorder (!%p289_p2), %s1183_s13, 31  ;;  %1289 = vmatprep.subr.bf16.mxu0 (!%p289_p2), %v1425_v0  ;;  %v1428_v3 = vld [vmem:[%s1700_s1 + $0x18] sm:$0xff] (!%p289_p2)   ;;  %v1429_v7 = vld [vmem:[%s1700_s1 + $0x20] sm:$0xff] (!%p289_p2)   ;;  %v1434_v9 = vld [vmem:[%s1702_s3 + $0x8] sm:$0xff] (!%p289_p2)  }
   0x7   : > { %1290 = vmatpush3.bf16.msra.mxu0 (!%p289_p2), %v1425_v0  ;;  %v1433_v8 = vld [vmem:[%s1702_s3] sm:$0xff] (!%p289_p2)   ;;  %v1430_v10 = vld [vmem:[%s1700_s1 + $0x28] sm:$0xff] (!%p289_p2)   ;;  %v1435_v11 = vld [vmem:[%s1702_s3 + $0x10] sm:$0xff] (!%p289_p2)  }
   0x8   : > { %1291 = vmatprep.subr.bf16.mxu0 (!%p289_p2), %v1426_v1  ;;  %1321 = vmatprep.subr.bf16.mxu1 (!%p289_p2), %v1433_v8  ;;  %v1431_v12 = vld [vmem:[%s1700_s1 + $0x30] sm:$0xff] (!%p289_p2)   ;;  %v1436_v13 = vld [vmem:[%s1702_s3 + $0x18] sm:$0xff] (!%p289_p2)   ;;  %v1437_v15 = vld [vmem:[%s1702_s3 + $0x20] sm:$0xff] (!%p289_p2)  }
   0x9   : > { %1322 = vmatpush3.bf16.msra.mxu1 (!%p289_p2), %v1433_v8  ;;  %v1432_v14 = vld [vmem:[%s1700_s1 + $0x38] sm:$0xff] (!%p289_p2)   ;;  %v1438_v20 = vld [vmem:[%s1702_s3 + $0x28] sm:$0xff] (!%p289_p2)   ;;  %v1439_v38 = vld [vmem:[%s1702_s3 + $0x30] sm:$0xff] (!%p289_p2)  }
   0xa   : > { %1323 = vmatprep.subr.bf16.mxu1 (!%p289_p2), %v1434_v9  ;;  %v1440_v39 = vld [vmem:[%s1702_s3 + $0x38] sm:$0xff] (!%p289_p2)   ;;  %v1441_v40 = vld [vmem:[%s1704_s5] sm:$0xff] (!%p289_p2)   ;;  %v1442_v41 = vld [vmem:[%s1704_s5 + $0x8] sm:$0xff] (!%p289_p2)  }
   0xb   : > { %1292 = vmatpush3.bf16.msra.mxu0 (!%p289_p2), %v1426_v1  ;;  %v1443_v42 = vld [vmem:[%s1704_s5 + $0x10] sm:$0xff] (!%p289_p2)   ;;  %v1444_v43 = vld [vmem:[%s1704_s5 + $0x18] sm:$0xff] (!%p289_p2)   ;;  %v1445_v44 = vld [vmem:[%s1704_s5 + $0x20] sm:$0xff] (!%p289_p2)  }
   0xc   : > { %1293 = vmatprep.subr.bf16.mxu0 (!%p289_p2), %v1427_v2  ;;  %v1446_v45 = vld [vmem:[%s1704_s5 + $0x28] sm:$0xff] (!%p289_p2)   ;;  %v1187_v46 = vld [vmem:[%s1701_s2] ss:$0 sm:$0xff] (!%p289_p2) }
   0xd   : > { %s1710_s13 = smov (!%p325_p3, %s1183_s13), 31  ;;  %1324 = vmatpush3.bf16.msra.mxu1 %v1434_v9 }
   0xe   : > { %s1184_s18 = sshll.u32 %s1710_s13, 3  ;;  %1325 = vmatprep.subr.bf16.mxu1 %v1435_v11 }
   0xf   : > { %s1540_s21 = scalar_lea.vmem %s1699_s0, %s1184_s18  ;;  %1294 = vmatpush3.bf16.msra.mxu0 %v1427_v2  ;;  %s1662_s17 = scalar_lea.vmem %s1708_s9, %s1184_s18 }
  0x10   : > { %v337_v4 = vld [vmem:[%s1540_s21] sm:$0xff]  ;;  %v338_v5 = vld [vmem:[%s1540_s21 + $0x8] sm:$0xff]  ;;  %1295 = vmatprep.subr.bf16.mxu0 %v1428_v3  ;;  %v339_v16 = vld [vmem:[%s1540_s21 + $0x10] sm:$0xff] }
  0x11   : > { %v353_v6 = vpack.c.bf16 %v338_v5, %v337_v4  ;;  %v340_v17 = vld [vmem:[%s1540_s21 + $0x18] sm:$0xff]  ;;  %1326 = vmatpush3.bf16.msra.mxu1 %v1435_v11  ;;  %v341_v18 = vld [vmem:[%s1540_s21 + $0x20] sm:$0xff]  ;;  %v342_v19 = vld [vmem:[%s1540_s21 + $0x28] sm:$0xff] }
  0x12   : > { %1327 = vmatprep.subr.bf16.mxu1 %v1436_v13  ;;  %v354_v21 = vpack.c.bf16 %v340_v17, %v339_v16  ;;  %v355_v22 = vpack.c.bf16 %v342_v19, %v341_v18  ;;  %v343_v23 = vld [vmem:[%s1540_s21 + $0x30] sm:$0xff]  ;;  %v344_v24 = vld [vmem:[%s1540_s21 + $0x38] sm:$0xff]  ;;  %v345_v25 = vld [vmem:[%s1540_s21 + $0x40] sm:$0xff] }
  0x13   : > { %1305 = vmatprep.mubr.bf16.mxu0 %v353_v6  ;;  %1296 = vmatpush3.bf16.msra.mxu0 %v1428_v3  ;;  %v346_v26 = vld [vmem:[%s1540_s21 + $0x48] sm:$0xff]  ;;  %v356_v27 = vpack.c.bf16 %v344_v24, %v343_v23  ;;  %v347_v29 = vld [vmem:[%s1540_s21 + $0x50] sm:$0xff]  ;;  %v348_v30 = vld [vmem:[%s1540_s21 + $0x58] sm:$0xff] }
  0x14   : > { %1297 = vmatprep.subr.bf16.mxu0 %v1429_v7  ;;  %v357_v28 = vpack.c.bf16 %v346_v26, %v345_v25  ;;  %v349_v31 = vld [vmem:[%s1540_s21 + $0x60] sm:$0xff]  ;;  %v350_v32 = vld [vmem:[%s1540_s21 + $0x68] sm:$0xff]  ;;  %v358_v33 = vpack.c.bf16 %v348_v30, %v347_v29  ;;  %v351_v35 = vld [vmem:[%s1540_s21 + $0x70] sm:$0xff] }
  0x15   : > { %1328 = vmatpush3.bf16.msra.mxu1 %v1436_v13  ;;  %v359_v34 = vpack.c.bf16 %v350_v32, %v349_v31  ;;  %v352_v36 = vld [vmem:[%s1540_s21 + $0x78] sm:$0xff] }
  0x16   : > { %1329 = vmatprep.subr.bf16.mxu1 %v1437_v15  ;;  %v360_v37 = vpack.c.bf16 %v352_v36, %v351_v35 }
  0x17   : > { %1298 = vmatpush3.bf16.msra.mxu0 %v1429_v7 }
  0x18   : > { %1299 = vmatprep.subr.bf16.mxu0 %v1430_v10 }
  0x19   : > { %1330 = vmatpush3.bf16.msra.mxu1 %v1437_v15 }
  0x1a   : > { %1331 = vmatprep.subr.bf16.mxu1 %v1438_v20 }
  0x1b   : > { %1300 = vmatpush3.bf16.msra.mxu0 %v1430_v10 }
  0x1c   : > { %1301 = vmatprep.subr.bf16.mxu0 %v1431_v12 }
  0x1d   : > { %1332 = vmatpush3.bf16.msra.mxu1 %v1438_v20 }
  0x1e   : > { %1333 = vmatprep.subr.bf16.mxu1 %v1439_v38 }
  0x1f   : > { %1302 = vmatpush3.bf16.msra.mxu0 %v1431_v12 }
  0x20   : > { %1303 = vmatprep.subr.bf16.mxu0 %v1432_v14 }
  0x21   : > { %1334 = vmatpush3.bf16.msra.mxu1 %v1439_v38 }
  0x22   : > { %1335 = vmatprep.subr.bf16.mxu1 %v1440_v39 }
  0x23   : > { %1304 = vmatpush3.bf16.msra.mxu0 %v1432_v14 }
  0x24   : > { %1353 = vmatprep.subr.bf16.mxu0 %v1441_v40 }
  0x25   : > { %1336 = vmatpush3.bf16.msra.mxu1 %v1440_v39  ;;  %v1447_v39 = vld [vmem:[%s1704_s5 + $0x30] sm:$0xff]  }
  0x26   : > { %1306 = vmatmul.mubr.bf16.vlgmr.msra.gmra.mrb[0].mxu0 %v354_v21 }
  0x27   : > { %1309 = vmatprep.mubr.bf16.mxu0 %v355_v22  ;;  %1354 = vmatpush3.bf16.msra.mxu0 %v1441_v40  ;;  %v1448_v40 = vld [vmem:[%s1704_s5 + $0x38] sm:$0xff]  }
  0x28   : > { %1355 = vmatprep.subr.bf16.mxu0 %v1442_v41 }
  0x2b   : > { %1356 = vmatpush3.bf16.msra.mxu0 %v1442_v41  ;;  %v1449_v41 = vld [vmem:[%s1706_s7] sm:$0xff]  }
  0x2c   : > { %1357 = vmatprep.subr.bf16.mxu0 %v1443_v42  ;;  %1385 = vmatprep.subr.bf16.mxu1 %v1449_v41 }
  0x2e   : > { %1310 = vmatmul.mubr.bf16.gmra.mrb[4].mxu0 %v356_v27 }
  0x2f   : > { %1313 = vmatprep.mubr.bf16.mxu0 %v357_v28  ;;  %1358 = vmatpush3.bf16.msra.mxu0 %v1443_v42  ;;  %v1450_v42 = vld [vmem:[%s1706_s7 + $0x8] sm:$0xff]  }
  0x30   : > { %1359 = vmatprep.subr.bf16.mxu0 %v1444_v43 }
  0x33   : > { %1360 = vmatpush3.bf16.msra.mxu0 %v1444_v43  ;;  %v1451_v43 = vld [vmem:[%s1706_s7 + $0x10] sm:$0xff]  }
  0x34   : > { %1361 = vmatprep.subr.bf16.mxu0 %v1445_v44 }
  0x36   : > { %1314 = vmatmul.mubr.bf16.gmra.mrb[8].mxu0 %v358_v33 }
  0x37   : > { %1317 = vmatprep.mubr.bf16.mxu0 %v359_v34  ;;  %1362 = vmatpush3.bf16.msra.mxu0 %v1445_v44  ;;  %v1452_v44 = vld [vmem:[%s1706_s7 + $0x18] sm:$0xff]  }
  0x38   : > { %1363 = vmatprep.subr.bf16.mxu0 %v1446_v45 }
  0x3b   : > { %1364 = vmatpush3.bf16.msra.mxu0 %v1446_v45  ;;  %v1453_v45 = vld [vmem:[%s1706_s7 + $0x20] sm:$0xff]  }
  0x3c   : > { %1365 = vmatprep.subr.bf16.mxu0 %v1447_v39 }
  0x3e   : > { %1318 = vmatmul.mubr.bf16.gmra.mrb[12].mxu0 %v360_v37 }
  0x3f   : > { %1366 = vmatpush3.bf16.msra.mxu0 %v1447_v39 }
  0x40   : > { %1367 = vmatprep.subr.bf16.mxu0 %v1448_v40 }
  0x43   : > { %1368 = vmatpush3.bf16.msra.mxu0 %v1448_v40  ;;  %v1455_v40 = vld [vmem:[%s1706_s7 + $0x30] sm:$0xff]  }
  0xf9   : > { %v1307_v47 = vpop.f32.mrb[0].mxu0 }
  0xfa   : > { %v475_v48 = vadd.f32 %v1307_v47, %v1187_v46  ;;  %v466_v49 = vpop.f32.mrb[1].mxu0  ;;  %v1196_v47 = vld [vmem:[%s1703_s4] ss:$0 sm:$0xff] }
  0xfb   : > { %v467_v50 = vadd.f32 %v1187_v46, %v466_v49  ;;  %v1308_v51 = vpop.f32.mrb[2].mxu0 }
  0xfc   : > { %v478_v52 = vadd.f32 %v1308_v51, %v1187_v46  ;;  %v469_v53 = vpop.f32.mrb[3].mxu0  ;;  %v531_v55 = vmax.f32 %v475_v48, 0.0 }
  0xfd   : > { %v470_v54 = vadd.f32 %v1187_v46, %v469_v53  ;;  %v529_v57 = vmax.f32 %v467_v50, 0.0 }
  0xfe   : > { %v532_v56 = vmax.f32 %v478_v52, 0.0 }
  0xff   : > { %v530_v58 = vmax.f32 %v470_v54, 0.0 }
 0x100   : > { %v546_v59 = vpack.c.bf16 %v532_v56, %v531_v55 }
 0x101   : > { %v1311_v60 = vpop.f32.mrb[4].mxu0  ;;  %v545_v61 = vpack.c.bf16 %v530_v58, %v529_v57 }
 0x102   : > { %v491_v62 = vadd.f32 %v1311_v60, %v1187_v46  ;;  %v482_v63 = vpop.f32.mrb[5].mxu0 }
 0x103   : > { %v483_v0 = vadd.f32 %v1187_v46, %v482_v63  ;;  %v1312_v1 = vpop.f32.mrb[6].mxu0  ;;  %1337 = vmatprep.mubr.bf16.mxu1 %v545_v61 }
 0x104   : > { %v494_v2 = vadd.f32 %v1312_v1, %v1187_v46  ;;  %v485_v3 = vpop.f32.mrb[7].mxu0  ;;  %1338 = vmatmul.mubr.bf16.vlgmr.msra.gmra.mrb[0].mxu1 %v546_v59  ;;  %v535_v5 = vmax.f32 %v491_v62, 0.0 }
 0x105   : > { %v486_v4 = vadd.f32 %v1187_v46, %v485_v3  ;;  %v533_v7 = vmax.f32 %v483_v0, 0.0  ;;  %1386 = vmatpush3.bf16.msra.mxu1 %v1449_v41  ;;  %v1456_v41 = vld [vmem:[%s1706_s7 + $0x38] sm:$0xff]  }
 0x106   : > { %v536_v6 = vmax.f32 %v494_v2, 0.0  ;;  %1387 = vmatprep.subr.bf16.mxu1 %v1450_v42 }
 0x107   : > { %v534_v8 = vmax.f32 %v486_v4, 0.0 }
 0x108   : > { %v548_v9 = vpack.c.bf16 %v536_v6, %v535_v5 }
 0x109   : > { %v547_v10 = vpack.c.bf16 %v534_v8, %v533_v7  ;;  %v1315_v11 = vpop.f32.mrb[8].mxu0  ;;  %1388 = vmatpush3.bf16.msra.mxu1 %v1450_v42  ;;  %v1205_v42 = vld [vmem:[%s1705_s6] ss:$0 sm:$0xff] }
 0x10a   : > { %v507_v12 = vadd.f32 %v1315_v11, %v1187_v46  ;;  %v498_v13 = vpop.f32.mrb[9].mxu0  ;;  %1389 = vmatprep.subr.bf16.mxu1 %v1451_v43 }
 0x10b   : > { %v499_v14 = vadd.f32 %v1187_v46, %v498_v13  ;;  %v1316_v15 = vpop.f32.mrb[10].mxu0  ;;  %1341 = vmatprep.mubr.bf16.mxu1 %v547_v10 }
 0x10c   : > { %v510_v16 = vadd.f32 %v1316_v15, %v1187_v46  ;;  %v501_v17 = vpop.f32.mrb[11].mxu0  ;;  %1342 = vmatmul.mubr.bf16.gmra.mrb[4].mxu1 %v548_v9  ;;  %v539_v19 = vmax.f32 %v507_v12, 0.0 }
 0x10d   : > { %v502_v18 = vadd.f32 %v1187_v46, %v501_v17  ;;  %v537_v21 = vmax.f32 %v499_v14, 0.0  ;;  %1390 = vmatpush3.bf16.msra.mxu1 %v1451_v43 }
 0x10e   : > { %v540_v20 = vmax.f32 %v510_v16, 0.0  ;;  %1391 = vmatprep.subr.bf16.mxu1 %v1452_v44 }
 0x10f   : > { %v538_v22 = vmax.f32 %v502_v18, 0.0 }
 0x110   : > { %v550_v23 = vpack.c.bf16 %v540_v20, %v539_v19 }
 0x111   : > { %v549_v24 = vpack.c.bf16 %v538_v22, %v537_v21  ;;  %v1319_v25 = vpop.f32.mrb[12].mxu0  ;;  %1392 = vmatpush3.bf16.msra.mxu1 %v1452_v44 }
 0x112   : > { %v523_v26 = vadd.f32 %v1319_v25, %v1187_v46  ;;  %v514_v27 = vpop.f32.mrb[13].mxu0  ;;  %1393 = vmatprep.subr.bf16.mxu1 %v1453_v45 }
 0x113   : > { %v515_v28 = vadd.f32 %v1187_v46, %v514_v27  ;;  %v1320_v29 = vpop.f32.mrb[14].mxu0  ;;  %1345 = vmatprep.mubr.bf16.mxu1 %v549_v24 }
 0x114   : > { %v526_v30 = vadd.f32 %v1320_v29, %v1187_v46  ;;  %v517_v31 = vpop.f32.mrb[15].mxu0  ;;  %1346 = vmatmul.mubr.bf16.gmra.mrb[8].mxu1 %v550_v23  ;;  %v543_v33 = vmax.f32 %v523_v26, 0.0 }
 0x115   : > { %v518_v32 = vadd.f32 %v1187_v46, %v517_v31  ;;  %v541_v35 = vmax.f32 %v515_v28, 0.0  ;;  %v1454_v46 = vld [vmem:[%s1706_s7 + $0x28] sm:$0xff]   ;;  %1394 = vmatpush3.bf16.msra.mxu1 %v1453_v45 }
 0x116   : > { %v544_v34 = vmax.f32 %v526_v30, 0.0  ;;  %1395 = vmatprep.subr.bf16.mxu1 %v1454_v46 }
 0x117   : > { %v542_v36 = vmax.f32 %v518_v32, 0.0 }
 0x118   : > { %v552_v37 = vpack.c.bf16 %v544_v34, %v543_v33 }
 0x119   : > { %v551_v38 = vpack.c.bf16 %v542_v36, %v541_v35  ;;  %1396 = vmatpush3.bf16.msra.mxu1 %v1454_v46 }
 0x11a   : > { %1397 = vmatprep.subr.bf16.mxu1 %v1455_v40 }
 0x11b   : > { %1349 = vmatprep.mubr.bf16.mxu1 %v551_v38 }
 0x11c   : > { %1350 = vmatmul.mubr.bf16.gmra.mrb[12].mxu1 %v552_v37 }
 0x11d   : > { %1398 = vmatpush3.bf16.msra.mxu1 %v1455_v40 }
 0x11e   : > { %1399 = vmatprep.subr.bf16.mxu1 %v1456_v41 }
 0x121   : > { %1400 = vmatpush3.bf16.msra.mxu1 %v1456_v41 }
 0x1d7   : > { %v1339_v48 = vpop.f32.mrb[0].mxu1 }
 0x1d8   : > { %v667_v49 = vadd.f32 %v1339_v48, %v1196_v47  ;;  %v658_v50 = vpop.f32.mrb[1].mxu1 }
 0x1d9   : > { %v659_v51 = vadd.f32 %v1196_v47, %v658_v50  ;;  %v1340_v52 = vpop.f32.mrb[2].mxu1 }
 0x1da   : > { %v670_v53 = vadd.f32 %v1340_v52, %v1196_v47  ;;  %v661_v54 = vpop.f32.mrb[3].mxu1  ;;  %v723_v56 = vmax.f32 %v667_v49, 0.0 }
 0x1db   : > { %v662_v55 = vadd.f32 %v1196_v47, %v661_v54  ;;  %v721_v58 = vmax.f32 %v659_v51, 0.0 }
 0x1dc   : > { %v724_v57 = vmax.f32 %v670_v53, 0.0 }
 0x1dd   : > { %v722_v59 = vmax.f32 %v662_v55, 0.0 }
 0x1de   : > { %v738_v60 = vpack.c.bf16 %v724_v57, %v723_v56 }
 0x1df   : > { %v737_v61 = vpack.c.bf16 %v722_v59, %v721_v58  ;;  %v1343_v62 = vpop.f32.mrb[4].mxu1 }
 0x1e0   : > { %v683_v63 = vadd.f32 %v1343_v62, %v1196_v47  ;;  %v674_v0 = vpop.f32.mrb[5].mxu1 }
 0x1e1   : > { %v675_v1 = vadd.f32 %v1196_v47, %v674_v0  ;;  %v1344_v2 = vpop.f32.mrb[6].mxu1  ;;  %1369 = vmatprep.mubr.bf16.mxu0 %v737_v61 }
 0x1e2   : > { %v686_v3 = vadd.f32 %v1344_v2, %v1196_v47  ;;  %v677_v4 = vpop.f32.mrb[7].mxu1  ;;  %1370 = vmatmul.mubr.bf16.vlgmr.msra.gmra.mrb[16].mxu0 %v738_v60  ;;  %v727_v6 = vmax.f32 %v683_v63, 0.0 }
 0x1e3   : > { %v678_v5 = vadd.f32 %v1196_v47, %v677_v4  ;;  %v725_v8 = vmax.f32 %v675_v1, 0.0 }
 0x1e4   : > { %v728_v7 = vmax.f32 %v686_v3, 0.0 }
 0x1e5   : > { %v726_v9 = vmax.f32 %v678_v5, 0.0 }
 0x1e6   : > { %v740_v10 = vpack.c.bf16 %v728_v7, %v727_v6 }
 0x1e7   : > { %v739_v11 = vpack.c.bf16 %v726_v9, %v725_v8  ;;  %v1347_v12 = vpop.f32.mrb[8].mxu1 }
 0x1e8   : > { %v699_v13 = vadd.f32 %v1347_v12, %v1196_v47  ;;  %v690_v14 = vpop.f32.mrb[9].mxu1 }
 0x1e9   : > { %v691_v15 = vadd.f32 %v1196_v47, %v690_v14  ;;  %v1348_v16 = vpop.f32.mrb[10].mxu1  ;;  %1373 = vmatprep.mubr.bf16.mxu0 %v739_v11 }
 0x1ea   : > { %v702_v17 = vadd.f32 %v1348_v16, %v1196_v47  ;;  %v693_v18 = vpop.f32.mrb[11].mxu1  ;;  %1374 = vmatmul.mubr.bf16.gmra.mrb[20].mxu0 %v740_v10  ;;  %v731_v20 = vmax.f32 %v699_v13, 0.0 }
 0x1eb   : > { %v694_v19 = vadd.f32 %v1196_v47, %v693_v18  ;;  %v729_v22 = vmax.f32 %v691_v15, 0.0 }
 0x1ec   : > { %v732_v21 = vmax.f32 %v702_v17, 0.0 }
 0x1ed   : > { %v730_v23 = vmax.f32 %v694_v19, 0.0 }
 0x1ee   : > { %v742_v24 = vpack.c.bf16 %v732_v21, %v731_v20 }
 0x1ef   : > { %v741_v25 = vpack.c.bf16 %v730_v23, %v729_v22  ;;  %v1351_v26 = vpop.f32.mrb[12].mxu1 }
 0x1f0   : > { %v715_v27 = vadd.f32 %v1351_v26, %v1196_v47  ;;  %v706_v28 = vpop.f32.mrb[13].mxu1 }
 0x1f1   : > { %v707_v29 = vadd.f32 %v1196_v47, %v706_v28  ;;  %v1352_v30 = vpop.f32.mrb[14].mxu1  ;;  %1377 = vmatprep.mubr.bf16.mxu0 %v741_v25 }
 0x1f2   : > { %v718_v31 = vadd.f32 %v1352_v30, %v1196_v47  ;;  %v709_v32 = vpop.f32.mrb[15].mxu1  ;;  %1378 = vmatmul.mubr.bf16.gmra.mrb[24].mxu0 %v742_v24  ;;  %v735_v34 = vmax.f32 %v715_v27, 0.0 }
 0x1f3   : > { %v710_v33 = vadd.f32 %v1196_v47, %v709_v32  ;;  %v733_v36 = vmax.f32 %v707_v29, 0.0 }
 0x1f4   : > { %v736_v35 = vmax.f32 %v718_v31, 0.0 }
 0x1f5   : > { %v734_v37 = vmax.f32 %v710_v33, 0.0 }
 0x1f6   : > { %v744_v38 = vpack.c.bf16 %v736_v35, %v735_v34  ;;  %v1214_v35 = vld [vmem:[%s1707_s8] ss:$0 sm:$0xff] }
 0x1f7   : > { %v743_v39 = vpack.c.bf16 %v734_v37, %v733_v36 }
 0x1f9   : > { %1381 = vmatprep.mubr.bf16.mxu0 %v743_v39 }
 0x1fa   : > { %1382 = vmatmul.mubr.bf16.gmra.mrb[28].mxu0 %v744_v38 }
 0x2b5   : > { %v1371_v43 = vpop.f32.mrb[16].mxu0 }
 0x2b6   : > { %v859_v44 = vadd.f32 %v1371_v43, %v1205_v42  ;;  %v850_v45 = vpop.f32.mrb[17].mxu0 }
 0x2b7   : > { %v851_v46 = vadd.f32 %v1205_v42, %v850_v45  ;;  %v1372_v47 = vpop.f32.mrb[18].mxu0 }
 0x2b8   : > { %v862_v48 = vadd.f32 %v1372_v47, %v1205_v42  ;;  %v853_v49 = vpop.f32.mrb[19].mxu0  ;;  %v915_v51 = vmax.f32 %v859_v44, 0.0 }
 0x2b9   : > { %v854_v50 = vadd.f32 %v1205_v42, %v853_v49  ;;  %v913_v53 = vmax.f32 %v851_v46, 0.0 }
 0x2ba   : > { %v916_v52 = vmax.f32 %v862_v48, 0.0 }
 0x2bb   : > { %v914_v54 = vmax.f32 %v854_v50, 0.0 }
 0x2bc   : > { %v930_v55 = vpack.c.bf16 %v916_v52, %v915_v51 }
 0x2bd   : > { %v929_v56 = vpack.c.bf16 %v914_v54, %v913_v53  ;;  %v1375_v57 = vpop.f32.mrb[20].mxu0 }
 0x2be   : > { %v875_v58 = vadd.f32 %v1375_v57, %v1205_v42  ;;  %v866_v59 = vpop.f32.mrb[21].mxu0 }
 0x2bf   : > { %v867_v60 = vadd.f32 %v1205_v42, %v866_v59  ;;  %v1376_v61 = vpop.f32.mrb[22].mxu0  ;;  %1401 = vmatprep.mubr.bf16.mxu1 %v929_v56 }
 0x2c0   : > { %v878_v62 = vadd.f32 %v1376_v61, %v1205_v42  ;;  %v869_v63 = vpop.f32.mrb[23].mxu0  ;;  %1402 = vmatmul.mubr.bf16.vlgmr.msra.gmra.mrb[16].mxu1 %v930_v55  ;;  %v919_v1 = vmax.f32 %v875_v58, 0.0 }
 0x2c1   : > { %v870_v0 = vadd.f32 %v1205_v42, %v869_v63  ;;  %v917_v3 = vmax.f32 %v867_v60, 0.0 }
 0x2c2   : > { %v920_v2 = vmax.f32 %v878_v62, 0.0 }
 0x2c3   : > { %v918_v4 = vmax.f32 %v870_v0, 0.0 }
 0x2c4   : > { %v932_v5 = vpack.c.bf16 %v920_v2, %v919_v1 }
 0x2c5   : > { %v931_v6 = vpack.c.bf16 %v918_v4, %v917_v3  ;;  %v1379_v7 = vpop.f32.mrb[24].mxu0 }
 0x2c6   : > { %v891_v8 = vadd.f32 %v1379_v7, %v1205_v42  ;;  %v882_v9 = vpop.f32.mrb[25].mxu0 }
 0x2c7   : > { %v883_v10 = vadd.f32 %v1205_v42, %v882_v9  ;;  %v1380_v11 = vpop.f32.mrb[26].mxu0  ;;  %1405 = vmatprep.mubr.bf16.mxu1 %v931_v6 }
 0x2c8   : > { %v894_v12 = vadd.f32 %v1380_v11, %v1205_v42  ;;  %v885_v13 = vpop.f32.mrb[27].mxu0  ;;  %1406 = vmatmul.mubr.bf16.gmra.mrb[20].mxu1 %v932_v5  ;;  %v923_v15 = vmax.f32 %v891_v8, 0.0 }
 0x2c9   : > { %v886_v14 = vadd.f32 %v1205_v42, %v885_v13  ;;  %v921_v17 = vmax.f32 %v883_v10, 0.0 }
 0x2ca   : > { %v924_v16 = vmax.f32 %v894_v12, 0.0 }
 0x2cb   : > { %v922_v18 = vmax.f32 %v886_v14, 0.0 }
 0x2cc   : > { %v934_v19 = vpack.c.bf16 %v924_v16, %v923_v15 }
 0x2cd   : > { %v933_v20 = vpack.c.bf16 %v922_v18, %v921_v17  ;;  %v1383_v21 = vpop.f32.mrb[28].mxu0 }
 0x2ce   : > { %v907_v22 = vadd.f32 %v1383_v21, %v1205_v42  ;;  %v898_v23 = vpop.f32.mrb[29].mxu0 }
 0x2cf   : > { %v899_v24 = vadd.f32 %v1205_v42, %v898_v23  ;;  %v1384_v25 = vpop.f32.mrb[30].mxu0  ;;  %1409 = vmatprep.mubr.bf16.mxu1 %v933_v20 }
 0x2d0   : > { %v910_v26 = vadd.f32 %v1384_v25, %v1205_v42  ;;  %v901_v27 = vpop.f32.mrb[31].mxu0  ;;  %1410 = vmatmul.mubr.bf16.gmra.mrb[24].mxu1 %v934_v19  ;;  %v927_v29 = vmax.f32 %v907_v22, 0.0 }
 0x2d1   : > { %v902_v28 = vadd.f32 %v1205_v42, %v901_v27  ;;  %v925_v31 = vmax.f32 %v899_v24, 0.0 }
 0x2d2   : > { %v928_v30 = vmax.f32 %v910_v26, 0.0 }
 0x2d3   : > { %v926_v32 = vmax.f32 %v902_v28, 0.0 }
 0x2d4   : > { %v936_v33 = vpack.c.bf16 %v928_v30, %v927_v29 }
 0x2d5   : > { %v935_v34 = vpack.c.bf16 %v926_v32, %v925_v31 }
 0x2d7   : > { %1413 = vmatprep.mubr.bf16.mxu1 %v935_v34 }
 0x2d8   : > { %1414 = vmatmul.mubr.bf16.gmra.mrb[28].mxu1 %v936_v33 }
 0x393   : > { %v1403_v36 = vpop.f32.mrb[16].mxu1 }
 0x394   : > { %v1051_v37 = vadd.f32 %v1403_v36, %v1214_v35  ;;  %v1042_v38 = vpop.f32.mrb[17].mxu1 }
 0x395   : > { %v1043_v39 = vadd.f32 %v1214_v35, %v1042_v38  ;;  %v1404_v40 = vpop.f32.mrb[18].mxu1 }
 0x396   : > { %1108 = vst.msk [vmem:[%s1662_s17 + $0x10] sm:$0xff] %vm1105_vm0, %v1051_v37  ;;  %v1054_v41 = vadd.f32 %v1404_v40, %v1214_v35  ;;  %v1045_v42 = vpop.f32.mrb[19].mxu1 }
 0x397   : > { %1106 = vst.msk [vmem:[%s1662_s17] sm:$0xff] %vm1105_vm0, %v1043_v39  ;;  %v1046_v43 = vadd.f32 %v1214_v35, %v1045_v42 }
 0x398   : > { %1109 = vst.msk [vmem:[%s1662_s17 + $0x18] sm:$0xff] %vm1105_vm0, %v1054_v41 }
 0x399   : > { %1107 = vst.msk [vmem:[%s1662_s17 + $0x8] sm:$0xff] %vm1105_vm0, %v1046_v43 }
 0x39b   : > { %v1407_v44 = vpop.f32.mrb[20].mxu1 }
 0x39c   : > { %v1067_v45 = vadd.f32 %v1407_v44, %v1214_v35  ;;  %v1058_v46 = vpop.f32.mrb[21].mxu1 }
 0x39d   : > { %v1059_v47 = vadd.f32 %v1214_v35, %v1058_v46  ;;  %v1408_v48 = vpop.f32.mrb[22].mxu1 }
 0x39e   : > { %1112 = vst.msk [vmem:[%s1662_s17 + $0x30] sm:$0xff] %vm1105_vm0, %v1067_v45  ;;  %v1070_v49 = vadd.f32 %v1408_v48, %v1214_v35  ;;  %v1061_v50 = vpop.f32.mrb[23].mxu1 }
 0x39f   : > { %1110 = vst.msk [vmem:[%s1662_s17 + $0x20] sm:$0xff] %vm1105_vm0, %v1059_v47  ;;  %v1062_v51 = vadd.f32 %v1214_v35, %v1061_v50 }
 0x3a0   : > { %1113 = vst.msk [vmem:[%s1662_s17 + $0x38] sm:$0xff] %vm1105_vm0, %v1070_v49 }
 0x3a1   : > { %1111 = vst.msk [vmem:[%s1662_s17 + $0x28] sm:$0xff] %vm1105_vm0, %v1062_v51 }
 0x3a3   : > { %v1411_v52 = vpop.f32.mrb[24].mxu1 }
 0x3a4   : > { %v1083_v53 = vadd.f32 %v1411_v52, %v1214_v35  ;;  %v1074_v54 = vpop.f32.mrb[25].mxu1 }
 0x3a5   : > { %v1075_v55 = vadd.f32 %v1214_v35, %v1074_v54  ;;  %v1412_v56 = vpop.f32.mrb[26].mxu1 }
 0x3a6   : > { %1116 = vst.msk [vmem:[%s1662_s17 + $0x50] sm:$0xff] %vm1105_vm0, %v1083_v53  ;;  %v1086_v57 = vadd.f32 %v1412_v56, %v1214_v35  ;;  %v1077_v58 = vpop.f32.mrb[27].mxu1 }
 0x3a7   : > { %1114 = vst.msk [vmem:[%s1662_s17 + $0x40] sm:$0xff] %vm1105_vm0, %v1075_v55  ;;  %v1078_v59 = vadd.f32 %v1214_v35, %v1077_v58 }
 0x3a8   : > { %1117 = vst.msk [vmem:[%s1662_s17 + $0x58] sm:$0xff] %vm1105_vm0, %v1086_v57 }
 0x3a9   : > { %1115 = vst.msk [vmem:[%s1662_s17 + $0x48] sm:$0xff] %vm1105_vm0, %v1078_v59 }
 0x3ab   : > { %v1415_v60 = vpop.f32.mrb[28].mxu1 }
 0x3ac   : > { %v1099_v61 = vadd.f32 %v1415_v60, %v1214_v35  ;;  %v1090_v62 = vpop.f32.mrb[29].mxu1 }
 0x3ad   : > { %v1091_v63 = vadd.f32 %v1214_v35, %v1090_v62  ;;  %v1416_v0 = vpop.f32.mrb[30].mxu1 }
 0x3ae   : > { %1120 = vst.msk [vmem:[%s1662_s17 + $0x70] sm:$0xff] %vm1105_vm0, %v1099_v61  ;;  %v1102_v1 = vadd.f32 %v1416_v0, %v1214_v35  ;;  %v1093_v2 = vpop.f32.mrb[31].mxu1 }
 0x3af   : > { %1118 = vst.msk [vmem:[%s1662_s17 + $0x60] sm:$0xff] %vm1105_vm0, %v1091_v63  ;;  %v1094_v3 = vadd.f32 %v1214_v35, %v1093_v2 }
 0x3b0   : > { %1121 = vst.msk [vmem:[%s1662_s17 + $0x78] sm:$0xff] %vm1105_vm0, %v1102_v1 }
 0x3b1   : > { %1119 = vst.msk [vmem:[%s1662_s17 + $0x68] sm:$0xff] %vm1105_vm0, %v1094_v3 }
 0x3b2 PF: > { %s19_s30 = sadd.s32 1, %s1463_s30  }
 0x3b3   : > { %p16_p4 = scmp.ge.s32.totalorder %s19_s30, 4  }
 0x3b5   :  { %18 = sbr.rel (!%p16_p4) target bundleno = 1 (0x1), region = 86 }

// kernel: encoder_processor_decoder.11
= control target key start
LH: loop header
LB: loop body
LE: loop exit
PB: predicated region body
PF: predicated region fallthrough
CT: control target
= control target key end

     0   :  { %s3063_s0 = inlined_call_operand.vmem [shape: s32[512], index: 0, kind: input, shape index: {}]   ;;  %s3064_s2 = inlined_call_operand.vmem [shape: f32[512,128], index: 2, kind: input, shape index: {}]   ;;  %s3065_s3 = inlined_call_operand.vmem [shape: f32[256,128], index: 3, kind: input, shape index: {}]   ;;  %s3066_s4 = inlined_call_operand.vmem [shape: bf16[128,128], index: 4, kind: input, shape index: {}]   ;;  %s3067_s5 = inlined_call_operand.vmem [shape: bf16[128,128], index: 5, kind: input, shape index: {}]   ;;  %s3068_s6 = inlined_call_operand.vmem [shape: bf16[128,128], index: 6, kind: input, shape index: {}]   ;;  %s3069_s7 = inlined_call_operand.vmem [shape: f32[1,128], index: 7, kind: input, shape index: {}]   ;;  %s3070_s8 = inlined_call_operand.vmem [shape: bf16[128,128], index: 8, kind: input, shape index: {}]   ;;  %s3071_s9 = inlined_call_operand.vmem [shape: f32[1,128], index: 9, kind: input, shape index: {}]   ;;  %s3072_s10 = inlined_call_operand.vmem [shape: bf16[128,128], index: 10, kind: input, shape index: {}]   ;;  %s3073_s11 = inlined_call_operand.vmem [shape: f32[1,128], index: 11, kind: input, shape index: {}]   ;;  %s3074_s12 = inlined_call_operand.vmem [shape: bf16[128,128], index: 12, kind: input, shape index: {}]   ;;  %s3075_s13 = inlined_call_operand.vmem [shape: f32[1,128], index: 13, kind: input, shape index: {}]   ;;  %s3076_s14 = inlined_call_operand.hbm [shape: f32[512,128], index: 14, kind: output, shape index: {0}]   ;;  %s3077_s15 = inlined_call_operand.vmem [shape: f32[256,128], index: 15, kind: output, shape index: {1}]   ;;  %s3078_s1 = inlined_call_operand.vmem [shape: s32[512], index: 1, kind: input, shape index: {}]  }
   0x1   :  { %3086 = sst [smem:[#allocation18_spill]] %s3064_s2  ;;  %s21_s20 = sshll.u32 %s3063_s0, 4  ;;  %s22_s20 = int_to_ptr.vmem [resolvable:$true] %s21_s20 }
   0x2   :  { %s25_s23 = sshll.u32 %s3078_s1, 4  ;;  %s2337_s24 = scalar_lea.vmem %s22_s20, 64  ;;  %s26_s23 = int_to_ptr.vmem [resolvable:$true] %s25_s23 }
   0x3   :  { %p2338_p0 = scmp.ne.s32.totalorder %s22_s20, %s2337_s24  ;;  %p2342_p1 = scmp.lt.s32.totalorder %s22_s20, %s22_s20 }
   0x4   :  { %p2343_p2 = scmp.lt.s32.totalorder %s2337_s24, %s2337_s24 }
   0x6   :  { %p2344_p3 = por %p2343_p2, %p2342_p1 }
   0x8   :  { %p2345_p4 = pnand %p2344_p3, %p2338_p0 }
   0xa   :  { %2348 = shalt.err (!%p2345_p4)  }
   0xb   :  { %s2443_s25 = smov [#allocation6]   ;;  %s2349_s26 = scalar_lea.vmem %s26_s23, 64 }
   0xc   :  { %24 = dma.vmem_to_smem %s22_s20, 64, %s2443_s25, [#allocation5] }
   0xd   :  { %p2350_p5 = scmp.ne.s32.totalorder %s26_s23, %s2349_s26  ;;  %p2354_p6 = scmp.lt.s32.totalorder %s26_s23, %s26_s23 }
   0xe   :  { %p2355_p7 = scmp.lt.s32.totalorder %s2349_s26, %s2349_s26 }
  0x10   :  { %p2356_p8 = por %p2355_p7, %p2354_p6 }
  0x12   :  { %p2357_p9 = pnand %p2356_p8, %p2350_p5 }
  0x14   :  { %2360 = shalt.err (!%p2357_p9)  }
  0x15   :  { %s2444_s0 = smov [#allocation7]  }
  0x16   :  { %28 = dma.vmem_to_smem %s26_s23, 64, %s2444_s0, [#allocation5] }
  0x17   :  { %2413 = dma.done.wait [#allocation5], 128 }
  0x18   :  { %2414 = vsyncadd [#allocation5], 4294967168 }
  0x19   :  { %30 = sfence }
  0x1a   :  { %31 = vsyncpa [#allocation9], 0 }
  0x1b   :  { %33 = vsyncpa [#allocation9 + $0x1], 0  ;;  %s2535_s1 = smov 0   ;;  %s2537_s27 = smov 0  }
  0x1c   :  { %s2539_s28 = smov 0   ;;  %s2541_s29 = smov 0  }
  0x1d LB: > { %3087 = sst [smem:[#allocation12_spill]] %s2421_s1  ;;  %s2556_s30 = sadd.s32 4294967295, %s2433_s29   ;;  %s2433_s29 = sphi %s2541_s29, %s3102_s29   ;;  %s2429_s28 = sphi %s2539_s28, %s3104_s28   ;;  %s2425_s27 = sphi %s2537_s27, %s3106_s27   ;;  %s2421_s1 = sphi %s2535_s1, %s3105_s1  }
  0x1e   : > { %3088 = sst [smem:[#allocation13_spill]] %s2429_s28  ;;  %s1842_s16 = sadd.s32 4294967294, %s2433_s29  }
  0x1f   : > { %3089 = sst [smem:[#allocation14_spill]] %s2433_s29  ;;  %s2560_s17 = sadd.s32 1, %s2433_s29  }
  0x20   : > { %3090 = sst [smem:[#allocation15_spill]] %s2560_s17  ;;  %s303_s18 = sadd.s32 1, %s2429_s28 }
  0x21   : > { %s300_s19 = ssub.s32 %s2433_s29, %s2560_s17  ;;  %p313_p10 = scmp.ne.s32.totalorder %s2429_s28, %s2425_s27 }
  0x22   : > { %p301_p11 = scmp.eq.s32.totalorder %s300_s19, 0  ;;  %p314_p12 = scmp.eq.s32.totalorder %s2556_s30, 3 }
  0x23   : > { %p319_p13 = scmp.ne.s32.totalorder %s2425_s27, %s2421_s1  ;;  %p320_p0 = scmp.eq.s32.totalorder %s1842_s16, 3 }
  0x24   : > { %s2571_s20 = scalar_select %p301_p11, %s2429_s28, %s303_s18  }
  0x25   : > { %p2573_p1 = por %p314_p12, %p313_p10  ;;  %p2577_p2 = por %p320_p0, %p319_p13 }
  0x26   : > { %3091 = sst [smem:[#allocation16_spill]] %s2571_s20  ;;  %p1845_p3 = scmp.ge.s32.totalorder %s2433_s29, 1 }
  0x27   : > { %s3093_s22 = scalar_select %p2577_p2, 1, 0 }
  0x28   : > { %p401_p4 = scmp.lt.s32.totalorder %s2433_s29, 5 }
  0x29   : > { %3094 = sst [smem:[#allocation17_spill]] %s3093_s22 }
  0x2a   : > { %p402_p5 = pnand %p1845_p3, %p401_p4 }
  0x2b   : > { %s3082_s23 = sand.u32 (!%p402_p5), 1, %s2425_s27   ;;  %s1847_s24 = sshll.u32 (!%p402_p5), %s2556_s30, 4 }
  0x2c   : > { %405 = sbr.rel (%p402_p5) target bundleno = 1113 (0x459), region = 68  ;;  %s1846_s25 = sshll.u32 (!%p402_p5), %s3082_s23, 7 }
  0x2d   : > { %p446_p6 = scmp.lt.s32.totalorder (!%p402_p5), %s1847_s24, 63  ;;  %s3095_s2 = sld [smem:[#allocation18_spill]] (!%p402_p5) }
  0x2e   : > { %s2593_s20 = scalar_lea.vmem (!%p402_p5), [#allocation8], %s1846_s25  ;;  %p1850_p7 = scmp.ne.s32.totalorder (!%p402_p5), %s2556_s30, 0 }
  0x33   : > { %s3108_s24 = smov (!%p446_p6, %s1847_s24), 63  ;;  %457 = sbr.rel (%p1850_p7) target bundleno = 69 (0x45), region = 72 }
  0x34   : > { %s1848_s0 = sshll.u32 %s3108_s24, 3  ;;  %v2445_v0 = vmov (!%p1850_p7), 0.0  }
  0x35   : > { %s2591_s19 = scalar_lea.vmem %s3095_s2, %s1848_s0  ;;  %458 = vst [vmem:[%s3077_s15] sm:$0xff] (!%p1850_p7), %v2445_v0  ;;  %459 = vst [vmem:[%s3077_s15 + $0x8] sm:$0xff] (!%p1850_p7), %v2445_v0 }
  0x36   : > { %460 = vst [vmem:[%s3077_s15 + $0x10] sm:$0xff] (!%p1850_p7), %v2445_v0  ;;  %461 = vst [vmem:[%s3077_s15 + $0x18] sm:$0xff] (!%p1850_p7), %v2445_v0 }
  0x37   : > { %462 = vst [vmem:[%s3077_s15 + $0x20] sm:$0xff] (!%p1850_p7), %v2445_v0  ;;  %463 = vst [vmem:[%s3077_s15 + $0x28] sm:$0xff] (!%p1850_p7), %v2445_v0 }
  0x38   : > { %464 = vst [vmem:[%s3077_s15 + $0x30] sm:$0xff] (!%p1850_p7), %v2445_v0  ;;  %465 = vst [vmem:[%s3077_s15 + $0x38] sm:$0xff] (!%p1850_p7), %v2445_v0 }
  0x39   : > { %466 = vst [vmem:[%s3077_s15 + $0x40] sm:$0xff] (!%p1850_p7), %v2445_v0  ;;  %467 = vst [vmem:[%s3077_s15 + $0x48] sm:$0xff] (!%p1850_p7), %v2445_v0 }
  0x3a   : > { %468 = vst [vmem:[%s3077_s15 + $0x50] sm:$0xff] %v2445_v0  ;;  %469 = vst [vmem:[%s3077_s15 + $0x58] sm:$0xff] %v2445_v0 }
  0x3b   : > { %470 = vst [vmem:[%s3077_s15 + $0x60] sm:$0xff] %v2445_v0  ;;  %471 = vst [vmem:[%s3077_s15 + $0x68] sm:$0xff] %v2445_v0 }
  0x3c   : > { %472 = vst [vmem:[%s3077_s15 + $0x70] sm:$0xff] %v2445_v0  ;;  %473 = vst [vmem:[%s3077_s15 + $0x78] sm:$0xff] %v2445_v0 }
  0x3d   : > { %474 = vst [vmem:[%s3077_s15 + $0x80] sm:$0xff] %v2445_v0  ;;  %475 = vst [vmem:[%s3077_s15 + $0x88] sm:$0xff] %v2445_v0 }
  0x3e   : > { %476 = vst [vmem:[%s3077_s15 + $0x90] sm:$0xff] %v2445_v0  ;;  %477 = vst [vmem:[%s3077_s15 + $0x98] sm:$0xff] %v2445_v0 }
  0x3f   : > { %478 = vst [vmem:[%s3077_s15 + $0xa0] sm:$0xff] %v2445_v0  ;;  %479 = vst [vmem:[%s3077_s15 + $0xa8] sm:$0xff] %v2445_v0 }
  0x40   : > { %480 = vst [vmem:[%s3077_s15 + $0xb0] sm:$0xff] %v2445_v0  ;;  %481 = vst [vmem:[%s3077_s15 + $0xb8] sm:$0xff] %v2445_v0 }
  0x41   : > { %482 = vst [vmem:[%s3077_s15 + $0xc0] sm:$0xff] %v2445_v0  ;;  %483 = vst [vmem:[%s3077_s15 + $0xc8] sm:$0xff] %v2445_v0 }
  0x42   : > { %484 = vst [vmem:[%s3077_s15 + $0xd0] sm:$0xff] %v2445_v0  ;;  %485 = vst [vmem:[%s3077_s15 + $0xd8] sm:$0xff] %v2445_v0 }
  0x43   : > { %486 = vst [vmem:[%s3077_s15 + $0xe0] sm:$0xff] %v2445_v0  ;;  %487 = vst [vmem:[%s3077_s15 + $0xe8] sm:$0xff] %v2445_v0 }
  0x44   : > { %488 = vst [vmem:[%s3077_s15 + $0xf0] sm:$0xff] %v2445_v0  ;;  %489 = vst [vmem:[%s3077_s15 + $0xf8] sm:$0xff] %v2445_v0 }
  0x45 PF: > { %s2435_s26 = smov 0  }
  0x46 LB: >> { %s3096_s24 = sshll.u32 %s2556_s30, 7  ;;  %s500_s22 = scalar_lea.vmem [#allocation2], %s2437_s26  ;;  %s2437_s26 = sphi %s2435_s26, %s495_s26  }
  0x47   : >> { %s496_s0 = sadd.s32 %s2437_s26, %s3096_s24  ;;  %s505_s23 = scalar_lea.vmem [#allocation3], %s2437_s26 }
  0x48   : >> { %s497_s16 = sld [smem:[#allocation6 + %s496_s0]]  ;;  %s495_s26 = sadd.s32 1, %s2437_s26  }
  0x49   : >> { %s502_s25 = sld [smem:[#allocation7 + %s496_s0]]  ;;  %p492_p8 = scmp.ge.s32.totalorder %s495_s26, 128  }
  0x4a   : > { %v2289_v3 = vld [vmem:[%s3067_s5] sm:$0xff] (%p492_p8)   ;;  %v2290_v4 = vld [vmem:[%s3067_s5 + $0x8] sm:$0xff] (%p492_p8)   ;;  %v2291_v5 = vld [vmem:[%s3067_s5 + $0x10] sm:$0xff] (%p492_p8)   ;;  %s2439_s17 = smov (%p492_p8), 0  }
  0x4b   : > { %494 = sbr.rel (!%p492_p8) target bundleno = 70 (0x46), region = 135  ;;  %2005 = vmatprep.subr.bf16.mxu0 (%p492_p8), %v2289_v3  ;;  %v2292_v6 = vld [vmem:[%s3067_s5 + $0x18] sm:$0xff] (%p492_p8)   ;;  %v2293_v10 = vld [vmem:[%s3067_s5 + $0x20] sm:$0xff] (%p492_p8)   ;;  %v2294_v11 = vld [vmem:[%s3067_s5 + $0x28] sm:$0xff] (%p492_p8)  }
  0x4c   : > { %2006 = vmatpush3.bf16.msra.mxu0 (%p492_p8), %v2289_v3  ;;  %v2295_v12 = vld [vmem:[%s3067_s5 + $0x30] sm:$0xff] (%p492_p8)   ;;  %v2296_v13 = vld [vmem:[%s3067_s5 + $0x38] sm:$0xff] (%p492_p8)   ;;  %v2297_v16 = vld [vmem:[%s3066_s4] sm:$0xff] (%p492_p8)  }
  0x4d   : > { %2007 = vmatprep.subr.bf16.mxu0 (%p492_p8), %v2290_v4  ;;  %v2298_v21 = vld [vmem:[%s3066_s4 + $0x8] sm:$0xff] (%p492_p8)   ;;  %v2299_v24 = vld [vmem:[%s3066_s4 + $0x10] sm:$0xff] (%p492_p8)   ;;  %v2300_v28 = vld [vmem:[%s3066_s4 + $0x18] sm:$0xff] (%p492_p8)  }
  0x4e   : >> { %s498_s1 = scalar_lea.vmem %s3065_s3, %s497_s16  ;;  %v2313_v30 = vld [vmem:[%s3070_s8] sm:$0xff] (%p492_p8)   ;;  %v2314_v33 = vld [vmem:[%s3070_s8 + $0x8] sm:$0xff] (%p492_p8)   ;;  %v2315_v37 = vld [vmem:[%s3070_s8 + $0x10] sm:$0xff] (%p492_p8)  }
  0x4f   : >> { %s503_s29 = scalar_lea.vmem %s3065_s3, %s502_s25  ;;  %v499_v1 = vld [vmem:[%s498_s1] sm:$0x1]  ;;  %2101 = vmatprep.subr.bf16.mxu1 (%p492_p8), %v2313_v30  ;;  %v2302_v39 = vld [vmem:[%s3066_s4 + $0x28] sm:$0xff] (%p492_p8)   ;;  %v2316_v41 = vld [vmem:[%s3070_s8 + $0x18] sm:$0xff] (%p492_p8)  }
  0x50   : >> { %v504_v2 = vld [vmem:[%s503_s29] sm:$0x1]  ;;  %501 = vst [vmem:[%s500_s22] sm:$0x1] %v499_v1  ;;  %2008 = vmatpush3.bf16.msra.mxu0 (%p492_p8), %v2290_v4  ;;  %2102 = vmatpush3.bf16.msra.mxu1 (%p492_p8), %v2313_v30  ;;  %v2303_v44 = vld [vmem:[%s3066_s4 + $0x30] sm:$0xff] (%p492_p8)   ;;  %v2304_v49 = vld [vmem:[%s3066_s4 + $0x38] sm:$0xff] (%p492_p8)  }
  0x51   : >> { %506 = vst [vmem:[%s505_s23] sm:$0x1] %v504_v2  ;;  %2009 = vmatprep.subr.bf16.mxu0 (%p492_p8), %v2291_v5  ;;  %v2301_v34 = vld [vmem:[%s3066_s4 + $0x20] sm:$0xff] (%p492_p8)   ;;  %2103 = vmatprep.subr.bf16.mxu1 (%p492_p8), %v2314_v33  ;;  %v2318_v51 = vld [vmem:[%s3070_s8 + $0x28] sm:$0xff] (%p492_p8)   ;;  %v2307_v62 = vld [vmem:[%s3068_s6 + $0x10] sm:$0xff] (%p492_p8)  }
  0x52   : > { %v2317_v47 = vld [vmem:[%s3070_s8 + $0x20] sm:$0xff]   ;;  %v2306_v59 = vld [vmem:[%s3068_s6 + $0x8] sm:$0xff]   ;;  %v2308_v3 = vld [vmem:[%s3068_s6 + $0x18] sm:$0xff]  }
  0x53   : > { %v2305_v54 = vld [vmem:[%s3068_s6] sm:$0xff]  }
  0x54   : > { %2010 = vmatpush3.bf16.msra.mxu0 %v2291_v5  ;;  %2104 = vmatpush3.bf16.msra.mxu1 %v2314_v33  ;;  %v2834_v33 = vld [vmem:[%s2591_s19 + $0x58] sm:$0xff] }
  0x55   : > { %2011 = vmatprep.subr.bf16.mxu0 %v2292_v6  ;;  %2105 = vmatprep.subr.bf16.mxu1 %v2315_v37 }
  0x57   : > { %v523_v45 = vld [vmem:[#allocation2] sm:$0xff]  ;;  %v524_v46 = vld [vmem:[#allocation2 + $0x8] sm:$0xff]  ;;  %v525_v52 = vld [vmem:[#allocation2 + $0x10] sm:$0xff] }
  0x58   : > { %v563_v7 = vld [vmem:[#allocation3] sm:$0xff]  ;;  %v564_v8 = vld [vmem:[#allocation3 + $0x8] sm:$0xff]  ;;  %2012 = vmatpush3.bf16.msra.mxu0 %v2292_v6  ;;  %v565_v14 = vld [vmem:[#allocation3 + $0x10] sm:$0xff]  ;;  %2106 = vmatpush3.bf16.msra.mxu1 %v2315_v37  ;;  %v539_v50 = vpack.c.bf16 %v524_v46, %v523_v45 }
  0x59   : > { %v579_v9 = vpack.c.bf16 %v564_v8, %v563_v7  ;;  %2013 = vmatprep.subr.bf16.mxu0 %v2293_v10  ;;  %v566_v15 = vld [vmem:[#allocation3 + $0x18] sm:$0xff]  ;;  %v567_v17 = vld [vmem:[#allocation3 + $0x20] sm:$0xff]  ;;  %v568_v18 = vld [vmem:[#allocation3 + $0x28] sm:$0xff]  ;;  %2107 = vmatprep.subr.bf16.mxu1 %v2316_v41 }
  0x5a   : > { %v580_v19 = vpack.c.bf16 %v566_v15, %v565_v14  ;;  %v581_v20 = vpack.c.bf16 %v568_v18, %v567_v17  ;;  %v569_v22 = vld [vmem:[#allocation3 + $0x30] sm:$0xff]  ;;  %v570_v23 = vld [vmem:[#allocation3 + $0x38] sm:$0xff]  ;;  %v571_v25 = vld [vmem:[#allocation3 + $0x40] sm:$0xff] }
  0x5b   : > { %2021 = vmatprep.mubr.bf16.mxu0 %v579_v9  ;;  %v572_v26 = vld [vmem:[#allocation3 + $0x48] sm:$0xff]  ;;  %v582_v27 = vpack.c.bf16 %v570_v23, %v569_v22  ;;  %v573_v31 = vld [vmem:[#allocation3 + $0x50] sm:$0xff]  ;;  %v574_v32 = vld [vmem:[#allocation3 + $0x58] sm:$0xff] }
  0x5c   : > { %2014 = vmatpush3.bf16.msra.mxu0 %v2293_v10  ;;  %v583_v29 = vpack.c.bf16 %v572_v26, %v571_v25  ;;  %v575_v35 = vld [vmem:[#allocation3 + $0x60] sm:$0xff]  ;;  %v576_v36 = vld [vmem:[#allocation3 + $0x68] sm:$0xff]  ;;  %v584_v38 = vpack.c.bf16 %v574_v32, %v573_v31  ;;  %v577_v42 = vld [vmem:[#allocation3 + $0x70] sm:$0xff]  ;;  %2108 = vmatpush3.bf16.msra.mxu1 %v2316_v41 }
  0x5d   : > { %2015 = vmatprep.subr.bf16.mxu0 %v2294_v11  ;;  %v585_v40 = vpack.c.bf16 %v576_v36, %v575_v35  ;;  %v578_v43 = vld [vmem:[#allocation3 + $0x78] sm:$0xff]  ;;  %2109 = vmatprep.subr.bf16.mxu1 %v2317_v47  ;;  %v527_v55 = vld [vmem:[#allocation2 + $0x20] sm:$0xff]  ;;  %v528_v56 = vld [vmem:[#allocation2 + $0x28] sm:$0xff] }
  0x5e   : > { %v586_v48 = vpack.c.bf16 %v578_v43, %v577_v42  ;;  %v526_v53 = vld [vmem:[#allocation2 + $0x18] sm:$0xff]  ;;  %v541_v58 = vpack.c.bf16 %v528_v56, %v527_v55  ;;  %v529_v60 = vld [vmem:[#allocation2 + $0x30] sm:$0xff]  ;;  %v531_v63 = vld [vmem:[#allocation2 + $0x40] sm:$0xff] }
  0x5f   : > { %v540_v57 = vpack.c.bf16 %v526_v53, %v525_v52  ;;  %v530_v61 = vld [vmem:[#allocation2 + $0x38] sm:$0xff]  ;;  %v532_v0 = vld [vmem:[#allocation2 + $0x48] sm:$0xff]  ;;  %v533_v4 = vld [vmem:[#allocation2 + $0x50] sm:$0xff] }
  0x60   : > { %2016 = vmatpush3.bf16.msra.mxu0 %v2294_v11  ;;  %2110 = vmatpush3.bf16.msra.mxu1 %v2317_v47  ;;  %v542_v1 = vpack.c.bf16 %v530_v61, %v529_v60  ;;  %v543_v2 = vpack.c.bf16 %v532_v0, %v531_v63  ;;  %v534_v5 = vld [vmem:[#allocation2 + $0x58] sm:$0xff]  ;;  %v2309_v6 = vld [vmem:[%s3068_s6 + $0x20] sm:$0xff]   ;;  %v536_v8 = vld [vmem:[#allocation2 + $0x68] sm:$0xff] }
  0x61   : > { %2017 = vmatprep.subr.bf16.mxu0 %v2295_v12  ;;  %2111 = vmatprep.subr.bf16.mxu1 %v2318_v51  ;;  %v535_v7 = vld [vmem:[#allocation2 + $0x60] sm:$0xff]  ;;  %v544_v9 = vpack.c.bf16 %v534_v5, %v533_v4  ;;  %v2310_v11 = vld [vmem:[%s3068_s6 + $0x28] sm:$0xff]   ;;  %v2311_v14 = vld [vmem:[%s3068_s6 + $0x30] sm:$0xff]  }
  0x62   : > { %v545_v10 = vpack.c.bf16 %v536_v8, %v535_v7  ;;  %v2788_v15 = vld [vmem:[%s2591_s19] sm:$0xff]  ;;  %v2808_v23 = vld [vmem:[%s2591_s19 + $0x28] sm:$0xff]  ;;  %v2815_v26 = vld [vmem:[%s2591_s19 + $0x30] sm:$0xff] }
  0x63   : > { %v2805_v22 = vld [vmem:[%s2591_s19 + $0x20] sm:$0xff]  ;;  %v2831_v32 = vld [vmem:[%s2591_s19 + $0x50] sm:$0xff]  ;;  %v2840_v35 = vld [vmem:[%s2591_s19 + $0x68] sm:$0xff] }
  0x64   : > { %2018 = vmatpush3.bf16.msra.mxu0 %v2295_v12  ;;  %2112 = vmatpush3.bf16.msra.mxu1 %v2318_v51  ;;  %v537_v12 = vld [vmem:[#allocation2 + $0x70] sm:$0xff]  ;;  %v895_v25 = vpack.c.bf16 %v2808_v23, %v2805_v22  ;;  %v898_v36 = vpack.c.bf16 %v2834_v33, %v2831_v32  ;;  %v2320_v42 = vld [vmem:[%s3070_s8 + $0x38] sm:$0xff]   ;;  %v2321_v43 = vld [vmem:[%s3072_s10] sm:$0xff]  }
  0x65   : > { %2019 = vmatprep.subr.bf16.mxu0 %v2296_v13  ;;  %v2319_v41 = vld [vmem:[%s3070_s8 + $0x30] sm:$0xff]  }
  0x66   : > { %2113 = vmatprep.subr.bf16.mxu1 %v2319_v41 }
  0x68   : > { %2020 = vmatpush3.bf16.msra.mxu0 %v2296_v13  ;;  %v538_v13 = vld [vmem:[#allocation2 + $0x78] sm:$0xff]  ;;  %2114 = vmatpush3.bf16.msra.mxu1 %v2319_v41 }
  0x69   : > { %2037 = vmatprep.subr.bf16.mxu0 %v2297_v16  ;;  %v546_v17 = vpack.c.bf16 %v538_v13, %v537_v12  ;;  %2115 = vmatprep.subr.bf16.mxu1 %v2320_v42 }
  0x6b   : > { %2022 = vmatmul.mubr.bf16.vlgmr.msra.gmra.mrb[0].mxu0 %v580_v19  ;;  %v2312_v19 = vld [vmem:[%s3068_s6 + $0x38] sm:$0xff]  }
  0x6c   : > { %2038 = vmatpush3.bf16.msra.mxu0 %v2297_v16  ;;  %2025 = vmatprep.mubr.bf16.mxu0 %v581_v20  ;;  %v2791_v16 = vld [vmem:[%s2591_s19 + $0x8] sm:$0xff]  ;;  %v2799_v20 = vld [vmem:[%s2591_s19 + $0x10] sm:$0xff] }
  0x6d   : > { %2039 = vmatprep.subr.bf16.mxu0 %v2298_v21  ;;  %v893_v18 = vpack.c.bf16 %v2791_v16, %v2788_v15  ;;  %2116 = vmatpush3.bf16.msra.mxu1 %v2320_v42 }
  0x6e   : > { %2133 = vmatprep.subr.bf16.mxu1 %v2321_v43 }
  0x70   : > { %2040 = vmatpush3.bf16.msra.mxu0 %v2298_v21  ;;  %v2802_v21 = vld [vmem:[%s2591_s19 + $0x18] sm:$0xff] }
  0x71   : > { %2041 = vmatprep.subr.bf16.mxu0 %v2299_v24 }
  0x73   : > { %2026 = vmatmul.mubr.bf16.gmra.mrb[4].mxu0 %v582_v27  ;;  %v2818_v27 = vld [vmem:[%s2591_s19 + $0x38] sm:$0xff] }
  0x74   : > { %2042 = vmatpush3.bf16.msra.mxu0 %v2299_v24  ;;  %2029 = vmatprep.mubr.bf16.mxu0 %v583_v29  ;;  %v894_v24 = vpack.c.bf16 %v2802_v21, %v2799_v20  ;;  %v2824_v29 = vld [vmem:[%s2591_s19 + $0x48] sm:$0xff]  ;;  %v896_v30 = vpack.c.bf16 %v2818_v27, %v2815_v26 }
  0x75   : > { %2043 = vmatprep.subr.bf16.mxu0 %v2300_v28 }
  0x78   : > { %2044 = vmatpush3.bf16.msra.mxu0 %v2300_v28  ;;  %v2821_v28 = vld [vmem:[%s2591_s19 + $0x40] sm:$0xff] }
  0x79   : > { %2045 = vmatprep.subr.bf16.mxu0 %v2301_v34  ;;  %v897_v31 = vpack.c.bf16 %v2824_v29, %v2821_v28 }
  0x7b   : > { %2030 = vmatmul.mubr.bf16.gmra.mrb[8].mxu0 %v584_v38  ;;  %v2847_v38 = vld [vmem:[%s2591_s19 + $0x70] sm:$0xff] }
  0x7c   : > { %2046 = vmatpush3.bf16.msra.mxu0 %v2301_v34  ;;  %2033 = vmatprep.mubr.bf16.mxu0 %v585_v40  ;;  %v2837_v34 = vld [vmem:[%s2591_s19 + $0x60] sm:$0xff] }
  0x7d   : > { %2047 = vmatprep.subr.bf16.mxu0 %v2302_v39  ;;  %v899_v37 = vpack.c.bf16 %v2840_v35, %v2837_v34 }
  0x80   : > { %2048 = vmatpush3.bf16.msra.mxu0 %v2302_v39  ;;  %v2850_v39 = vld [vmem:[%s2591_s19 + $0x78] sm:$0xff] }
  0x81   : > { %2049 = vmatprep.subr.bf16.mxu0 %v2303_v44  ;;  %v900_v40 = vpack.c.bf16 %v2850_v39, %v2847_v38 }
  0x83   : > { %2034 = vmatmul.mubr.bf16.gmra.mrb[12].mxu0 %v586_v48 }
  0x84   : > { %2050 = vmatpush3.bf16.msra.mxu0 %v2303_v44  ;;  %2053 = vmatprep.mubr.bf16.mxu0 %v539_v50  ;;  %v2866_v44 = vld [vmem:[%s3069_s7] ss:$0 sm:$0xff] }
  0x85   : > { %2051 = vmatprep.subr.bf16.mxu0 %v2304_v49 }
  0x88   : > { %2052 = vmatpush3.bf16.msra.mxu0 %v2304_v49 }
  0x89   : > { %2069 = vmatprep.subr.bf16.mxu0 %v2305_v54 }
  0x8b   : > { %2054 = vmatmul.mubr.bf16.vlgmr.msra.gmra.mrb[0].mxu0 %v540_v57 }
  0x8c   : > { %2070 = vmatpush3.bf16.msra.mxu0 %v2305_v54  ;;  %2057 = vmatprep.mubr.bf16.mxu0 %v541_v58 }
  0x8d   : > { %2071 = vmatprep.subr.bf16.mxu0 %v2306_v59 }
  0x90   : > { %2072 = vmatpush3.bf16.msra.mxu0 %v2306_v59 }
  0x91   : > { %2073 = vmatprep.subr.bf16.mxu0 %v2307_v62 }
  0x93   : > { %2058 = vmatmul.mubr.bf16.gmra.mrb[4].mxu0 %v542_v1 }
  0x94   : > { %2074 = vmatpush3.bf16.msra.mxu0 %v2307_v62  ;;  %2061 = vmatprep.mubr.bf16.mxu0 %v543_v2  ;;  %v2322_v62 = vld [vmem:[%s3072_s10 + $0x8] sm:$0xff]  }
  0x95   : > { %2075 = vmatprep.subr.bf16.mxu0 %v2308_v3 }
  0x98   : > { %2076 = vmatpush3.bf16.msra.mxu0 %v2308_v3 }
  0x99   : > { %2077 = vmatprep.subr.bf16.mxu0 %v2309_v6 }
  0x9b   : > { %2062 = vmatmul.mubr.bf16.gmra.mrb[8].mxu0 %v544_v9 }
  0x9c   : > { %2078 = vmatpush3.bf16.msra.mxu0 %v2309_v6  ;;  %2065 = vmatprep.mubr.bf16.mxu0 %v545_v10  ;;  %v2323_v6 = vld [vmem:[%s3072_s10 + $0x10] sm:$0xff]  }
  0x9d   : > { %2079 = vmatprep.subr.bf16.mxu0 %v2310_v11 }
  0xa0   : > { %2080 = vmatpush3.bf16.msra.mxu0 %v2310_v11 }
  0xa1   : > { %2081 = vmatprep.subr.bf16.mxu0 %v2311_v14 }
  0xa3   : > { %2066 = vmatmul.mubr.bf16.gmra.mrb[12].mxu0 %v546_v17 }
  0xa4   : > { %2082 = vmatpush3.bf16.msra.mxu0 %v2311_v14  ;;  %2085 = vmatprep.mubr.bf16.mxu0 %v893_v18  ;;  %v2324_v14 = vld [vmem:[%s3072_s10 + $0x18] sm:$0xff]  }
  0xa5   : > { %2083 = vmatprep.subr.bf16.mxu0 %v2312_v19 }
  0xa8   : > { %2084 = vmatpush3.bf16.msra.mxu0 %v2312_v19 }
  0xab   : > { %2086 = vmatmul.mubr.bf16.vlgmr.msra.gmra.mrb[0].mxu0 %v894_v24 }
  0xac   : > { %2089 = vmatprep.mubr.bf16.mxu0 %v895_v25 }
  0xb3   : > { %2090 = vmatmul.mubr.bf16.gmra.mrb[4].mxu0 %v896_v30 }
  0xb4   : > { %2093 = vmatprep.mubr.bf16.mxu0 %v897_v31 }
  0xbb   : > { %2094 = vmatmul.mubr.bf16.gmra.mrb[8].mxu0 %v898_v36  ;;  %v2325_v36 = vld [vmem:[%s3072_s10 + $0x20] sm:$0xff]  }
  0xbc   : > { %2097 = vmatprep.mubr.bf16.mxu0 %v899_v37 }
  0xc3   : > { %2098 = vmatmul.mubr.bf16.gmra.mrb[12].mxu0 %v900_v40 }
 0x17e   : > { %v2087_v45 = vpop.f32.mrb[0].mxu0 }
 0x17f   : > { %v1087_v46 = vadd.f32 %v2087_v45, %v2866_v44  ;;  %v999_v47 = vpop.f32.mrb[1].mxu0 }
 0x180   : > { %v1085_v48 = vadd.f32 %v2866_v44, %v999_v47  ;;  %v2088_v49 = vpop.f32.mrb[2].mxu0  ;;  %v2326_v47 = vld [vmem:[%s3072_s10 + $0x28] sm:$0xff]  }
 0x181   : > { %v1088_v50 = vadd.f32 %v2088_v49, %v2866_v44  ;;  %v1002_v51 = vpop.f32.mrb[3].mxu0  ;;  %v1103_v53 = vmax.f32 %v1087_v46, 0.0 }
 0x182   : > { %v1086_v52 = vadd.f32 %v2866_v44, %v1002_v51  ;;  %v1101_v55 = vmax.f32 %v1085_v48, 0.0 }
 0x183   : > { %v1104_v54 = vmax.f32 %v1088_v50, 0.0 }
 0x184   : > { %v1102_v56 = vmax.f32 %v1086_v52, 0.0 }
 0x185   : > { %v1118_v57 = vpack.c.bf16 %v1104_v54, %v1103_v53 }
 0x186   : > { %v2091_v58 = vpop.f32.mrb[4].mxu0  ;;  %v1117_v59 = vpack.c.bf16 %v1102_v56, %v1101_v55 }
 0x187   : > { %v1091_v60 = vadd.f32 %v2091_v58, %v2866_v44  ;;  %v1015_v61 = vpop.f32.mrb[5].mxu0 }
 0x188   : > { %v1089_v63 = vadd.f32 %v2866_v44, %v1015_v61  ;;  %v2092_v0 = vpop.f32.mrb[6].mxu0  ;;  %2117 = vmatprep.mubr.bf16.mxu1 %v1117_v59  ;;  %v2327_v59 = vld [vmem:[%s3072_s10 + $0x30] sm:$0xff]   ;;  %v2911_v61 = vld [vmem:[%s3071_s9] ss:$0 sm:$0xff] }
 0x189   : > { %v1092_v1 = vadd.f32 %v2092_v0, %v2866_v44  ;;  %v1018_v2 = vpop.f32.mrb[7].mxu0  ;;  %2118 = vmatmul.mubr.bf16.vlgmr.msra.gmra.mrb[0].mxu1 %v1118_v57  ;;  %v1107_v4 = vmax.f32 %v1091_v60, 0.0  ;;  %v2329_v60 = vld [vmem:[%s3074_s12] sm:$0xff]  }
 0x18a   : > { %v1090_v3 = vadd.f32 %v2866_v44, %v1018_v2  ;;  %2134 = vmatpush3.bf16.msra.mxu1 %v2321_v43  ;;  %v1105_v7 = vmax.f32 %v1089_v63, 0.0 }
 0x18b   : > { %v1108_v5 = vmax.f32 %v1092_v1, 0.0  ;;  %2135 = vmatprep.subr.bf16.mxu1 %v2322_v62 }
 0x18c   : > { %v1106_v8 = vmax.f32 %v1090_v3, 0.0 }
 0x18d   : > { %v1120_v9 = vpack.c.bf16 %v1108_v5, %v1107_v4 }
 0x18e   : > { %v1119_v10 = vpack.c.bf16 %v1106_v8, %v1105_v7  ;;  %v2095_v11 = vpop.f32.mrb[8].mxu0  ;;  %2136 = vmatpush3.bf16.msra.mxu1 %v2322_v62 }
 0x18f   : > { %v1095_v12 = vadd.f32 %v2095_v11, %v2866_v44  ;;  %v1031_v13 = vpop.f32.mrb[9].mxu0  ;;  %2137 = vmatprep.subr.bf16.mxu1 %v2323_v6 }
 0x190   : > { %v1093_v17 = vadd.f32 %v2866_v44, %v1031_v13  ;;  %v2096_v18 = vpop.f32.mrb[10].mxu0  ;;  %2121 = vmatprep.mubr.bf16.mxu1 %v1119_v10 }
 0x191   : > { %v1096_v19 = vadd.f32 %v2096_v18, %v2866_v44  ;;  %v1034_v24 = vpop.f32.mrb[11].mxu0  ;;  %2122 = vmatmul.mubr.bf16.gmra.mrb[4].mxu1 %v1120_v9  ;;  %v1111_v30 = vmax.f32 %v1095_v12, 0.0 }
 0x192   : > { %v1094_v25 = vadd.f32 %v2866_v44, %v1034_v24  ;;  %2138 = vmatpush3.bf16.msra.mxu1 %v2323_v6  ;;  %v1109_v37 = vmax.f32 %v1093_v17, 0.0  ;;  %v2330_v17 = vld [vmem:[%s3074_s12 + $0x8] sm:$0xff]  }
 0x193   : > { %v1112_v31 = vmax.f32 %v1096_v19, 0.0  ;;  %2139 = vmatprep.subr.bf16.mxu1 %v2324_v14 }
 0x194   : > { %v1110_v40 = vmax.f32 %v1094_v25, 0.0 }
 0x195   : > { %v1122_v41 = vpack.c.bf16 %v1112_v31, %v1111_v30 }
 0x196   : > { %v1121_v42 = vpack.c.bf16 %v1110_v40, %v1109_v37  ;;  %v2099_v43 = vpop.f32.mrb[12].mxu0  ;;  %2140 = vmatpush3.bf16.msra.mxu1 %v2324_v14  ;;  %v2331_v37 = vld [vmem:[%s3074_s12 + $0x10] sm:$0xff]  }
 0x197   : > { %v1099_v45 = vadd.f32 %v2099_v43, %v2866_v44  ;;  %v1047_v46 = vpop.f32.mrb[13].mxu0  ;;  %2141 = vmatprep.subr.bf16.mxu1 %v2325_v36 }
 0x198   : > { %v1097_v48 = vadd.f32 %v2866_v44, %v1047_v46  ;;  %v2100_v49 = vpop.f32.mrb[14].mxu0  ;;  %2125 = vmatprep.mubr.bf16.mxu1 %v1121_v42 }
 0x199   : > { %v1100_v50 = vadd.f32 %v2100_v49, %v2866_v44  ;;  %v1050_v51 = vpop.f32.mrb[15].mxu0  ;;  %2126 = vmatmul.mubr.bf16.gmra.mrb[8].mxu1 %v1122_v41  ;;  %v1115_v53 = vmax.f32 %v1099_v45, 0.0 }
 0x19a   : > { %v1098_v52 = vadd.f32 %v2866_v44, %v1050_v51  ;;  %2142 = vmatpush3.bf16.msra.mxu1 %v2325_v36  ;;  %v1113_v55 = vmax.f32 %v1097_v48, 0.0  ;;  %v2328_v44 = vld [vmem:[%s3072_s10 + $0x38] sm:$0xff]  }
 0x19b   : > { %v1116_v54 = vmax.f32 %v1100_v50, 0.0  ;;  %2143 = vmatprep.subr.bf16.mxu1 %v2326_v47  ;;  %v2332_v48 = vld [vmem:[%s3074_s12 + $0x18] sm:$0xff]  }
 0x19c   : > { %v1114_v56 = vmax.f32 %v1098_v52, 0.0 }
 0x19d   : > { %v1124_v57 = vpack.c.bf16 %v1116_v54, %v1115_v53 }
 0x19e   : > { %v1123_v58 = vpack.c.bf16 %v1114_v56, %v1113_v55  ;;  %2144 = vmatpush3.bf16.msra.mxu1 %v2326_v47  ;;  %v2333_v56 = vld [vmem:[%s3074_s12 + $0x20] sm:$0xff]  }
 0x19f   : > { %2145 = vmatprep.subr.bf16.mxu1 %v2327_v59 }
 0x1a0   : > { %2129 = vmatprep.mubr.bf16.mxu1 %v1123_v58 }
 0x1a1   : > { %2130 = vmatmul.mubr.bf16.gmra.mrb[12].mxu1 %v1124_v57 }
 0x1a2   : > { %2146 = vmatpush3.bf16.msra.mxu1 %v2327_v59 }
 0x1a3   : > { %2147 = vmatprep.subr.bf16.mxu1 %v2328_v44 }
 0x1a6   : > { %2148 = vmatpush3.bf16.msra.mxu1 %v2328_v44 }
 0x1a7   : > { %2165 = vmatprep.subr.bf16.mxu1 %v2329_v60 }
 0x25c   : > { %v2119_v62 = vpop.f32.mrb[0].mxu1 }
 0x25d   : > { %v1239_v63 = vadd.f32 %v2119_v62, %v2911_v61  ;;  %v1230_v0 = vpop.f32.mrb[1].mxu1 }
 0x25e   : > { %v1231_v1 = vadd.f32 %v2911_v61, %v1230_v0  ;;  %v2120_v2 = vpop.f32.mrb[2].mxu1  ;;  %v2334_v0 = vld [vmem:[%s3074_s12 + $0x28] sm:$0xff]  }
 0x25f   : > { %v1242_v3 = vadd.f32 %v2120_v2, %v2911_v61  ;;  %v1233_v4 = vpop.f32.mrb[3].mxu1  ;;  %v1295_v6 = vmax.f32 %v1239_v63, 0.0 }
 0x260   : > { %v1234_v5 = vadd.f32 %v2911_v61, %v1233_v4  ;;  %v1293_v8 = vmax.f32 %v1231_v1, 0.0 }
 0x261   : > { %v1296_v7 = vmax.f32 %v1242_v3, 0.0 }
 0x262   : > { %v1294_v9 = vmax.f32 %v1234_v5, 0.0 }
 0x263   : > { %v1310_v10 = vpack.c.bf16 %v1296_v7, %v1295_v6 }
 0x264   : > { %v1309_v11 = vpack.c.bf16 %v1294_v9, %v1293_v8  ;;  %v2123_v12 = vpop.f32.mrb[4].mxu1 }
 0x265   : > { %v1255_v13 = vadd.f32 %v2123_v12, %v2911_v61  ;;  %v1246_v14 = vpop.f32.mrb[5].mxu1  ;;  %v2335_v12 = vld [vmem:[%s3074_s12 + $0x30] sm:$0xff]  }
 0x266   : > { %v1247_v18 = vadd.f32 %v2911_v61, %v1246_v14  ;;  %v2124_v19 = vpop.f32.mrb[6].mxu1  ;;  %2149 = vmatprep.mubr.bf16.mxu1 %v1309_v11 }
 0x267   : > { %v1258_v24 = vadd.f32 %v2124_v19, %v2911_v61  ;;  %v1249_v25 = vpop.f32.mrb[7].mxu1  ;;  %2150 = vmatmul.mubr.bf16.vlgmr.msra.gmra.mrb[16].mxu1 %v1310_v10  ;;  %v1299_v31 = vmax.f32 %v1255_v13, 0.0  ;;  %v1885_v13 = vld [vmem:[%s3073_s11] ss:$0 sm:$0xff] }
 0x268   : > { %v1250_v30 = vadd.f32 %v2911_v61, %v1249_v25  ;;  %2166 = vmatpush3.bf16.msra.mxu1 %v2329_v60  ;;  %v1297_v40 = vmax.f32 %v1247_v18, 0.0 }
 0x269   : > { %v1300_v36 = vmax.f32 %v1258_v24, 0.0  ;;  %2167 = vmatprep.subr.bf16.mxu1 %v2330_v17 }
 0x26a   : > { %v1298_v41 = vmax.f32 %v1250_v30, 0.0 }
 0x26b   : > { %v1312_v42 = vpack.c.bf16 %v1300_v36, %v1299_v31 }
 0x26c   : > { %v1311_v43 = vpack.c.bf16 %v1298_v41, %v1297_v40  ;;  %v2127_v45 = vpop.f32.mrb[8].mxu1  ;;  %2168 = vmatpush3.bf16.msra.mxu1 %v2330_v17 }
 0x26d   : > { %v1271_v46 = vadd.f32 %v2127_v45, %v2911_v61  ;;  %v1262_v47 = vpop.f32.mrb[9].mxu1  ;;  %2169 = vmatprep.subr.bf16.mxu1 %v2331_v37 }
 0x26e   : > { %v1263_v49 = vadd.f32 %v2911_v61, %v1262_v47  ;;  %v2128_v50 = vpop.f32.mrb[10].mxu1  ;;  %2153 = vmatprep.mubr.bf16.mxu1 %v1311_v43 }
 0x26f   : > { %v1274_v51 = vadd.f32 %v2128_v50, %v2911_v61  ;;  %v1265_v52 = vpop.f32.mrb[11].mxu1  ;;  %2154 = vmatmul.mubr.bf16.gmra.mrb[20].mxu1 %v1312_v42  ;;  %v1303_v54 = vmax.f32 %v1271_v46, 0.0 }
 0x270   : > { %v1266_v53 = vadd.f32 %v2911_v61, %v1265_v52  ;;  %2170 = vmatpush3.bf16.msra.mxu1 %v2331_v37  ;;  %v1301_v57 = vmax.f32 %v1263_v49, 0.0 }
 0x271   : > { %v1304_v55 = vmax.f32 %v1274_v51, 0.0  ;;  %2171 = vmatprep.subr.bf16.mxu1 %v2332_v48 }
 0x272   : > { %v1302_v58 = vmax.f32 %v1266_v53, 0.0 }
 0x273   : > { %v1314_v59 = vpack.c.bf16 %v1304_v55, %v1303_v54 }
 0x274   : > { %v1313_v44 = vpack.c.bf16 %v1302_v58, %v1301_v57  ;;  %v2131_v60 = vpop.f32.mrb[12].mxu1  ;;  %2172 = vmatpush3.bf16.msra.mxu1 %v2332_v48 }
 0x275   : > { %v1287_v62 = vadd.f32 %v2131_v60, %v2911_v61  ;;  %v1278_v63 = vpop.f32.mrb[13].mxu1  ;;  %2173 = vmatprep.subr.bf16.mxu1 %v2333_v56 }
 0x276   : > { %v1279_v1 = vadd.f32 %v2911_v61, %v1278_v63  ;;  %v2132_v2 = vpop.f32.mrb[14].mxu1  ;;  %2157 = vmatprep.mubr.bf16.mxu1 %v1313_v44 }
 0x277   : > { %v1290_v3 = vadd.f32 %v2132_v2, %v2911_v61  ;;  %v1281_v4 = vpop.f32.mrb[15].mxu1  ;;  %2158 = vmatmul.mubr.bf16.gmra.mrb[24].mxu1 %v1314_v59  ;;  %v1307_v6 = vmax.f32 %v1287_v62, 0.0 }
 0x278   : > { %v1282_v5 = vadd.f32 %v2911_v61, %v1281_v4  ;;  %2174 = vmatpush3.bf16.msra.mxu1 %v2333_v56  ;;  %v1305_v8 = vmax.f32 %v1279_v1, 0.0  ;;  %v2336_v61 = vld [vmem:[%s3074_s12 + $0x38] sm:$0xff]  }
 0x279   : > { %v1308_v7 = vmax.f32 %v1290_v3, 0.0  ;;  %2175 = vmatprep.subr.bf16.mxu1 %v2334_v0 }
 0x27a   : > { %v1306_v9 = vmax.f32 %v1282_v5, 0.0 }
 0x27b   : > { %v1316_v10 = vpack.c.bf16 %v1308_v7, %v1307_v6 }
 0x27c   : > { %v1315_v11 = vpack.c.bf16 %v1306_v9, %v1305_v8  ;;  %2176 = vmatpush3.bf16.msra.mxu1 %v2334_v0 }
 0x27d   : > { %2177 = vmatprep.subr.bf16.mxu1 %v2335_v12 }
 0x27e   : > { %2161 = vmatprep.mubr.bf16.mxu1 %v1315_v11 }
 0x27f   : > { %2162 = vmatmul.mubr.bf16.gmra.mrb[28].mxu1 %v1316_v10 }
 0x280   : > { %2178 = vmatpush3.bf16.msra.mxu1 %v2335_v12 }
 0x281   : > { %2179 = vmatprep.subr.bf16.mxu1 %v2336_v61 }
 0x284   : > { %2180 = vmatpush3.bf16.msra.mxu1 %v2336_v61 }
 0x33a   : > { %v2151_v14 = vpop.f32.mrb[16].mxu1 }
 0x33b   : > { %v1431_v17 = vadd.f32 %v2151_v14, %v1885_v13  ;;  %v1422_v18 = vpop.f32.mrb[17].mxu1 }
 0x33c   : > { %v1423_v19 = vadd.f32 %v1885_v13, %v1422_v18  ;;  %v2152_v24 = vpop.f32.mrb[18].mxu1 }
 0x33d   : > { %v1434_v25 = vadd.f32 %v2152_v24, %v1885_v13  ;;  %v1425_v30 = vpop.f32.mrb[19].mxu1  ;;  %v1487_v36 = vmax.f32 %v1431_v17, 0.0 }
 0x33e   : > { %v1426_v31 = vadd.f32 %v1885_v13, %v1425_v30  ;;  %v1485_v40 = vmax.f32 %v1423_v19, 0.0 }
 0x33f   : > { %v1488_v37 = vmax.f32 %v1434_v25, 0.0 }
 0x340   : > { %v1486_v41 = vmax.f32 %v1426_v31, 0.0 }
 0x341   : > { %v1502_v42 = vpack.c.bf16 %v1488_v37, %v1487_v36  ;;  %v2956_v37 = vld [vmem:[%s3075_s13] ss:$0 sm:$0xff] }
 0x342   : > { %v1501_v43 = vpack.c.bf16 %v1486_v41, %v1485_v40  ;;  %v2155_v45 = vpop.f32.mrb[20].mxu1 }
 0x343   : > { %v1447_v46 = vadd.f32 %v2155_v45, %v1885_v13  ;;  %v1438_v47 = vpop.f32.mrb[21].mxu1 }
 0x344   : > { %v1439_v48 = vadd.f32 %v1885_v13, %v1438_v47  ;;  %v2156_v49 = vpop.f32.mrb[22].mxu1  ;;  %2181 = vmatprep.mubr.bf16.mxu1 %v1501_v43 }
 0x345   : > { %v1450_v50 = vadd.f32 %v2156_v49, %v1885_v13  ;;  %v1441_v51 = vpop.f32.mrb[23].mxu1  ;;  %2182 = vmatmul.mubr.bf16.vlgmr.msra.gmra.mrb[32].mxu1 %v1502_v42  ;;  %v1491_v53 = vmax.f32 %v1447_v46, 0.0 }
 0x346   : > { %v1442_v52 = vadd.f32 %v1885_v13, %v1441_v51  ;;  %v1489_v55 = vmax.f32 %v1439_v48, 0.0 }
 0x347   : > { %v1492_v54 = vmax.f32 %v1450_v50, 0.0 }
 0x348   : > { %v1490_v56 = vmax.f32 %v1442_v52, 0.0 }
 0x349   : > { %v1504_v57 = vpack.c.bf16 %v1492_v54, %v1491_v53 }
 0x34a   : > { %v1503_v58 = vpack.c.bf16 %v1490_v56, %v1489_v55  ;;  %v2159_v59 = vpop.f32.mrb[24].mxu1 }
 0x34b   : > { %v1463_v44 = vadd.f32 %v2159_v59, %v1885_v13  ;;  %v1454_v60 = vpop.f32.mrb[25].mxu1 }
 0x34c   : > { %v1455_v62 = vadd.f32 %v1885_v13, %v1454_v60  ;;  %v2160_v63 = vpop.f32.mrb[26].mxu1  ;;  %2185 = vmatprep.mubr.bf16.mxu1 %v1503_v58 }
 0x34d   : > { %v1466_v0 = vadd.f32 %v2160_v63, %v1885_v13  ;;  %v1457_v1 = vpop.f32.mrb[27].mxu1  ;;  %2186 = vmatmul.mubr.bf16.gmra.mrb[36].mxu1 %v1504_v57  ;;  %v1495_v3 = vmax.f32 %v1463_v44, 0.0 }
 0x34e   : > { %v1458_v2 = vadd.f32 %v1885_v13, %v1457_v1  ;;  %v1493_v5 = vmax.f32 %v1455_v62, 0.0 }
 0x34f   : > { %v1496_v4 = vmax.f32 %v1466_v0, 0.0 }
 0x350   : > { %v1494_v6 = vmax.f32 %v1458_v2, 0.0 }
 0x351   : > { %v1506_v7 = vpack.c.bf16 %v1496_v4, %v1495_v3 }
 0x352   : > { %v1505_v8 = vpack.c.bf16 %v1494_v6, %v1493_v5  ;;  %v2163_v9 = vpop.f32.mrb[28].mxu1 }
 0x353   : > { %v1479_v10 = vadd.f32 %v2163_v9, %v1885_v13  ;;  %v1470_v11 = vpop.f32.mrb[29].mxu1 }
 0x354   : > { %v1471_v12 = vadd.f32 %v1885_v13, %v1470_v11  ;;  %v2164_v61 = vpop.f32.mrb[30].mxu1  ;;  %2189 = vmatprep.mubr.bf16.mxu1 %v1505_v8 }
 0x355   : > { %v1482_v14 = vadd.f32 %v2164_v61, %v1885_v13  ;;  %v1473_v17 = vpop.f32.mrb[31].mxu1  ;;  %2190 = vmatmul.mubr.bf16.gmra.mrb[40].mxu1 %v1506_v7  ;;  %v1499_v19 = vmax.f32 %v1479_v10, 0.0 }
 0x356   : > { %v1474_v18 = vadd.f32 %v1885_v13, %v1473_v17  ;;  %v1497_v25 = vmax.f32 %v1471_v12, 0.0 }
 0x357   : > { %v1500_v24 = vmax.f32 %v1482_v14, 0.0 }
 0x358   : > { %v1498_v30 = vmax.f32 %v1474_v18, 0.0 }
 0x359   : > { %v1508_v31 = vpack.c.bf16 %v1500_v24, %v1499_v19 }
 0x35a   : > { %v1507_v36 = vpack.c.bf16 %v1498_v30, %v1497_v25 }
 0x35c   : > { %2193 = vmatprep.mubr.bf16.mxu1 %v1507_v36 }
 0x35d   : > { %2194 = vmatmul.mubr.bf16.gmra.mrb[44].mxu1 %v1508_v31 }
 0x418   : > { %v2183_v40 = vpop.f32.mrb[32].mxu1 }
 0x419   : > { %v1623_v41 = vadd.f32 %v2183_v40, %v2956_v37  ;;  %v1614_v42 = vpop.f32.mrb[33].mxu1 }
 0x41a   : > { %v1615_v13 = vadd.f32 %v2956_v37, %v1614_v42  ;;  %v2184_v43 = vpop.f32.mrb[34].mxu1 }
 0x41b   : > { %1679 = vst [vmem:[#allocation4 + $0x10] sm:$0xff] %v1623_v41  ;;  %v1695_v45 = vadd.f32 %v1623_v41, %v2799_v20  ;;  %v1626_v46 = vadd.f32 %v2184_v43, %v2956_v37  ;;  %v1617_v47 = vpop.f32.mrb[35].mxu1 }
 0x41c   : > { %1677 = vst [vmem:[#allocation4] sm:$0xff] %v1615_v13  ;;  %v1693_v48 = vadd.f32 %v1615_v13, %v2788_v15  ;;  %v1618_v49 = vadd.f32 %v2956_v37, %v1617_v47 }
 0x41d   : > { %1711 = vst [vmem:[%s2593_s20 + $0x10] sm:$0xff] %v1695_v45  ;;  %1680 = vst [vmem:[#allocation4 + $0x18] sm:$0xff] %v1626_v46  ;;  %v1696_v50 = vadd.f32 %v1626_v46, %v2802_v21 }
 0x41e   : > { %1709 = vst [vmem:[%s2593_s20] sm:$0xff] %v1693_v48  ;;  %1678 = vst [vmem:[#allocation4 + $0x8] sm:$0xff] %v1618_v49  ;;  %v1694_v51 = vadd.f32 %v1618_v49, %v2791_v16 }
 0x41f   : > { %1712 = vst [vmem:[%s2593_s20 + $0x18] sm:$0xff] %v1696_v50 }
 0x420   : > { %1710 = vst [vmem:[%s2593_s20 + $0x8] sm:$0xff] %v1694_v51  ;;  %v2187_v20 = vpop.f32.mrb[36].mxu1 }
 0x421   : > { %v1639_v52 = vadd.f32 %v2187_v20, %v2956_v37  ;;  %v1630_v53 = vpop.f32.mrb[37].mxu1 }
 0x422   : > { %v1631_v15 = vadd.f32 %v2956_v37, %v1630_v53  ;;  %v2188_v54 = vpop.f32.mrb[38].mxu1 }
 0x423   : > { %1683 = vst [vmem:[#allocation4 + $0x30] sm:$0xff] %v1639_v52  ;;  %v1699_v21 = vadd.f32 %v1639_v52, %v2815_v26  ;;  %v1642_v55 = vadd.f32 %v2188_v54, %v2956_v37  ;;  %v1633_v56 = vpop.f32.mrb[39].mxu1 }
 0x424   : > { %1681 = vst [vmem:[#allocation4 + $0x20] sm:$0xff] %v1631_v15  ;;  %v1697_v16 = vadd.f32 %v1631_v15, %v2805_v22  ;;  %v1634_v57 = vadd.f32 %v2956_v37, %v1633_v56 }
 0x425   : > { %1715 = vst [vmem:[%s2593_s20 + $0x30] sm:$0xff] %v1699_v21  ;;  %1684 = vst [vmem:[#allocation4 + $0x38] sm:$0xff] %v1642_v55  ;;  %v1700_v58 = vadd.f32 %v1642_v55, %v2818_v27 }
 0x426   : > { %1713 = vst [vmem:[%s2593_s20 + $0x20] sm:$0xff] %v1697_v16  ;;  %1682 = vst [vmem:[#allocation4 + $0x28] sm:$0xff] %v1634_v57  ;;  %v1698_v59 = vadd.f32 %v1634_v57, %v2808_v23 }
 0x427   : > { %1716 = vst [vmem:[%s2593_s20 + $0x38] sm:$0xff] %v1700_v58 }
 0x428   : > { %1714 = vst [vmem:[%s2593_s20 + $0x28] sm:$0xff] %v1698_v59  ;;  %v2191_v26 = vpop.f32.mrb[40].mxu1 }
 0x429   : > { %v1655_v44 = vadd.f32 %v2191_v26, %v2956_v37  ;;  %v1646_v60 = vpop.f32.mrb[41].mxu1 }
 0x42a   : > { %v1647_v22 = vadd.f32 %v2956_v37, %v1646_v60  ;;  %v2192_v62 = vpop.f32.mrb[42].mxu1 }
 0x42b   : > { %1687 = vst [vmem:[#allocation4 + $0x50] sm:$0xff] %v1655_v44  ;;  %v1703_v27 = vadd.f32 %v1655_v44, %v2831_v32  ;;  %v1658_v63 = vadd.f32 %v2192_v62, %v2956_v37  ;;  %v1649_v0 = vpop.f32.mrb[43].mxu1 }
 0x42c   : > { %1685 = vst [vmem:[#allocation4 + $0x40] sm:$0xff] %v1647_v22  ;;  %v1701_v23 = vadd.f32 %v1647_v22, %v2821_v28  ;;  %v1650_v1 = vadd.f32 %v2956_v37, %v1649_v0 }
 0x42d   : > { %1719 = vst [vmem:[%s2593_s20 + $0x50] sm:$0xff] %v1703_v27  ;;  %1688 = vst [vmem:[#allocation4 + $0x58] sm:$0xff] %v1658_v63  ;;  %v1704_v2 = vadd.f32 %v1658_v63, %v2834_v33 }
 0x42e   : > { %1717 = vst [vmem:[%s2593_s20 + $0x40] sm:$0xff] %v1701_v23  ;;  %1686 = vst [vmem:[#allocation4 + $0x48] sm:$0xff] %v1650_v1  ;;  %v1702_v3 = vadd.f32 %v1650_v1, %v2824_v29 }
 0x42f   : > { %1720 = vst [vmem:[%s2593_s20 + $0x58] sm:$0xff] %v1704_v2 }
 0x430   : > { %1718 = vst [vmem:[%s2593_s20 + $0x48] sm:$0xff] %v1702_v3  ;;  %v2195_v32 = vpop.f32.mrb[44].mxu1 }
 0x431   : > { %v1671_v4 = vadd.f32 %v2195_v32, %v2956_v37  ;;  %v1662_v5 = vpop.f32.mrb[45].mxu1 }
 0x432   : > { %v1663_v28 = vadd.f32 %v2956_v37, %v1662_v5  ;;  %v2196_v6 = vpop.f32.mrb[46].mxu1 }
 0x433   : > { %1691 = vst [vmem:[#allocation4 + $0x70] sm:$0xff] %v1671_v4  ;;  %v1707_v33 = vadd.f32 %v1671_v4, %v2847_v38  ;;  %v1674_v7 = vadd.f32 %v2196_v6, %v2956_v37  ;;  %v1665_v8 = vpop.f32.mrb[47].mxu1 }
 0x434   : > { %1689 = vst [vmem:[#allocation4 + $0x60] sm:$0xff] %v1663_v28  ;;  %v1705_v29 = vadd.f32 %v1663_v28, %v2837_v34  ;;  %v1666_v9 = vadd.f32 %v2956_v37, %v1665_v8 }
 0x435   : > { %1723 = vst [vmem:[%s2593_s20 + $0x70] sm:$0xff] %v1707_v33  ;;  %1692 = vst [vmem:[#allocation4 + $0x78] sm:$0xff] %v1674_v7  ;;  %v1708_v10 = vadd.f32 %v1674_v7, %v2850_v39 }
 0x436   : > { %1721 = vst [vmem:[%s2593_s20 + $0x60] sm:$0xff] %v1705_v29  ;;  %1690 = vst [vmem:[#allocation4 + $0x68] sm:$0xff] %v1666_v9  ;;  %v1706_v11 = vadd.f32 %v1666_v9, %v2840_v35 }
 0x437   : > { %1724 = vst [vmem:[%s2593_s20 + $0x78] sm:$0xff] %v1708_v10 }
 0x438   : > { %1722 = vst [vmem:[%s2593_s20 + $0x68] sm:$0xff] %v1706_v11 }
 0x439 LB: >> { %s3097_s22 = sshll.u32 %s2556_s30, 7  ;;  %s1738_s18 = scalar_lea.vmem [#allocation4], %s2441_s17  ;;  %s2441_s17 = sphi %s2439_s17, %s1730_s17  }
 0x43a   : >> { %s1731_s23 = sadd.s32 %s2441_s17, %s3097_s22  ;;  %s1730_s17 = sadd.s32 1, %s2441_s17  }
 0x43b   : >> { %p1732_p9 = scmp.lt.s32.totalorder %s1731_s23, 512  ;;  %s1735_s24 = sld [smem:[#allocation7 + %s1731_s23]] }
 0x43c   : >> { %p1727_p10 = scmp.ge.s32.totalorder %s1730_s17, 128  }
 0x43d   : >> { %s1733_s19 = scalar_select %p1732_p9, 1, 0  ;;  %v1739_v34 = vld [vmem:[%s1738_s18] sm:$0x1] }
 0x43e   : > { %s1908_s2 = sshll.u32 (%p1727_p10), %s2556_s30, 11  ;;  %s1758_s22 = sshll.u32 (%p1727_p10), %s2593_s20, 4  ;;  %s3018_s22 = int_to_ptr.vmem [resolvable:$true] %s1758_s22 }
 0x43f   : >> { %s1734_s0 = scvt.s32.f32 %s1733_s19  ;;  %s3015_s28 = scalar_lea.hbm (%p1727_p10), %s3076_s14, %s1908_s2 }
 0x440   : > { %1729 = sbr.rel (!%p1727_p10) target bundleno = 1081 (0x439), region = 146  ;;  %s3098_s23 = sand.u32 (%p1727_p10), 1, %s2425_s27  }
 0x441   : >> { %s1736_s25 = scalar_lea.vmem %s3077_s15, %s1735_s24  ;;  %v1740_v35 = vstv %s1734_s0  ;;  %s3022_s24 = scalar_lea.sflag (%p1727_p10), [#allocation9], %s3098_s23 }
 0x442   : >> { %v1737_v38 = vld [vmem:[%s1736_s25] sm:$0x1]  ;;  %v1741_v39 = vmul.f32 %v1740_v35, %v1739_v34  ;;  %s2361_s17 = scalar_lea.vmem (%p1727_p10), %s3018_s22, 2048  ;;  %s2446_s30 = smov (%p1727_p10), [#allocation8]  }
 0x443   : > { %p2362_p11 = scmp.ne.s32.totalorder (%p1727_p10), %s3018_s22, %s2361_s17  ;;  %s2365_s19 = sshll.u32 (%p1727_p10), %s2446_s30, 4  ;;  %s2366_s19 = int_to_ptr.vmem [resolvable:$false] %s2365_s19 }
 0x444   : >> { %v1742_v12 = vadd.f32 %v1741_v39, %v1737_v38  ;;  %s2367_s0 = scalar_lea.vmem (%p1727_p10), %s2366_s19, 4096  ;;  %p2368_p0 = scmp.lt.s32.totalorder (%p1727_p10), %s3018_s22, %s2366_s19 }
 0x445   : > { %p2363_p12 = pnand (%p1727_p10), %p2362_p11, %p2573_p1  ;;  %p2369_p3 = scmp.lt.s32.totalorder (%p1727_p10), %s2367_s0, %s2361_s17 }
 0x446   : >> { %1743 = vst [vmem:[%s1736_s25] sm:$0x1] %v1742_v12 }
 0x447   : > { %p2364_p13 = pneg %p2363_p12  ;;  %p2370_p4 = por %p2369_p3, %p2368_p0 }
 0x449   : > { %p2371_p5 = pnand %p2370_p4, %p2364_p13 }
 0x44b   : > { %2374 = shalt.err (!%p2371_p5)
}
 0x44c   : > { %s2375_s20 = scalar_lea.hbm %s3015_s28, 2048  ;;  %s2379_s29 = scalar_lea.hbm %s3076_s14, 8192 }
 0x44d   : > { %p2376_p6 = scmp.ne.s32.totalorder %s3015_s28, %s2375_s20  ;;  %p2380_p9 = scmp.lt.u32.totalorder %s3015_s28, %s3076_s14 }
 0x44e   : > { %p2381_p10 = scmp.lt.u32.totalorder %s2379_s29, %s2375_s20  ;;  %p2383_p12 = scmp.lt.u32.totalorder %s2375_s20, %s3015_s28 }
 0x44f   : > { %p2377_p7 = pnand %p2376_p6, %p2573_p1 }
 0x450   : > { %p2382_p11 = por %p2381_p10, %p2380_p9 }
 0x451   : > { %p2378_p8 = pneg %p2377_p7 }
 0x452   : > { %p2384_p13 = por %p2383_p12, %p2382_p11 }
 0x454   : > { %p2385_p0 = pnand %p2384_p13, %p2378_p8 }
 0x456   : > { %2388 = shalt.err (!%p2385_p0)
}
 0x457   : > { %s2447_s26 = smov 128   ;;  %s2448_s1 = smov 8  }
 0x458   : > { %2229 = dma.vmem_to_hbm [thread:$0]  (%p2573_p1), %s3018_s22, 2048, %s3015_s28, %s3022_s24, %s2447_s26, %s2447_s26, %s2448_s1  }
 0x459 PF: > { %s3099_s23 = sld [smem:[#allocation14_spill]]  ;;  %s3100_s17 = sld [smem:[#allocation12_spill]] }
 0x45f   : > { %p2235_p3 = scmp.ge.s32.totalorder %s3099_s23, 2  ;;  %s1779_s19 = sand.u32 1, %s3100_s17  }
 0x460   : > { %s1780_s0 = scalar_lea.sflag [#allocation9], %s1779_s19 }
 0x461   : > { %p2232_p4 = pnand %p2235_p3, %p2577_p2 }
 0x463   : > { %2416 = dma.done.wait (!%p2232_p4), %s1780_s0, 2048  }
 0x464   : > { %2418 = vsyncadd (!%p2232_p4), %s1780_s0, 4294965248  ;;  %s3102_s29 = sld [smem:[#allocation15_spill]]  ;;  %s3103_s20 = sld [smem:[#allocation13_spill]] }
 0x465   : > { %s3104_s28 = sld [smem:[#allocation16_spill]]  ;;  %s3105_s1 = smov %s2425_s27 }
 0x46a   : > { %p36_p5 = scmp.ge.s32.totalorder %s3102_s29, 6   ;;  %s3106_s27 = smov %s3103_s20 }
 0x46c   :  { %38 = sbr.rel (!%p36_p5) target bundleno = 29 (0x1d), region = 157 }
 0x473   :  { %1785 = vsyncpa [#allocation9], 1 }
 0x474   :  { %1787 = vsyncpa [#allocation9 + $0x1], 1 }

</bundles_post_ra>
